<compile_context>
chip_gen: v7x
topology: tpu7x:2x2x1
jax: 0.10.0
libtpu: 0.0.40
codegen_flags: <defaults>
</compile_context>

<pallas_src>
import jax
import jax.numpy as jnp
from jax.experimental import pallas as pl
from jax.experimental.pallas import tpu as pltpu

# ---------------- model hyper-parameters (dataset='en', small synthetic config) ----
L = 8                    # sequence length
EMB = 32                 # emb_dim == fea_size
H = EMB                  # per-direction GRU hidden size
EMO = 38 * 5             # emotion feature width for the 'en' branch (=190)
MLP_DIM = 64             # mlp_dims = [64]
SHARED = 2 * H + EMO     # 254
VOCAB = 100
BN_EPS = 1e-5

# ---------------- TPU-friendly padded layout constants -----------------------------
BOFF = 128               # lane offset of the backward-direction gate block
GW = 2 * BOFF            # compact gate slab width (fwd r/z/n at 0/32/64, bwd at 128/160/192)
EMO_PAD = 256            # emotion features padded to a multiple of 128 lanes
MLP_PAD = 128            # MLP hidden width padded to 128 lanes
CF_PAD = 128             # padded content-feature output slab: [hf(32) | hb(32) | 0...]
HEAD_PAD = 128           # packed head output slab: [logit0, logit1, sigmoid(out), 0...]
MAX_B_TILE = 128         # upper bound on batch rows per grid step


def dual_emotion_kernel(
    emb_ref,      # (L, BT, EMB)        token embeddings, time-major
    mask_ref,     # (L, BT, 1)          attention mask, time-major
    emo_ref,      # (BT, EMO_PAD)       emotion features (zero padded)
    wih_ref,      # (EMB, GW)           input->gate proj, compact gate layout
    bgi_ref,      # (1, GW)             b_ih (+ b_hh of r,z gates) folded together
    whh_ref,      # (2H, GW)            block-diagonal hidden->gate proj [fwd ; bwd]
    bhn_ref,      # (2, H)              b_hn for forward / backward n-gate
    wa_ref,       # (1, 2H)             MaskAttention weight (bias cancels in softmax)
    w1c_ref,      # (2H, MLP_PAD)       classifier layer-1 weight, content half (BN folded)
    w1e_ref,      # (EMO_PAD, MLP_PAD)  classifier layer-1 weight, emotion half (BN folded)
    b1_ref,       # (1, MLP_PAD)        folded layer-1 bias
    whead_ref,    # (MLP_PAD, HEAD_PAD) [w2 | w2 @ w3 | 0...]  (classifier+classifier1)
    bhead_ref,    # (1, HEAD_PAD)       [b2 | b2 @ w3 + b3 | 0...]
    cf_ref,       # out (BT, CF_PAD)    padded content feature [hf | hb | 0...]
    head_ref,     # out (BT, HEAD_PAD)  packed [logits(2), sigmoid(out), 0...]
    gi_ref,       # scratch (L, BT, GW) precomputed input projections
):
    f32 = jnp.float32
    bt = emb_ref.shape[1]

    # -- 1. hoisted input projections: one matmul for all timesteps & both
    #       directions (b_ih and the r/z half of b_hh folded into bgi).
    x2d = emb_ref[...].reshape(L * bt, EMB)
    gi = jnp.dot(x2d, wih_ref[...], preferred_element_type=f32) + bgi_ref[...]
    gi_ref[...] = gi.reshape(L, bt, GW)

    # emotion half of the classifier's first layer: independent of the
    # recurrence, issued early so it overlaps the serial GRU chain.
    emo_part = (jnp.dot(emo_ref[...], w1e_ref[...], preferred_element_type=f32)
                + b1_ref[...])                                    # (BT, MLP_PAD)

    # -- 2. fused bidirectional recurrence. Forward step t and backward step
    #       L-1-t share ONE (BT, 2H) @ (2H, GW) block-diagonal MXU matmul per
    #       step (one 256-wide weight tile, BT LHS rows). Per-step outputs are
    #       kept in registers; no partial stores on the serial chain.
    b_hn_f = bhn_ref[0:1, :]
    b_hn_b = bhn_ref[1:2, :]
    h_f = jnp.zeros((bt, H), f32)
    h_b = jnp.zeros((bt, H), f32)
    hf = [None] * L
    hb = [None] * L
    for i in range(L):                      # static unroll, L is small
        tf = i
        tb = L - 1 - i
        h_cat = jnp.concatenate([h_f, h_b], axis=1)                       # (BT, 2H)
        gh = jnp.dot(h_cat, whh_ref[...], preferred_element_type=f32)     # (BT, GW)
        gi_f = gi_ref[tf, :, 0:BOFF]        # lane-aligned 128-wide load (fwd gates)
        gi_b = gi_ref[tb, :, BOFF:GW]       # lane-aligned 128-wide load (bwd gates)
        # forward direction
        r_f = jax.nn.sigmoid(gi_f[:, 0:H] + gh[:, 0:H])
        z_f = jax.nn.sigmoid(gi_f[:, H:2 * H] + gh[:, H:2 * H])
        n_f = jnp.tanh(gi_f[:, 2 * H:3 * H]
                       + r_f * (gh[:, 2 * H:3 * H] + b_hn_f))
        h_f = (1.0 - z_f) * n_f + z_f * h_f
        # backward direction
        r_b = jax.nn.sigmoid(gi_b[:, 0:H] + gh[:, BOFF:BOFF + H])
        z_b = jax.nn.sigmoid(gi_b[:, H:2 * H] + gh[:, BOFF + H:BOFF + 2 * H])
        n_b = jnp.tanh(gi_b[:, 2 * H:3 * H]
                       + r_b * (gh[:, BOFF + 2 * H:BOFF + 3 * H] + b_hn_b))
        h_b = (1.0 - z_b) * n_b + z_b * h_b
        hf[tf] = h_f
        hb[tb] = h_b

    # single dense materialization of all per-step outputs after the loop
    h_all = jnp.stack(
        [jnp.concatenate([hf[t], hb[t]], axis=-1) for t in range(L)], axis=0)  # (L, BT, 2H)

    # -- 3. MaskAttention: fused score computation + masked softmax + one
    #       contraction. (Attention bias cancels: softmax(s + c) == softmax(s).)
    scores = jnp.sum(h_all * wa_ref[...], axis=-1, keepdims=True)   # (L, BT, 1)
    scores = jnp.where(mask_ref[...] > 0.0, scores, -jnp.inf)       # masked_fill(mask==0, -inf)
    m = jnp.maximum(jnp.max(scores, axis=0, keepdims=True), f32(-1e30))   # safe for empty masks
    e = jnp.exp(scores - m)
    denom = jnp.sum(e, axis=0, keepdims=True)
    denom = jnp.where(denom > 0.0, denom, f32(1.0))                 # fully-masked row -> zeros
    attn = e * pl.reciprocal(denom, approx=True)                    # EUP, off the VPU
    cf = jnp.sum(attn * h_all, axis=0)                              # (BT, 2H)
    cf_ref[...] = jnp.concatenate(
        [cf, jnp.zeros((bt, CF_PAD - 2 * H), f32)], axis=1)         # 128-wide unmasked store

    # -- 4. classifier MLP (BatchNorm folded into w1/b1, dropout = identity) +
    #       fused (Linear(64,2) ; Linear(2,1) ; sigmoid) head.
    h1 = jnp.maximum(
        jnp.dot(cf, w1c_ref[...], preferred_element_type=f32) + emo_part, 0.0)
    head = jnp.dot(h1, whead_ref[...], preferred_element_type=f32) + bhead_ref[...]
    col = jax.lax.broadcasted_iota(jnp.int32, head.shape, 1)
    head_ref[...] = jnp.where(col == 2, jax.nn.sigmoid(head), head)  # sigmoid only col 2


def _rep(shape):
    """Full-array block replicated across the batch grid."""
    nd = len(shape)
    return pl.BlockSpec(shape, lambda b: (0,) * nd)


def _choose_b_tile(b_total):
    """Largest multiple-of-8 tile <= MAX_B_TILE dividing b_total with >= 2 grid
    steps (so both v7x TensorCores get work). Falls back to a single tile only
    when the batch itself is a single tile."""
    best = 8
    for cand in range(8, MAX_B_TILE + 1, 8):
        if b_total % cand == 0 and (b_total // cand) >= 2:
            best = cand
    if b_total % best != 0:
        raise ValueError("batch size must be a multiple of 8")
    return best


@jax.jit
def dual_emotion_forward(packed, content, content_masks,
                         content_emotion, comments_emotion, emotion_gap):
    b_total = content.shape[0]
    b_tile = _choose_b_tile(b_total)
    n_tiles = b_total // b_tile

    # TODO(synk): the frozen pretrained BertModel/RobertaModel cannot be loaded here;
    # it is replaced by a deterministic embedding-table lookup producing (B, L, EMB).
    emb = packed['bert_emb'][content].astype(jnp.float32)          # (B, L, EMB)
    emb_t = jnp.transpose(emb, (1, 0, 2))                          # (L, B, EMB) time-major

    emotion_feature = jnp.concatenate(
        [content_emotion, comments_emotion, emotion_gap], axis=1).astype(jnp.float32)
    emo_pad = jnp.zeros((b_total, EMO_PAD), jnp.float32).at[:, :EMO].set(emotion_feature)

    mask3 = jnp.transpose(content_masks.astype(jnp.float32), (1, 0))[:, :, None]  # (L, B, 1)

    grid_spec = pltpu.PrefetchScalarGridSpec(
        num_scalar_prefetch=0,
        grid=(n_tiles,),
        in_specs=[
            pl.BlockSpec((L, b_tile, EMB), lambda b: (0, b, 0)),   # embeddings
            pl.BlockSpec((L, b_tile, 1), lambda b: (0, b, 0)),     # mask
            pl.BlockSpec((b_tile, EMO_PAD), lambda b: (b, 0)),     # emotion features
            _rep((EMB, GW)),                                       # W_ih (compact)
            _rep((1, GW)),                                         # folded gate bias
            _rep((2 * H, GW)),                                     # W_hh (block-diag, compact)
            _rep((2, H)),                                          # b_hn fwd/bwd
            _rep((1, 2 * H)),                                      # attention weight
            _rep((2 * H, MLP_PAD)),                                # MLP weight (content, BN folded)
            _rep((EMO_PAD, MLP_PAD)),                              # MLP weight (emotion, BN folded)
            _rep((1, MLP_PAD)),                                    # MLP bias (BN folded)
            _rep((MLP_PAD, HEAD_PAD)),                             # fused head weight
            _rep((1, HEAD_PAD)),                                   # fused head bias
        ],
        out_specs=(
            pl.BlockSpec((b_tile, CF_PAD), lambda b: (b, 0)),      # padded content feature
            pl.BlockSpec((b_tile, HEAD_PAD), lambda b: (b, 0)),    # packed logits / prob
        ),
        scratch_shapes=[
            pltpu.VMEM((L, b_tile, GW), jnp.float32),              # precomputed gi
        ],
    )

    cf_pad, head = pl.pallas_call(
        dual_emotion_kernel,
        out_shape=(jax.ShapeDtypeStruct((b_total, CF_PAD), jnp.float32),
                   jax.ShapeDtypeStruct((b_total, HEAD_PAD), jnp.float32)),
        grid_spec=grid_spec,
        compiler_params=pltpu.CompilerParams(
            dimension_semantics=("parallel",),                     # shards tiles across TCs
            vmem_limit_bytes=32 * 1024 * 1024),                    # headroom for big B_TILE on v5e
    )(emb_t, mask3, emo_pad,
      packed['wih'], packed['bgi'], packed['whh'], packed['bhn'],
      packed['wa'],
      packed['w1c'], packed['w1e'], packed['b1'],
      packed['whead'], packed['bhead'])

    content_feature = cf_pad[:, 0:2 * H]                           # compact [hf | hb]
    shared_feature = jnp.concatenate([content_feature, emotion_feature], axis=1)
    logits = head[:, 0:2]
    prob = head[:, 2]
    # matches PyTorch: [logits, sigmoid(classifier1(logits)).squeeze(1), shared_feature]
    return [logits, prob, shared_feature]


def init_params(key):
    ks = jax.random.split(key, 21)

    def w(k, shape, scale=0.1):
        return jax.random.normal(k, shape, jnp.float32) * scale

    p = {}
    p['bert_emb'] = w(ks[0], (VOCAB, EMB), 1.0)
    # bidirectional GRU, weights stored transposed for `x @ W` (gate order r, z, n)
    p['wih_f'] = w(ks[1], (EMB, 3 * H)); p['whh_f'] = w(ks[2], (H, 3 * H))
    p['bih_f'] = w(ks[3], (3 * H,));     p['bhh_f'] = w(ks[4], (3 * H,))
    p['wih_b'] = w(ks[5], (EMB, 3 * H)); p['whh_b'] = w(ks[6], (H, 3 * H))
    p['bih_b'] = w(ks[7], (3 * H,));     p['bhh_b'] = w(ks[8], (3 * H,))
    # MaskAttention: Linear(2H -> 1) in nn.Linear layout (1, 2H) + scalar bias
    p['watt'] = w(ks[9], (1, 2 * H));    p['batt'] = w(ks[10], (1,))
    # classifier: MLP(SHARED -> MLP_DIM) [Linear + BatchNorm1d + ReLU + Dropout] + Linear(MLP_DIM, 2)
    p['w1'] = w(ks[11], (SHARED, MLP_DIM)); p['b1'] = w(ks[12], (MLP_DIM,))
    p['bn_gamma'] = 1.0 + w(ks[13], (MLP_DIM,))
    p['bn_beta'] = w(ks[14], (MLP_DIM,))
    p['bn_mean'] = w(ks[15], (MLP_DIM,))
    p['bn_var'] = 1.0 + jnp.abs(w(ks[16], (MLP_DIM,)))
    p['w2'] = w(ks[17], (MLP_DIM, 2));      p['b2'] = w(ks[18], (2,))
    # classifier1: Linear(2 -> 1)
    p['w3'] = w(ks[19], (2, 1));            p['b3'] = w(ks[20], (1,))
    return p


def pack_params(p):
    """Repack PyTorch-layout parameters into the compact kernel layout (done once)."""
    f32 = jnp.float32
    # gate g of direction d lives in lane block [d*BOFF + g*H : d*BOFF + (g+1)*H]
    wih = jnp.zeros((EMB, GW), f32)
    whh = jnp.zeros((2 * H, GW), f32)          # block-diagonal: row block d feeds direction d
    bgi = jnp.zeros((1, GW), f32)
    for d, (wi, wh, bi, bh) in enumerate(
            [(p['wih_f'], p['whh_f'], p['bih_f'], p['bhh_f']),
             (p['wih_b'], p['whh_b'], p['bih_b'], p['bhh_b'])]):
        for g in range(3):
            c = d * BOFF + g * H
            wih = wih.at[:, c:c + H].set(wi[:, g * H:(g + 1) * H])
            whh = whh.at[d * H:(d + 1) * H, c:c + H].set(wh[:, g * H:(g + 1) * H])
            bias = bi[g * H:(g + 1) * H]
            if g < 2:                          # b_hh of r/z gates folds into b_ih
                bias = bias + bh[g * H:(g + 1) * H]
            bgi = bgi.at[0, c:c + H].set(bias)
    # b_hh of the n gate stays separate: n = tanh(gi_n + r * (gh_n + b_hn))
    bhn = jnp.stack([p['bhh_f'][2 * H:3 * H], p['bhh_b'][2 * H:3 * H]], axis=0)

    # attention weight: compact layout equals the natural [hf | hb] layout
    wa = p['watt'].astype(f32)

    # fold eval-mode BatchNorm1d into the classifier's first linear layer
    s = p['bn_gamma'] / jnp.sqrt(p['bn_var'] + BN_EPS)
    w1f = p['w1'] * s[None, :]
    b1f = (p['b1'] - p['bn_mean']) * s + p['bn_beta']

    # split folded layer 1 into content / emotion halves (padded)
    w1c = jnp.zeros((2 * H, MLP_PAD), f32).at[:, 0:MLP_DIM].set(w1f[0:2 * H, :])
    w1e = jnp.zeros((EMO_PAD, MLP_PAD), f32).at[0:EMO, 0:MLP_DIM].set(w1f[2 * H:2 * H + EMO, :])
    b1 = jnp.zeros((1, MLP_PAD), f32).at[0, 0:MLP_DIM].set(b1f)

    # fused head: cols 0..1 = Linear(MLP_DIM,2); col 2 = classifier1 folded through
    whead = jnp.zeros((MLP_PAD, HEAD_PAD), f32)
    whead = whead.at[0:MLP_DIM, 0:2].set(p['w2'])
    whead = whead.at[0:MLP_DIM, 2:3].set(p['w2'] @ p['w3'])
    bhead = jnp.zeros((1, HEAD_PAD), f32)
    bhead = bhead.at[0, 0:2].set(p['b2'])
    bhead = bhead.at[0, 2].set((p['b2'] @ p['w3'])[0] + p['b3'][0])

    return dict(bert_emb=p['bert_emb'], wih=wih, bgi=bgi, whh=whh, bhn=bhn,
                wa=wa, w1c=w1c, w1e=w1e, b1=b1, whead=whead, bhead=bhead)


def reference_forward(p, content, content_masks,
                      content_emotion, comments_emotion, emotion_gap):
    """Pure-JAX reference using the raw (un-packed) parameters."""
    emb = p['bert_emb'][content].astype(jnp.float32)
    emo = jnp.concatenate([content_emotion, comments_emotion, emotion_gap], axis=1)

    def gru_dir(wih, whh, bih, bhh, reverse):
        h = jnp.zeros((content.shape[0], H), jnp.float32)
        outs = [None] * L
        order = range(L - 1, -1, -1) if reverse else range(L)
        for t in order:
            gi = emb[:, t, :] @ wih + bih
            gh = h @ whh + bhh
            r = jax.nn.sigmoid(gi[:, 0:H] + gh[:, 0:H])
            z = jax.nn.sigmoid(gi[:, H:2 * H] + gh[:, H:2 * H])
            n = jnp.tanh(gi[:, 2 * H:] + r * gh[:, 2 * H:])
            h = (1.0 - z) * n + z * h
            outs[t] = h
        return jnp.stack(outs, axis=1)                              # (B, L, H)

    hf = gru_dir(p['wih_f'], p['whh_f'], p['bih_f'], p['bhh_f'], False)
    hb = gru_dir(p['wih_b'], p['whh_b'], p['bih_b'], p['bhh_b'], True)
    hcat = jnp.concatenate([hf, hb], axis=-1)                       # (B, L, 2H)
    scores = jnp.einsum('blk,k->bl', hcat, p['watt'][0]) + p['batt'][0]
    scores = jnp.where(content_masks > 0, scores, -jnp.inf)
    attn = jax.nn.softmax(scores, axis=-1)
    content_feature = jnp.einsum('bl,blk->bk', attn, hcat)
    shared = jnp.concatenate([content_feature, emo], axis=1)
    pre = shared @ p['w1'] + p['b1']
    bn = (pre - p['bn_mean']) / jnp.sqrt(p['bn_var'] + BN_EPS) * p['bn_gamma'] + p['bn_beta']
    h1 = jax.nn.relu(bn)
    logits = h1 @ p['w2'] + p['b2']
    prob = jax.nn.sigmoid((logits @ p['w3'])[:, 0] + p['b3'][0])
    return logits, prob, shared


if __name__ == "__main__":
    B_TOTAL = 128   # -> B_TILE=64, 2 grid tiles (keeps both v7x TensorCores busy)
    key = jax.random.PRNGKey(0)
    kp, kc, km, ke1, ke2, ke3 = jax.random.split(key, 6)

    params = init_params(kp)
    packed = pack_params(params)

    content = jax.random.randint(kc, (B_TOTAL, L), 0, VOCAB, dtype=jnp.int32)
    lens = jax.random.randint(km, (B_TOTAL,), 1, L + 1)             # >=1 valid token per row
    content_masks = (jnp.arange(L)[None, :] < lens[:, None]).astype(jnp.float32)
    content_emotion = jax.random.normal(ke1, (B_TOTAL, 38 * 2), jnp.float32)
    comments_emotion = jax.random.normal(ke2, (B_TOTAL, 38 * 2), jnp.float32)
    emotion_gap = jax.random.normal(ke3, (B_TOTAL, 38), jnp.float32)

    logits, prob, shared = jax.block_until_ready(
        dual_emotion_forward(packed, content, content_masks,
                             content_emotion, comments_emotion, emotion_gap))

    assert logits.shape == (B_TOTAL, 2)
    assert prob.shape == (B_TOTAL,)
    assert shared.shape == (B_TOTAL, SHARED)

    ref_logits, ref_prob, ref_shared = reference_forward(
        params, content, content_masks,
        content_emotion, comments_emotion, emotion_gap)
    assert bool(jnp.allclose(logits, ref_logits, rtol=2e-2, atol=2e-2))
    assert bool(jnp.allclose(prob, ref_prob, rtol=2e-2, atol=2e-2))
    assert bool(jnp.allclose(shared, ref_shared, rtol=2e-2, atol=2e-2))

    print("KERNEL_OK")
</pallas_src>

<mosaic_0001>
module attributes {stable_mosaic.version = 11 : i64} {
  func.func @dual_emotion_kernel(%arg0: i32, %arg1: memref<8x64x32xf32, #tpu.memory_space<vmem>>, %arg2: memref<8x64x1xf32, #tpu.memory_space<vmem>>, %arg3: memref<64x256xf32, #tpu.memory_space<vmem>>, %arg4: memref<32x256xf32, #tpu.memory_space<vmem>>, %arg5: memref<1x256xf32, #tpu.memory_space<vmem>>, %arg6: memref<64x256xf32, #tpu.memory_space<vmem>>, %arg7: memref<2x32xf32, #tpu.memory_space<vmem>>, %arg8: memref<1x64xf32, #tpu.memory_space<vmem>>, %arg9: memref<64x128xf32, #tpu.memory_space<vmem>>, %arg10: memref<256x128xf32, #tpu.memory_space<vmem>>, %arg11: memref<1x128xf32, #tpu.memory_space<vmem>>, %arg12: memref<128x128xf32, #tpu.memory_space<vmem>>, %arg13: memref<1x128xf32, #tpu.memory_space<vmem>>, %arg14: memref<64x128xf32, #tpu.memory_space<vmem>>, %arg15: memref<64x128xf32, #tpu.memory_space<vmem>>, %arg16: memref<8x64x256xf32, #tpu.memory_space<vmem>>) attributes {dimension_semantics = [#tpu.dimension_semantics<parallel>], iteration_bounds = array<i64: 2>, scalar_prefetch = 0 : i64, scratch_operands = 1 : i64, tpu.core_type = #tpu.core_type<tc>, window_params = [{transform_indices = @transform_0, window_bounds = array<i64: 8, 64, 32>}, {transform_indices = @transform_1, window_bounds = array<i64: 8, 64, 1>}, {transform_indices = @transform_2, window_bounds = array<i64: 64, 256>}, {pipeline_mode = #tpu.pipeline_mode<synchronous>, transform_indices = @transform_3, window_bounds = array<i64: 32, 256>}, {pipeline_mode = #tpu.pipeline_mode<synchronous>, transform_indices = @transform_4, window_bounds = array<i64: 1, 256>}, {pipeline_mode = #tpu.pipeline_mode<synchronous>, transform_indices = @transform_5, window_bounds = array<i64: 64, 256>}, {pipeline_mode = #tpu.pipeline_mode<synchronous>, transform_indices = @transform_6, window_bounds = array<i64: 2, 32>}, {pipeline_mode = #tpu.pipeline_mode<synchronous>, transform_indices = @transform_7, window_bounds = array<i64: 1, 64>}, {pipeline_mode = #tpu.pipeline_mode<synchronous>, transform_indices = @transform_8, window_bounds = array<i64: 64, 128>}, {pipeline_mode = #tpu.pipeline_mode<synchronous>, transform_indices = @transform_9, window_bounds = array<i64: 256, 128>}, {pipeline_mode = #tpu.pipeline_mode<synchronous>, transform_indices = @transform_10, window_bounds = array<i64: 1, 128>}, {pipeline_mode = #tpu.pipeline_mode<synchronous>, transform_indices = @transform_11, window_bounds = array<i64: 128, 128>}, {pipeline_mode = #tpu.pipeline_mode<synchronous>, transform_indices = @transform_12, window_bounds = array<i64: 1, 128>}, {transform_indices = @transform_13, window_bounds = array<i64: 64, 128>}, {transform_indices = @transform_14, window_bounds = array<i64: 64, 128>}]} {
    %c0 = arith.constant 0 : index
    %c0_0 = arith.constant 0 : index
    %c0_1 = arith.constant 0 : index
    %0 = vector.load %arg1[%c0, %c0_0, %c0_1] : memref<8x64x32xf32, #tpu.memory_space<vmem>>, vector<8x64x32xf32>
    %1 = vector.shape_cast %0 : vector<8x64x32xf32> to vector<512x32xf32>
    %c0_2 = arith.constant 0 : index
    %c0_3 = arith.constant 0 : index
    %2 = vector.load %arg4[%c0_2, %c0_3] : memref<32x256xf32, #tpu.memory_space<vmem>>, vector<32x256xf32>
    %cst = arith.constant dense<0.000000e+00> : vector<512x256xf32>
    %3 = tpu.matmul %1, %2, %cst {dimension_numbers = #tpu.dot_dimension_numbers<[1], [0], [0], [1], [0, 0, 1, 1], [], []>} : vector<512x32xf32>, vector<32x256xf32>, vector<512x256xf32> -> vector<512x256xf32>
    %c0_4 = arith.constant 0 : index
    %c0_5 = arith.constant 0 : index
    %4 = vector.load %arg5[%c0_4, %c0_5] : memref<1x256xf32, #tpu.memory_space<vmem>>, vector<1x256xf32>
    %5 = vector.broadcast %4 : vector<1x256xf32> to vector<512x256xf32>
    %6 = arith.addf %3, %5 : vector<512x256xf32>
    %7 = vector.shape_cast %6 : vector<512x256xf32> to vector<8x64x256xf32>
    %c0_6 = arith.constant 0 : index
    %c0_7 = arith.constant 0 : index
    %c0_8 = arith.constant 0 : index
    %8 = vector.load %arg16[%c0_6, %c0_7, %c0_8] : memref<8x64x256xf32, #tpu.memory_space<vmem>>, vector<8x64x256xf32>
    tpu.vector_store %arg16[%c0_6, %c0_7, %c0_8], %7 {strides = array<i32>} : memref<8x64x256xf32, #tpu.memory_space<vmem>>, vector<8x64x256xf32>,
    %c0_9 = arith.constant 0 : index
    %c0_10 = arith.constant 0 : index
    %9 = vector.load %arg3[%c0_9, %c0_10] : memref<64x256xf32, #tpu.memory_space<vmem>>, vector<64x256xf32>
    %c0_11 = arith.constant 0 : index
    %c0_12 = arith.constant 0 : index
    %10 = vector.load %arg10[%c0_11, %c0_12] : memref<256x128xf32, #tpu.memory_space<vmem>>, vector<256x128xf32>
    %cst_13 = arith.constant dense<0.000000e+00> : vector<64x128xf32>
    %11 = tpu.matmul %9, %10, %cst_13 {dimension_numbers = #tpu.dot_dimension_numbers<[1], [0], [0], [1], [0, 0, 1, 1], [], []>} : vector<64x256xf32>, vector<256x128xf32>, vector<64x128xf32> -> vector<64x128xf32>
    %c0_14 = arith.constant 0 : index
    %c0_15 = arith.constant 0 : index
    %12 = vector.load %arg11[%c0_14, %c0_15] : memref<1x128xf32, #tpu.memory_space<vmem>>, vector<1x128xf32>
    %13 = vector.broadcast %12 : vector<1x128xf32> to vector<64x128xf32>
    %14 = arith.addf %11, %13 : vector<64x128xf32>
    %c0_16 = arith.constant 0 : index
    %c0_17 = arith.constant 0 : index
    %15 = vector.load %arg7[%c0_16, %c0_17] : memref<2x32xf32, #tpu.memory_space<vmem>>, vector<1x32xf32>
    %c1 = arith.constant 1 : index
    %c0_18 = arith.constant 0 : index
    %16 = vector.load %arg7[%c1, %c0_18] : memref<2x32xf32, #tpu.memory_space<vmem>>, vector<1x32xf32>
    %cst_19 = arith.constant 0.000000e+00 : f32
    %17 = vector.broadcast %cst_19 : f32 to vector<64x32xf32>
    %cst_20 = arith.constant 0.000000e+00 : f32
    %18 = vector.broadcast %cst_20 : f32 to vector<64x32xf32>
    %19 = tpu.concatenate %17, %18 in 1 : vector<64x32xf32>, vector<64x32xf32> -> vector<64x64xf32>
    %c0_21 = arith.constant 0 : index
    %c0_22 = arith.constant 0 : index
    %20 = vector.load %arg6[%c0_21, %c0_22] : memref<64x256xf32, #tpu.memory_space<vmem>>, vector<64x256xf32>
    %cst_23 = arith.constant dense<0.000000e+00> : vector<64x256xf32>
    %21 = tpu.matmul %19, %20, %cst_23 {dimension_numbers = #tpu.dot_dimension_numbers<[1], [0], [0], [1], [0, 0, 1, 1], [], []>} : vector<64x64xf32>, vector<64x256xf32>, vector<64x256xf32> -> vector<64x256xf32>
    %c0_24 = arith.constant 0 : index
    %c0_25 = arith.constant 0 : index
    %c0_26 = arith.constant 0 : index
    %22 = vector.load %arg16[%c0_24, %c0_25, %c0_26] : memref<8x64x256xf32, #tpu.memory_space<vmem>>, vector<1x64x128xf32>
    %23 = vector.shape_cast %22 : vector<1x64x128xf32> to vector<64x128xf32>
    %c7 = arith.constant 7 : index
    %c0_27 = arith.constant 0 : index
    %c128 = arith.constant 128 : index
    %24 = vector.load %arg16[%c7, %c0_27, %c128] : memref<8x64x256xf32, #tpu.memory_space<vmem>>, vector<1x64x128xf32>
    %25 = vector.shape_cast %24 : vector<1x64x128xf32> to vector<64x128xf32>
    %26 = vector.extract_strided_slice %23 {offsets = [0, 0], sizes = [64, 32], strides = [1, 1]} : vector<64x128xf32> to vector<64x32xf32>
    %27 = vector.extract_strided_slice %21 {offsets = [0, 0], sizes = [64, 32], strides = [1, 1]} : vector<64x256xf32> to vector<64x32xf32>
    %28 = arith.addf %26, %27 : vector<64x32xf32>
    %29 = arith.negf %28 : vector<64x32xf32>
    %30 = math.exp %29 : vector<64x32xf32>
    %cst_28 = arith.constant 1.000000e+00 : f32
    %31 = vector.broadcast %cst_28 : f32 to vector<64x32xf32>
    %32 = arith.addf %31, %30 : vector<64x32xf32>
    %33 = arith.divf %31, %32 : vector<64x32xf32>
    %34 = vector.extract_strided_slice %23 {offsets = [0, 32], sizes = [64, 32], strides = [1, 1]} : vector<64x128xf32> to vector<64x32xf32>
    %35 = vector.extract_strided_slice %21 {offsets = [0, 32], sizes = [64, 32], strides = [1, 1]} : vector<64x256xf32> to vector<64x32xf32>
    %36 = arith.addf %34, %35 : vector<64x32xf32>
    %37 = arith.negf %36 : vector<64x32xf32>
    %38 = math.exp %37 : vector<64x32xf32>
    %cst_29 = arith.constant 1.000000e+00 : f32
    %39 = vector.broadcast %cst_29 : f32 to vector<64x32xf32>
    %40 = arith.addf %39, %38 : vector<64x32xf32>
    %41 = arith.divf %39, %40 : vector<64x32xf32>
    %42 = vector.extract_strided_slice %23 {offsets = [0, 64], sizes = [64, 32], strides = [1, 1]} : vector<64x128xf32> to vector<64x32xf32>
    %43 = vector.extract_strided_slice %21 {offsets = [0, 64], sizes = [64, 32], strides = [1, 1]} : vector<64x256xf32> to vector<64x32xf32>
    %44 = vector.broadcast %15 : vector<1x32xf32> to vector<64x32xf32>
    %45 = arith.addf %43, %44 : vector<64x32xf32>
    %46 = arith.mulf %33, %45 : vector<64x32xf32>
    %47 = arith.addf %42, %46 : vector<64x32xf32>
    %48 = math.tanh %47 : vector<64x32xf32>
    %cst_30 = arith.constant 1.000000e+00 : f32
    %49 = vector.broadcast %cst_30 : f32 to vector<64x32xf32>
    %50 = arith.subf %49, %41 : vector<64x32xf32>
    %51 = arith.mulf %50, %48 : vector<64x32xf32>
    %52 = arith.mulf %41, %17 : vector<64x32xf32>
    %53 = arith.addf %51, %52 : vector<64x32xf32>
    %54 = vector.extract_strided_slice %25 {offsets = [0, 0], sizes = [64, 32], strides = [1, 1]} : vector<64x128xf32> to vector<64x32xf32>
    %55 = vector.extract_strided_slice %21 {offsets = [0, 128], sizes = [64, 32], strides = [1, 1]} : vector<64x256xf32> to vector<64x32xf32>
    %56 = arith.addf %54, %55 : vector<64x32xf32>
    %57 = arith.negf %56 : vector<64x32xf32>
    %58 = math.exp %57 : vector<64x32xf32>
    %cst_31 = arith.constant 1.000000e+00 : f32
    %59 = vector.broadcast %cst_31 : f32 to vector<64x32xf32>
    %60 = arith.addf %59, %58 : vector<64x32xf32>
    %61 = arith.divf %59, %60 : vector<64x32xf32>
    %62 = vector.extract_strided_slice %25 {offsets = [0, 32], sizes = [64, 32], strides = [1, 1]} : vector<64x128xf32> to vector<64x32xf32>
    %63 = vector.extract_strided_slice %21 {offsets = [0, 160], sizes = [64, 32], strides = [1, 1]} : vector<64x256xf32> to vector<64x32xf32>
    %64 = arith.addf %62, %63 : vector<64x32xf32>
    %65 = arith.negf %64 : vector<64x32xf32>
    %66 = math.exp %65 : vector<64x32xf32>
    %cst_32 = arith.constant 1.000000e+00 : f32
    %67 = vector.broadcast %cst_32 : f32 to vector<64x32xf32>
    %68 = arith.addf %67, %66 : vector<64x32xf32>
    %69 = arith.divf %67, %68 : vector<64x32xf32>
    %70 = vector.extract_strided_slice %25 {offsets = [0, 64], sizes = [64, 32], strides = [1, 1]} : vector<64x128xf32> to vector<64x32xf32>
    %71 = vector.extract_strided_slice %21 {offsets = [0, 192], sizes = [64, 32], strides = [1, 1]} : vector<64x256xf32> to vector<64x32xf32>
    %72 = vector.broadcast %16 : vector<1x32xf32> to vector<64x32xf32>
    %73 = arith.addf %71, %72 : vector<64x32xf32>
    %74 = arith.mulf %61, %73 : vector<64x32xf32>
    %75 = arith.addf %70, %74 : vector<64x32xf32>
    %76 = math.tanh %75 : vector<64x32xf32>
    %cst_33 = arith.constant 1.000000e+00 : f32
    %77 = vector.broadcast %cst_33 : f32 to vector<64x32xf32>
    %78 = arith.subf %77, %69 : vector<64x32xf32>
    %79 = arith.mulf %78, %76 : vector<64x32xf32>
    %80 = arith.mulf %69, %18 : vector<64x32xf32>
    %81 = arith.addf %79, %80 : vector<64x32xf32>
    %82 = tpu.concatenate %53, %81 in 1 : vector<64x32xf32>, vector<64x32xf32> -> vector<64x64xf32>
    %c0_34 = arith.constant 0 : index
    %c0_35 = arith.constant 0 : index
    %83 = vector.load %arg6[%c0_34, %c0_35] : memref<64x256xf32, #tpu.memory_space<vmem>>, vector<64x256xf32>
    %cst_36 = arith.constant dense<0.000000e+00> : vector<64x256xf32>
    %84 = tpu.matmul %82, %83, %cst_36 {dimension_numbers = #tpu.dot_dimension_numbers<[1], [0], [0], [1], [0, 0, 1, 1], [], []>} : vector<64x64xf32>, vector<64x256xf32>, vector<64x256xf32> -> vector<64x256xf32>
    %c1_37 = arith.constant 1 : index
    %c0_38 = arith.constant 0 : index
    %c0_39 = arith.constant 0 : index
    %85 = vector.load %arg16[%c1_37, %c0_38, %c0_39] : memref<8x64x256xf32, #tpu.memory_space<vmem>>, vector<1x64x128xf32>
    %86 = vector.shape_cast %85 : vector<1x64x128xf32> to vector<64x128xf32>
    %c6 = arith.constant 6 : index
    %c0_40 = arith.constant 0 : index
    %c128_41 = arith.constant 128 : index
    %87 = vector.load %arg16[%c6, %c0_40, %c128_41] : memref<8x64x256xf32, #tpu.memory_space<vmem>>, vector<1x64x128xf32>
    %88 = vector.shape_cast %87 : vector<1x64x128xf32> to vector<64x128xf32>
    %89 = vector.extract_strided_slice %86 {offsets = [0, 0], sizes = [64, 32], strides = [1, 1]} : vector<64x128xf32> to vector<64x32xf32>
    %90 = vector.extract_strided_slice %84 {offsets = [0, 0], sizes = [64, 32], strides = [1, 1]} : vector<64x256xf32> to vector<64x32xf32>
    %91 = arith.addf %89, %90 : vector<64x32xf32>
    %92 = arith.negf %91 : vector<64x32xf32>
    %93 = math.exp %92 : vector<64x32xf32>
    %cst_42 = arith.constant 1.000000e+00 : f32
    %94 = vector.broadcast %cst_42 : f32 to vector<64x32xf32>
    %95 = arith.addf %94, %93 : vector<64x32xf32>
    %96 = arith.divf %94, %95 : vector<64x32xf32>
    %97 = vector.extract_strided_slice %86 {offsets = [0, 32], sizes = [64, 32], strides = [1, 1]} : vector<64x128xf32> to vector<64x32xf32>
    %98 = vector.extract_strided_slice %84 {offsets = [0, 32], sizes = [64, 32], strides = [1, 1]} : vector<64x256xf32> to vector<64x32xf32>
    %99 = arith.addf %97, %98 : vector<64x32xf32>
    %100 = arith.negf %99 : vector<64x32xf32>
    %101 = math.exp %100 : vector<64x32xf32>
    %cst_43 = arith.constant 1.000000e+00 : f32
    %102 = vector.broadcast %cst_43 : f32 to vector<64x32xf32>
    %103 = arith.addf %102, %101 : vector<64x32xf32>
    %104 = arith.divf %102, %103 : vector<64x32xf32>
    %105 = vector.extract_strided_slice %86 {offsets = [0, 64], sizes = [64, 32], strides = [1, 1]} : vector<64x128xf32> to vector<64x32xf32>
    %106 = vector.extract_strided_slice %84 {offsets = [0, 64], sizes = [64, 32], strides = [1, 1]} : vector<64x256xf32> to vector<64x32xf32>
    %107 = vector.broadcast %15 : vector<1x32xf32> to vector<64x32xf32>
    %108 = arith.addf %106, %107 : vector<64x32xf32>
    %109 = arith.mulf %96, %108 : vector<64x32xf32>
    %110 = arith.addf %105, %109 : vector<64x32xf32>
    %111 = math.tanh %110 : vector<64x32xf32>
    %cst_44 = arith.constant 1.000000e+00 : f32
    %112 = vector.broadcast %cst_44 : f32 to vector<64x32xf32>
    %113 = arith.subf %112, %104 : vector<64x32xf32>
    %114 = arith.mulf %113, %111 : vector<64x32xf32>
    %115 = arith.mulf %104, %53 : vector<64x32xf32>
    %116 = arith.addf %114, %115 : vector<64x32xf32>
    %117 = vector.extract_strided_slice %88 {offsets = [0, 0], sizes = [64, 32], strides = [1, 1]} : vector<64x128xf32> to vector<64x32xf32>
    %118 = vector.extract_strided_slice %84 {offsets = [0, 128], sizes = [64, 32], strides = [1, 1]} : vector<64x256xf32> to vector<64x32xf32>
    %119 = arith.addf %117, %118 : vector<64x32xf32>
    %120 = arith.negf %119 : vector<64x32xf32>
    %121 = math.exp %120 : vector<64x32xf32>
    %cst_45 = arith.constant 1.000000e+00 : f32
    %122 = vector.broadcast %cst_45 : f32 to vector<64x32xf32>
    %123 = arith.addf %122, %121 : vector<64x32xf32>
    %124 = arith.divf %122, %123 : vector<64x32xf32>
    %125 = vector.extract_strided_slice %88 {offsets = [0, 32], sizes = [64, 32], strides = [1, 1]} : vector<64x128xf32> to vector<64x32xf32>
    %126 = vector.extract_strided_slice %84 {offsets = [0, 160], sizes = [64, 32], strides = [1, 1]} : vector<64x256xf32> to vector<64x32xf32>
    %127 = arith.addf %125, %126 : vector<64x32xf32>
    %128 = arith.negf %127 : vector<64x32xf32>
    %129 = math.exp %128 : vector<64x32xf32>
    %cst_46 = arith.constant 1.000000e+00 : f32
    %130 = vector.broadcast %cst_46 : f32 to vector<64x32xf32>
    %131 = arith.addf %130, %129 : vector<64x32xf32>
    %132 = arith.divf %130, %131 : vector<64x32xf32>
    %133 = vector.extract_strided_slice %88 {offsets = [0, 64], sizes = [64, 32], strides = [1, 1]} : vector<64x128xf32> to vector<64x32xf32>
    %134 = vector.extract_strided_slice %84 {offsets = [0, 192], sizes = [64, 32], strides = [1, 1]} : vector<64x256xf32> to vector<64x32xf32>
    %135 = vector.broadcast %16 : vector<1x32xf32> to vector<64x32xf32>
    %136 = arith.addf %134, %135 : vector<64x32xf32>
    %137 = arith.mulf %124, %136 : vector<64x32xf32>
    %138 = arith.addf %133, %137 : vector<64x32xf32>
    %139 = math.tanh %138 : vector<64x32xf32>
    %cst_47 = arith.constant 1.000000e+00 : f32
    %140 = vector.broadcast %cst_47 : f32 to vector<64x32xf32>
    %141 = arith.subf %140, %132 : vector<64x32xf32>
    %142 = arith.mulf %141, %139 : vector<64x32xf32>
    %143 = arith.mulf %132, %81 : vector<64x32xf32>
    %144 = arith.addf %142, %143 : vector<64x32xf32>
    %145 = tpu.concatenate %116, %144 in 1 : vector<64x32xf32>, vector<64x32xf32> -> vector<64x64xf32>
    %c0_48 = arith.constant 0 : index
    %c0_49 = arith.constant 0 : index
    %146 = vector.load %arg6[%c0_48, %c0_49] : memref<64x256xf32, #tpu.memory_space<vmem>>, vector<64x256xf32>
    %cst_50 = arith.constant dense<0.000000e+00> : vector<64x256xf32>
    %147 = tpu.matmul %145, %146, %cst_50 {dimension_numbers = #tpu.dot_dimension_numbers<[1], [0], [0], [1], [0, 0, 1, 1], [], []>} : vector<64x64xf32>, vector<64x256xf32>, vector<64x256xf32> -> vector<64x256xf32>
    %c2 = arith.constant 2 : index
    %c0_51 = arith.constant 0 : index
    %c0_52 = arith.constant 0 : index
    %148 = vector.load %arg16[%c2, %c0_51, %c0_52] : memref<8x64x256xf32, #tpu.memory_space<vmem>>, vector<1x64x128xf32>
    %149 = vector.shape_cast %148 : vector<1x64x128xf32> to vector<64x128xf32>
    %c5 = arith.constant 5 : index
    %c0_53 = arith.constant 0 : index
    %c128_54 = arith.constant 128 : index
    %150 = vector.load %arg16[%c5, %c0_53, %c128_54] : memref<8x64x256xf32, #tpu.memory_space<vmem>>, vector<1x64x128xf32>
    %151 = vector.shape_cast %150 : vector<1x64x128xf32> to vector<64x128xf32>
    %152 = vector.extract_strided_slice %149 {offsets = [0, 0], sizes = [64, 32], strides = [1, 1]} : vector<64x128xf32> to vector<64x32xf32>
    %153 = vector.extract_strided_slice %147 {offsets = [0, 0], sizes = [64, 32], strides = [1, 1]} : vector<64x256xf32> to vector<64x32xf32>
    %154 = arith.addf %152, %153 : vector<64x32xf32>
    %155 = arith.negf %154 : vector<64x32xf32>
    %156 = math.exp %155 : vector<64x32xf32>
    %cst_55 = arith.constant 1.000000e+00 : f32
    %157 = vector.broadcast %cst_55 : f32 to vector<64x32xf32>
    %158 = arith.addf %157, %156 : vector<64x32xf32>
    %159 = arith.divf %157, %158 : vector<64x32xf32>
    %160 = vector.extract_strided_slice %149 {offsets = [0, 32], sizes = [64, 32], strides = [1, 1]} : vector<64x128xf32> to vector<64x32xf32>
    %161 = vector.extract_strided_slice %147 {offsets = [0, 32], sizes = [64, 32], strides = [1, 1]} : vector<64x256xf32> to vector<64x32xf32>
    %162 = arith.addf %160, %161 : vector<64x32xf32>
    %163 = arith.negf %162 : vector<64x32xf32>
    %164 = math.exp %163 : vector<64x32xf32>
    %cst_56 = arith.constant 1.000000e+00 : f32
    %165 = vector.broadcast %cst_56 : f32 to vector<64x32xf32>
    %166 = arith.addf %165, %164 : vector<64x32xf32>
    %167 = arith.divf %165, %166 : vector<64x32xf32>
    %168 = vector.extract_strided_slice %149 {offsets = [0, 64], sizes = [64, 32], strides = [1, 1]} : vector<64x128xf32> to vector<64x32xf32>
    %169 = vector.extract_strided_slice %147 {offsets = [0, 64], sizes = [64, 32], strides = [1, 1]} : vector<64x256xf32> to vector<64x32xf32>
    %170 = vector.broadcast %15 : vector<1x32xf32> to vector<64x32xf32>
    %171 = arith.addf %169, %170 : vector<64x32xf32>
    %172 = arith.mulf %159, %171 : vector<64x32xf32>
    %173 = arith.addf %168, %172 : vector<64x32xf32>
    %174 = math.tanh %173 : vector<64x32xf32>
    %cst_57 = arith.constant 1.000000e+00 : f32
    %175 = vector.broadcast %cst_57 : f32 to vector<64x32xf32>
    %176 = arith.subf %175, %167 : vector<64x32xf32>
    %177 = arith.mulf %176, %174 : vector<64x32xf32>
    %178 = arith.mulf %167, %116 : vector<64x32xf32>
    %179 = arith.addf %177, %178 : vector<64x32xf32>
    %180 = vector.extract_strided_slice %151 {offsets = [0, 0], sizes = [64, 32], strides = [1, 1]} : vector<64x128xf32> to vector<64x32xf32>
    %181 = vector.extract_strided_slice %147 {offsets = [0, 128], sizes = [64, 32], strides = [1, 1]} : vector<64x256xf32> to vector<64x32xf32>
    %182 = arith.addf %180, %181 : vector<64x32xf32>
    %183 = arith.negf %182 : vector<64x32xf32>
    %184 = math.exp %183 : vector<64x32xf32>
    %cst_58 = arith.constant 1.000000e+00 : f32
    %185 = vector.broadcast %cst_58 : f32 to vector<64x32xf32>
    %186 = arith.addf %185, %184 : vector<64x32xf32>
    %187 = arith.divf %185, %186 : vector<64x32xf32>
    %188 = vector.extract_strided_slice %151 {offsets = [0, 32], sizes = [64, 32], strides = [1, 1]} : vector<64x128xf32> to vector<64x32xf32>
    %189 = vector.extract_strided_slice %147 {offsets = [0, 160], sizes = [64, 32], strides = [1, 1]} : vector<64x256xf32> to vector<64x32xf32>
    %190 = arith.addf %188, %189 : vector<64x32xf32>
    %191 = arith.negf %190 : vector<64x32xf32>
    %192 = math.exp %191 : vector<64x32xf32>
    %cst_59 = arith.constant 1.000000e+00 : f32
    %193 = vector.broadcast %cst_59 : f32 to vector<64x32xf32>
    %194 = arith.addf %193, %192 : vector<64x32xf32>
    %195 = arith.divf %193, %194 : vector<64x32xf32>
    %196 = vector.extract_strided_slice %151 {offsets = [0, 64], sizes = [64, 32], strides = [1, 1]} : vector<64x128xf32> to vector<64x32xf32>
    %197 = vector.extract_strided_slice %147 {offsets = [0, 192], sizes = [64, 32], strides = [1, 1]} : vector<64x256xf32> to vector<64x32xf32>
    %198 = vector.broadcast %16 : vector<1x32xf32> to vector<64x32xf32>
    %199 = arith.addf %197, %198 : vector<64x32xf32>
    %200 = arith.mulf %187, %199 : vector<64x32xf32>
    %201 = arith.addf %196, %200 : vector<64x32xf32>
    %202 = math.tanh %201 : vector<64x32xf32>
    %cst_60 = arith.constant 1.000000e+00 : f32
    %203 = vector.broadcast %cst_60 : f32 to vector<64x32xf32>
    %204 = arith.subf %203, %195 : vector<64x32xf32>
    %205 = arith.mulf %204, %202 : vector<64x32xf32>
    %206 = arith.mulf %195, %144 : vector<64x32xf32>
    %207 = arith.addf %205, %206 : vector<64x32xf32>
    %208 = tpu.concatenate %179, %207 in 1 : vector<64x32xf32>, vector<64x32xf32> -> vector<64x64xf32>
    %c0_61 = arith.constant 0 : index
    %c0_62 = arith.constant 0 : index
    %209 = vector.load %arg6[%c0_61, %c0_62] : memref<64x256xf32, #tpu.memory_space<vmem>>, vector<64x256xf32>
    %cst_63 = arith.constant dense<0.000000e+00> : vector<64x256xf32>
    %210 = tpu.matmul %208, %209, %cst_63 {dimension_numbers = #tpu.dot_dimension_numbers<[1], [0], [0], [1], [0, 0, 1, 1], [], []>} : vector<64x64xf32>, vector<64x256xf32>, vector<64x256xf32> -> vector<64x256xf32>
    %c3 = arith.constant 3 : index
    %c0_64 = arith.constant 0 : index
    %c0_65 = arith.constant 0 : index
    %211 = vector.load %arg16[%c3, %c0_64, %c0_65] : memref<8x64x256xf32, #tpu.memory_space<vmem>>, vector<1x64x128xf32>
    %212 = vector.shape_cast %211 : vector<1x64x128xf32> to vector<64x128xf32>
    %c4 = arith.constant 4 : index
    %c0_66 = arith.constant 0 : index
    %c128_67 = arith.constant 128 : index
    %213 = vector.load %arg16[%c4, %c0_66, %c128_67] : memref<8x64x256xf32, #tpu.memory_space<vmem>>, vector<1x64x128xf32>
    %214 = vector.shape_cast %213 : vector<1x64x128xf32> to vector<64x128xf32>
    %215 = vector.extract_strided_slice %212 {offsets = [0, 0], sizes = [64, 32], strides = [1, 1]} : vector<64x128xf32> to vector<64x32xf32>
    %216 = vector.extract_strided_slice %210 {offsets = [0, 0], sizes = [64, 32], strides = [1, 1]} : vector<64x256xf32> to vector<64x32xf32>
    %217 = arith.addf %215, %216 : vector<64x32xf32>
    %218 = arith.negf %217 : vector<64x32xf32>
    %219 = math.exp %218 : vector<64x32xf32>
    %cst_68 = arith.constant 1.000000e+00 : f32
    %220 = vector.broadcast %cst_68 : f32 to vector<64x32xf32>
    %221 = arith.addf %220, %219 : vector<64x32xf32>
    %222 = arith.divf %220, %221 : vector<64x32xf32>
    %223 = vector.extract_strided_slice %212 {offsets = [0, 32], sizes = [64, 32], strides = [1, 1]} : vector<64x128xf32> to vector<64x32xf32>
    %224 = vector.extract_strided_slice %210 {offsets = [0, 32], sizes = [64, 32], strides = [1, 1]} : vector<64x256xf32> to vector<64x32xf32>
    %225 = arith.addf %223, %224 : vector<64x32xf32>
    %226 = arith.negf %225 : vector<64x32xf32>
    %227 = math.exp %226 : vector<64x32xf32>
    %cst_69 = arith.constant 1.000000e+00 : f32
    %228 = vector.broadcast %cst_69 : f32 to vector<64x32xf32>
    %229 = arith.addf %228, %227 : vector<64x32xf32>
    %230 = arith.divf %228, %229 : vector<64x32xf32>
    %231 = vector.extract_strided_slice %212 {offsets = [0, 64], sizes = [64, 32], strides = [1, 1]} : vector<64x128xf32> to vector<64x32xf32>
    %232 = vector.extract_strided_slice %210 {offsets = [0, 64], sizes = [64, 32], strides = [1, 1]} : vector<64x256xf32> to vector<64x32xf32>
    %233 = vector.broadcast %15 : vector<1x32xf32> to vector<64x32xf32>
    %234 = arith.addf %232, %233 : vector<64x32xf32>
    %235 = arith.mulf %222, %234 : vector<64x32xf32>
    %236 = arith.addf %231, %235 : vector<64x32xf32>
    %237 = math.tanh %236 : vector<64x32xf32>
    %cst_70 = arith.constant 1.000000e+00 : f32
    %238 = vector.broadcast %cst_70 : f32 to vector<64x32xf32>
    %239 = arith.subf %238, %230 : vector<64x32xf32>
    %240 = arith.mulf %239, %237 : vector<64x32xf32>
    %241 = arith.mulf %230, %179 : vector<64x32xf32>
    %242 = arith.addf %240, %241 : vector<64x32xf32>
    %243 = vector.extract_strided_slice %214 {offsets = [0, 0], sizes = [64, 32], strides = [1, 1]} : vector<64x128xf32> to vector<64x32xf32>
    %244 = vector.extract_strided_slice %210 {offsets = [0, 128], sizes = [64, 32], strides = [1, 1]} : vector<64x256xf32> to vector<64x32xf32>
    %245 = arith.addf %243, %244 : vector<64x32xf32>
    %246 = arith.negf %245 : vector<64x32xf32>
    %247 = math.exp %246 : vector<64x32xf32>
    %cst_71 = arith.constant 1.000000e+00 : f32
    %248 = vector.broadcast %cst_71 : f32 to vector<64x32xf32>
    %249 = arith.addf %248, %247 : vector<64x32xf32>
    %250 = arith.divf %248, %249 : vector<64x32xf32>
    %251 = vector.extract_strided_slice %214 {offsets = [0, 32], sizes = [64, 32], strides = [1, 1]} : vector<64x128xf32> to vector<64x32xf32>
    %252 = vector.extract_strided_slice %210 {offsets = [0, 160], sizes = [64, 32], strides = [1, 1]} : vector<64x256xf32> to vector<64x32xf32>
    %253 = arith.addf %251, %252 : vector<64x32xf32>
    %254 = arith.negf %253 : vector<64x32xf32>
    %255 = math.exp %254 : vector<64x32xf32>
    %cst_72 = arith.constant 1.000000e+00 : f32
    %256 = vector.broadcast %cst_72 : f32 to vector<64x32xf32>
    %257 = arith.addf %256, %255 : vector<64x32xf32>
    %258 = arith.divf %256, %257 : vector<64x32xf32>
    %259 = vector.extract_strided_slice %214 {offsets = [0, 64], sizes = [64, 32], strides = [1, 1]} : vector<64x128xf32> to vector<64x32xf32>
    %260 = vector.extract_strided_slice %210 {offsets = [0, 192], sizes = [64, 32], strides = [1, 1]} : vector<64x256xf32> to vector<64x32xf32>
    %261 = vector.broadcast %16 : vector<1x32xf32> to vector<64x32xf32>
    %262 = arith.addf %260, %261 : vector<64x32xf32>
    %263 = arith.mulf %250, %262 : vector<64x32xf32>
    %264 = arith.addf %259, %263 : vector<64x32xf32>
    %265 = math.tanh %264 : vector<64x32xf32>
    %cst_73 = arith.constant 1.000000e+00 : f32
    %266 = vector.broadcast %cst_73 : f32 to vector<64x32xf32>
    %267 = arith.subf %266, %258 : vector<64x32xf32>
    %268 = arith.mulf %267, %265 : vector<64x32xf32>
    %269 = arith.mulf %258, %207 : vector<64x32xf32>
    %270 = arith.addf %268, %269 : vector<64x32xf32>
    %271 = tpu.concatenate %242, %270 in 1 : vector<64x32xf32>, vector<64x32xf32> -> vector<64x64xf32>
    %c0_74 = arith.constant 0 : index
    %c0_75 = arith.constant 0 : index
    %272 = vector.load %arg6[%c0_74, %c0_75] : memref<64x256xf32, #tpu.memory_space<vmem>>, vector<64x256xf32>
    %cst_76 = arith.constant dense<0.000000e+00> : vector<64x256xf32>
    %273 = tpu.matmul %271, %272, %cst_76 {dimension_numbers = #tpu.dot_dimension_numbers<[1], [0], [0], [1], [0, 0, 1, 1], [], []>} : vector<64x64xf32>, vector<64x256xf32>, vector<64x256xf32> -> vector<64x256xf32>
    %c4_77 = arith.constant 4 : index
    %c0_78 = arith.constant 0 : index
    %c0_79 = arith.constant 0 : index
    %274 = vector.load %arg16[%c4_77, %c0_78, %c0_79] : memref<8x64x256xf32, #tpu.memory_space<vmem>>, vector<1x64x128xf32>
    %275 = vector.shape_cast %274 : vector<1x64x128xf32> to vector<64x128xf32>
    %c3_80 = arith.constant 3 : index
    %c0_81 = arith.constant 0 : index
    %c128_82 = arith.constant 128 : index
    %276 = vector.load %arg16[%c3_80, %c0_81, %c128_82] : memref<8x64x256xf32, #tpu.memory_space<vmem>>, vector<1x64x128xf32>
    %277 = vector.shape_cast %276 : vector<1x64x128xf32> to vector<64x128xf32>
    %278 = vector.extract_strided_slice %275 {offsets = [0, 0], sizes = [64, 32], strides = [1, 1]} : vector<64x128xf32> to vector<64x32xf32>
    %279 = vector.extract_strided_slice %273 {offsets = [0, 0], sizes = [64, 32], strides = [1, 1]} : vector<64x256xf32> to vector<64x32xf32>
    %280 = arith.addf %278, %279 : vector<64x32xf32>
    %281 = arith.negf %280 : vector<64x32xf32>
    %282 = math.exp %281 : vector<64x32xf32>
    %cst_83 = arith.constant 1.000000e+00 : f32
    %283 = vector.broadcast %cst_83 : f32 to vector<64x32xf32>
    %284 = arith.addf %283, %282 : vector<64x32xf32>
    %285 = arith.divf %283, %284 : vector<64x32xf32>
    %286 = vector.extract_strided_slice %275 {offsets = [0, 32], sizes = [64, 32], strides = [1, 1]} : vector<64x128xf32> to vector<64x32xf32>
    %287 = vector.extract_strided_slice %273 {offsets = [0, 32], sizes = [64, 32], strides = [1, 1]} : vector<64x256xf32> to vector<64x32xf32>
    %288 = arith.addf %286, %287 : vector<64x32xf32>
    %289 = arith.negf %288 : vector<64x32xf32>
    %290 = math.exp %289 : vector<64x32xf32>
    %cst_84 = arith.constant 1.000000e+00 : f32
    %291 = vector.broadcast %cst_84 : f32 to vector<64x32xf32>
    %292 = arith.addf %291, %290 : vector<64x32xf32>
    %293 = arith.divf %291, %292 : vector<64x32xf32>
    %294 = vector.extract_strided_slice %275 {offsets = [0, 64], sizes = [64, 32], strides = [1, 1]} : vector<64x128xf32> to vector<64x32xf32>
    %295 = vector.extract_strided_slice %273 {offsets = [0, 64], sizes = [64, 32], strides = [1, 1]} : vector<64x256xf32> to vector<64x32xf32>
    %296 = vector.broadcast %15 : vector<1x32xf32> to vector<64x32xf32>
    %297 = arith.addf %295, %296 : vector<64x32xf32>
    %298 = arith.mulf %285, %297 : vector<64x32xf32>
    %299 = arith.addf %294, %298 : vector<64x32xf32>
    %300 = math.tanh %299 : vector<64x32xf32>
    %cst_85 = arith.constant 1.000000e+00 : f32
    %301 = vector.broadcast %cst_85 : f32 to vector<64x32xf32>
    %302 = arith.subf %301, %293 : vector<64x32xf32>
    %303 = arith.mulf %302, %300 : vector<64x32xf32>
    %304 = arith.mulf %293, %242 : vector<64x32xf32>
    %305 = arith.addf %303, %304 : vector<64x32xf32>
    %306 = vector.extract_strided_slice %277 {offsets = [0, 0], sizes = [64, 32], strides = [1, 1]} : vector<64x128xf32> to vector<64x32xf32>
    %307 = vector.extract_strided_slice %273 {offsets = [0, 128], sizes = [64, 32], strides = [1, 1]} : vector<64x256xf32> to vector<64x32xf32>
    %308 = arith.addf %306, %307 : vector<64x32xf32>
    %309 = arith.negf %308 : vector<64x32xf32>
    %310 = math.exp %309 : vector<64x32xf32>
    %cst_86 = arith.constant 1.000000e+00 : f32
    %311 = vector.broadcast %cst_86 : f32 to vector<64x32xf32>
    %312 = arith.addf %311, %310 : vector<64x32xf32>
    %313 = arith.divf %311, %312 : vector<64x32xf32>
    %314 = vector.extract_strided_slice %277 {offsets = [0, 32], sizes = [64, 32], strides = [1, 1]} : vector<64x128xf32> to vector<64x32xf32>
    %315 = vector.extract_strided_slice %273 {offsets = [0, 160], sizes = [64, 32], strides = [1, 1]} : vector<64x256xf32> to vector<64x32xf32>
    %316 = arith.addf %314, %315 : vector<64x32xf32>
    %317 = arith.negf %316 : vector<64x32xf32>
    %318 = math.exp %317 : vector<64x32xf32>
    %cst_87 = arith.constant 1.000000e+00 : f32
    %319 = vector.broadcast %cst_87 : f32 to vector<64x32xf32>
    %320 = arith.addf %319, %318 : vector<64x32xf32>
    %321 = arith.divf %319, %320 : vector<64x32xf32>
    %322 = vector.extract_strided_slice %277 {offsets = [0, 64], sizes = [64, 32], strides = [1, 1]} : vector<64x128xf32> to vector<64x32xf32>
    %323 = vector.extract_strided_slice %273 {offsets = [0, 192], sizes = [64, 32], strides = [1, 1]} : vector<64x256xf32> to vector<64x32xf32>
    %324 = vector.broadcast %16 : vector<1x32xf32> to vector<64x32xf32>
    %325 = arith.addf %323, %324 : vector<64x32xf32>
    %326 = arith.mulf %313, %325 : vector<64x32xf32>
    %327 = arith.addf %322, %326 : vector<64x32xf32>
    %328 = math.tanh %327 : vector<64x32xf32>
    %cst_88 = arith.constant 1.000000e+00 : f32
    %329 = vector.broadcast %cst_88 : f32 to vector<64x32xf32>
    %330 = arith.subf %329, %321 : vector<64x32xf32>
    %331 = arith.mulf %330, %328 : vector<64x32xf32>
    %332 = arith.mulf %321, %270 : vector<64x32xf32>
    %333 = arith.addf %331, %332 : vector<64x32xf32>
    %334 = tpu.concatenate %305, %333 in 1 : vector<64x32xf32>, vector<64x32xf32> -> vector<64x64xf32>
    %c0_89 = arith.constant 0 : index
    %c0_90 = arith.constant 0 : index
    %335 = vector.load %arg6[%c0_89, %c0_90] : memref<64x256xf32, #tpu.memory_space<vmem>>, vector<64x256xf32>
    %cst_91 = arith.constant dense<0.000000e+00> : vector<64x256xf32>
    %336 = tpu.matmul %334, %335, %cst_91 {dimension_numbers = #tpu.dot_dimension_numbers<[1], [0], [0], [1], [0, 0, 1, 1], [], []>} : vector<64x64xf32>, vector<64x256xf32>, vector<64x256xf32> -> vector<64x256xf32>
    %c5_92 = arith.constant 5 : index
    %c0_93 = arith.constant 0 : index
    %c0_94 = arith.constant 0 : index
    %337 = vector.load %arg16[%c5_92, %c0_93, %c0_94] : memref<8x64x256xf32, #tpu.memory_space<vmem>>, vector<1x64x128xf32>
    %338 = vector.shape_cast %337 : vector<1x64x128xf32> to vector<64x128xf32>
    %c2_95 = arith.constant 2 : index
    %c0_96 = arith.constant 0 : index
    %c128_97 = arith.constant 128 : index
    %339 = vector.load %arg16[%c2_95, %c0_96, %c128_97] : memref<8x64x256xf32, #tpu.memory_space<vmem>>, vector<1x64x128xf32>
    %340 = vector.shape_cast %339 : vector<1x64x128xf32> to vector<64x128xf32>
    %341 = vector.extract_strided_slice %338 {offsets = [0, 0], sizes = [64, 32], strides = [1, 1]} : vector<64x128xf32> to vector<64x32xf32>
    %342 = vector.extract_strided_slice %336 {offsets = [0, 0], sizes = [64, 32], strides = [1, 1]} : vector<64x256xf32> to vector<64x32xf32>
    %343 = arith.addf %341, %342 : vector<64x32xf32>
    %344 = arith.negf %343 : vector<64x32xf32>
    %345 = math.exp %344 : vector<64x32xf32>
    %cst_98 = arith.constant 1.000000e+00 : f32
    %346 = vector.broadcast %cst_98 : f32 to vector<64x32xf32>
    %347 = arith.addf %346, %345 : vector<64x32xf32>
    %348 = arith.divf %346, %347 : vector<64x32xf32>
    %349 = vector.extract_strided_slice %338 {offsets = [0, 32], sizes = [64, 32], strides = [1, 1]} : vector<64x128xf32> to vector<64x32xf32>
    %350 = vector.extract_strided_slice %336 {offsets = [0, 32], sizes = [64, 32], strides = [1, 1]} : vector<64x256xf32> to vector<64x32xf32>
    %351 = arith.addf %349, %350 : vector<64x32xf32>
    %352 = arith.negf %351 : vector<64x32xf32>
    %353 = math.exp %352 : vector<64x32xf32>
    %cst_99 = arith.constant 1.000000e+00 : f32
    %354 = vector.broadcast %cst_99 : f32 to vector<64x32xf32>
    %355 = arith.addf %354, %353 : vector<64x32xf32>
    %356 = arith.divf %354, %355 : vector<64x32xf32>
    %357 = vector.extract_strided_slice %338 {offsets = [0, 64], sizes = [64, 32], strides = [1, 1]} : vector<64x128xf32> to vector<64x32xf32>
    %358 = vector.extract_strided_slice %336 {offsets = [0, 64], sizes = [64, 32], strides = [1, 1]} : vector<64x256xf32> to vector<64x32xf32>
    %359 = vector.broadcast %15 : vector<1x32xf32> to vector<64x32xf32>
    %360 = arith.addf %358, %359 : vector<64x32xf32>
    %361 = arith.mulf %348, %360 : vector<64x32xf32>
    %362 = arith.addf %357, %361 : vector<64x32xf32>
    %363 = math.tanh %362 : vector<64x32xf32>
    %cst_100 = arith.constant 1.000000e+00 : f32
    %364 = vector.broadcast %cst_100 : f32 to vector<64x32xf32>
    %365 = arith.subf %364, %356 : vector<64x32xf32>
    %366 = arith.mulf %365, %363 : vector<64x32xf32>
    %367 = arith.mulf %356, %305 : vector<64x32xf32>
    %368 = arith.addf %366, %367 : vector<64x32xf32>
    %369 = vector.extract_strided_slice %340 {offsets = [0, 0], sizes = [64, 32], strides = [1, 1]} : vector<64x128xf32> to vector<64x32xf32>
    %370 = vector.extract_strided_slice %336 {offsets = [0, 128], sizes = [64, 32], strides = [1, 1]} : vector<64x256xf32> to vector<64x32xf32>
    %371 = arith.addf %369, %370 : vector<64x32xf32>
    %372 = arith.negf %371 : vector<64x32xf32>
    %373 = math.exp %372 : vector<64x32xf32>
    %cst_101 = arith.constant 1.000000e+00 : f32
    %374 = vector.broadcast %cst_101 : f32 to vector<64x32xf32>
    %375 = arith.addf %374, %373 : vector<64x32xf32>
    %376 = arith.divf %374, %375 : vector<64x32xf32>
    %377 = vector.extract_strided_slice %340 {offsets = [0, 32], sizes = [64, 32], strides = [1, 1]} : vector<64x128xf32> to vector<64x32xf32>
    %378 = vector.extract_strided_slice %336 {offsets = [0, 160], sizes = [64, 32], strides = [1, 1]} : vector<64x256xf32> to vector<64x32xf32>
    %379 = arith.addf %377, %378 : vector<64x32xf32>
    %380 = arith.negf %379 : vector<64x32xf32>
    %381 = math.exp %380 : vector<64x32xf32>
    %cst_102 = arith.constant 1.000000e+00 : f32
    %382 = vector.broadcast %cst_102 : f32 to vector<64x32xf32>
    %383 = arith.addf %382, %381 : vector<64x32xf32>
    %384 = arith.divf %382, %383 : vector<64x32xf32>
    %385 = vector.extract_strided_slice %340 {offsets = [0, 64], sizes = [64, 32], strides = [1, 1]} : vector<64x128xf32> to vector<64x32xf32>
    %386 = vector.extract_strided_slice %336 {offsets = [0, 192], sizes = [64, 32], strides = [1, 1]} : vector<64x256xf32> to vector<64x32xf32>
    %387 = vector.broadcast %16 : vector<1x32xf32> to vector<64x32xf32>
    %388 = arith.addf %386, %387 : vector<64x32xf32>
    %389 = arith.mulf %376, %388 : vector<64x32xf32>
    %390 = arith.addf %385, %389 : vector<64x32xf32>
    %391 = math.tanh %390 : vector<64x32xf32>
    %cst_103 = arith.constant 1.000000e+00 : f32
    %392 = vector.broadcast %cst_103 : f32 to vector<64x32xf32>
    %393 = arith.subf %392, %384 : vector<64x32xf32>
    %394 = arith.mulf %393, %391 : vector<64x32xf32>
    %395 = arith.mulf %384, %333 : vector<64x32xf32>
    %396 = arith.addf %394, %395 : vector<64x32xf32>
    %397 = tpu.concatenate %368, %396 in 1 : vector<64x32xf32>, vector<64x32xf32> -> vector<64x64xf32>
    %c0_104 = arith.constant 0 : index
    %c0_105 = arith.constant 0 : index
    %398 = vector.load %arg6[%c0_104, %c0_105] : memref<64x256xf32, #tpu.memory_space<vmem>>, vector<64x256xf32>
    %cst_106 = arith.constant dense<0.000000e+00> : vector<64x256xf32>
    %399 = tpu.matmul %397, %398, %cst_106 {dimension_numbers = #tpu.dot_dimension_numbers<[1], [0], [0], [1], [0, 0, 1, 1], [], []>} : vector<64x64xf32>, vector<64x256xf32>, vector<64x256xf32> -> vector<64x256xf32>
    %c6_107 = arith.constant 6 : index
    %c0_108 = arith.constant 0 : index
    %c0_109 = arith.constant 0 : index
    %400 = vector.load %arg16[%c6_107, %c0_108, %c0_109] : memref<8x64x256xf32, #tpu.memory_space<vmem>>, vector<1x64x128xf32>
    %401 = vector.shape_cast %400 : vector<1x64x128xf32> to vector<64x128xf32>
    %c1_110 = arith.constant 1 : index
    %c0_111 = arith.constant 0 : index
    %c128_112 = arith.constant 128 : index
    %402 = vector.load %arg16[%c1_110, %c0_111, %c128_112] : memref<8x64x256xf32, #tpu.memory_space<vmem>>, vector<1x64x128xf32>
    %403 = vector.shape_cast %402 : vector<1x64x128xf32> to vector<64x128xf32>
    %404 = vector.extract_strided_slice %401 {offsets = [0, 0], sizes = [64, 32], strides = [1, 1]} : vector<64x128xf32> to vector<64x32xf32>
    %405 = vector.extract_strided_slice %399 {offsets = [0, 0], sizes = [64, 32], strides = [1, 1]} : vector<64x256xf32> to vector<64x32xf32>
    %406 = arith.addf %404, %405 : vector<64x32xf32>
    %407 = arith.negf %406 : vector<64x32xf32>
    %408 = math.exp %407 : vector<64x32xf32>
    %cst_113 = arith.constant 1.000000e+00 : f32
    %409 = vector.broadcast %cst_113 : f32 to vector<64x32xf32>
    %410 = arith.addf %409, %408 : vector<64x32xf32>
    %411 = arith.divf %409, %410 : vector<64x32xf32>
    %412 = vector.extract_strided_slice %401 {offsets = [0, 32], sizes = [64, 32], strides = [1, 1]} : vector<64x128xf32> to vector<64x32xf32>
    %413 = vector.extract_strided_slice %399 {offsets = [0, 32], sizes = [64, 32], strides = [1, 1]} : vector<64x256xf32> to vector<64x32xf32>
    %414 = arith.addf %412, %413 : vector<64x32xf32>
    %415 = arith.negf %414 : vector<64x32xf32>
    %416 = math.exp %415 : vector<64x32xf32>
    %cst_114 = arith.constant 1.000000e+00 : f32
    %417 = vector.broadcast %cst_114 : f32 to vector<64x32xf32>
    %418 = arith.addf %417, %416 : vector<64x32xf32>
    %419 = arith.divf %417, %418 : vector<64x32xf32>
    %420 = vector.extract_strided_slice %401 {offsets = [0, 64], sizes = [64, 32], strides = [1, 1]} : vector<64x128xf32> to vector<64x32xf32>
    %421 = vector.extract_strided_slice %399 {offsets = [0, 64], sizes = [64, 32], strides = [1, 1]} : vector<64x256xf32> to vector<64x32xf32>
    %422 = vector.broadcast %15 : vector<1x32xf32> to vector<64x32xf32>
    %423 = arith.addf %421, %422 : vector<64x32xf32>
    %424 = arith.mulf %411, %423 : vector<64x32xf32>
    %425 = arith.addf %420, %424 : vector<64x32xf32>
    %426 = math.tanh %425 : vector<64x32xf32>
    %cst_115 = arith.constant 1.000000e+00 : f32
    %427 = vector.broadcast %cst_115 : f32 to vector<64x32xf32>
    %428 = arith.subf %427, %419 : vector<64x32xf32>
    %429 = arith.mulf %428, %426 : vector<64x32xf32>
    %430 = arith.mulf %419, %368 : vector<64x32xf32>
    %431 = arith.addf %429, %430 : vector<64x32xf32>
    %432 = vector.extract_strided_slice %403 {offsets = [0, 0], sizes = [64, 32], strides = [1, 1]} : vector<64x128xf32> to vector<64x32xf32>
    %433 = vector.extract_strided_slice %399 {offsets = [0, 128], sizes = [64, 32], strides = [1, 1]} : vector<64x256xf32> to vector<64x32xf32>
    %434 = arith.addf %432, %433 : vector<64x32xf32>
    %435 = arith.negf %434 : vector<64x32xf32>
    %436 = math.exp %435 : vector<64x32xf32>
    %cst_116 = arith.constant 1.000000e+00 : f32
    %437 = vector.broadcast %cst_116 : f32 to vector<64x32xf32>
    %438 = arith.addf %437, %436 : vector<64x32xf32>
    %439 = arith.divf %437, %438 : vector<64x32xf32>
    %440 = vector.extract_strided_slice %403 {offsets = [0, 32], sizes = [64, 32], strides = [1, 1]} : vector<64x128xf32> to vector<64x32xf32>
    %441 = vector.extract_strided_slice %399 {offsets = [0, 160], sizes = [64, 32], strides = [1, 1]} : vector<64x256xf32> to vector<64x32xf32>
    %442 = arith.addf %440, %441 : vector<64x32xf32>
    %443 = arith.negf %442 : vector<64x32xf32>
    %444 = math.exp %443 : vector<64x32xf32>
    %cst_117 = arith.constant 1.000000e+00 : f32
    %445 = vector.broadcast %cst_117 : f32 to vector<64x32xf32>
    %446 = arith.addf %445, %444 : vector<64x32xf32>
    %447 = arith.divf %445, %446 : vector<64x32xf32>
    %448 = vector.extract_strided_slice %403 {offsets = [0, 64], sizes = [64, 32], strides = [1, 1]} : vector<64x128xf32> to vector<64x32xf32>
    %449 = vector.extract_strided_slice %399 {offsets = [0, 192], sizes = [64, 32], strides = [1, 1]} : vector<64x256xf32> to vector<64x32xf32>
    %450 = vector.broadcast %16 : vector<1x32xf32> to vector<64x32xf32>
    %451 = arith.addf %449, %450 : vector<64x32xf32>
    %452 = arith.mulf %439, %451 : vector<64x32xf32>
    %453 = arith.addf %448, %452 : vector<64x32xf32>
    %454 = math.tanh %453 : vector<64x32xf32>
    %cst_118 = arith.constant 1.000000e+00 : f32
    %455 = vector.broadcast %cst_118 : f32 to vector<64x32xf32>
    %456 = arith.subf %455, %447 : vector<64x32xf32>
    %457 = arith.mulf %456, %454 : vector<64x32xf32>
    %458 = arith.mulf %447, %396 : vector<64x32xf32>
    %459 = arith.addf %457, %458 : vector<64x32xf32>
    %460 = tpu.concatenate %431, %459 in 1 : vector<64x32xf32>, vector<64x32xf32> -> vector<64x64xf32>
    %c0_119 = arith.constant 0 : index
    %c0_120 = arith.constant 0 : index
    %461 = vector.load %arg6[%c0_119, %c0_120] : memref<64x256xf32, #tpu.memory_space<vmem>>, vector<64x256xf32>
    %cst_121 = arith.constant dense<0.000000e+00> : vector<64x256xf32>
    %462 = tpu.matmul %460, %461, %cst_121 {dimension_numbers = #tpu.dot_dimension_numbers<[1], [0], [0], [1], [0, 0, 1, 1], [], []>} : vector<64x64xf32>, vector<64x256xf32>, vector<64x256xf32> -> vector<64x256xf32>
    %c7_122 = arith.constant 7 : index
    %c0_123 = arith.constant 0 : index
    %c0_124 = arith.constant 0 : index
    %463 = vector.load %arg16[%c7_122, %c0_123, %c0_124] : memref<8x64x256xf32, #tpu.memory_space<vmem>>, vector<1x64x128xf32>
    %464 = vector.shape_cast %463 : vector<1x64x128xf32> to vector<64x128xf32>
    %c0_125 = arith.constant 0 : index
    %c0_126 = arith.constant 0 : index
    %c128_127 = arith.constant 128 : index
    %465 = vector.load %arg16[%c0_125, %c0_126, %c128_127] : memref<8x64x256xf32, #tpu.memory_space<vmem>>, vector<1x64x128xf32>
    %466 = vector.shape_cast %465 : vector<1x64x128xf32> to vector<64x128xf32>
    %467 = vector.extract_strided_slice %464 {offsets = [0, 0], sizes = [64, 32], strides = [1, 1]} : vector<64x128xf32> to vector<64x32xf32>
    %468 = vector.extract_strided_slice %462 {offsets = [0, 0], sizes = [64, 32], strides = [1, 1]} : vector<64x256xf32> to vector<64x32xf32>
    %469 = arith.addf %467, %468 : vector<64x32xf32>
    %470 = arith.negf %469 : vector<64x32xf32>
    %471 = math.exp %470 : vector<64x32xf32>
    %cst_128 = arith.constant 1.000000e+00 : f32
    %472 = vector.broadcast %cst_128 : f32 to vector<64x32xf32>
    %473 = arith.addf %472, %471 : vector<64x32xf32>
    %474 = arith.divf %472, %473 : vector<64x32xf32>
    %475 = vector.extract_strided_slice %464 {offsets = [0, 32], sizes = [64, 32], strides = [1, 1]} : vector<64x128xf32> to vector<64x32xf32>
    %476 = vector.extract_strided_slice %462 {offsets = [0, 32], sizes = [64, 32], strides = [1, 1]} : vector<64x256xf32> to vector<64x32xf32>
    %477 = arith.addf %475, %476 : vector<64x32xf32>
    %478 = arith.negf %477 : vector<64x32xf32>
    %479 = math.exp %478 : vector<64x32xf32>
    %cst_129 = arith.constant 1.000000e+00 : f32
    %480 = vector.broadcast %cst_129 : f32 to vector<64x32xf32>
    %481 = arith.addf %480, %479 : vector<64x32xf32>
    %482 = arith.divf %480, %481 : vector<64x32xf32>
    %483 = vector.extract_strided_slice %464 {offsets = [0, 64], sizes = [64, 32], strides = [1, 1]} : vector<64x128xf32> to vector<64x32xf32>
    %484 = vector.extract_strided_slice %462 {offsets = [0, 64], sizes = [64, 32], strides = [1, 1]} : vector<64x256xf32> to vector<64x32xf32>
    %485 = vector.broadcast %15 : vector<1x32xf32> to vector<64x32xf32>
    %486 = arith.addf %484, %485 : vector<64x32xf32>
    %487 = arith.mulf %474, %486 : vector<64x32xf32>
    %488 = arith.addf %483, %487 : vector<64x32xf32>
    %489 = math.tanh %488 : vector<64x32xf32>
    %cst_130 = arith.constant 1.000000e+00 : f32
    %490 = vector.broadcast %cst_130 : f32 to vector<64x32xf32>
    %491 = arith.subf %490, %482 : vector<64x32xf32>
    %492 = arith.mulf %491, %489 : vector<64x32xf32>
    %493 = arith.mulf %482, %431 : vector<64x32xf32>
    %494 = arith.addf %492, %493 : vector<64x32xf32>
    %495 = vector.extract_strided_slice %466 {offsets = [0, 0], sizes = [64, 32], strides = [1, 1]} : vector<64x128xf32> to vector<64x32xf32>
    %496 = vector.extract_strided_slice %462 {offsets = [0, 128], sizes = [64, 32], strides = [1, 1]} : vector<64x256xf32> to vector<64x32xf32>
    %497 = arith.addf %495, %496 : vector<64x32xf32>
    %498 = arith.negf %497 : vector<64x32xf32>
    %499 = math.exp %498 : vector<64x32xf32>
    %cst_131 = arith.constant 1.000000e+00 : f32
    %500 = vector.broadcast %cst_131 : f32 to vector<64x32xf32>
    %501 = arith.addf %500, %499 : vector<64x32xf32>
    %502 = arith.divf %500, %501 : vector<64x32xf32>
    %503 = vector.extract_strided_slice %466 {offsets = [0, 32], sizes = [64, 32], strides = [1, 1]} : vector<64x128xf32> to vector<64x32xf32>
    %504 = vector.extract_strided_slice %462 {offsets = [0, 160], sizes = [64, 32], strides = [1, 1]} : vector<64x256xf32> to vector<64x32xf32>
    %505 = arith.addf %503, %504 : vector<64x32xf32>
    %506 = arith.negf %505 : vector<64x32xf32>
    %507 = math.exp %506 : vector<64x32xf32>
    %cst_132 = arith.constant 1.000000e+00 : f32
    %508 = vector.broadcast %cst_132 : f32 to vector<64x32xf32>
    %509 = arith.addf %508, %507 : vector<64x32xf32>
    %510 = arith.divf %508, %509 : vector<64x32xf32>
    %511 = vector.extract_strided_slice %466 {offsets = [0, 64], sizes = [64, 32], strides = [1, 1]} : vector<64x128xf32> to vector<64x32xf32>
    %512 = vector.extract_strided_slice %462 {offsets = [0, 192], sizes = [64, 32], strides = [1, 1]} : vector<64x256xf32> to vector<64x32xf32>
    %513 = vector.broadcast %16 : vector<1x32xf32> to vector<64x32xf32>
    %514 = arith.addf %512, %513 : vector<64x32xf32>
    %515 = arith.mulf %502, %514 : vector<64x32xf32>
    %516 = arith.addf %511, %515 : vector<64x32xf32>
    %517 = math.tanh %516 : vector<64x32xf32>
    %cst_133 = arith.constant 1.000000e+00 : f32
    %518 = vector.broadcast %cst_133 : f32 to vector<64x32xf32>
    %519 = arith.subf %518, %510 : vector<64x32xf32>
    %520 = arith.mulf %519, %517 : vector<64x32xf32>
    %521 = arith.mulf %510, %459 : vector<64x32xf32>
    %522 = arith.addf %520, %521 : vector<64x32xf32>
    %523 = tpu.concatenate %53, %522 in 1 : vector<64x32xf32>, vector<64x32xf32> -> vector<64x64xf32>
    %524 = tpu.concatenate %116, %459 in 1 : vector<64x32xf32>, vector<64x32xf32> -> vector<64x64xf32>
    %525 = tpu.concatenate %179, %396 in 1 : vector<64x32xf32>, vector<64x32xf32> -> vector<64x64xf32>
    %526 = tpu.concatenate %242, %333 in 1 : vector<64x32xf32>, vector<64x32xf32> -> vector<64x64xf32>
    %527 = tpu.concatenate %305, %270 in 1 : vector<64x32xf32>, vector<64x32xf32> -> vector<64x64xf32>
    %528 = tpu.concatenate %368, %207 in 1 : vector<64x32xf32>, vector<64x32xf32> -> vector<64x64xf32>
    %529 = tpu.concatenate %431, %144 in 1 : vector<64x32xf32>, vector<64x32xf32> -> vector<64x64xf32>
    %530 = tpu.concatenate %494, %81 in 1 : vector<64x32xf32>, vector<64x32xf32> -> vector<64x64xf32>
    %531 = vector.shape_cast %523 : vector<64x64xf32> to vector<1x64x64xf32>
    %532 = vector.shape_cast %524 : vector<64x64xf32> to vector<1x64x64xf32>
    %533 = vector.shape_cast %525 : vector<64x64xf32> to vector<1x64x64xf32>
    %534 = vector.shape_cast %526 : vector<64x64xf32> to vector<1x64x64xf32>
    %535 = vector.shape_cast %527 : vector<64x64xf32> to vector<1x64x64xf32>
    %536 = vector.shape_cast %528 : vector<64x64xf32> to vector<1x64x64xf32>
    %537 = vector.shape_cast %529 : vector<64x64xf32> to vector<1x64x64xf32>
    %538 = vector.shape_cast %530 : vector<64x64xf32> to vector<1x64x64xf32>
    %539 = tpu.concatenate %531, %532, %533, %534, %535, %536, %537, %538 in 0 : vector<1x64x64xf32>, vector<1x64x64xf32>, vector<1x64x64xf32>, vector<1x64x64xf32>, vector<1x64x64xf32>, vector<1x64x64xf32>, vector<1x64x64xf32>, vector<1x64x64xf32> -> vector<8x64x64xf32>
    %c0_134 = arith.constant 0 : index
    %c0_135 = arith.constant 0 : index
    %540 = vector.load %arg8[%c0_134, %c0_135] : memref<1x64xf32, #tpu.memory_space<vmem>>, vector<1x64xf32>
    %541 = vector.shape_cast %540 : vector<1x64xf32> to vector<1x1x64xf32>
    %542 = vector.broadcast %541 : vector<1x1x64xf32> to vector<8x64x64xf32>
    %543 = arith.mulf %539, %542 : vector<8x64x64xf32>
    %cst_136 = arith.constant dense<0.000000e+00> : vector<8x64xf32>
    %544 = vector.multi_reduction <add>, %543, %cst_136 [2] : vector<8x64x64xf32> to vector<8x64xf32>
    %545 = vector.shape_cast %544 : vector<8x64xf32> to vector<8x64x1xf32>
    %c0_137 = arith.constant 0 : index
    %c0_138 = arith.constant 0 : index
    %c0_139 = arith.constant 0 : index
    %546 = vector.load %arg2[%c0_137, %c0_138, %c0_139] : memref<8x64x1xf32, #tpu.memory_space<vmem>>, vector<8x64x1xf32>
    %cst_140 = arith.constant 0.000000e+00 : f32
    %547 = vector.broadcast %cst_140 : f32 to vector<8x64x1xf32>
    %548 = arith.cmpf ogt, %546, %547 : vector<8x64x1xf32>
    %cst_141 = arith.constant 0xFF800000 : f32
    %549 = vector.broadcast %cst_141 : f32 to vector<8x64x1xf32>
    %550 = arith.select %548, %545, %549 : vector<8x64x1xi1>, vector<8x64x1xf32>
    %cst_142 = arith.constant dense<0xFF800000> : vector<64x1xf32>
    %551 = vector.multi_reduction <maximumf>, %550, %cst_142 [0] : vector<8x64x1xf32> to vector<64x1xf32>
    %552 = vector.shape_cast %551 : vector<64x1xf32> to vector<1x64x1xf32>
    %cst_143 = arith.constant -1.000000e+30 : f32
    %553 = vector.broadcast %cst_143 : f32 to vector<1x64x1xf32>
    %554 = arith.maximumf %552, %553 : vector<1x64x1xf32>
    %555 = vector.broadcast %554 : vector<1x64x1xf32> to vector<8x64x1xf32>
    %556 = arith.subf %550, %555 : vector<8x64x1xf32>
    %557 = math.exp %556 : vector<8x64x1xf32>
    %cst_144 = arith.constant dense<0.000000e+00> : vector<64x1xf32>
    %558 = vector.multi_reduction <add>, %557, %cst_144 [0] : vector<8x64x1xf32> to vector<64x1xf32>
    %559 = vector.shape_cast %558 : vector<64x1xf32> to vector<1x64x1xf32>
    %cst_145 = arith.constant 0.000000e+00 : f32
    %560 = vector.broadcast %cst_145 : f32 to vector<1x64x1xf32>
    %561 = arith.cmpf ogt, %559, %560 : vector<1x64x1xf32>
    %cst_146 = arith.constant 1.000000e+00 : f32
    %562 = vector.broadcast %cst_146 : f32 to vector<1x64x1xf32>
    %563 = arith.select %561, %559, %562 : vector<1x64x1xi1>, vector<1x64x1xf32>
    %564 = tpu.reciprocal %563 {approx = true} : vector<1x64x1xf32> -> vector<1x64x1xf32>
    %565 = vector.broadcast %564 : vector<1x64x1xf32> to vector<8x64x1xf32>
    %566 = arith.mulf %557, %565 : vector<8x64x1xf32>
    %567 = vector.broadcast %566 : vector<8x64x1xf32> to vector<8x64x64xf32>
    %568 = arith.mulf %567, %539 : vector<8x64x64xf32>
    %cst_147 = arith.constant dense<0.000000e+00> : vector<64x64xf32>
    %569 = vector.multi_reduction <add>, %568, %cst_147 [0] : vector<8x64x64xf32> to vector<64x64xf32>
    %cst_148 = arith.constant 0.000000e+00 : f32
    %570 = vector.broadcast %cst_148 : f32 to vector<64x64xf32>
    %571 = tpu.concatenate %569, %570 in 1 : vector<64x64xf32>, vector<64x64xf32> -> vector<64x128xf32>
    %c0_149 = arith.constant 0 : index
    %c0_150 = arith.constant 0 : index
    %572 = vector.load %arg14[%c0_149, %c0_150] : memref<64x128xf32, #tpu.memory_space<vmem>>, vector<64x128xf32>
    tpu.vector_store %arg14[%c0_149, %c0_150], %571 {strides = array<i32>} : memref<64x128xf32, #tpu.memory_space<vmem>>, vector<64x128xf32>,
    %c0_151 = arith.constant 0 : index
    %c0_152 = arith.constant 0 : index
    %573 = vector.load %arg9[%c0_151, %c0_152] : memref<64x128xf32, #tpu.memory_space<vmem>>, vector<64x128xf32>
    %cst_153 = arith.constant dense<0.000000e+00> : vector<64x128xf32>
    %574 = tpu.matmul %569, %573, %cst_153 {dimension_numbers = #tpu.dot_dimension_numbers<[1], [0], [0], [1], [0, 0, 1, 1], [], []>} : vector<64x64xf32>, vector<64x128xf32>, vector<64x128xf32> -> vector<64x128xf32>
    %575 = arith.addf %574, %14 : vector<64x128xf32>
    %cst_154 = arith.constant 0.000000e+00 : f32
    %576 = vector.broadcast %cst_154 : f32 to vector<64x128xf32>
    %577 = arith.maximumf %575, %576 : vector<64x128xf32>
    %c0_155 = arith.constant 0 : index
    %c0_156 = arith.constant 0 : index
    %578 = vector.load %arg12[%c0_155, %c0_156] : memref<128x128xf32, #tpu.memory_space<vmem>>, vector<128x128xf32>
    %cst_157 = arith.constant dense<0.000000e+00> : vector<64x128xf32>
    %579 = tpu.matmul %577, %578, %cst_157 {dimension_numbers = #tpu.dot_dimension_numbers<[1], [0], [0], [1], [0, 0, 1, 1], [], []>} : vector<64x128xf32>, vector<128x128xf32>, vector<64x128xf32> -> vector<64x128xf32>
    %c0_158 = arith.constant 0 : index
    %c0_159 = arith.constant 0 : index
    %580 = vector.load %arg13[%c0_158, %c0_159] : memref<1x128xf32, #tpu.memory_space<vmem>>, vector<1x128xf32>
    %581 = vector.broadcast %580 : vector<1x128xf32> to vector<64x128xf32>
    %582 = arith.addf %579, %581 : vector<64x128xf32>
    %583 = tpu.iota {dimensions = array<i32: 1>} : vector<64x128xi32>
    %c2_i32 = arith.constant 2 : i32
    %584 = vector.broadcast %c2_i32 : i32 to vector<64x128xi32>
    %585 = arith.cmpi eq, %583, %584 : vector<64x128xi32>
    %586 = arith.negf %582 : vector<64x128xf32>
    %587 = math.exp %586 : vector<64x128xf32>
    %cst_160 = arith.constant 1.000000e+00 : f32
    %588 = vector.broadcast %cst_160 : f32 to vector<64x128xf32>
    %589 = arith.addf %588, %587 : vector<64x128xf32>
    %590 = arith.divf %588, %589 : vector<64x128xf32>
    %591 = arith.select %585, %590, %582 : vector<64x128xi1>, vector<64x128xf32>
    %c0_161 = arith.constant 0 : index
    %c0_162 = arith.constant 0 : index
    %592 = vector.load %arg15[%c0_161, %c0_162] : memref<64x128xf32, #tpu.memory_space<vmem>>, vector<64x128xf32>
    tpu.vector_store %arg15[%c0_161, %c0_162], %591 {strides = array<i32>} : memref<64x128xf32, #tpu.memory_space<vmem>>, vector<64x128xf32>,
    return
  }
  func.func @transform_0(%arg0: i32) -> (i32, i32, i32) {
    %c0_i32 = arith.constant 0 : i32
    %c0_i32_0 = arith.constant 0 : i32
    %c0_i32_1 = arith.constant 0 : i32
    return %c0_i32, %arg0, %c0_i32_0 : i32, i32, i32
  }
  func.func @transform_1(%arg0: i32) -> (i32, i32, i32) {
    %c0_i32 = arith.constant 0 : i32
    %c0_i32_0 = arith.constant 0 : i32
    %c0_i32_1 = arith.constant 0 : i32
    return %c0_i32, %arg0, %c0_i32_0 : i32, i32, i32
  }
  func.func @transform_2(%arg0: i32) -> (i32, i32) {
    %c0_i32 = arith.constant 0 : i32
    %c0_i32_0 = arith.constant 0 : i32
    return %arg0, %c0_i32 : i32, i32
  }
  func.func @transform_3(%arg0: i32) -> (i32, i32) {
    %c0_i32 = arith.constant 0 : i32
    %c0_i32_0 = arith.constant 0 : i32
    %c0_i32_1 = arith.constant 0 : i32
    return %c0_i32, %c0_i32_0 : i32, i32
  }
  func.func @transform_4(%arg0: i32) -> (i32, i32) {
    %c0_i32 = arith.constant 0 : i32
    %c0_i32_0 = arith.constant 0 : i32
    %c0_i32_1 = arith.constant 0 : i32
    return %c0_i32, %c0_i32_0 : i32, i32
  }
  func.func @transform_5(%arg0: i32) -> (i32, i32) {
    %c0_i32 = arith.constant 0 : i32
    %c0_i32_0 = arith.constant 0 : i32
    %c0_i32_1 = arith.constant 0 : i32
    return %c0_i32, %c0_i32_0 : i32, i32
  }
  func.func @transform_6(%arg0: i32) -> (i32, i32) {
    %c0_i32 = arith.constant 0 : i32
    %c0_i32_0 = arith.constant 0 : i32
    %c0_i32_1 = arith.constant 0 : i32
    return %c0_i32, %c0_i32_0 : i32, i32
  }
  func.func @transform_7(%arg0: i32) -> (i32, i32) {
    %c0_i32 = arith.constant 0 : i32
    %c0_i32_0 = arith.constant 0 : i32
    %c0_i32_1 = arith.constant 0 : i32
    return %c0_i32, %c0_i32_0 : i32, i32
  }
  func.func @transform_8(%arg0: i32) -> (i32, i32) {
    %c0_i32 = arith.constant 0 : i32
    %c0_i32_0 = arith.constant 0 : i32
    %c0_i32_1 = arith.constant 0 : i32
    return %c0_i32, %c0_i32_0 : i32, i32
  }
  func.func @transform_9(%arg0: i32) -> (i32, i32) {
    %c0_i32 = arith.constant 0 : i32
    %c0_i32_0 = arith.constant 0 : i32
    %c0_i32_1 = arith.constant 0 : i32
    return %c0_i32, %c0_i32_0 : i32, i32
  }
  func.func @transform_10(%arg0: i32) -> (i32, i32) {
    %c0_i32 = arith.constant 0 : i32
    %c0_i32_0 = arith.constant 0 : i32
    %c0_i32_1 = arith.constant 0 : i32
    return %c0_i32, %c0_i32_0 : i32, i32
  }
  func.func @transform_11(%arg0: i32) -> (i32, i32) {
    %c0_i32 = arith.constant 0 : i32
    %c0_i32_0 = arith.constant 0 : i32
    %c0_i32_1 = arith.constant 0 : i32
    return %c0_i32, %c0_i32_0 : i32, i32
  }
  func.func @transform_12(%arg0: i32) -> (i32, i32) {
    %c0_i32 = arith.constant 0 : i32
    %c0_i32_0 = arith.constant 0 : i32
    %c0_i32_1 = arith.constant 0 : i32
    return %c0_i32, %c0_i32_0 : i32, i32
  }
  func.func @transform_13(%arg0: i32) -> (i32, i32) {
    %c0_i32 = arith.constant 0 : i32
    %c0_i32_0 = arith.constant 0 : i32
    return %arg0, %c0_i32 : i32, i32
  }
  func.func @transform_14(%arg0: i32) -> (i32, i32) {
    %c0_i32 = arith.constant 0 : i32
    %c0_i32_0 = arith.constant 0 : i32
    return %arg0, %c0_i32 : i32, i32
  }
}

</mosaic_0001>

<bundles_post_ra>
// kernel: dual_emotion_forward.1
= control target key start
LH: loop header
LB: loop body
LE: loop exit
PB: predicated region body
PF: predicated region fallthrough
CT: control target
= control target key end

     0   :  { %s17172_s0 = inlined_call_operand.vmem [shape: f32[8,128,32], index: 0, kind: input, shape index: {}]   ;;  %s17173_s1 = inlined_call_operand.vmem [shape: f32[8,128,1], index: 1, kind: input, shape index: {}]   ;;  %s17174_s2 = inlined_call_operand.vmem [shape: f32[128,256], index: 2, kind: input, shape index: {}]   ;;  %s17175_s3 = inlined_call_operand.vmem [shape: f32[32,256], index: 3, kind: input, shape index: {}]   ;;  %s17176_s4 = inlined_call_operand.vmem [shape: f32[1,256], index: 4, kind: input, shape index: {}]   ;;  %s17177_s5 = inlined_call_operand.vmem [shape: f32[64,256], index: 5, kind: input, shape index: {}]   ;;  %s17178_s6 = inlined_call_operand.vmem [shape: f32[2,32], index: 6, kind: input, shape index: {}]   ;;  %s17179_s7 = inlined_call_operand.vmem [shape: f32[1,64], index: 7, kind: input, shape index: {}]   ;;  %s17180_s8 = inlined_call_operand.vmem [shape: f32[64,128], index: 8, kind: input, shape index: {}]   ;;  %s17181_s9 = inlined_call_operand.vmem [shape: f32[256,128], index: 9, kind: input, shape index: {}]   ;;  %s17182_s10 = inlined_call_operand.vmem [shape: f32[1,128], index: 10, kind: input, shape index: {}]   ;;  %s17183_s11 = inlined_call_operand.vmem [shape: f32[128,128], index: 11, kind: input, shape index: {}]   ;;  %s17184_s12 = inlined_call_operand.vmem [shape: f32[1,128], index: 12, kind: input, shape index: {}]   ;;  %s17185_s13 = inlined_call_operand.vmem [shape: f32[128,128], index: 13, kind: output, shape index: {0}]   ;;  %s17186_s14 = inlined_call_operand.vmem [shape: f32[128,128], index: 14, kind: output, shape index: {1}]  }
   0x1   :  { %17411 = sst [smem:[#allocation145_spill]] %s17172_s0 }
   0x2   :  { %s10922_s29 = smov 0   ;;  %s10924_s30 = smov 0  }
   0x3   :  { %s10926_s15 = smov 0  }
   0x4 LB: > { %s10939_s17 = sadd.s32 1, %s10841_s15   ;;  %s32_s19 = sadd.s32 1, %s10837_s30  ;;  %s10841_s15 = sphi %s10926_s15, %s18196_s15   ;;  %s10837_s30 = sphi %s10924_s30, %s18195_s30   ;;  %s10833_s29 = sphi %s10922_s29, %s18194_s29  }
   0x5   : > { %s29_s18 = ssub.s32 %s10841_s15, %s10939_s17  ;;  %p39_p1 = scmp.ne.s32.totalorder %s10837_s30, %s10833_s29 }
   0x6   : > { %p30_p0 = scmp.eq.s32.totalorder %s29_s18, 0  ;;  %p40_p2 = scmp.eq.s32.totalorder %s10841_s15, 0 }
   0x7   : > { %p9168_p4 = scmp.ge.s32.totalorder %s10841_s15, 2 }
   0x8   : > { %s10948_s20 = scalar_select %p30_p0, %s10837_s30, %s32_s19  }
   0x9   : > { %p10950_p3 = por %p40_p2, %p39_p1  ;;  %409 = sbr.rel (%p9168_p4) target bundleno = 94 (0x5e), region = 56 }
  0x10   : > { %412 = sbr.rel (!%p10950_p3) target bundleno = 58 (0x3a), region = 60  ;;  %s414_s22 = sand.u32 (%p10950_p3), 1, %s10837_s30  }
  0x11   : > { %s9456_s23 = sshll.u32 (%p10950_p3), %s10841_s15, 6  ;;  %s9169_s24 = sshll.u32 (%p10950_p3), %s414_s22, 9 }
  0x12   : > { %s17413_s0 = sld [smem:[#allocation145_spill]] (%p10950_p3)  ;;  %s10967_s28 = scalar_lea.vmem (%p10950_p3), [#allocation3], %s9169_s24 }
  0x18   : > { %s10962_s27 = scalar_lea.vmem %s17413_s0, %s9456_s23 }
  0x19   : > { %v573_v0 = vld [vmem:[%s10962_s27] sm:$0xff]  ;;  %v575_v1 = vld [vmem:[%s10962_s27 + $0x8] sm:$0xff]  ;;  %v577_v2 = vld [vmem:[%s10962_s27 + $0x10] sm:$0xff] }
  0x1a   : > { %574 = vst [vmem:[%s10967_s28] sm:$0xff] %v573_v0  ;;  %576 = vst [vmem:[%s10967_s28 + $0x8] sm:$0xff] %v575_v1  ;;  %v579_v3 = vld [vmem:[%s10962_s27 + $0x18] sm:$0xff]  ;;  %v581_v4 = vld [vmem:[%s10962_s27 + $0x20] sm:$0xff] }
  0x1b   : > { %578 = vst [vmem:[%s10967_s28 + $0x10] sm:$0xff] %v577_v2  ;;  %v583_v5 = vld [vmem:[%s10962_s27 + $0x28] sm:$0xff]  ;;  %580 = vst [vmem:[%s10967_s28 + $0x18] sm:$0xff] %v579_v3  ;;  %v585_v6 = vld [vmem:[%s10962_s27 + $0x30] sm:$0xff] }
  0x1c   : > { %582 = vst [vmem:[%s10967_s28 + $0x20] sm:$0xff] %v581_v4  ;;  %584 = vst [vmem:[%s10967_s28 + $0x28] sm:$0xff] %v583_v5  ;;  %v587_v7 = vld [vmem:[%s10962_s27 + $0x38] sm:$0xff]  ;;  %v589_v8 = vld [vmem:[%s10962_s27 + $0x80] sm:$0xff] }
  0x1d   : > { %586 = vst [vmem:[%s10967_s28 + $0x30] sm:$0xff] %v585_v6  ;;  %588 = vst [vmem:[%s10967_s28 + $0x38] sm:$0xff] %v587_v7  ;;  %v591_v9 = vld [vmem:[%s10962_s27 + $0x88] sm:$0xff]  ;;  %v593_v10 = vld [vmem:[%s10962_s27 + $0x90] sm:$0xff] }
  0x1e   : > { %590 = vst [vmem:[%s10967_s28 + $0x40] sm:$0xff] %v589_v8  ;;  %v595_v11 = vld [vmem:[%s10962_s27 + $0x98] sm:$0xff]  ;;  %592 = vst [vmem:[%s10967_s28 + $0x48] sm:$0xff] %v591_v9  ;;  %v597_v12 = vld [vmem:[%s10962_s27 + $0xa0] sm:$0xff] }
  0x1f   : > { %594 = vst [vmem:[%s10967_s28 + $0x50] sm:$0xff] %v593_v10  ;;  %596 = vst [vmem:[%s10967_s28 + $0x58] sm:$0xff] %v595_v11  ;;  %v599_v13 = vld [vmem:[%s10962_s27 + $0xa8] sm:$0xff]  ;;  %v601_v14 = vld [vmem:[%s10962_s27 + $0xb0] sm:$0xff] }
  0x20   : > { %598 = vst [vmem:[%s10967_s28 + $0x60] sm:$0xff] %v597_v12  ;;  %600 = vst [vmem:[%s10967_s28 + $0x68] sm:$0xff] %v599_v13  ;;  %v603_v15 = vld [vmem:[%s10962_s27 + $0xb8] sm:$0xff]  ;;  %v605_v16 = vld [vmem:[%s10962_s27 + $0x100] sm:$0xff] }
  0x21   : > { %602 = vst [vmem:[%s10967_s28 + $0x70] sm:$0xff] %v601_v14  ;;  %v607_v17 = vld [vmem:[%s10962_s27 + $0x108] sm:$0xff]  ;;  %604 = vst [vmem:[%s10967_s28 + $0x78] sm:$0xff] %v603_v15  ;;  %v609_v18 = vld [vmem:[%s10962_s27 + $0x110] sm:$0xff] }
  0x22   : > { %606 = vst [vmem:[%s10967_s28 + $0x80] sm:$0xff] %v605_v16  ;;  %608 = vst [vmem:[%s10967_s28 + $0x88] sm:$0xff] %v607_v17  ;;  %v611_v19 = vld [vmem:[%s10962_s27 + $0x118] sm:$0xff]  ;;  %v613_v20 = vld [vmem:[%s10962_s27 + $0x120] sm:$0xff] }
  0x23   : > { %610 = vst [vmem:[%s10967_s28 + $0x90] sm:$0xff] %v609_v18  ;;  %612 = vst [vmem:[%s10967_s28 + $0x98] sm:$0xff] %v611_v19  ;;  %v615_v21 = vld [vmem:[%s10962_s27 + $0x128] sm:$0xff]  ;;  %v617_v22 = vld [vmem:[%s10962_s27 + $0x130] sm:$0xff] }
  0x24   : > { %614 = vst [vmem:[%s10967_s28 + $0xa0] sm:$0xff] %v613_v20  ;;  %v619_v23 = vld [vmem:[%s10962_s27 + $0x138] sm:$0xff]  ;;  %616 = vst [vmem:[%s10967_s28 + $0xa8] sm:$0xff] %v615_v21  ;;  %v621_v24 = vld [vmem:[%s10962_s27 + $0x180] sm:$0xff] }
  0x25   : > { %618 = vst [vmem:[%s10967_s28 + $0xb0] sm:$0xff] %v617_v22  ;;  %620 = vst [vmem:[%s10967_s28 + $0xb8] sm:$0xff] %v619_v23  ;;  %v623_v25 = vld [vmem:[%s10962_s27 + $0x188] sm:$0xff]  ;;  %v625_v26 = vld [vmem:[%s10962_s27 + $0x190] sm:$0xff] }
  0x26   : > { %622 = vst [vmem:[%s10967_s28 + $0xc0] sm:$0xff] %v621_v24  ;;  %624 = vst [vmem:[%s10967_s28 + $0xc8] sm:$0xff] %v623_v25  ;;  %v627_v27 = vld [vmem:[%s10962_s27 + $0x198] sm:$0xff]  ;;  %v629_v28 = vld [vmem:[%s10962_s27 + $0x1a0] sm:$0xff] }
  0x27   : > { %626 = vst [vmem:[%s10967_s28 + $0xd0] sm:$0xff] %v625_v26  ;;  %v631_v29 = vld [vmem:[%s10962_s27 + $0x1a8] sm:$0xff]  ;;  %628 = vst [vmem:[%s10967_s28 + $0xd8] sm:$0xff] %v627_v27  ;;  %v633_v30 = vld [vmem:[%s10962_s27 + $0x1b0] sm:$0xff] }
  0x28   : > { %630 = vst [vmem:[%s10967_s28 + $0xe0] sm:$0xff] %v629_v28  ;;  %632 = vst [vmem:[%s10967_s28 + $0xe8] sm:$0xff] %v631_v29  ;;  %v635_v31 = vld [vmem:[%s10962_s27 + $0x1b8] sm:$0xff]  ;;  %v637_v32 = vld [vmem:[%s10962_s27 + $0x200] sm:$0xff] }
  0x29   : > { %634 = vst [vmem:[%s10967_s28 + $0xf0] sm:$0xff] %v633_v30  ;;  %636 = vst [vmem:[%s10967_s28 + $0xf8] sm:$0xff] %v635_v31  ;;  %v639_v33 = vld [vmem:[%s10962_s27 + $0x208] sm:$0xff]  ;;  %v641_v34 = vld [vmem:[%s10962_s27 + $0x210] sm:$0xff] }
  0x2a   : > { %638 = vst [vmem:[%s10967_s28 + $0x100] sm:$0xff] %v637_v32  ;;  %v643_v35 = vld [vmem:[%s10962_s27 + $0x218] sm:$0xff]  ;;  %640 = vst [vmem:[%s10967_s28 + $0x108] sm:$0xff] %v639_v33  ;;  %v645_v36 = vld [vmem:[%s10962_s27 + $0x220] sm:$0xff] }
  0x2b   : > { %642 = vst [vmem:[%s10967_s28 + $0x110] sm:$0xff] %v641_v34  ;;  %644 = vst [vmem:[%s10967_s28 + $0x118] sm:$0xff] %v643_v35  ;;  %v647_v37 = vld [vmem:[%s10962_s27 + $0x228] sm:$0xff]  ;;  %v649_v38 = vld [vmem:[%s10962_s27 + $0x230] sm:$0xff] }
  0x2c   : > { %646 = vst [vmem:[%s10967_s28 + $0x120] sm:$0xff] %v645_v36  ;;  %648 = vst [vmem:[%s10967_s28 + $0x128] sm:$0xff] %v647_v37  ;;  %v651_v39 = vld [vmem:[%s10962_s27 + $0x238] sm:$0xff]  ;;  %v653_v40 = vld [vmem:[%s10962_s27 + $0x280] sm:$0xff] }
  0x2d   : > { %650 = vst [vmem:[%s10967_s28 + $0x130] sm:$0xff] %v649_v38  ;;  %v655_v41 = vld [vmem:[%s10962_s27 + $0x288] sm:$0xff]  ;;  %652 = vst [vmem:[%s10967_s28 + $0x138] sm:$0xff] %v651_v39  ;;  %v657_v42 = vld [vmem:[%s10962_s27 + $0x290] sm:$0xff] }
  0x2e   : > { %654 = vst [vmem:[%s10967_s28 + $0x140] sm:$0xff] %v653_v40  ;;  %656 = vst [vmem:[%s10967_s28 + $0x148] sm:$0xff] %v655_v41  ;;  %v659_v43 = vld [vmem:[%s10962_s27 + $0x298] sm:$0xff]  ;;  %v661_v44 = vld [vmem:[%s10962_s27 + $0x2a0] sm:$0xff] }
  0x2f   : > { %658 = vst [vmem:[%s10967_s28 + $0x150] sm:$0xff] %v657_v42  ;;  %660 = vst [vmem:[%s10967_s28 + $0x158] sm:$0xff] %v659_v43  ;;  %v663_v45 = vld [vmem:[%s10962_s27 + $0x2a8] sm:$0xff]  ;;  %v665_v46 = vld [vmem:[%s10962_s27 + $0x2b0] sm:$0xff] }
  0x30   : > { %662 = vst [vmem:[%s10967_s28 + $0x160] sm:$0xff] %v661_v44  ;;  %v667_v47 = vld [vmem:[%s10962_s27 + $0x2b8] sm:$0xff]  ;;  %664 = vst [vmem:[%s10967_s28 + $0x168] sm:$0xff] %v663_v45  ;;  %v669_v48 = vld [vmem:[%s10962_s27 + $0x300] sm:$0xff] }
  0x31   : > { %666 = vst [vmem:[%s10967_s28 + $0x170] sm:$0xff] %v665_v46  ;;  %668 = vst [vmem:[%s10967_s28 + $0x178] sm:$0xff] %v667_v47  ;;  %v671_v49 = vld [vmem:[%s10962_s27 + $0x308] sm:$0xff]  ;;  %v673_v50 = vld [vmem:[%s10962_s27 + $0x310] sm:$0xff] }
  0x32   : > { %670 = vst [vmem:[%s10967_s28 + $0x180] sm:$0xff] %v669_v48  ;;  %672 = vst [vmem:[%s10967_s28 + $0x188] sm:$0xff] %v671_v49  ;;  %v675_v51 = vld [vmem:[%s10962_s27 + $0x318] sm:$0xff]  ;;  %v677_v52 = vld [vmem:[%s10962_s27 + $0x320] sm:$0xff] }
  0x33   : > { %674 = vst [vmem:[%s10967_s28 + $0x190] sm:$0xff] %v673_v50  ;;  %v679_v53 = vld [vmem:[%s10962_s27 + $0x328] sm:$0xff]  ;;  %676 = vst [vmem:[%s10967_s28 + $0x198] sm:$0xff] %v675_v51  ;;  %v681_v54 = vld [vmem:[%s10962_s27 + $0x330] sm:$0xff] }
  0x34   : > { %678 = vst [vmem:[%s10967_s28 + $0x1a0] sm:$0xff] %v677_v52  ;;  %680 = vst [vmem:[%s10967_s28 + $0x1a8] sm:$0xff] %v679_v53  ;;  %v683_v55 = vld [vmem:[%s10962_s27 + $0x338] sm:$0xff]  ;;  %v685_v56 = vld [vmem:[%s10962_s27 + $0x380] sm:$0xff] }
  0x35   : > { %682 = vst [vmem:[%s10967_s28 + $0x1b0] sm:$0xff] %v681_v54  ;;  %684 = vst [vmem:[%s10967_s28 + $0x1b8] sm:$0xff] %v683_v55  ;;  %v687_v57 = vld [vmem:[%s10962_s27 + $0x388] sm:$0xff]  ;;  %v689_v58 = vld [vmem:[%s10962_s27 + $0x390] sm:$0xff] }
  0x36   : > { %686 = vst [vmem:[%s10967_s28 + $0x1c0] sm:$0xff] %v685_v56  ;;  %v691_v59 = vld [vmem:[%s10962_s27 + $0x398] sm:$0xff]  ;;  %688 = vst [vmem:[%s10967_s28 + $0x1c8] sm:$0xff] %v687_v57  ;;  %v693_v60 = vld [vmem:[%s10962_s27 + $0x3a0] sm:$0xff] }
  0x37   : > { %690 = vst [vmem:[%s10967_s28 + $0x1d0] sm:$0xff] %v689_v58  ;;  %692 = vst [vmem:[%s10967_s28 + $0x1d8] sm:$0xff] %v691_v59  ;;  %v695_v61 = vld [vmem:[%s10962_s27 + $0x3a8] sm:$0xff]  ;;  %v697_v62 = vld [vmem:[%s10962_s27 + $0x3b0] sm:$0xff] }
  0x38   : > { %694 = vst [vmem:[%s10967_s28 + $0x1e0] sm:$0xff] %v693_v60  ;;  %696 = vst [vmem:[%s10967_s28 + $0x1e8] sm:$0xff] %v695_v61  ;;  %v699_v63 = vld [vmem:[%s10962_s27 + $0x3b8] sm:$0xff] }
  0x39   : > { %698 = vst [vmem:[%s10967_s28 + $0x1f0] sm:$0xff] %v697_v62  ;;  %700 = vst [vmem:[%s10967_s28 + $0x1f8] sm:$0xff] %v699_v63 }
  0x3a PF: > { %706 = sbr.rel (!%p10950_p3) target bundleno = 94 (0x5e), region = 98  ;;  %s708_s18 = sand.u32 (%p10950_p3), 1, %s10837_s30  }
  0x3b   : > { %s9457_s19 = sshll.u32 (%p10950_p3), %s10841_s15, 6  ;;  %s9172_s22 = sshll.u32 (%p10950_p3), %s708_s18, 9 }
  0x3c   : > { %s11101_s25 = scalar_lea.vmem (%p10950_p3), %s17173_s1, %s9457_s19  ;;  %s11106_s21 = scalar_lea.vmem (%p10950_p3), [#allocation4], %s9172_s22 }
  0x3d   : > { %v867_v0 = vld [vmem:[%s11101_s25] sm:$0xff] (%p10950_p3)  ;;  %v869_v1 = vld [vmem:[%s11101_s25 + $0x8] sm:$0xff] (%p10950_p3)  ;;  %v871_v2 = vld [vmem:[%s11101_s25 + $0x10] sm:$0xff] (%p10950_p3) }
  0x3e   : > { %868 = vst [vmem:[%s11106_s21] sm:$0xff] (%p10950_p3), %v867_v0  ;;  %870 = vst [vmem:[%s11106_s21 + $0x8] sm:$0xff] (%p10950_p3), %v869_v1  ;;  %v873_v3 = vld [vmem:[%s11101_s25 + $0x18] sm:$0xff] (%p10950_p3)  ;;  %v875_v4 = vld [vmem:[%s11101_s25 + $0x20] sm:$0xff] (%p10950_p3) }
  0x3f   : > { %872 = vst [vmem:[%s11106_s21 + $0x10] sm:$0xff] (%p10950_p3), %v871_v2  ;;  %v877_v5 = vld [vmem:[%s11101_s25 + $0x28] sm:$0xff] (%p10950_p3)  ;;  %874 = vst [vmem:[%s11106_s21 + $0x18] sm:$0xff] (%p10950_p3), %v873_v3  ;;  %v879_v6 = vld [vmem:[%s11101_s25 + $0x30] sm:$0xff] (%p10950_p3) }
  0x40   : > { %876 = vst [vmem:[%s11106_s21 + $0x20] sm:$0xff] (%p10950_p3), %v875_v4  ;;  %878 = vst [vmem:[%s11106_s21 + $0x28] sm:$0xff] (%p10950_p3), %v877_v5  ;;  %v881_v7 = vld [vmem:[%s11101_s25 + $0x38] sm:$0xff] (%p10950_p3)  ;;  %v883_v8 = vld [vmem:[%s11101_s25 + $0x80] sm:$0xff] (%p10950_p3) }
  0x41   : > { %880 = vst [vmem:[%s11106_s21 + $0x30] sm:$0xff] %v879_v6  ;;  %882 = vst [vmem:[%s11106_s21 + $0x38] sm:$0xff] %v881_v7  ;;  %v885_v9 = vld [vmem:[%s11101_s25 + $0x88] sm:$0xff]  ;;  %v887_v10 = vld [vmem:[%s11101_s25 + $0x90] sm:$0xff] }
  0x42   : > { %884 = vst [vmem:[%s11106_s21 + $0x40] sm:$0xff] %v883_v8  ;;  %v889_v11 = vld [vmem:[%s11101_s25 + $0x98] sm:$0xff]  ;;  %886 = vst [vmem:[%s11106_s21 + $0x48] sm:$0xff] %v885_v9  ;;  %v891_v12 = vld [vmem:[%s11101_s25 + $0xa0] sm:$0xff] }
  0x43   : > { %888 = vst [vmem:[%s11106_s21 + $0x50] sm:$0xff] %v887_v10  ;;  %890 = vst [vmem:[%s11106_s21 + $0x58] sm:$0xff] %v889_v11  ;;  %v893_v13 = vld [vmem:[%s11101_s25 + $0xa8] sm:$0xff]  ;;  %v895_v14 = vld [vmem:[%s11101_s25 + $0xb0] sm:$0xff] }
  0x44   : > { %892 = vst [vmem:[%s11106_s21 + $0x60] sm:$0xff] %v891_v12  ;;  %894 = vst [vmem:[%s11106_s21 + $0x68] sm:$0xff] %v893_v13  ;;  %v897_v15 = vld [vmem:[%s11101_s25 + $0xb8] sm:$0xff]  ;;  %v899_v16 = vld [vmem:[%s11101_s25 + $0x100] sm:$0xff] }
  0x45   : > { %896 = vst [vmem:[%s11106_s21 + $0x70] sm:$0xff] %v895_v14  ;;  %v901_v17 = vld [vmem:[%s11101_s25 + $0x108] sm:$0xff]  ;;  %898 = vst [vmem:[%s11106_s21 + $0x78] sm:$0xff] %v897_v15  ;;  %v903_v18 = vld [vmem:[%s11101_s25 + $0x110] sm:$0xff] }
  0x46   : > { %900 = vst [vmem:[%s11106_s21 + $0x80] sm:$0xff] %v899_v16  ;;  %902 = vst [vmem:[%s11106_s21 + $0x88] sm:$0xff] %v901_v17  ;;  %v905_v19 = vld [vmem:[%s11101_s25 + $0x118] sm:$0xff]  ;;  %v907_v20 = vld [vmem:[%s11101_s25 + $0x120] sm:$0xff] }
  0x47   : > { %904 = vst [vmem:[%s11106_s21 + $0x90] sm:$0xff] %v903_v18  ;;  %906 = vst [vmem:[%s11106_s21 + $0x98] sm:$0xff] %v905_v19  ;;  %v909_v21 = vld [vmem:[%s11101_s25 + $0x128] sm:$0xff]  ;;  %v911_v22 = vld [vmem:[%s11101_s25 + $0x130] sm:$0xff] }
  0x48   : > { %908 = vst [vmem:[%s11106_s21 + $0xa0] sm:$0xff] %v907_v20  ;;  %v913_v23 = vld [vmem:[%s11101_s25 + $0x138] sm:$0xff]  ;;  %910 = vst [vmem:[%s11106_s21 + $0xa8] sm:$0xff] %v909_v21  ;;  %v915_v24 = vld [vmem:[%s11101_s25 + $0x180] sm:$0xff] }
  0x49   : > { %912 = vst [vmem:[%s11106_s21 + $0xb0] sm:$0xff] %v911_v22  ;;  %914 = vst [vmem:[%s11106_s21 + $0xb8] sm:$0xff] %v913_v23  ;;  %v917_v25 = vld [vmem:[%s11101_s25 + $0x188] sm:$0xff]  ;;  %v919_v26 = vld [vmem:[%s11101_s25 + $0x190] sm:$0xff] }
  0x4a   : > { %916 = vst [vmem:[%s11106_s21 + $0xc0] sm:$0xff] %v915_v24  ;;  %918 = vst [vmem:[%s11106_s21 + $0xc8] sm:$0xff] %v917_v25  ;;  %v921_v27 = vld [vmem:[%s11101_s25 + $0x198] sm:$0xff]  ;;  %v923_v28 = vld [vmem:[%s11101_s25 + $0x1a0] sm:$0xff] }
  0x4b   : > { %920 = vst [vmem:[%s11106_s21 + $0xd0] sm:$0xff] %v919_v26  ;;  %v925_v29 = vld [vmem:[%s11101_s25 + $0x1a8] sm:$0xff]  ;;  %922 = vst [vmem:[%s11106_s21 + $0xd8] sm:$0xff] %v921_v27  ;;  %v927_v30 = vld [vmem:[%s11101_s25 + $0x1b0] sm:$0xff] }
  0x4c   : > { %924 = vst [vmem:[%s11106_s21 + $0xe0] sm:$0xff] %v923_v28  ;;  %926 = vst [vmem:[%s11106_s21 + $0xe8] sm:$0xff] %v925_v29  ;;  %v929_v31 = vld [vmem:[%s11101_s25 + $0x1b8] sm:$0xff]  ;;  %v931_v32 = vld [vmem:[%s11101_s25 + $0x200] sm:$0xff] }
  0x4d   : > { %928 = vst [vmem:[%s11106_s21 + $0xf0] sm:$0xff] %v927_v30  ;;  %930 = vst [vmem:[%s11106_s21 + $0xf8] sm:$0xff] %v929_v31  ;;  %v933_v33 = vld [vmem:[%s11101_s25 + $0x208] sm:$0xff]  ;;  %v935_v34 = vld [vmem:[%s11101_s25 + $0x210] sm:$0xff] }
  0x4e   : > { %932 = vst [vmem:[%s11106_s21 + $0x100] sm:$0xff] %v931_v32  ;;  %v937_v35 = vld [vmem:[%s11101_s25 + $0x218] sm:$0xff]  ;;  %934 = vst [vmem:[%s11106_s21 + $0x108] sm:$0xff] %v933_v33  ;;  %v939_v36 = vld [vmem:[%s11101_s25 + $0x220] sm:$0xff] }
  0x4f   : > { %936 = vst [vmem:[%s11106_s21 + $0x110] sm:$0xff] %v935_v34  ;;  %938 = vst [vmem:[%s11106_s21 + $0x118] sm:$0xff] %v937_v35  ;;  %v941_v37 = vld [vmem:[%s11101_s25 + $0x228] sm:$0xff]  ;;  %v943_v38 = vld [vmem:[%s11101_s25 + $0x230] sm:$0xff] }
  0x50   : > { %940 = vst [vmem:[%s11106_s21 + $0x120] sm:$0xff] %v939_v36  ;;  %942 = vst [vmem:[%s11106_s21 + $0x128] sm:$0xff] %v941_v37  ;;  %v945_v39 = vld [vmem:[%s11101_s25 + $0x238] sm:$0xff]  ;;  %v947_v40 = vld [vmem:[%s11101_s25 + $0x280] sm:$0xff] }
  0x51   : > { %944 = vst [vmem:[%s11106_s21 + $0x130] sm:$0xff] %v943_v38  ;;  %v949_v41 = vld [vmem:[%s11101_s25 + $0x288] sm:$0xff]  ;;  %946 = vst [vmem:[%s11106_s21 + $0x138] sm:$0xff] %v945_v39  ;;  %v951_v42 = vld [vmem:[%s11101_s25 + $0x290] sm:$0xff] }
  0x52   : > { %948 = vst [vmem:[%s11106_s21 + $0x140] sm:$0xff] %v947_v40  ;;  %950 = vst [vmem:[%s11106_s21 + $0x148] sm:$0xff] %v949_v41  ;;  %v953_v43 = vld [vmem:[%s11101_s25 + $0x298] sm:$0xff]  ;;  %v955_v44 = vld [vmem:[%s11101_s25 + $0x2a0] sm:$0xff] }
  0x53   : > { %952 = vst [vmem:[%s11106_s21 + $0x150] sm:$0xff] %v951_v42  ;;  %954 = vst [vmem:[%s11106_s21 + $0x158] sm:$0xff] %v953_v43  ;;  %v957_v45 = vld [vmem:[%s11101_s25 + $0x2a8] sm:$0xff]  ;;  %v959_v46 = vld [vmem:[%s11101_s25 + $0x2b0] sm:$0xff] }
  0x54   : > { %956 = vst [vmem:[%s11106_s21 + $0x160] sm:$0xff] %v955_v44  ;;  %v961_v47 = vld [vmem:[%s11101_s25 + $0x2b8] sm:$0xff]  ;;  %958 = vst [vmem:[%s11106_s21 + $0x168] sm:$0xff] %v957_v45  ;;  %v963_v48 = vld [vmem:[%s11101_s25 + $0x300] sm:$0xff] }
  0x55   : > { %960 = vst [vmem:[%s11106_s21 + $0x170] sm:$0xff] %v959_v46  ;;  %962 = vst [vmem:[%s11106_s21 + $0x178] sm:$0xff] %v961_v47  ;;  %v965_v49 = vld [vmem:[%s11101_s25 + $0x308] sm:$0xff]  ;;  %v967_v50 = vld [vmem:[%s11101_s25 + $0x310] sm:$0xff] }
  0x56   : > { %964 = vst [vmem:[%s11106_s21 + $0x180] sm:$0xff] %v963_v48  ;;  %966 = vst [vmem:[%s11106_s21 + $0x188] sm:$0xff] %v965_v49  ;;  %v969_v51 = vld [vmem:[%s11101_s25 + $0x318] sm:$0xff]  ;;  %v971_v52 = vld [vmem:[%s11101_s25 + $0x320] sm:$0xff] }
  0x57   : > { %968 = vst [vmem:[%s11106_s21 + $0x190] sm:$0xff] %v967_v50  ;;  %v973_v53 = vld [vmem:[%s11101_s25 + $0x328] sm:$0xff]  ;;  %970 = vst [vmem:[%s11106_s21 + $0x198] sm:$0xff] %v969_v51  ;;  %v975_v54 = vld [vmem:[%s11101_s25 + $0x330] sm:$0xff] }
  0x58   : > { %972 = vst [vmem:[%s11106_s21 + $0x1a0] sm:$0xff] %v971_v52  ;;  %974 = vst [vmem:[%s11106_s21 + $0x1a8] sm:$0xff] %v973_v53  ;;  %v977_v55 = vld [vmem:[%s11101_s25 + $0x338] sm:$0xff]  ;;  %v979_v56 = vld [vmem:[%s11101_s25 + $0x380] sm:$0xff] }
  0x59   : > { %976 = vst [vmem:[%s11106_s21 + $0x1b0] sm:$0xff] %v975_v54  ;;  %978 = vst [vmem:[%s11106_s21 + $0x1b8] sm:$0xff] %v977_v55  ;;  %v981_v57 = vld [vmem:[%s11101_s25 + $0x388] sm:$0xff]  ;;  %v983_v58 = vld [vmem:[%s11101_s25 + $0x390] sm:$0xff] }
  0x5a   : > { %980 = vst [vmem:[%s11106_s21 + $0x1c0] sm:$0xff] %v979_v56  ;;  %v985_v59 = vld [vmem:[%s11101_s25 + $0x398] sm:$0xff]  ;;  %982 = vst [vmem:[%s11106_s21 + $0x1c8] sm:$0xff] %v981_v57  ;;  %v987_v60 = vld [vmem:[%s11101_s25 + $0x3a0] sm:$0xff] }
  0x5b   : > { %984 = vst [vmem:[%s11106_s21 + $0x1d0] sm:$0xff] %v983_v58  ;;  %986 = vst [vmem:[%s11106_s21 + $0x1d8] sm:$0xff] %v985_v59  ;;  %v989_v61 = vld [vmem:[%s11101_s25 + $0x3a8] sm:$0xff]  ;;  %v991_v62 = vld [vmem:[%s11101_s25 + $0x3b0] sm:$0xff] }
  0x5c   : > { %988 = vst [vmem:[%s11106_s21 + $0x1e0] sm:$0xff] %v987_v60  ;;  %990 = vst [vmem:[%s11106_s21 + $0x1e8] sm:$0xff] %v989_v61  ;;  %v993_v63 = vld [vmem:[%s11101_s25 + $0x3b8] sm:$0xff] }
  0x5d   : > { %992 = vst [vmem:[%s11106_s21 + $0x1f0] sm:$0xff] %v991_v62  ;;  %994 = vst [vmem:[%s11106_s21 + $0x1f8] sm:$0xff] %v993_v63 }
  0x5e PF: > { %p9175_p5 = scmp.ge.s32.totalorder %s10841_s15, 1  ;;  %p1009_p6 = scmp.lt.s32.totalorder %s10841_s15, 3 }
  0x60   : > { %p1010_p7 = pnand %p9175_p5, %p1009_p6 }
  0x62   : > { %1013 = sbr.rel (%p1010_p7) target bundleno = 6741 (0x1a55), region = 140 }
  0x69   : > { %v1169_v0 = vld [vmem:[%s17175_s3 + $0x8] sm:$0xff]  ;;  %v1171_v1 = vld [vmem:[%s17175_s3 + $0x18] sm:$0xff]  ;;  %v1990_v2 = vld [vmem:[%s17181_s9 + $0x80] sm:$0xff]  ;;  %s1016_s23 = sand.u32 1, %s10833_s29   ;;  %v17188_v7 = vmov 0.0   ;;  %s17414_s18 = sadd.s32 4294967295, %s10841_s15  }
  0x6a   : > { %v9627_v3 = vpack.c.bf16 %v1171_v1, %v1169_v0  ;;  %v1991_v4 = vld [vmem:[%s17181_s9 + $0x88] sm:$0xff]  ;;  %v1168_v5 = vld [vmem:[%s17175_s3] sm:$0xff]  ;;  %v1170_v6 = vld [vmem:[%s17175_s3 + $0x10] sm:$0xff]  ;;  %1445 = vmatprep.mubr.f32.mxu0 %v17188_v7  ;;  %s11255_s28 = sshll.u32 %s1016_s23, 9  ;;  %s9178_s29 = sshll.u32 %s17414_s18, 3  ;;  %vm1188_vm0 = vcmask 261120  }
  0x6b   : > { %v9635_v8 = vpack.c.bf16 %v1991_v4, %v1990_v2  ;;  %v9629_v9 = vpack.c.bf16 %v1170_v6, %v1168_v5  ;;  %v1974_v10 = vld [vmem:[%s17181_s9] sm:$0xff]  ;;  %v1975_v11 = vld [vmem:[%s17181_s9 + $0x8] sm:$0xff]  ;;  %p1086_p8 = scmp.lt.s32.totalorder %s9178_s29, 15  ;;  %v1175_v14 = vld [vmem:[%s17175_s3 + $0x38] sm:$0xff]  ;;  %s11311_s18 = scalar_lea.vmem [#allocation3], %s11255_s28  ;;  %vm17359_vm1 = vcmask 523264  }
  0x6c   : > { %v1173_v12 = vld [vmem:[%s17175_s3 + $0x28] sm:$0xff]  ;;  %9628 = vmatprep.subr.bf16.mxu0 %v9627_v3  ;;  %v9637_v13 = vpack.c.bf16 %v1975_v11, %v1974_v10  ;;  %v1992_v15 = vld [vmem:[%s17181_s9 + $0x90] sm:$0xff]  ;;  %v1993_v16 = vld [vmem:[%s17181_s9 + $0x98] sm:$0xff]  ;;  %s10844_s0 = smov 64   ;;  %vm7650_vm6 = vcmask 7168  }
  0x6d   : > { %9636 = vmatprep.subr.bf16.mxu1 %v9635_v8  ;;  %9630 = vmatpush1.bf16.msra.mxu0 %v9629_v9  ;;  %v9631_v17 = vpack.c.bf16 %v1175_v14, %v1173_v12  ;;  %v9639_v18 = vpack.c.bf16 %v1993_v16, %v1992_v15  ;;  %v1172_v19 = vld [vmem:[%s17175_s3 + $0x20] sm:$0xff]  ;;  %v1174_v20 = vld [vmem:[%s17175_s3 + $0x30] sm:$0xff]  ;;  %v1977_v23 = vld [vmem:[%s17181_s9 + $0x18] sm:$0xff]  ;;  %s18198_s29 = smov (!%p1086_p8, %s9178_s29), 15 }
  0x6e   : > { %v1976_v21 = vld [vmem:[%s17181_s9 + $0x10] sm:$0xff]  ;;  %9638 = vmatpush3.bf16.msra.mxu1 %v9637_v13  ;;  %v9633_v22 = vpack.c.bf16 %v1174_v20, %v1172_v19  ;;  %v1994_v24 = vld [vmem:[%s17181_s9 + $0xa0] sm:$0xff]  ;;  %v1995_v26 = vld [vmem:[%s17181_s9 + $0xa8] sm:$0xff]  ;;  %s9458_s19 = sshll.u32 %s18198_s29, 4  ;;  %s9182_s23 = sshll.u32 %s18198_s29, 3 }
  0x6f   : > { %9632 = vmatprep.subr.bf16.mxu0 %v9631_v17  ;;  %9640 = vmatprep.subr.bf16.mxu1 %v9639_v18  ;;  %v9641_v25 = vpack.c.bf16 %v1977_v23, %v1976_v21  ;;  %v1978_v27 = vld [vmem:[%s17181_s9 + $0x20] sm:$0xff]  ;;  %v1979_v28 = vld [vmem:[%s17181_s9 + $0x28] sm:$0xff]  ;;  %v9643_v29 = vpack.c.bf16 %v1995_v26, %v1994_v24  ;;  %v1996_v30 = vld [vmem:[%s17181_s9 + $0xb0] sm:$0xff]  ;;  %s11333_s24 = scalar_lea.vmem %s17174_s2, %s9458_s19  ;;  %s16929_s27 = scalar_lea.vmem %s17185_s13, %s9182_s23 }
  0x70   : > { %v1997_v31 = vld [vmem:[%s17181_s9 + $0xb8] sm:$0xff]  ;;  %v1104_v32 = vld [vmem:[%s11311_s18] sm:$0xff]  ;;  %v9645_v33 = vpack.c.bf16 %v1979_v28, %v1978_v27  ;;  %v1980_v35 = vld [vmem:[%s17181_s9 + $0x30] sm:$0xff]  ;;  %s17136_s25 = scalar_lea.vmem %s17186_s14, %s9182_s23 }
  0x71   : > { %9634 = vmatpush1.bf16.msra.mxu0 %v9633_v22  ;;  %v9647_v34 = vpack.c.bf16 %v1997_v31, %v1996_v30  ;;  %v1981_v36 = vld [vmem:[%s17181_s9 + $0x38] sm:$0xff]  ;;  %v1998_v37 = vld [vmem:[%s17181_s9 + $0xc0] sm:$0xff]  ;;  %v1999_v38 = vld [vmem:[%s17181_s9 + $0xc8] sm:$0xff] }
  0x72   : > { %9642 = vmatpush3.bf16.msra.mxu1 %v9641_v25  ;;  %v1105_v39 = vld [vmem:[%s11311_s18 + $0x8] sm:$0xff]  ;;  %v9649_v40 = vpack.c.bf16 %v1981_v36, %v1980_v35  ;;  %v9651_v41 = vpack.c.bf16 %v1999_v38, %v1998_v37  ;;  %v1982_v42 = vld [vmem:[%s17181_s9 + $0x40] sm:$0xff]  ;;  %v2000_v44 = vld [vmem:[%s17181_s9 + $0xd0] sm:$0xff] }
  0x73   : > { %9644 = vmatprep.subr.bf16.mxu1 %v9643_v29  ;;  %v1983_v43 = vld [vmem:[%s17181_s9 + $0x48] sm:$0xff]  ;;  %v2001_v45 = vld [vmem:[%s17181_s9 + $0xd8] sm:$0xff]  ;;  %v1106_v47 = vld [vmem:[%s11311_s18 + $0x10] sm:$0xff] }
  0x74   : > { %9185 = vmatmul.mubr.msk.f32.vlgmr.msra.gmra.mrb[0].mxu0 %vm1188_vm0, %v1104_v32  ;;  %v1959_v46 = vld [vmem:[%s11333_s24 + $0x8] sm:$0xff]  ;;  %v2123_v49 = vld [vmem:[%s17177_s5 + $0x18] sm:$0xff]  ;;  %v9653_v50 = vpack.c.bf16 %v1983_v43, %v1982_v42  ;;  %v2120_v52 = vld [vmem:[%s17177_s5] sm:$0xff]  ;;  %v9655_v55 = vpack.c.bf16 %v2001_v45, %v2000_v44 }
  0x75   : > { %1451 = vmatprep.mubr.f32.mxu0 %v17188_v7  ;;  %2077 = vmatprep.mubr.f32.mxu1 %v1959_v46  ;;  %v2121_v48 = vld [vmem:[%s17177_s5 + $0x8] sm:$0xff]  ;;  %v2122_v53 = vld [vmem:[%s17177_s5 + $0x10] sm:$0xff]  ;;  %v1107_v54 = vld [vmem:[%s11311_s18 + $0x18] sm:$0xff] }
  0x76   : > { %9646 = vmatpush3.bf16.msra.mxu1 %v9645_v33  ;;  %v11357_v51 = vpack.c.bf16 %v2123_v49, %v2121_v48  ;;  %v1984_v56 = vld [vmem:[%s17181_s9 + $0x50] sm:$0xff]  ;;  %v1985_v57 = vld [vmem:[%s17181_s9 + $0x58] sm:$0xff]  ;;  %v11372_v58 = vpack.c.bf16 %v2122_v53, %v2120_v52  ;;  %v2002_v59 = vld [vmem:[%s17181_s9 + $0xe0] sm:$0xff] }
  0x77   : > { %9648 = vmatprep.subr.bf16.mxu1 %v9647_v34  ;;  %v2003_v60 = vld [vmem:[%s17181_s9 + $0xe8] sm:$0xff]  ;;  %v2127_v62 = vld [vmem:[%s17177_s5 + $0x38] sm:$0xff]  ;;  %v2124_v63 = vld [vmem:[%s17177_s5 + $0x20] sm:$0xff]  ;;  %v9657_v1 = vpack.c.bf16 %v1985_v57, %v1984_v56 }
  0x78   : > { %9186 = vmatmul.mubr.msk.f32.gmra.mrb[2].mxu0 %vm1188_vm0, %v1105_v39  ;;  %v2125_v61 = vld [vmem:[%s17177_s5 + $0x28] sm:$0xff]  ;;  %9780 = vmatprep.subr.bf16.mxu0 %v11357_v51  ;;  %v2126_v0 = vld [vmem:[%s17177_s5 + $0x30] sm:$0xff]  ;;  %v1986_v2 = vld [vmem:[%s17181_s9 + $0x60] sm:$0xff]  ;;  %v9659_v4 = vpack.c.bf16 %v2003_v60, %v2002_v59 }
  0x79   : > { %1457 = vmatprep.mubr.f32.mxu0 %v17188_v7  ;;  %9782 = vmatpush1.bf16.msra.mxu0 %v11372_v58  ;;  %v11399_v3 = vpack.c.bf16 %v2127_v62, %v2125_v61  ;;  %v1987_v5 = vld [vmem:[%s17181_s9 + $0x68] sm:$0xff]  ;;  %v2004_v6 = vld [vmem:[%s17181_s9 + $0xf0] sm:$0xff]  ;;  %v2005_v8 = vld [vmem:[%s17181_s9 + $0xf8] sm:$0xff]  ;;  %v11410_v9 = vpack.c.bf16 %v2126_v0, %v2124_v63 }
  0x7a   : > { %9650 = vmatpush3.bf16.msra.mxu1 %v9649_v40  ;;  %v2129_v10 = vld [vmem:[%s17177_s5 + $0x48] sm:$0xff]  ;;  %v2131_v11 = vld [vmem:[%s17177_s5 + $0x58] sm:$0xff]  ;;  %v2128_v12 = vld [vmem:[%s17177_s5 + $0x40] sm:$0xff]  ;;  %v9661_v16 = vpack.c.bf16 %v1987_v5, %v1986_v2  ;;  %v9663_v18 = vpack.c.bf16 %v2005_v8, %v2004_v6 }
  0x7b   : > { %9652 = vmatprep.subr.bf16.mxu1 %v9651_v41  ;;  %9784 = vmatprep.subr.bf16.mxu0 %v11399_v3  ;;  %v1108_v13 = vld [vmem:[%s11311_s18 + $0x20] sm:$0xff]  ;;  %v11425_v14 = vpack.c.bf16 %v2131_v11, %v2129_v10  ;;  %v2130_v15 = vld [vmem:[%s17177_s5 + $0x50] sm:$0xff]  ;;  %v1989_v19 = vld [vmem:[%s17181_s9 + $0x78] sm:$0xff]  ;;  %v17187_v10 = vlaneseq }
  0x7c   : > { %9187 = vmatmul.mubr.msk.f32.gmra.mrb[4].mxu0 %vm1188_vm0, %v1106_v47  ;;  %v1988_v17 = vld [vmem:[%s17181_s9 + $0x70] sm:$0xff]  ;;  %v11437_v20 = vpack.c.bf16 %v2130_v15, %v2128_v12  ;;  %v2133_v21 = vld [vmem:[%s17177_s5 + $0x68] sm:$0xff]  ;;  %v2135_v22 = vld [vmem:[%s17177_s5 + $0x78] sm:$0xff] }
  0x7d   : > { %1463 = vmatprep.mubr.f32.mxu0 %v17188_v7  ;;  %9786 = vmatpush1.bf16.msra.mxu0 %v11410_v9  ;;  %v11447_v23 = vpack.c.bf16 %v2135_v22, %v2133_v21  ;;  %v2132_v24 = vld [vmem:[%s17177_s5 + $0x60] sm:$0xff]  ;;  %v2134_v25 = vld [vmem:[%s17177_s5 + $0x70] sm:$0xff]  ;;  %v1109_v26 = vld [vmem:[%s11311_s18 + $0x28] sm:$0xff]  ;;  %v9665_v27 = vpack.c.bf16 %v1989_v19, %v1988_v17  ;;  %v11590_v11 = vshrl.u32 %v17187_v10, 7 }
  0x7e   : > { %9654 = vmatpush3.bf16.msra.mxu1 %v9653_v50  ;;  %9788 = vmatprep.subr.bf16.mxu0 %v11425_v14  ;;  %v11459_v28 = vpack.c.bf16 %v2134_v25, %v2132_v24  ;;  %v1110_v29 = vld [vmem:[%s11311_s18 + $0x30] sm:$0xff]  ;;  %v1958_v30 = vld [vmem:[%s11333_s24] sm:$0xff]  ;;  %v1961_v31 = vld [vmem:[%s11333_s24 + $0x18] sm:$0xff] }
  0x7f   : > { %9656 = vmatprep.subr.bf16.mxu1 %v9655_v55  ;;  %v1111_v32 = vld [vmem:[%s11311_s18 + $0x38] sm:$0xff]  ;;  %v9258_v33 = vld [vmem:[%s17178_s6] ss:$0 sm:$0xff]  ;;  %v1960_v34 = vld [vmem:[%s11333_s24 + $0x10] sm:$0xff] }
  0x80   : > { %9188 = vmatmul.mubr.msk.f32.gmra.mrb[6].mxu0 %vm1188_vm0, %v1107_v54  ;;  %v1963_v35 = vld [vmem:[%s11333_s24 + $0x28] sm:$0xff]  ;;  %2331 = vrot.lane.b32.xlu0 %v9258_v33, %s10844_s0  ;;  %v9267_v36 = vld [vmem:[%s17178_s6 + $0x1] ss:$0 sm:$0xff]  ;;  %v1965_v39 = vld [vmem:[%s11333_s24 + $0x38] sm:$0xff] }
  0x81   : > { %1469 = vmatprep.mubr.f32.mxu0 %v17188_v7  ;;  %9790 = vmatpush1.bf16.msra.mxu0 %v11437_v20  ;;  %v1112_v37 = vld [vmem:[%s11311_s18 + $0x40] sm:$0xff]  ;;  %v1113_v40 = vld [vmem:[%s11311_s18 + $0x48] sm:$0xff]  ;;  %v1964_v41 = vld [vmem:[%s11333_s24 + $0x30] sm:$0xff] }
  0x82   : > { %9658 = vmatpush3.bf16.msra.mxu1 %v9657_v1  ;;  %9792 = vmatprep.subr.bf16.mxu0 %v11447_v23  ;;  %v1962_v38 = vld [vmem:[%s11333_s24 + $0x20] sm:$0xff]  ;;  %v1967_v42 = vld [vmem:[%s11333_s24 + $0x48] sm:$0xff]  ;;  %v1114_v43 = vld [vmem:[%s11311_s18 + $0x50] sm:$0xff] }
  0x83   : > { %9660 = vmatprep.subr.bf16.mxu1 %v9659_v4  ;;  %v1966_v44 = vld [vmem:[%s11333_s24 + $0x40] sm:$0xff]  ;;  %v1969_v45 = vld [vmem:[%s11333_s24 + $0x58] sm:$0xff]  ;;  %v1968_v47 = vld [vmem:[%s11333_s24 + $0x50] sm:$0xff] }
  0x84   : > { %9189 = vmatmul.mubr.msk.f32.gmra.mrb[8].mxu0 %vm1188_vm0, %v1108_v13  ;;  %2555 = vrot.lane.b32.xlu0 %v9267_v36, %s10844_s0  ;;  %v1115_v46 = vld [vmem:[%s11311_s18 + $0x58] sm:$0xff]  ;;  %v1971_v48 = vld [vmem:[%s11333_s24 + $0x68] sm:$0xff]  ;;  %v1116_v49 = vld [vmem:[%s11311_s18 + $0x60] sm:$0xff]  ;;  %v1184_v13 = vsub.s32 1, %v11590_v11 }
  0x85   : > { %1475 = vmatprep.mubr.f32.mxu0 %v17188_v7  ;;  %9794 = vmatpush1.bf16.msra.mxu0 %v11459_v28  ;;  %v1970_v50 = vld [vmem:[%s11333_s24 + $0x60] sm:$0xff]  ;;  %v1973_v52 = vld [vmem:[%s11333_s24 + $0x78] sm:$0xff]  ;;  %v1117_v53 = vld [vmem:[%s11311_s18 + $0x68] sm:$0xff] }
  0x86   : > { %9662 = vmatpush3.bf16.msra.mxu1 %v9661_v16  ;;  %v1972_v54 = vld [vmem:[%s11333_s24 + $0x70] sm:$0xff]  ;;  %v1119_v56 = vld [vmem:[%s11311_s18 + $0x78] sm:$0xff]  ;;  %v1120_v57 = vld [vmem:[%s11311_s18 + $0x80] sm:$0xff] }
  0x87   : > { %9664 = vmatprep.subr.bf16.mxu1 %v9663_v18  ;;  %v1118_v55 = vld [vmem:[%s11311_s18 + $0x70] sm:$0xff]  ;;  %v1121_v59 = vld [vmem:[%s11311_s18 + $0x88] sm:$0xff]  ;;  %v1123_v61 = vld [vmem:[%s11311_s18 + $0x98] sm:$0xff] }
  0x88   : > { %9190 = vmatmul.mubr.msk.f32.gmra.mrb[10].mxu0 %vm1188_vm0, %v1109_v26  ;;  %v1122_v60 = vld [vmem:[%s11311_s18 + $0x90] sm:$0xff]  ;;  %v1124_v62 = vld [vmem:[%s11311_s18 + $0xa0] sm:$0xff]  ;;  %v1125_v63 = vld [vmem:[%s11311_s18 + $0xa8] sm:$0xff] }
  0x89   : > { %1481 = vmatprep.mubr.f32.mxu0 %v17188_v7  ;;  %v1126_v0 = vld [vmem:[%s11311_s18 + $0xb0] sm:$0xff]  ;;  %v1127_v1 = vld [vmem:[%s11311_s18 + $0xb8] sm:$0xff]  ;;  %v1128_v2 = vld [vmem:[%s11311_s18 + $0xc0] sm:$0xff] }
  0x8a   : > { %9666 = vmatpush3.bf16.msra.mxu1 %v9665_v27  ;;  %v1129_v4 = vld [vmem:[%s11311_s18 + $0xc8] sm:$0xff]  ;;  %v1130_v5 = vld [vmem:[%s11311_s18 + $0xd0] sm:$0xff]  ;;  %v1131_v6 = vld [vmem:[%s11311_s18 + $0xd8] sm:$0xff] }
  0x8b   : > { %9668 = vmatprep.subr.bf16.mxu1 %v11357_v51  ;;  %v1132_v8 = vld [vmem:[%s11311_s18 + $0xe0] sm:$0xff]  ;;  %v1133_v12 = vld [vmem:[%s11311_s18 + $0xe8] sm:$0xff]  ;;  %v1134_v17 = vld [vmem:[%s11311_s18 + $0xf0] sm:$0xff] }
  0x8c   : > { %9191 = vmatmul.mubr.msk.f32.gmra.mrb[12].mxu0 %vm1188_vm0, %v1110_v29  ;;  %v11598_v15 = vld [vmem:[%s17176_s4] sm:$0x3]  ;;  %v1135_v18 = vld [vmem:[%s11311_s18 + $0xf8] sm:$0xff]  ;;  %v1137_v21 = vld [vmem:[%s11311_s18 + $0x108] sm:$0xff] }
  0x8d   : > { %2078 = vmatmul.mubr.f32.vlgmr.msra.gmra.mrb[0].mxu1 %v1958_v30  ;;  %1487 = vmatprep.mubr.f32.mxu0 %v17188_v7  ;;  %v11602_v16 = vrot.slane %v11598_v15, %v1184_v13  ;;  %v1136_v19 = vld [vmem:[%s11311_s18 + $0x100] sm:$0xff]  ;;  %v1138_v22 = vld [vmem:[%s11311_s18 + $0x110] sm:$0xff]  ;;  %v1139_v24 = vld [vmem:[%s11311_s18 + $0x118] sm:$0xff] }
  0x8e   : > { %9670 = vmatpush1.bf16.msra.mxu1 %v11372_v58  ;;  %2082 = vmatprep.mubr.f32.mxu1 %v1961_v31  ;;  %v1140_v25 = vld [vmem:[%s11311_s18 + $0x120] sm:$0xff]  ;;  %v1141_v26 = vld [vmem:[%s11311_s18 + $0x128] sm:$0xff]  ;;  %v1142_v27 = vld [vmem:[%s11311_s18 + $0x130] sm:$0xff] }
  0x8f   : > { %9672 = vmatprep.subr.bf16.mxu1 %v11399_v3  ;;  %17415 = vst [vmem:[#allocation5_spill] sm:$0xff] %v11602_v16  ;;  %v1143_v29 = vld [vmem:[%s11311_s18 + $0x138] sm:$0xff]  ;;  %v1144_v30 = vld [vmem:[%s11311_s18 + $0x140] sm:$0xff]  ;;  %v1145_v31 = vld [vmem:[%s11311_s18 + $0x148] sm:$0xff] }
  0x90   : > { %9192 = vmatmul.mubr.msk.f32.gmra.mrb[14].mxu0 %vm1188_vm0, %v1111_v32  ;;  %v1146_v32 = vld [vmem:[%s11311_s18 + $0x150] sm:$0xff]  ;;  %v1147_v33 = vld [vmem:[%s11311_s18 + $0x158] sm:$0xff] }
  0x91   : > { %2083 = vmatmul.mubr.f32.gmra.mrb[2].mxu1 %v1960_v34  ;;  %1493 = vmatprep.mubr.f32.mxu0 %v17188_v7  ;;  %v1148_v34 = vld [vmem:[%s11311_s18 + $0x160] sm:$0xff]  ;;  %v1150_v36 = vld [vmem:[%s11311_s18 + $0x170] sm:$0xff] }
  0x92   : > { %2087 = vmatprep.mubr.f32.mxu1 %v1963_v35  ;;  %9674 = vmatpush1.bf16.msra.mxu1 %v11410_v9  ;;  %v1149_v35 = vld [vmem:[%s11311_s18 + $0x168] sm:$0xff] }
  0x93   : > { %9676 = vmatprep.subr.bf16.mxu1 %v11425_v14 }
  0x94   : > { %9193 = vmatmul.mubr.msk.f32.gmra.mrb[16].mxu0 %vm1188_vm0, %v1112_v37  ;;  %v1151_v37 = vld [vmem:[%s11311_s18 + $0x178] sm:$0xff] }
  0x95   : > { %2088 = vmatmul.mubr.f32.gmra.mrb[4].mxu1 %v1962_v38  ;;  %1499 = vmatprep.mubr.f32.mxu0 %v17188_v7  ;;  %v1152_v38 = vld [vmem:[%s11311_s18 + $0x180] sm:$0xff] }
  0x96   : > { %2092 = vmatprep.mubr.f32.mxu1 %v1965_v39  ;;  %9678 = vmatpush1.bf16.msra.mxu1 %v11437_v20  ;;  %v1153_v39 = vld [vmem:[%s11311_s18 + $0x188] sm:$0xff] }
  0x97   : > { %9680 = vmatprep.subr.bf16.mxu1 %v11447_v23 }
  0x98   : > { %9194 = vmatmul.mubr.msk.f32.gmra.mrb[18].mxu0 %vm1188_vm0, %v1113_v40  ;;  %v1154_v40 = vld [vmem:[%s11311_s18 + $0x190] sm:$0xff] }
  0x99   : > { %2093 = vmatmul.mubr.f32.gmra.mrb[6].mxu1 %v1964_v41  ;;  %1505 = vmatprep.mubr.f32.mxu0 %v17188_v7  ;;  %v1155_v41 = vld [vmem:[%s11311_s18 + $0x198] sm:$0xff] }
  0x9a   : > { %2097 = vmatprep.mubr.f32.mxu1 %v1967_v42  ;;  %9682 = vmatpush1.bf16.msra.mxu1 %v11459_v28  ;;  %v1156_v42 = vld [vmem:[%s11311_s18 + $0x1a0] sm:$0xff] }
  0x9b   : > { %9684 = vmatprep.subr.bf16.mxu1 %v11357_v51 }
  0x9c   : > { %9195 = vmatmul.mubr.msk.f32.gmra.mrb[20].mxu0 %vm1188_vm0, %v1114_v43  ;;  %v1157_v43 = vld [vmem:[%s11311_s18 + $0x1a8] sm:$0xff] }
  0x9d   : > { %2098 = vmatmul.mubr.f32.gmra.mrb[8].mxu1 %v1966_v44  ;;  %1511 = vmatprep.mubr.f32.mxu0 %v17188_v7 }
  0x9e   : > { %2102 = vmatprep.mubr.f32.mxu1 %v1969_v45 }
  0xa0   : > { %9196 = vmatmul.mubr.msk.f32.gmra.mrb[22].mxu0 %vm1188_vm0, %v1115_v46  ;;  %v1158_v46 = vld [vmem:[%s11311_s18 + $0x1b0] sm:$0xff] }
  0xa1   : > { %2103 = vmatmul.mubr.f32.gmra.mrb[10].mxu1 %v1968_v47  ;;  %1517 = vmatprep.mubr.f32.mxu0 %v17188_v7 }
  0xa2   : > { %2107 = vmatprep.mubr.f32.mxu1 %v1971_v48 }
  0xa4   : > { %9197 = vmatmul.mubr.msk.f32.gmra.mrb[24].mxu0 %vm1188_vm0, %v1116_v49  ;;  %v1159_v49 = vld [vmem:[%s11311_s18 + $0x1b8] sm:$0xff] }
  0xa5   : > { %2108 = vmatmul.mubr.f32.gmra.mrb[12].mxu1 %v1970_v50  ;;  %1523 = vmatprep.mubr.f32.mxu0 %v17188_v7 }
  0xa6   : > { %2112 = vmatprep.mubr.f32.mxu1 %v1973_v52 }
  0xa8   : > { %9198 = vmatmul.mubr.msk.f32.gmra.mrb[26].mxu0 %vm1188_vm0, %v1117_v53  ;;  %v1160_v53 = vld [vmem:[%s11311_s18 + $0x1c0] sm:$0xff] }
  0xa9   : > { %2113 = vmatmul.mubr.f32.gmra.mrb[14].mxu1 %v1972_v54  ;;  %1529 = vmatprep.mubr.f32.mxu0 %v17188_v7 }
  0xaa   : > { %2204 = vmatprep.mubr.f32.mxu1 %v17188_v7 }
  0xac   : > { %9199 = vmatmul.mubr.msk.f32.gmra.mrb[28].mxu0 %vm1188_vm0, %v1118_v55 }
  0xad   : > { %2205 = vmatmul.mubr.f32.vlgmr.msra.gmra.mrb[16].mxu1 %v17188_v7  ;;  %1535 = vmatprep.mubr.f32.mxu0 %v17188_v7 }
  0xae   : > { %2210 = vmatprep.mubr.f32.mxu1 %v17188_v7  ;;  %9686 = vmatpush1.bf16.msra.mxu1 %v11372_v58 }
  0xaf   : > { %9688 = vmatprep.subr.bf16.mxu1 %v11399_v3 }
  0xb0   : > { %9200 = vmatmul.mubr.msk.f32.gmra.mrb[30].mxu0 %vm1188_vm0, %v1119_v56  ;;  %v1161_v56 = vld [vmem:[%s11311_s18 + $0x1c8] sm:$0xff] }
  0xb1   : > { %2211 = vmatmul.mubr.f32.gmra.mrb[18].mxu1 %v17188_v7  ;;  %1541 = vmatprep.mubr.f32.mxu0 %v17188_v7 }
  0xb2   : > { %2216 = vmatprep.mubr.f32.mxu1 %v17188_v7  ;;  %9690 = vmatpush1.bf16.msra.mxu1 %v11410_v9 }
  0xb3   : > { %9692 = vmatprep.subr.bf16.mxu1 %v11425_v14 }
  0xb4   : > { %9201 = vmatmul.mubr.msk.f32.gmra.mrb[32].mxu0 %vm1188_vm0, %v1120_v57 }
  0xb5   : > { %2217 = vmatmul.mubr.f32.gmra.mrb[20].mxu1 %v17188_v7  ;;  %1547 = vmatprep.mubr.f32.mxu0 %v17188_v7 }
  0xb6   : > { %2222 = vmatprep.mubr.f32.mxu1 %v17188_v7  ;;  %9694 = vmatpush1.bf16.msra.mxu1 %v11437_v20 }
  0xb7   : > { %9696 = vmatprep.subr.bf16.mxu1 %v11447_v23 }
  0xb8   : > { %9202 = vmatmul.mubr.msk.f32.gmra.mrb[34].mxu0 %vm1188_vm0, %v1121_v59 }
  0xb9   : > { %2223 = vmatmul.mubr.f32.gmra.mrb[22].mxu1 %v17188_v7  ;;  %1553 = vmatprep.mubr.f32.mxu0 %v17188_v7 }
  0xba   : > { %2228 = vmatprep.mubr.f32.mxu1 %v17188_v7  ;;  %9698 = vmatpush1.bf16.msra.mxu1 %v11459_v28 }
  0xbb   : > { %9700 = vmatprep.subr.bf16.mxu1 %v11357_v51 }
  0xbc   : > { %9203 = vmatmul.mubr.msk.f32.gmra.mrb[36].mxu0 %vm1188_vm0, %v1122_v60  ;;  %v1162_v60 = vld [vmem:[%s11311_s18 + $0x1d0] sm:$0xff] }
  0xbd   : > { %2229 = vmatmul.mubr.f32.gmra.mrb[24].mxu1 %v17188_v7  ;;  %1559 = vmatprep.mubr.f32.mxu0 %v17188_v7 }
  0xbe   : > { %2234 = vmatprep.mubr.f32.mxu1 %v17188_v7 }
  0xc0   : > { %9204 = vmatmul.mubr.msk.f32.gmra.mrb[38].mxu0 %vm1188_vm0, %v1123_v61 }
  0xc1   : > { %2235 = vmatmul.mubr.f32.gmra.mrb[26].mxu1 %v17188_v7  ;;  %1565 = vmatprep.mubr.f32.mxu0 %v17188_v7 }
  0xc2   : > { %2240 = vmatprep.mubr.f32.mxu1 %v17188_v7 }
  0xc4   : > { %9205 = vmatmul.mubr.msk.f32.gmra.mrb[40].mxu0 %vm1188_vm0, %v1124_v62 }
  0xc5   : > { %2241 = vmatmul.mubr.f32.gmra.mrb[28].mxu1 %v17188_v7  ;;  %1571 = vmatprep.mubr.f32.mxu0 %v17188_v7 }
  0xc6   : > { %2246 = vmatprep.mubr.f32.mxu1 %v17188_v7 }
  0xc8   : > { %9206 = vmatmul.mubr.msk.f32.gmra.mrb[42].mxu0 %vm1188_vm0, %v1125_v63  ;;  %v1163_v63 = vld [vmem:[%s11311_s18 + $0x1d8] sm:$0xff] }
  0xc9   : > { %2247 = vmatmul.mubr.f32.gmra.mrb[30].mxu1 %v17188_v7  ;;  %1577 = vmatprep.mubr.f32.mxu0 %v17188_v7 }
  0xca   : > { %2846 = vmatprep.mubr.f32.mxu1 %v17188_v7 }
  0xcc   : > { %9207 = vmatmul.mubr.msk.f32.gmra.mrb[44].mxu0 %vm1188_vm0, %v1126_v0 }
  0xcd   : > { %1583 = vmatprep.mubr.f32.mxu0 %v17188_v7 }
  0xd0   : > { %9208 = vmatmul.mubr.msk.f32.gmra.mrb[46].mxu0 %vm1188_vm0, %v1127_v1 }
  0xd1   : > { %1589 = vmatprep.mubr.f32.mxu0 %v17188_v7 }
  0xd4   : > { %9209 = vmatmul.mubr.msk.f32.gmra.mrb[48].mxu0 %vm1188_vm0, %v1128_v2 }
  0xd5   : > { %1595 = vmatprep.mubr.f32.mxu0 %v17188_v7 }
  0xd8   : > { %9210 = vmatmul.mubr.msk.f32.gmra.mrb[50].mxu0 %vm1188_vm0, %v1129_v4 }
  0xd9   : > { %1601 = vmatprep.mubr.f32.mxu0 %v17188_v7 }
  0xdc   : > { %9211 = vmatmul.mubr.msk.f32.gmra.mrb[52].mxu0 %vm1188_vm0, %v1130_v5  ;;  %v1164_v5 = vld [vmem:[%s11311_s18 + $0x1e0] sm:$0xff] }
  0xdd   : > { %1607 = vmatprep.mubr.f32.mxu0 %v17188_v7 }
  0xe0   : > { %9212 = vmatmul.mubr.msk.f32.gmra.mrb[54].mxu0 %vm1188_vm0, %v1131_v6 }
  0xe1   : > { %1613 = vmatprep.mubr.f32.mxu0 %v17188_v7 }
  0xe4   : > { %9213 = vmatmul.mubr.msk.f32.gmra.mrb[56].mxu0 %vm1188_vm0, %v1132_v8 }
  0xe5   : > { %1619 = vmatprep.mubr.f32.mxu0 %v17188_v7 }
  0xe8   : > { %9214 = vmatmul.mubr.msk.f32.gmra.mrb[58].mxu0 %vm1188_vm0, %v1133_v12 }
  0xe9   : > { %1625 = vmatprep.mubr.f32.mxu0 %v17188_v7 }
  0xec   : > { %9215 = vmatmul.mubr.msk.f32.gmra.mrb[60].mxu0 %vm1188_vm0, %v1134_v17 }
  0xed   : > { %1631 = vmatprep.mubr.f32.mxu0 %v17188_v7 }
  0xf0   : > { %9216 = vmatmul.mubr.msk.f32.gmra.mrb[62].mxu0 %vm1188_vm0, %v1135_v18  ;;  %v1165_v18 = vld [vmem:[%s11311_s18 + $0x1e8] sm:$0xff] }
  0xf1   : > { %1637 = vmatprep.mubr.f32.mxu0 %v17188_v7 }
  0xf4   : > { %9217 = vmatmul.mubr.msk.f32.gmra.mrb[64].mxu0 %vm1188_vm0, %v1136_v19 }
  0xf5   : > { %1643 = vmatprep.mubr.f32.mxu0 %v17188_v7 }
  0xf8   : > { %9218 = vmatmul.mubr.msk.f32.gmra.mrb[66].mxu0 %vm1188_vm0, %v1137_v21 }
  0xf9   : > { %1649 = vmatprep.mubr.f32.mxu0 %v17188_v7 }
  0xfc   : > { %9219 = vmatmul.mubr.msk.f32.gmra.mrb[68].mxu0 %vm1188_vm0, %v1138_v22 }
  0xfd   : > { %1655 = vmatprep.mubr.f32.mxu0 %v17188_v7 }
 0x100   : > { %9220 = vmatmul.mubr.msk.f32.gmra.mrb[70].mxu0 %vm1188_vm0, %v1139_v24 }
 0x101   : > { %1661 = vmatprep.mubr.f32.mxu0 %v17188_v7 }
 0x104   : > { %9221 = vmatmul.mubr.msk.f32.gmra.mrb[72].mxu0 %vm1188_vm0, %v1140_v25 }
 0x105   : > { %1667 = vmatprep.mubr.f32.mxu0 %v17188_v7 }
 0x108   : > { %9222 = vmatmul.mubr.msk.f32.gmra.mrb[74].mxu0 %vm1188_vm0, %v1141_v26  ;;  %v1166_v26 = vld [vmem:[%s11311_s18 + $0x1f0] sm:$0xff] }
 0x109   : > { %1673 = vmatprep.mubr.f32.mxu0 %v17188_v7 }
 0x10c   : > { %9223 = vmatmul.mubr.msk.f32.gmra.mrb[76].mxu0 %vm1188_vm0, %v1142_v27 }
 0x10d   : > { %1679 = vmatprep.mubr.f32.mxu0 %v17188_v7 }
 0x110   : > { %9224 = vmatmul.mubr.msk.f32.gmra.mrb[78].mxu0 %vm1188_vm0, %v1143_v29 }
 0x111   : > { %1685 = vmatprep.mubr.f32.mxu0 %v17188_v7 }
 0x114   : > { %9225 = vmatmul.mubr.msk.f32.gmra.mrb[80].mxu0 %vm1188_vm0, %v1144_v30 }
 0x115   : > { %1691 = vmatprep.mubr.f32.mxu0 %v17188_v7 }
 0x118   : > { %9226 = vmatmul.mubr.msk.f32.gmra.mrb[82].mxu0 %vm1188_vm0, %v1145_v31 }
 0x119   : > { %1697 = vmatprep.mubr.f32.mxu0 %v17188_v7 }
 0x11c   : > { %9227 = vmatmul.mubr.msk.f32.gmra.mrb[84].mxu0 %vm1188_vm0, %v1146_v32 }
 0x11d   : > { %1703 = vmatprep.mubr.f32.mxu0 %v17188_v7 }
 0x120   : > { %9228 = vmatmul.mubr.msk.f32.gmra.mrb[86].mxu0 %vm1188_vm0, %v1147_v33  ;;  %v1167_v33 = vld [vmem:[%s11311_s18 + $0x1f8] sm:$0xff]  ;;  %s10845_s18 = smov 96  }
 0x121   : > { %1709 = vmatprep.mubr.f32.mxu0 %v17188_v7 }
 0x124   : > { %9229 = vmatmul.mubr.msk.f32.gmra.mrb[88].mxu0 %vm1188_vm0, %v1148_v34 }
 0x125   : > { %1715 = vmatprep.mubr.f32.mxu0 %v17188_v7 }
 0x128   : > { %9230 = vmatmul.mubr.msk.f32.gmra.mrb[90].mxu0 %vm1188_vm0, %v1149_v35 }
 0x129   : > { %1721 = vmatprep.mubr.f32.mxu0 %v17188_v7 }
 0x12c   : > { %9231 = vmatmul.mubr.msk.f32.gmra.mrb[92].mxu0 %vm1188_vm0, %v1150_v36 }
 0x12d   : > { %1727 = vmatprep.mubr.f32.mxu0 %v17188_v7 }
 0x130   : > { %9232 = vmatmul.mubr.msk.f32.gmra.mrb[94].mxu0 %vm1188_vm0, %v1151_v37 }
 0x131   : > { %1733 = vmatprep.mubr.f32.mxu0 %v17188_v7 }
 0x134   : > { %9233 = vmatmul.mubr.msk.f32.gmra.mrb[96].mxu0 %vm1188_vm0, %v1152_v38 }
 0x135   : > { %1739 = vmatprep.mubr.f32.mxu0 %v17188_v7 }
 0x138   : > { %9234 = vmatmul.mubr.msk.f32.gmra.mrb[98].mxu0 %vm1188_vm0, %v1153_v39 }
 0x139   : > { %1745 = vmatprep.mubr.f32.mxu0 %v17188_v7 }
 0x13c   : > { %9235 = vmatmul.mubr.msk.f32.gmra.mrb[100].mxu0 %vm1188_vm0, %v1154_v40 }
 0x13d   : > { %1751 = vmatprep.mubr.f32.mxu0 %v17188_v7 }
 0x140   : > { %9236 = vmatmul.mubr.msk.f32.gmra.mrb[102].mxu0 %vm1188_vm0, %v1155_v41  ;;  %v9249_v41 = vld [vmem:[%s17182_s10] ss:$0 sm:$0xff] }
 0x141   : > { %1757 = vmatprep.mubr.f32.mxu0 %v17188_v7 }
 0x144   : > { %9237 = vmatmul.mubr.msk.f32.gmra.mrb[104].mxu0 %vm1188_vm0, %v1156_v42 }
 0x145   : > { %1763 = vmatprep.mubr.f32.mxu0 %v17188_v7 }
 0x147   : > { %v11675_v44 = vpop.f32.mrb[0].mxu0 }
 0x148   : > { %9238 = vmatmul.mubr.msk.f32.gmra.mrb[106].mxu0 %vm1188_vm0, %v1157_v43  ;;  %v11678_v45 = vpop.f32.mrb[1].mxu0 }
 0x149   : > { %17416 = vst [vmem:[#allocation6_spill] sm:$0xff] %v11678_v45  ;;  %1769 = vmatprep.mubr.f32.mxu0 %v17188_v7 }
 0x14b   : > { %v11682_v47 = vpop.f32.mrb[2].mxu0 }
 0x14c   : > { %9239 = vmatmul.mubr.msk.f32.gmra.mrb[108].mxu0 %vm1188_vm0, %v1158_v46  ;;  %v11685_v48 = vpop.f32.mrb[3].mxu0 }
 0x14d   : > { %17417 = vst [vmem:[#allocation7_spill] sm:$0xff] %v11685_v48  ;;  %1775 = vmatprep.mubr.f32.mxu0 %v17188_v7 }
 0x14f   : > { %v11689_v50 = vpop.f32.mrb[4].mxu0 }
 0x150   : > { %9240 = vmatmul.mubr.msk.f32.gmra.mrb[110].mxu0 %vm1188_vm0, %v1159_v49  ;;  %v11692_v52 = vpop.f32.mrb[5].mxu0 }
 0x151   : > { %17418 = vst [vmem:[#allocation8_spill] sm:$0xff] %v11692_v52  ;;  %1781 = vmatprep.mubr.f32.mxu0 %v17188_v7 }
 0x153   : > { %v11696_v54 = vpop.f32.mrb[6].mxu0 }
 0x154   : > { %9241 = vmatmul.mubr.msk.f32.gmra.mrb[112].mxu0 %vm1188_vm0, %v1160_v53  ;;  %v11699_v55 = vpop.f32.mrb[7].mxu0 }
 0x155   : > { %17419 = vst [vmem:[#allocation9_spill] sm:$0xff] %v11699_v55  ;;  %1787 = vmatprep.mubr.f32.mxu0 %v17188_v7 }
 0x157   : > { %v11703_v57 = vpop.f32.mrb[8].mxu0 }
 0x158   : > { %9242 = vmatmul.mubr.msk.f32.gmra.mrb[114].mxu0 %vm1188_vm0, %v1161_v56  ;;  %v11706_v59 = vpop.f32.mrb[9].mxu0 }
 0x159   : > { %17420 = vst [vmem:[#allocation10_spill] sm:$0xff] %v11706_v59  ;;  %1793 = vmatprep.mubr.f32.mxu0 %v17188_v7 }
 0x15b   : > { %v11710_v61 = vpop.f32.mrb[10].mxu0 }
 0x15c   : > { %9243 = vmatmul.mubr.msk.f32.gmra.mrb[116].mxu0 %vm1188_vm0, %v1162_v60  ;;  %v11713_v62 = vpop.f32.mrb[11].mxu0 }
 0x15d   : > { %17421 = vst [vmem:[#allocation11_spill] sm:$0xff] %v11713_v62  ;;  %1799 = vmatprep.mubr.f32.mxu0 %v17188_v7 }
 0x15f   : > { %v11717_v0 = vpop.f32.mrb[12].mxu0 }
 0x160   : > { %v9491_v1 = vpop.f32.mrb[0].mxu1  ;;  %9244 = vmatmul.mubr.msk.f32.gmra.mrb[118].mxu0 %vm1188_vm0, %v1163_v63  ;;  %v11720_v2 = vpop.f32.mrb[13].mxu0 }
 0x161   : > { %17422 = vst [vmem:[#allocation12_spill] sm:$0xff] %v11720_v2  ;;  %v9492_v4 = vpop.f32.mrb[1].mxu1  ;;  %1805 = vmatprep.mubr.f32.mxu0 %v17188_v7 }
 0x162   : > { %v11724_v6 = vadd.f32 %v9492_v4, %v9491_v1 }
 0x163   : > { %v11726_v8 = vpop.f32.mrb[14].mxu0 }
 0x164   : > { %17423 = vst [vmem:[#allocation13_spill] sm:$0xff] %v11724_v6  ;;  %v9494_v12 = vpop.f32.mrb[2].mxu1  ;;  %9245 = vmatmul.mubr.msk.f32.gmra.mrb[120].mxu0 %vm1188_vm0, %v1164_v5  ;;  %v11729_v13 = vpop.f32.mrb[15].mxu0 }
 0x165   : > { %17424 = vst [vmem:[#allocation14_spill] sm:$0xff] %v11729_v13  ;;  %v9495_v17 = vpop.f32.mrb[3].mxu1  ;;  %1811 = vmatprep.mubr.f32.mxu0 %v17188_v7 }
 0x166   : > { %v11733_v19 = vadd.f32 %v9495_v17, %v9494_v12 }
 0x167   : > { %v11735_v21 = vpop.f32.mrb[16].mxu0 }
 0x168   : > { %17425 = vst [vmem:[#allocation15_spill] sm:$0xff] %v11733_v19  ;;  %v9497_v22 = vpop.f32.mrb[4].mxu1  ;;  %9246 = vmatmul.mubr.msk.f32.gmra.mrb[122].mxu0 %vm1188_vm0, %v1165_v18  ;;  %v11738_v24 = vpop.f32.mrb[17].mxu0 }
 0x169   : > { %17426 = vst [vmem:[#allocation16_spill] sm:$0xff] %v11738_v24  ;;  %v9498_v25 = vpop.f32.mrb[5].mxu1  ;;  %1817 = vmatprep.mubr.f32.mxu0 %v17188_v7 }
 0x16a   : > { %v11742_v27 = vadd.f32 %v9498_v25, %v9497_v22 }
 0x16b   : > { %v11744_v29 = vpop.f32.mrb[18].mxu0 }
 0x16c   : > { %17427 = vst [vmem:[#allocation17_spill] sm:$0xff] %v11742_v27  ;;  %v9500_v30 = vpop.f32.mrb[6].mxu1  ;;  %9247 = vmatmul.mubr.msk.f32.gmra.mrb[124].mxu0 %vm1188_vm0, %v1166_v26  ;;  %v11747_v31 = vpop.f32.mrb[19].mxu0 }
 0x16d   : > { %17428 = vst [vmem:[#allocation18_spill] sm:$0xff] %v11747_v31  ;;  %v9501_v32 = vpop.f32.mrb[7].mxu1  ;;  %1823 = vmatprep.mubr.f32.mxu0 %v17188_v7 }
 0x16e   : > { %v11751_v34 = vadd.f32 %v9501_v32, %v9500_v30  ;;  %v11780_v30 = vpop.permute.xlu0 %2331 }
 0x16f   : > { %v11753_v35 = vpop.f32.mrb[20].mxu0  ;;  %17437 = vst [vmem:[#allocation27_spill] sm:$0xff] %v11780_v30 }
 0x170   : > { %17429 = vst [vmem:[#allocation19_spill] sm:$0xff] %v11751_v34  ;;  %v9503_v36 = vpop.f32.mrb[8].mxu1  ;;  %9248 = vmatmul.mubr.msk.f32.gmra.mrb[126].mxu0 %vm1188_vm0, %v1167_v33  ;;  %v11756_v37 = vpop.f32.mrb[21].mxu0 }
 0x171   : > { %17430 = vst [vmem:[#allocation20_spill] sm:$0xff] %v11756_v37  ;;  %v9504_v38 = vpop.f32.mrb[9].mxu1  ;;  %6602 = vmatprep.mubr.f32.mxu0 %v17188_v7 }
 0x172   : > { %v9505_v39 = vadd.f32 %v9504_v38, %v9503_v36  ;;  %v11860_v48 = vpop.permute.xlu0 %2555 }
 0x173   : > { %v11759_v40 = vpop.f32.mrb[22].mxu0  ;;  %17451 = vst [vmem:[#allocation41_spill] sm:$0xff] %v11860_v48 }
 0x174   : > { %v9506_v42 = vpop.f32.mrb[10].mxu1  ;;  %v11764_v43 = vpop.f32.mrb[23].mxu0  ;;  %v11766_v46 = vadd.f32 %v9505_v39, %v9249_v41 }
 0x175   : > { %17431 = vst [vmem:[#allocation21_spill] sm:$0xff] %v11764_v43  ;;  %v9507_v49 = vpop.f32.mrb[11].mxu1 }
 0x176   : > { %17432 = vst [vmem:[#allocation22_spill] sm:$0xff] %v11766_v46  ;;  %v9508_v53 = vadd.f32 %v9507_v49, %v9506_v42 }
 0x177   : > { %v11768_v56 = vpop.f32.mrb[24].mxu0 }
 0x178   : > { %v9509_v60 = vpop.f32.mrb[12].mxu1  ;;  %v11770_v63 = vpop.f32.mrb[25].mxu0  ;;  %v11772_v1 = vadd.f32 %v9508_v53, %v9249_v41 }
 0x179   : > { %17433 = vst [vmem:[#allocation23_spill] sm:$0xff] %v11770_v63  ;;  %v9510_v4 = vpop.f32.mrb[13].mxu1 }
 0x17a   : > { %17434 = vst [vmem:[#allocation24_spill] sm:$0xff] %v11772_v1  ;;  %v9511_v5 = vadd.f32 %v9510_v4, %v9509_v60 }
 0x17b   : > { %v11774_v12 = vpop.f32.mrb[26].mxu0 }
 0x17c   : > { %v9512_v17 = vpop.f32.mrb[14].mxu1  ;;  %v11776_v18 = vpop.f32.mrb[27].mxu0  ;;  %v11778_v22 = vadd.f32 %v9511_v5, %v9249_v41 }
 0x17d   : > { %17435 = vst [vmem:[#allocation25_spill] sm:$0xff] %v11776_v18  ;;  %v9513_v25 = vpop.f32.mrb[15].mxu1 }
 0x17e   : > { %17436 = vst [vmem:[#allocation26_spill] sm:$0xff] %v11778_v22  ;;  %v9514_v26 = vadd.f32 %v9513_v25, %v9512_v17 }
 0x17f   : > { %v11782_v32 = vpop.f32.mrb[28].mxu0 }
 0x180   : > { %v11784_v33 = vpop.f32.mrb[16].mxu1  ;;  %v11786_v36 = vpop.f32.mrb[29].mxu0  ;;  %v11788_v38 = vadd.f32 %v9514_v26, %v9249_v41 }
 0x181   : > { %17438 = vst [vmem:[#allocation28_spill] sm:$0xff] %v11786_v36  ;;  %v11790_v39 = vpop.f32.mrb[17].mxu1  ;;  %v2334_v42 = vadd.f32 %v11780_v30, %v11784_v33 }
 0x182   : > { %17439 = vst [vmem:[#allocation29_spill] sm:$0xff] %v11788_v38  ;;  %v2558_v36 = vadd.f32 %v11860_v48, %v11790_v39 }
 0x183   : > { %2350 = vrot.lane.b32.xlu1 %v2334_v42, %s10844_s0  ;;  %v11795_v49 = vpop.f32.mrb[30].mxu0 }
 0x184   : > { %v11797_v53 = vpop.f32.mrb[18].mxu1  ;;  %v11799_v60 = vpop.f32.mrb[31].mxu0 }
 0x185   : > { %17440 = vst [vmem:[#allocation30_spill] sm:$0xff] %v11799_v60  ;;  %v2335_v4 = vadd.f32 %v11780_v30, %v11797_v53  ;;  %v11803_v5 = vpop.f32.mrb[19].mxu1 }
 0x186   : > { %v2559_v37 = vadd.f32 %v11860_v48, %v11803_v5 }
 0x187   : > { %2352 = vrot.lane.b32.xlu1 %v2335_v4, %s10844_s0  ;;  %v11806_v41 = vpop.f32.mrb[32].mxu0 }
 0x188   : > { %17441 = vst [vmem:[#allocation31_spill] sm:$0xff] %v11806_v41  ;;  %v11808_v17 = vpop.f32.mrb[20].mxu1  ;;  %v11810_v25 = vpop.f32.mrb[33].mxu0 }
 0x189   : > { %17442 = vst [vmem:[#allocation32_spill] sm:$0xff] %v11810_v25  ;;  %v2336_v26 = vadd.f32 %v11780_v30, %v11808_v17  ;;  %v11814_v42 = vpop.f32.mrb[21].mxu1 }
 0x18b   : > { %2354 = vrot.lane.b32.xlu0 %v2336_v26, %s10844_s0  ;;  %v11817_v10 = vpop.f32.mrb[34].mxu0 }
 0x18c   : > { %17443 = vst [vmem:[#allocation33_spill] sm:$0xff] %v11817_v10  ;;  %v11819_v7 = vpop.f32.mrb[22].mxu1  ;;  %v11821_v22 = vpop.f32.mrb[35].mxu0 }
 0x18d   : > { %17444 = vst [vmem:[#allocation34_spill] sm:$0xff] %v11821_v22  ;;  %v2337_v4 = vadd.f32 %v11780_v30, %v11819_v7  ;;  %v11825_v38 = vpop.f32.mrb[23].mxu1 }
 0x18f   : > { %2356 = vrot.lane.b32.xlu1 %v2337_v4, %s10844_s0  ;;  %v11828_v46 = vpop.f32.mrb[36].mxu0 }
 0x190   : > { %17445 = vst [vmem:[#allocation35_spill] sm:$0xff] %v11828_v46  ;;  %v11830_v1 = vpop.f32.mrb[24].mxu1  ;;  %v11832_v27 = vpop.f32.mrb[37].mxu0 }
 0x191   : > { %17446 = vst [vmem:[#allocation36_spill] sm:$0xff] %v11832_v27  ;;  %v2338_v26 = vadd.f32 %v11780_v30, %v11830_v1  ;;  %v11836_v34 = vpop.f32.mrb[25].mxu1 }
 0x193   : > { %2358 = vrot.lane.b32.xlu0 %v2338_v26, %s10844_s0  ;;  %v11839_v6 = vpop.f32.mrb[38].mxu0 }
 0x194   : > { %17447 = vst [vmem:[#allocation37_spill] sm:$0xff] %v11839_v6  ;;  %v11841_v19 = vpop.f32.mrb[26].mxu1  ;;  %v11843_v13 = vpop.f32.mrb[39].mxu0 }
 0x195   : > { %17448 = vst [vmem:[#allocation38_spill] sm:$0xff] %v11843_v13  ;;  %v2339_v4 = vadd.f32 %v11780_v30, %v11841_v19  ;;  %v11847_v2 = vpop.f32.mrb[27].mxu1 }
 0x196   : > { %v2563_v13 = vadd.f32 %v11860_v48, %v11847_v2 }
 0x197   : > { %2360 = vrot.lane.b32.xlu1 %v2339_v4, %s10844_s0  ;;  %v11850_v62 = vpop.f32.mrb[40].mxu0 }
 0x198   : > { %17449 = vst [vmem:[#allocation39_spill] sm:$0xff] %v11850_v62  ;;  %v11852_v59 = vpop.f32.mrb[28].mxu1  ;;  %v11854_v55 = vpop.f32.mrb[41].mxu0 }
 0x199   : > { %17450 = vst [vmem:[#allocation40_spill] sm:$0xff] %v11854_v55  ;;  %v2340_v26 = vadd.f32 %v11780_v30, %v11852_v59  ;;  %v11858_v52 = vpop.f32.mrb[29].mxu1  ;;  %v2562_v55 = vadd.f32 %v11860_v48, %v11836_v34 }
 0x19a   : > { %v2564_v22 = vadd.f32 %v11860_v48, %v11858_v52 }
 0x19b   : > { %2362 = vrot.lane.b32.xlu0 %v2340_v26, %s10844_s0  ;;  %v11863_v45 = vpop.f32.mrb[42].mxu0 }
 0x19c   : > { %17452 = vst [vmem:[#allocation42_spill] sm:$0xff] %v11863_v45  ;;  %v11865_v60 = vpop.f32.mrb[30].mxu1  ;;  %v11867_v4 = vpop.f32.mrb[43].mxu0 }
 0x19d   : > { %17453 = vst [vmem:[#allocation43_spill] sm:$0xff] %v11867_v4  ;;  %v2341_v18 = vadd.f32 %v11780_v30, %v11865_v60  ;;  %v11873_v63 = vpop.f32.mrb[31].mxu1  ;;  %v2560_v4 = vadd.f32 %v11860_v48, %v11814_v42 }
 0x19f   : > { %2574 = vrot.lane.b32.xlu0 %v2558_v36, %s10844_s0  ;;  %2364 = vrot.lane.b32.xlu1 %v2341_v18, %s10844_s0  ;;  %v11877_v43 = vpop.f32.mrb[44].mxu0 }
 0x1a0   : > { %17454 = vst [vmem:[#allocation44_spill] sm:$0xff] %v11877_v43  ;;  %v11879_v26 = vpop.f32.mrb[45].mxu0 }
 0x1a1   : > { %17455 = vst [vmem:[#allocation45_spill] sm:$0xff] %v11879_v26  ;;  %v2561_v26 = vadd.f32 %v11860_v48, %v11825_v38 }
 0x1a3   : > { %2576 = vrot.lane.b32.xlu0 %v2559_v37, %s10844_s0  ;;  %v11884_v31 = vpop.f32.mrb[46].mxu0 }
 0x1a4   : > { %17456 = vst [vmem:[#allocation46_spill] sm:$0xff] %v11884_v31  ;;  %v11886_v24 = vpop.f32.mrb[47].mxu0 }
 0x1a5   : > { %17457 = vst [vmem:[#allocation47_spill] sm:$0xff] %v11886_v24 }
 0x1a7   : > { %2578 = vrot.lane.b32.xlu0 %v2560_v4, %s10844_s0  ;;  %v11891_v36 = vpop.f32.mrb[48].mxu0 }
 0x1a8   : > { %17458 = vst [vmem:[#allocation48_spill] sm:$0xff] %v11891_v36  ;;  %v11893_v18 = vpop.f32.mrb[49].mxu0 }
 0x1a9   : > { %17459 = vst [vmem:[#allocation49_spill] sm:$0xff] %v11893_v18 }
 0x1ab   : > { %2580 = vrot.lane.b32.xlu0 %v2561_v26, %s10844_s0  ;;  %v11900_v37 = vpop.f32.mrb[50].mxu0 }
 0x1ac   : > { %17460 = vst [vmem:[#allocation50_spill] sm:$0xff] %v11900_v37  ;;  %v11902_v24 = vpop.f32.mrb[51].mxu0  ;;  %v1180_v37 = vsub.s32 0, %v11590_v11 }
 0x1ad   : > { %17461 = vst [vmem:[#allocation51_spill] sm:$0xff] %v11902_v24 }
 0x1af   : > { %2582 = vrot.lane.b32.xlu0 %v2562_v55, %s10844_s0  ;;  %v11907_v4 = vpop.f32.mrb[52].mxu0  ;;  %v2565_v55 = vadd.f32 %v11860_v48, %v11873_v63 }
 0x1b0   : > { %17462 = vst [vmem:[#allocation52_spill] sm:$0xff] %v11907_v4  ;;  %v11909_v27 = vpop.f32.mrb[53].mxu0 }
 0x1b1   : > { %17463 = vst [vmem:[#allocation53_spill] sm:$0xff] %v11909_v27 }
 0x1b3   : > { %2584 = vrot.lane.b32.xlu0 %v2563_v13, %s10844_s0  ;;  %v11914_v25 = vpop.f32.mrb[54].mxu0 }
 0x1b4   : > { %17464 = vst [vmem:[#allocation54_spill] sm:$0xff] %v11914_v25  ;;  %v11916_v26 = vpop.f32.mrb[55].mxu0 }
 0x1b5   : > { %17465 = vst [vmem:[#allocation55_spill] sm:$0xff] %v11916_v26 }
 0x1b7   : > { %v11918_v18 = vpop.f32.mrb[56].mxu0  ;;  %2586 = vrot.lane.b32.xlu0 %v2564_v22, %s10844_s0 }
 0x1b8   : > { %17466 = vst [vmem:[#allocation56_spill] sm:$0xff] %v11918_v18  ;;  %v11923_v24 = vpop.f32.mrb[57].mxu0 }
 0x1b9   : > { %17467 = vst [vmem:[#allocation57_spill] sm:$0xff] %v11923_v24 }
 0x1bb   : > { %v11925_v4 = vpop.f32.mrb[58].mxu0  ;;  %2588 = vrot.lane.b32.xlu0 %v2565_v55, %s10844_s0  ;;  %v11946_v55 = vrot.slane %v11598_v15, %v1180_v37 }
 0x1bc   : > { %17468 = vst [vmem:[#allocation58_spill] sm:$0xff] %v11925_v4  ;;  %v11928_v27 = vpop.f32.mrb[59].mxu0 }
 0x1bd   : > { %17469 = vst [vmem:[#allocation59_spill] sm:$0xff] %v11928_v27  ;;  %17477 = vst [vmem:[#allocation67_spill] sm:$0xff] %v11946_v55 }
 0x1bf   : > { %v11930_v13 = vpop.f32.mrb[60].mxu0 }
 0x1c0   : > { %17470 = vst [vmem:[#allocation60_spill] sm:$0xff] %v11930_v13  ;;  %v11932_v25 = vpop.f32.mrb[61].mxu0 }
 0x1c1   : > { %17471 = vst [vmem:[#allocation61_spill] sm:$0xff] %v11932_v25  ;;  %v11954_v25 = vadd.f32 %v11675_v44, %v11946_v55  ;;  %v11974_v44 = vadd.f32 %v11689_v50, %v11946_v55 }
 0x1c3   : > { %v11934_v26 = vpop.f32.mrb[62].mxu0  ;;  %v2270_v11 = vadd.f32 %v11784_v33, %v11954_v25 }
 0x1c4   : > { %17472 = vst [vmem:[#allocation62_spill] sm:$0xff] %v11934_v26  ;;  %v11936_v18 = vpop.f32.mrb[63].mxu0 }
 0x1c5   : > { %17473 = vst [vmem:[#allocation63_spill] sm:$0xff] %v11936_v18  ;;  %v9250_v37 = vmul.f32 -1.442695, %v2270_v11  ;;  %v11984_v11 = vadd.f32 %v11696_v54, %v11946_v55 }
 0x1c7   : > { %v11938_v22 = vpop.f32.mrb[64].mxu0  ;;  %9873 = vpow2.f32 %v9250_v37  ;;  %v2273_v50 = vadd.f32 %v11819_v7, %v11984_v11 }
 0x1c8   : > { %17474 = vst [vmem:[#allocation64_spill] sm:$0xff] %v11938_v22  ;;  %v11941_v36 = vpop.f32.mrb[65].mxu0 }
 0x1c9   : > { %17475 = vst [vmem:[#allocation65_spill] sm:$0xff] %v11941_v36  ;;  %v9253_v37 = vmul.f32 -1.442695, %v2273_v50 }
 0x1cb   : > { %v11943_v24 = vpop.f32.mrb[66].mxu0 }
 0x1cc   : > { %17476 = vst [vmem:[#allocation66_spill] sm:$0xff] %v11943_v24  ;;  %v11948_v27 = vpop.f32.mrb[67].mxu0  ;;  %v11964_v24 = vadd.f32 %v11682_v47, %v11946_v55  ;;  %v2272_v47 = vadd.f32 %v11808_v17, %v11974_v44 }
 0x1cd   : > { %17478 = vst [vmem:[#allocation68_spill] sm:$0xff] %v11948_v27 }
 0x1cf   : > { %v11950_v13 = vpop.f32.mrb[68].mxu0 }
 0x1d0   : > { %17479 = vst [vmem:[#allocation69_spill] sm:$0xff] %v11950_v13  ;;  %v11956_v18 = vpop.f32.mrb[69].mxu0  ;;  %v2271_v13 = vadd.f32 %v11797_v53, %v11964_v24 }
 0x1d1   : > { %17480 = vst [vmem:[#allocation70_spill] sm:$0xff] %v11956_v18 }
 0x1d2   : > { %v9251_v33 = vmul.f32 -1.442695, %v2271_v13  ;;  %v11994_v13 = vadd.f32 %v11703_v57, %v11946_v55 }
 0x1d3   : > { %v11960_v22 = vpop.f32.mrb[70].mxu0 }
 0x1d4   : > { %17481 = vst [vmem:[#allocation71_spill] sm:$0xff] %v11960_v22  ;;  %v11966_v15 = vpop.f32.mrb[71].mxu0  ;;  %9875 = vpow2.f32 %v9251_v33  ;;  %v2274_v54 = vadd.f32 %v11830_v1, %v11994_v13  ;;  %v9874_v33 = vpop.eup %9873  ;;  %v12014_v1 = vadd.f32 %v11717_v0, %v11946_v55 }
 0x1d5   : > { %17482 = vst [vmem:[#allocation72_spill] sm:$0xff] %v11966_v15 }
 0x1d7   : > { %v11970_v27 = vpop.f32.mrb[72].mxu0 }
 0x1d8   : > { %17483 = vst [vmem:[#allocation73_spill] sm:$0xff] %v11970_v27  ;;  %v11976_v18 = vpop.f32.mrb[73].mxu0  ;;  %v9252_v27 = vmul.f32 -1.442695, %v2272_v47  ;;  %v12004_v47 = vadd.f32 %v11710_v61, %v11946_v55 }
 0x1d9   : > { %17484 = vst [vmem:[#allocation74_spill] sm:$0xff] %v11976_v18 }
 0x1da   : > { %9877 = vpow2.f32 %v9252_v27  ;;  %v2275_v57 = vadd.f32 %v11841_v19, %v12004_v47 }
 0x1db   : > { %v11980_v22 = vpop.f32.mrb[74].mxu0  ;;  %9879 = vpow2.f32 %v9253_v37 }
 0x1dc   : > { %17485 = vst [vmem:[#allocation75_spill] sm:$0xff] %v11980_v22  ;;  %v11986_v53 = vpop.f32.mrb[75].mxu0  ;;  %v9255_v61 = vmul.f32 -1.442695, %v2275_v57 }
 0x1dd   : > { %17486 = vst [vmem:[#allocation76_spill] sm:$0xff] %v11986_v53 }
 0x1de   : > { %v9876_v50 = vpop.eup %9875 }
 0x1df   : > { %v11990_v15 = vpop.f32.mrb[76].mxu0  ;;  %v2303_v37 = vadd.f32 1.0, %v9876_v50 }
 0x1e0   : > { %17487 = vst [vmem:[#allocation77_spill] sm:$0xff] %v11990_v15  ;;  %v11996_v17 = vpop.f32.mrb[77].mxu0  ;;  %v9254_v15 = vmul.f32 -1.442695, %v2274_v54 }
 0x1e1   : > { %17488 = vst [vmem:[#allocation78_spill] sm:$0xff] %v11996_v17  ;;  %v2302_v17 = vadd.f32 1.0, %v9874_v33  ;;  %v12024_v33 = vadd.f32 %v11726_v8, %v11946_v55 }
 0x1e2   : > { %9881 = vpow2.f32 %v9254_v15 }
 0x1e3   : > { %v12000_v22 = vpop.f32.mrb[78].mxu0  ;;  %9883 = vrcp.f32 %v2302_v17  ;;  %v2277_v15 = vadd.f32 %v11865_v60, %v12024_v33 }
 0x1e4   : > { %17489 = vst [vmem:[#allocation79_spill] sm:$0xff] %v12000_v22  ;;  %v12006_v7 = vpop.f32.mrb[79].mxu0  ;;  %v9878_v19 = vpop.eup %9877  ;;  %9885 = vpow2.f32 %v9255_v61 }
 0x1e5   : > { %17490 = vst [vmem:[#allocation80_spill] sm:$0xff] %v12006_v7  ;;  %v2276_v7 = vadd.f32 %v11852_v59, %v12014_v1  ;;  %9887 = vrcp.f32 %v2303_v37  ;;  %v2304_v57 = vadd.f32 1.0, %v9878_v19  ;;  %v9880_v59 = vpop.eup %9879  ;;  %v9257_v50 = vmul.f32 -1.442695, %v2277_v15 }
 0x1e7   : > { %v12010_v27 = vpop.f32.mrb[80].mxu0  ;;  %v9256_v0 = vmul.f32 -1.442695, %v2276_v7 }
 0x1e8   : > { %17491 = vst [vmem:[#allocation81_spill] sm:$0xff] %v12010_v27  ;;  %v12016_v22 = vpop.f32.mrb[81].mxu0 }
 0x1e9   : > { %17492 = vst [vmem:[#allocation82_spill] sm:$0xff] %v12016_v22  ;;  %9889 = vpow2.f32 %v9256_v0 }
 0x1ea   : > { %9891 = vrcp.f32 %v2304_v57 }
 0x1eb   : > { %v12020_v54 = vpop.f32.mrb[82].mxu0  ;;  %9893 = vpow2.f32 %v9257_v50 }
 0x1ec   : > { %17493 = vst [vmem:[#allocation83_spill] sm:$0xff] %v12020_v54  ;;  %v12026_v27 = vpop.f32.mrb[83].mxu0  ;;  %v2305_v54 = vadd.f32 1.0, %v9880_v59  ;;  %v9882_v18 = vpop.eup %9881 }
 0x1ed   : > { %17494 = vst [vmem:[#allocation84_spill] sm:$0xff] %v12026_v27  ;;  %v12038_v7 = vpop.eup %9883  ;;  %v2306_v37 = vadd.f32 1.0, %v9882_v18 }
 0x1ee   : > { %9895 = vrcp.f32 %v2305_v54 }
 0x1ef   : > { %v12030_v53 = vpop.f32.mrb[84].mxu0  ;;  %9897 = vrcp.f32 %v2306_v37 }
 0x1f0   : > { %17495 = vst [vmem:[#allocation85_spill] sm:$0xff] %v12030_v53  ;;  %v12032_v17 = vpop.f32.mrb[85].mxu0  ;;  %v9886_v53 = vpop.eup %9885 }
 0x1f1   : > { %17496 = vst [vmem:[#allocation86_spill] sm:$0xff] %v12032_v17  ;;  %v12046_v15 = vpop.eup %9887 }
 0x1f3   : > { %v12034_v8 = vpop.f32.mrb[86].mxu0  ;;  %v9890_v50 = vpop.eup %9889 }
 0x1f4   : > { %17497 = vst [vmem:[#allocation87_spill] sm:$0xff] %v12034_v8  ;;  %v12036_v26 = vpop.f32.mrb[87].mxu0  ;;  %v2307_v8 = vadd.f32 1.0, %v9886_v53  ;;  %v12054_v54 = vpop.eup %9891 }
 0x1f5   : > { %17498 = vst [vmem:[#allocation88_spill] sm:$0xff] %v12036_v26  ;;  %v2351_v61 = vpop.permute.xlu1 %2350 }
 0x1f6   : > { %v2374_v60 = vmul.f32 %v12038_v7, %v2351_v61  ;;  %9899 = vrcp.f32 %v2307_v8 }
 0x1f7   : > { %v12041_v19 = vpop.f32.mrb[88].mxu0 }
 0x1f8   : > { %17499 = vst [vmem:[#allocation89_spill] sm:$0xff] %v12041_v19  ;;  %2390 = vrot.lane.b32.xlu1 %v2374_v60, %s10844_s0  ;;  %v12044_v0 = vpop.f32.mrb[89].mxu0  ;;  %v2308_v19 = vadd.f32 1.0, %v9890_v50 }
 0x1f9   : > { %17500 = vst [vmem:[#allocation90_spill] sm:$0xff] %v12044_v0  ;;  %v2353_v57 = vpop.permute.xlu1 %2352  ;;  %v9894_v0 = vpop.eup %9893 }
 0x1fa   : > { %v2375_v59 = vmul.f32 %v12046_v15, %v2353_v57  ;;  %v12062_v37 = vpop.eup %9895  ;;  %9901 = vrcp.f32 %v2308_v19 }
 0x1fb   : > { %v12049_v36 = vpop.f32.mrb[90].mxu0  ;;  %v12070_v50 = vpop.eup %9897 }
 0x1fc   : > { %17501 = vst [vmem:[#allocation91_spill] sm:$0xff] %v12049_v36  ;;  %2392 = vrot.lane.b32.xlu1 %v2375_v59, %s10844_s0  ;;  %v12052_v18 = vpop.f32.mrb[91].mxu0  ;;  %v2309_v36 = vadd.f32 1.0, %v9894_v0 }
 0x1fd   : > { %17502 = vst [vmem:[#allocation92_spill] sm:$0xff] %v12052_v18  ;;  %v2355_v61 = vpop.permute.xlu0 %2354 }
 0x1fe   : > { %v2376_v60 = vmul.f32 %v12054_v54, %v2355_v61  ;;  %9903 = vrcp.f32 %v2309_v36 }
 0x1ff   : > { %v12057_v4 = vpop.f32.mrb[92].mxu0 }
 0x200   : > { %17503 = vst [vmem:[#allocation93_spill] sm:$0xff] %v12057_v4  ;;  %2394 = vrot.lane.b32.xlu1 %v2376_v60, %s10844_s0  ;;  %v12060_v53 = vpop.f32.mrb[93].mxu0  ;;  %v12078_v19 = vpop.eup %9899 }
 0x201   : > { %17504 = vst [vmem:[#allocation94_spill] sm:$0xff] %v12060_v53  ;;  %v2357_v57 = vpop.permute.xlu1 %2356 }
 0x202   : > { %v2377_v59 = vmul.f32 %v12062_v37, %v2357_v57 }
 0x203   : > { %v12065_v18 = vpop.f32.mrb[94].mxu0 }
 0x204   : > { %17505 = vst [vmem:[#allocation95_spill] sm:$0xff] %v12065_v18  ;;  %2396 = vrot.lane.b32.xlu1 %v2377_v59, %s10844_s0  ;;  %v12068_v8 = vpop.f32.mrb[95].mxu0 }
 0x205   : > { %17506 = vst [vmem:[#allocation96_spill] sm:$0xff] %v12068_v8  ;;  %v2359_v61 = vpop.permute.xlu0 %2358  ;;  %v12086_v8 = vpop.eup %9901 }
 0x206   : > { %v2378_v60 = vmul.f32 %v12070_v50, %v2359_v61 }
 0x207   : > { %v12073_v4 = vpop.f32.mrb[96].mxu0 }
 0x208   : > { %17507 = vst [vmem:[#allocation97_spill] sm:$0xff] %v12073_v4  ;;  %2398 = vrot.lane.b32.xlu1 %v2378_v60, %s10844_s0  ;;  %v12076_v53 = vpop.f32.mrb[97].mxu0  ;;  %v12094_v26 = vpop.eup %9903 }
 0x209   : > { %v2361_v0 = vpop.permute.xlu1 %2360 }
 0x20a   : > { %v2379_v57 = vmul.f32 %v12078_v19, %v2361_v0 }
 0x20b   : > { %v12081_v59 = vpop.f32.mrb[98].mxu0 }
 0x20c   : > { %17508 = vst [vmem:[#allocation98_spill] sm:$0xff] %v12081_v59  ;;  %2400 = vrot.lane.b32.xlu1 %v2379_v57, %s10844_s0  ;;  %v12084_v18 = vpop.f32.mrb[99].mxu0 }
 0x20d   : > { %17509 = vst [vmem:[#allocation99_spill] sm:$0xff] %v12084_v18  ;;  %v2363_v36 = vpop.permute.xlu0 %2362 }
 0x20e   : > { %v2380_v61 = vmul.f32 %v12086_v8, %v2363_v36 }
 0x20f   : > { %v12089_v4 = vpop.f32.mrb[100].mxu0 }
 0x210   : > { %17510 = vst [vmem:[#allocation100_spill] sm:$0xff] %v12089_v4  ;;  %2402 = vrot.lane.b32.xlu1 %v2380_v61, %s10844_s0  ;;  %v12092_v60 = vpop.f32.mrb[101].mxu0 }
 0x211   : > { %17511 = vst [vmem:[#allocation101_spill] sm:$0xff] %v12092_v60  ;;  %v2365_v0 = vpop.permute.xlu1 %2364 }
 0x212   : > { %v2381_v59 = vmul.f32 %v12094_v26, %v2365_v0 }
 0x213   : > { %v12097_v17 = vpop.f32.mrb[102].mxu0 }
 0x214   : > { %17512 = vst [vmem:[#allocation102_spill] sm:$0xff] %v12097_v17  ;;  %2404 = vrot.lane.b32.xlu1 %v2381_v59, %s10844_s0  ;;  %v12100_v57 = vpop.f32.mrb[103].mxu0 }
 0x215   : > { %17513 = vst [vmem:[#allocation103_spill] sm:$0xff] %v12100_v57 }
 0x217   : > { %v12102_v27 = vpop.f32.mrb[104].mxu0 }
 0x218   : > { %17514 = vst [vmem:[#allocation104_spill] sm:$0xff] %v12102_v27  ;;  %v12104_v36 = vpop.f32.mrb[105].mxu0 }
 0x219   : > { %17515 = vst [vmem:[#allocation105_spill] sm:$0xff] %v12104_v36 }
 0x21b   : > { %v12106_v4 = vpop.f32.mrb[106].mxu0 }
 0x21c   : > { %17516 = vst [vmem:[#allocation106_spill] sm:$0xff] %v12106_v4  ;;  %v12108_v61 = vpop.f32.mrb[107].mxu0 }
 0x21d   : > { %17517 = vst [vmem:[#allocation107_spill] sm:$0xff] %v12108_v61 }
 0x21f   : > { %v12110_v31 = vpop.f32.mrb[108].mxu0 }
 0x220   : > { %17518 = vst [vmem:[#allocation108_spill] sm:$0xff] %v12110_v31  ;;  %v12112_v22 = vpop.f32.mrb[109].mxu0 }
 0x221   : > { %17519 = vst [vmem:[#allocation109_spill] sm:$0xff] %v12112_v22 }
 0x223   : > { %v12114_v43 = vpop.f32.mrb[110].mxu0 }
 0x224   : > { %17520 = vst [vmem:[#allocation110_spill] sm:$0xff] %v12114_v43  ;;  %v12116_v0 = vpop.f32.mrb[111].mxu0 }
 0x225   : > { %17521 = vst [vmem:[#allocation111_spill] sm:$0xff] %v12116_v0 }
 0x227   : > { %v12118_v17 = vpop.f32.mrb[112].mxu0 }
 0x228   : > { %17522 = vst [vmem:[#allocation112_spill] sm:$0xff] %v12118_v17  ;;  %v1785_v59 = vpop.f32.mrb[113].mxu0 }
 0x229   : > { %v12121_v45 = vadd.f32 %v1785_v59, %v11602_v16 }
 0x22b   : > { %v2494_v27 = vadd.f32 %v11790_v39, %v12121_v45  ;;  %v12125_v4 = vpop.f32.mrb[114].mxu0 }
 0x22c   : > { %17523 = vst [vmem:[#allocation113_spill] sm:$0xff] %v12125_v4  ;;  %v1791_v62 = vpop.f32.mrb[115].mxu0 }
 0x22d   : > { %v9259_v6 = vmul.f32 -1.442695, %v2494_v27  ;;  %v12128_v31 = vadd.f32 %v1791_v62, %v11602_v16 }
 0x22f   : > { %9905 = vpow2.f32 %v9259_v6  ;;  %v2495_v43 = vadd.f32 %v11803_v5, %v12128_v31  ;;  %v12132_v46 = vpop.f32.mrb[116].mxu0 }
 0x230   : > { %17524 = vst [vmem:[#allocation114_spill] sm:$0xff] %v12132_v46  ;;  %v1797_v17 = vpop.f32.mrb[117].mxu0 }
 0x231   : > { %v9260_v10 = vmul.f32 -1.442695, %v2495_v43  ;;  %v12135_v59 = vadd.f32 %v1797_v17, %v11602_v16 }
 0x233   : > { %9907 = vpow2.f32 %v9260_v10  ;;  %v2496_v39 = vadd.f32 %v11814_v42, %v12135_v59  ;;  %v12139_v4 = vpop.f32.mrb[118].mxu0  ;;  %v2575_v42 = vpop.permute.xlu0 %2574 }
 0x234   : > { %17525 = vst [vmem:[#allocation115_spill] sm:$0xff] %v12139_v4  ;;  %v1803_v27 = vpop.f32.mrb[119].mxu0 }
 0x235   : > { %v9261_v62 = vmul.f32 -1.442695, %v2496_v39  ;;  %v12142_v6 = vadd.f32 %v1803_v27, %v11602_v16 }
 0x237   : > { %9909 = vpow2.f32 %v9261_v62  ;;  %v2497_v5 = vadd.f32 %v11825_v38, %v12142_v6  ;;  %v12146_v46 = vpop.f32.mrb[120].mxu0 }
 0x238   : > { %17526 = vst [vmem:[#allocation116_spill] sm:$0xff] %v12146_v46  ;;  %v1809_v43 = vpop.f32.mrb[121].mxu0 }
 0x239   : > { %v9906_v17 = vpop.eup %9905  ;;  %v9262_v41 = vmul.f32 -1.442695, %v2497_v5  ;;  %v12149_v10 = vadd.f32 %v1809_v43, %v11602_v16 }
 0x23a   : > { %v2526_v0 = vadd.f32 1.0, %v9906_v17 }
 0x23b   : > { %9911 = vpow2.f32 %v9262_v41  ;;  %v2498_v39 = vadd.f32 %v11836_v34, %v12149_v10  ;;  %v12153_v27 = vpop.f32.mrb[122].mxu0  ;;  %v2577_v41 = vpop.permute.xlu0 %2576 }
 0x23c   : > { %17527 = vst [vmem:[#allocation117_spill] sm:$0xff] %v12153_v27  ;;  %9913 = vrcp.f32 %v2526_v0  ;;  %v1815_v62 = vpop.f32.mrb[123].mxu0 }
 0x23d   : > { %v9908_v4 = vpop.eup %9907  ;;  %v9263_v38 = vmul.f32 -1.442695, %v2498_v39  ;;  %v12156_v46 = vadd.f32 %v1815_v62, %v11602_v16 }
 0x23e   : > { %v2527_v22 = vadd.f32 1.0, %v9908_v4 }
 0x23f   : > { %9915 = vpow2.f32 %v9263_v38  ;;  %v2499_v5 = vadd.f32 %v11847_v2, %v12156_v46  ;;  %v12160_v43 = vpop.f32.mrb[124].mxu0 }
 0x240   : > { %17528 = vst [vmem:[#allocation118_spill] sm:$0xff] %v12160_v43  ;;  %9917 = vrcp.f32 %v2527_v22  ;;  %v1821_v17 = vpop.f32.mrb[125].mxu0 }
 0x241   : > { %v9910_v34 = vpop.eup %9909  ;;  %v9264_v61 = vmul.f32 -1.442695, %v2499_v5  ;;  %v12163_v0 = vadd.f32 %v1821_v17, %v11602_v16  ;;  %v2579_v5 = vpop.permute.xlu0 %2578 }
 0x242   : > { %v2528_v27 = vadd.f32 1.0, %v9910_v34 }
 0x243   : > { %9919 = vpow2.f32 %v9264_v61  ;;  %v2500_v39 = vadd.f32 %v11858_v52, %v12163_v0  ;;  %v12167_v4 = vpop.f32.mrb[126].mxu0 }
 0x244   : > { %17529 = vst [vmem:[#allocation119_spill] sm:$0xff] %v12167_v4  ;;  %9921 = vrcp.f32 %v2528_v27  ;;  %v1827_v62 = vpop.f32.mrb[127].mxu0 }
 0x245   : > { %v9912_v2 = vpop.eup %9911  ;;  %v9265_v38 = vmul.f32 -1.442695, %v2500_v39  ;;  %v12170_v43 = vadd.f32 %v1827_v62, %v11602_v16  ;;  %v2581_v4 = vpop.permute.xlu0 %2580 }
 0x246   : > { %v12172_v22 = vpop.eup %9913  ;;  %v2529_v36 = vadd.f32 1.0, %v9912_v2 }
 0x247   : > { %9923 = vpow2.f32 %v9265_v38  ;;  %v2501_v61 = vadd.f32 %v11873_v63, %v12170_v43  ;;  %v2598_v17 = vmul.f32 %v12172_v22, %v2575_v42 }
 0x248   : > { %9925 = vrcp.f32 %v2529_v36 }
 0x249   : > { %v9916_v52 = vpop.eup %9915  ;;  %v9266_v34 = vmul.f32 -1.442695, %v2501_v61  ;;  %2614 = vrot.lane.b32.xlu0 %v2598_v17, %s10844_s0  ;;  %v2583_v42 = vpop.permute.xlu0 %2582 }
 0x24a   : > { %v12178_v27 = vpop.eup %9917  ;;  %v2530_v39 = vadd.f32 1.0, %v9916_v52 }
 0x24b   : > { %9927 = vpow2.f32 %v9266_v34  ;;  %v2599_v62 = vmul.f32 %v12178_v27, %v2577_v41 }
 0x24c   : > { %9929 = vrcp.f32 %v2530_v39 }
 0x24d   : > { %v9920_v2 = vpop.eup %9919  ;;  %2616 = vrot.lane.b32.xlu1 %v2599_v62, %s10844_s0  ;;  %v2585_v62 = vpop.permute.xlu0 %2584 }
 0x24e   : > { %v12182_v38 = vpop.eup %9921  ;;  %v2531_v63 = vadd.f32 1.0, %v9920_v2 }
 0x24f   : > { %v2600_v36 = vmul.f32 %v12182_v38, %v2579_v5 }
 0x250   : > { %9931 = vrcp.f32 %v2531_v63 }
 0x251   : > { %v9924_v61 = vpop.eup %9923  ;;  %2618 = vrot.lane.b32.xlu0 %v2600_v36, %s10844_s0  ;;  %v2587_v36 = vpop.permute.xlu0 %2586 }
 0x252   : > { %v12186_v17 = vpop.eup %9925  ;;  %v2532_v52 = vadd.f32 1.0, %v9924_v61 }
 0x253   : > { %v2601_v41 = vmul.f32 %v12186_v17, %v2581_v4 }
 0x254   : > { %9933 = vrcp.f32 %v2532_v52 }
 0x255   : > { %v9928_v34 = vpop.eup %9927  ;;  %2620 = vrot.lane.b32.xlu1 %v2601_v41, %s10844_s0  ;;  %v2589_v41 = vpop.permute.xlu0 %2588 }
 0x256   : > { %v12190_v39 = vpop.eup %9929  ;;  %v2533_v2 = vadd.f32 1.0, %v9928_v34 }
 0x257   : > { %v2602_v5 = vmul.f32 %v12190_v39, %v2583_v42 }
 0x258   : > { %9935 = vrcp.f32 %v2533_v2 }
 0x259   : > { %2622 = vrot.lane.b32.xlu1 %v2602_v5, %s10844_s0 }
 0x25a   : > { %v12194_v63 = vpop.eup %9931 }
 0x25b   : > { %v2603_v61 = vmul.f32 %v12194_v63, %v2585_v62 }
 0x25d   : > { %2624 = vrot.lane.b32.xlu1 %v2603_v61, %s10844_s0 }
 0x25e   : > { %v12198_v4 = vpop.eup %9933 }
 0x25f   : > { %v2604_v52 = vmul.f32 %v12198_v4, %v2587_v36 }
 0x261   : > { %2626 = vrot.lane.b32.xlu1 %v2604_v52, %s10844_s0 }
 0x262   : > { %v12202_v34 = vpop.eup %9935 }
 0x263   : > { %v2605_v42 = vmul.f32 %v12202_v34, %v2589_v41 }
 0x265   : > { %2628 = vrot.lane.b32.xlu1 %v2605_v42, %s10844_s0 }
 0x26a   : > { %v2391_v2 = vpop.permute.xlu1 %2390 }
 0x26b   : > { %v2414_v5 = vadd.f32 %v2391_v2, %v11954_v25 }
 0x26d   : > { %9937 = vtanh.f32 %v2414_v5 }
 0x26e   : > { %v2393_v62 = vpop.permute.xlu1 %2392 }
 0x26f   : > { %v2415_v61 = vadd.f32 %v2393_v62, %v11964_v24 }
 0x271   : > { %9939 = vtanh.f32 %v2415_v61 }
 0x272   : > { %v2395_v57 = vpop.permute.xlu1 %2394 }
 0x273   : > { %v2416_v36 = vadd.f32 %v2395_v57, %v11974_v44 }
 0x275   : > { %9941 = vtanh.f32 %v2416_v36 }
 0x276   : > { %v2397_v60 = vpop.permute.xlu1 %2396 }
 0x277   : > { %v9938_v52 = vpop.eup %9937  ;;  %v2417_v18 = vadd.f32 %v2397_v60, %v11984_v11 }
 0x278   : > { %2446 = vrot.lane.b32.xlu0 %v9938_v52, %s10845_s18 }
 0x279   : > { %9943 = vtanh.f32 %v2417_v18 }
 0x27a   : > { %v2399_v41 = vpop.permute.xlu1 %2398 }
 0x27b   : > { %v9940_v42 = vpop.eup %9939  ;;  %v2418_v25 = vadd.f32 %v2399_v41, %v11994_v13 }
 0x27c   : > { %2448 = vrot.lane.b32.xlu0 %v9940_v42, %s10845_s18 }
 0x27d   : > { %9945 = vtanh.f32 %v2418_v25 }
 0x27e   : > { %v2401_v24 = vpop.permute.xlu1 %2400 }
 0x27f   : > { %v9942_v2 = vpop.eup %9941  ;;  %v2419_v44 = vadd.f32 %v2401_v24, %v12004_v47 }
 0x280   : > { %2450 = vrot.lane.b32.xlu0 %v9942_v2, %s10845_s18 }
 0x281   : > { %9947 = vtanh.f32 %v2419_v44 }
 0x282   : > { %v2403_v57 = vpop.permute.xlu1 %2402 }
 0x283   : > { %v9944_v11 = vpop.eup %9943  ;;  %v2420_v60 = vadd.f32 %v2403_v57, %v12014_v1 }
 0x284   : > { %2452 = vrot.lane.b32.xlu0 %v9944_v11, %s10845_s18 }
 0x285   : > { %9949 = vtanh.f32 %v2420_v60 }
 0x286   : > { %v2405_v18 = vpop.permute.xlu1 %2404 }
 0x287   : > { %v9946_v5 = vpop.eup %9945  ;;  %v2421_v13 = vadd.f32 %v2405_v18, %v12024_v33 }
 0x288   : > { %2454 = vrot.lane.b32.xlu0 %v9946_v5, %s10845_s18 }
 0x289   : > { %9951 = vtanh.f32 %v2421_v13 }
 0x28b   : > { %v9948_v62 = vpop.eup %9947 }
 0x28c   : > { %2456 = vrot.lane.b32.xlu1 %v9948_v62, %s10845_s18 }
 0x28f   : > { %v9950_v47 = vpop.eup %9949 }
 0x290   : > { %2458 = vrot.lane.b32.xlu0 %v9950_v47, %s10845_s18 }
 0x293   : > { %v9952_v61 = vpop.eup %9951 }
 0x294   : > { %2460 = vrot.lane.b32.xlu1 %v9952_v61, %s10845_s18 }
 0x2bb   : > { %v2615_v1 = vpop.permute.xlu0 %2614 }
 0x2bc   : > { %v2638_v36 = vadd.f32 %v2615_v1, %v12121_v45  ;;  %v2478_v1 = vmul.f32 0.0, %v12038_v7 }
 0x2be   : > { %9953 = vtanh.f32 %v2638_v36 }
 0x2bf   : > { %v2617_v52 = vpop.permute.xlu1 %2616 }
 0x2c0   : > { %v2639_v41 = vadd.f32 %v2617_v52, %v12128_v31 }
 0x2c2   : > { %9955 = vtanh.f32 %v2639_v41 }
 0x2c3   : > { %v2619_v33 = vpop.permute.xlu0 %2618 }
 0x2c4   : > { %v2640_v42 = vadd.f32 %v2619_v33, %v12135_v59  ;;  %v2479_v33 = vmul.f32 0.0, %v12046_v15 }
 0x2c6   : > { %9957 = vtanh.f32 %v2640_v42 }
 0x2c7   : > { %v2621_v25 = vpop.permute.xlu1 %2620 }
 0x2c8   : > { %v9954_v24 = vpop.eup %9953  ;;  %v2641_v2 = vadd.f32 %v2621_v25, %v12142_v6 }
 0x2c9   : > { %2670 = vrot.lane.b32.xlu0 %v9954_v24, %s10845_s18  ;;  %v2432_v24 = vsub.f32 1.0, %v12054_v54 }
 0x2ca   : > { %9959 = vtanh.f32 %v2641_v2 }
 0x2cb   : > { %v2623_v44 = vpop.permute.xlu1 %2622 }
 0x2cc   : > { %v9956_v57 = vpop.eup %9955  ;;  %v2642_v45 = vadd.f32 %v2623_v44, %v12149_v10  ;;  %v2480_v44 = vmul.f32 0.0, %v12054_v54 }
 0x2cd   : > { %2672 = vrot.lane.b32.xlu1 %v9956_v57, %s10845_s18 }
 0x2ce   : > { %9961 = vtanh.f32 %v2642_v45  ;;  %v2433_v45 = vsub.f32 1.0, %v12062_v37 }
 0x2cf   : > { %v2625_v31 = vpop.permute.xlu1 %2624 }
 0x2d0   : > { %v9958_v11 = vpop.eup %9957  ;;  %v2643_v60 = vadd.f32 %v2625_v31, %v12156_v46  ;;  %v2481_v31 = vmul.f32 0.0, %v12062_v37 }
 0x2d1   : > { %2674 = vrot.lane.b32.xlu1 %v9958_v11, %s10845_s18 }
 0x2d2   : > { %9963 = vtanh.f32 %v2643_v60 }
 0x2d3   : > { %v2627_v59 = vpop.permute.xlu1 %2626 }
 0x2d4   : > { %v9960_v18 = vpop.eup %9959  ;;  %v2644_v6 = vadd.f32 %v2627_v59, %v12163_v0  ;;  %v2430_v0 = vsub.f32 1.0, %v12038_v7  ;;  %v2434_v59 = vsub.f32 1.0, %v12070_v50 }
 0x2d5   : > { %2676 = vrot.lane.b32.xlu1 %v9960_v18, %s10845_s18  ;;  %v2482_v18 = vmul.f32 0.0, %v12070_v50 }
 0x2d6   : > { %9965 = vtanh.f32 %v2644_v6 }
 0x2d7   : > { %v2629_v5 = vpop.permute.xlu1 %2628 }
 0x2d8   : > { %v9962_v13 = vpop.eup %9961  ;;  %v2645_v10 = vadd.f32 %v2629_v5, %v12170_v43  ;;  %v2431_v43 = vsub.f32 1.0, %v12046_v15 }
 0x2d9   : > { %2678 = vrot.lane.b32.xlu1 %v9962_v13, %s10845_s18  ;;  %v2435_v13 = vsub.f32 1.0, %v12078_v19 }
 0x2da   : > { %9967 = vtanh.f32 %v2645_v10  ;;  %v2483_v10 = vmul.f32 0.0, %v12078_v19 }
 0x2dc   : > { %v9964_v62 = vpop.eup %9963 }
 0x2dd   : > { %2680 = vrot.lane.b32.xlu1 %v9964_v62, %s10845_s18 }
 0x2e0   : > { %v9966_v46 = vpop.eup %9965 }
 0x2e1   : > { %2682 = vrot.lane.b32.xlu1 %v9966_v46, %s10845_s18 }
 0x2e4   : > { %v9968_v47 = vpop.eup %9967 }
 0x2e5   : > { %2684 = vrot.lane.b32.xlu1 %v9968_v47, %s10845_s18  ;;  %v2436_v47 = vsub.f32 1.0, %v12086_v8 }
 0x2ea   : > { %v2447_v61 = vpop.permute.xlu0 %2446 }
 0x2eb   : > { %v2470_v36 = vmul.f32 %v2447_v61, %v2430_v0  ;;  %v2484_v0 = vmul.f32 0.0, %v12086_v8 }
 0x2ed   : > { %v12240_v52 = vadd.f32 %v2478_v1, %v2470_v36  ;;  %v2437_v36 = vsub.f32 1.0, %v12094_v26 }
 0x2ee   : > { %v2449_v41 = vpop.permute.xlu0 %2448 }
 0x2ef   : > { %v2471_v42 = vmul.f32 %v2449_v41, %v2431_v43  ;;  %2726 = vrot.lane.b32.xlu0 %v12240_v52, %s10845_s18  ;;  %v2485_v43 = vmul.f32 0.0, %v12094_v26  ;;  %v2655_v26 = vsub.f32 1.0, %v12178_v27 }
 0x2f1   : > { %v12246_v25 = vadd.f32 %v2479_v33, %v2471_v42 }
 0x2f2   : > { %v2451_v2 = vpop.permute.xlu0 %2450 }
 0x2f3   : > { %v2472_v7 = vmul.f32 %v2451_v2, %v2432_v24  ;;  %2728 = vrot.lane.b32.xlu0 %v12246_v25, %s10845_s18  ;;  %v2654_v2 = vsub.f32 1.0, %v12172_v22 }
 0x2f5   : > { %v12252_v57 = vadd.f32 %v2480_v44, %v2472_v7 }
 0x2f6   : > { %v2453_v15 = vpop.permute.xlu0 %2452 }
 0x2f7   : > { %v2473_v11 = vmul.f32 %v2453_v15, %v2433_v45  ;;  %2730 = vrot.lane.b32.xlu0 %v12252_v57, %s10845_s18  ;;  %v2702_v45 = vmul.f32 0.0, %v12172_v22 }
 0x2f9   : > { %v12258_v60 = vadd.f32 %v2481_v31, %v2473_v11 }
 0x2fa   : > { %v2455_v54 = vpop.permute.xlu0 %2454 }
 0x2fb   : > { %v2474_v6 = vmul.f32 %v2455_v54, %v2434_v59  ;;  %2732 = vrot.lane.b32.xlu0 %v12258_v60, %s10845_s18  ;;  %v2703_v59 = vmul.f32 0.0, %v12178_v27  ;;  %v2656_v54 = vsub.f32 1.0, %v12182_v38  ;;  %v2704_v27 = vmul.f32 0.0, %v12182_v38 }
 0x2fc   : > { %v2705_v38 = vmul.f32 0.0, %v12186_v17 }
 0x2fd   : > { %v12264_v5 = vadd.f32 %v2482_v18, %v2474_v6 }
 0x2fe   : > { %v2457_v37 = vpop.permute.xlu1 %2456 }
 0x2ff   : > { %v2475_v62 = vmul.f32 %v2457_v37, %v2435_v13  ;;  %2734 = vrot.lane.b32.xlu0 %v12264_v5, %s10845_s18  ;;  %v17533_v37 = vmov 0.0  }
 0x301   : > { %v12270_v46 = vadd.f32 %v2483_v10, %v2475_v62  ;;  %v2657_v62 = vsub.f32 1.0, %v12186_v17  ;;  %v2706_v17 = vmul.f32 0.0, %v12190_v39 }
 0x302   : > { %v2459_v50 = vpop.permute.xlu0 %2458 }
 0x303   : > { %v2476_v61 = vmul.f32 %v2459_v50, %v2436_v47  ;;  %2736 = vrot.lane.b32.xlu0 %v12270_v46, %s10845_s18 }
 0x305   : > { %v12276_v1 = vadd.f32 %v2484_v0, %v2476_v61 }
 0x306   : > { %v2461_v19 = vpop.permute.xlu1 %2460 }
 0x307   : > { %v2477_v41 = vmul.f32 %v2461_v19, %v2437_v36  ;;  %2738 = vrot.lane.b32.xlu0 %v12276_v1, %s10845_s18  ;;  %v2658_v19 = vsub.f32 1.0, %v12190_v39  ;;  %v2707_v39 = vmul.f32 0.0, %v12194_v63 }
 0x309   : > { %v12282_v33 = vadd.f32 %v2485_v43, %v2477_v41 }
 0x30b   : > { %2740 = vrot.lane.b32.xlu1 %v12282_v33, %s10845_s18 }
 0x33b   : > { %v2671_v24 = vpop.permute.xlu0 %2670 }
 0x33c   : > { %v2694_v44 = vmul.f32 %v2671_v24, %v2654_v2  ;;  %v2659_v24 = vsub.f32 1.0, %v12194_v63  ;;  %v2661_v63 = vsub.f32 1.0, %v12202_v34 }
 0x33e   : > { %v12289_v15 = vadd.f32 %v2702_v45, %v2694_v44 }
 0x33f   : > { %v2673_v8 = vpop.permute.xlu1 %2672 }
 0x340   : > { %17530 = vst [vmem:[#allocation120_spill] sm:$0xff] %v12289_v15  ;;  %v2695_v31 = vmul.f32 %v2673_v8, %v2655_v26 }
 0x342   : > { %v12299_v22 = vadd.f32 %v2703_v59, %v2695_v31  ;;  %v2660_v31 = vsub.f32 1.0, %v12198_v4 }
 0x343   : > { %v2675_v42 = vpop.permute.xlu1 %2674 }
 0x344   : > { %17532 = vst [vmem:[#allocation122_spill] sm:$0xff] %v12299_v22  ;;  %v2696_v13 = vmul.f32 %v2675_v42, %v2656_v54 }
 0x346   : > { %v12312_v50 = vadd.f32 %v2704_v27, %v2696_v13  ;;  %v2708_v27 = vmul.f32 0.0, %v12198_v4 }
 0x347   : > { %v2677_v7 = vpop.permute.xlu1 %2676 }
 0x348   : > { %17535 = vst [vmem:[#allocation124_spill] sm:$0xff] %v12312_v50  ;;  %v2697_v0 = vmul.f32 %v2677_v7, %v2657_v62 }
 0x34a   : > { %v12325_v41 = vadd.f32 %v2705_v38, %v2697_v0  ;;  %v2709_v38 = vmul.f32 0.0, %v12202_v34 }
 0x34b   : > { %v2679_v6 = vpop.permute.xlu1 %2678 }
 0x34c   : > { %17537 = vst [vmem:[#allocation126_spill] sm:$0xff] %v12325_v41  ;;  %v2698_v8 = vmul.f32 %v2679_v6, %v2658_v19 }
 0x34e   : > { %v12338_v7 = vadd.f32 %v2706_v17, %v2698_v8 }
 0x34f   : > { %v2681_v61 = vpop.permute.xlu1 %2680 }
 0x350   : > { %17539 = vst [vmem:[#allocation128_spill] sm:$0xff] %v12338_v7  ;;  %v2699_v45 = vmul.f32 %v2681_v61, %v2659_v24 }
 0x352   : > { %v12351_v54 = vadd.f32 %v2707_v39, %v2699_v45 }
 0x353   : > { %v2683_v44 = vpop.permute.xlu1 %2682 }
 0x354   : > { %17541 = vst [vmem:[#allocation130_spill] sm:$0xff] %v12351_v54 }
 0x357   : > { %v2685_v6 = vpop.permute.xlu1 %2684 }
 0x358   : > { %v2701_v0 = vmul.f32 %v2685_v6, %v2661_v63 }
 0x35a   : > { %v12372_v19 = vadd.f32 %v2709_v38, %v2701_v0 }
 0x35c   : > { %17545 = vst [vmem:[#allocation134_spill] sm:$0xff] %v12372_v19 }
 0x361   : > { %v12291_v11 = vpop.permute.xlu0 %2726 }
 0x362   : > { %17531 = vst [vmem:[#allocation121_spill] sm:$0xff] %v12291_v11  ;;  %v2750_v18 = vsel %vm1188_vm0, %v12291_v11, %v12289_v15 }
 0x363   : > { %9268 = vmatmul.mubr.msk.f32.vlgmr.msra.gmra.mrb[32].mxu1 %vm17359_vm1, %v2750_v18  ;;  %v2700_v18 = vmul.f32 %v2683_v44, %v2660_v31 }
 0x364   : > { %2852 = vmatprep.mubr.f32.mxu1 %v17533_v37  ;;  %9702 = vmatpush1.bf16.msra.mxu1 %v11372_v58 }
 0x365   : > { %v12303_v10 = vpop.permute.xlu0 %2728  ;;  %9704 = vmatprep.subr.bf16.mxu1 %v11399_v3 }
 0x366   : > { %17534 = vst [vmem:[#allocation123_spill] sm:$0xff] %v12303_v10  ;;  %v2751_v47 = vsel %vm1188_vm0, %v12303_v10, %v12299_v22 }
 0x367   : > { %9269 = vmatmul.mubr.msk.f32.gmra.mrb[34].mxu1 %vm17359_vm1, %v2751_v47  ;;  %v12362_v47 = vadd.f32 %v2708_v27, %v2700_v18 }
 0x368   : > { %2858 = vmatprep.mubr.f32.mxu1 %v17533_v37  ;;  %9706 = vmatpush1.bf16.msra.mxu1 %v11410_v9 }
 0x369   : > { %v12316_v36 = vpop.permute.xlu0 %2730  ;;  %9708 = vmatprep.subr.bf16.mxu1 %v11425_v14  ;;  %17543 = vst [vmem:[#allocation132_spill] sm:$0xff] %v12362_v47 }
 0x36a   : > { %17536 = vst [vmem:[#allocation125_spill] sm:$0xff] %v12316_v36  ;;  %v2752_v43 = vsel %vm1188_vm0, %v12316_v36, %v12312_v50 }
 0x36b   : > { %9270 = vmatmul.mubr.msk.f32.gmra.mrb[36].mxu1 %vm17359_vm1, %v2752_v43 }
 0x36c   : > { %2864 = vmatprep.mubr.f32.mxu1 %v17533_v37  ;;  %9710 = vmatpush1.bf16.msra.mxu1 %v11437_v20 }
 0x36d   : > { %v12329_v42 = vpop.permute.xlu0 %2732  ;;  %9712 = vmatprep.subr.bf16.mxu1 %v11447_v23 }
 0x36e   : > { %17538 = vst [vmem:[#allocation127_spill] sm:$0xff] %v12329_v42  ;;  %v2753_v2 = vsel %vm1188_vm0, %v12329_v42, %v12325_v41 }
 0x36f   : > { %9271 = vmatmul.mubr.msk.f32.gmra.mrb[38].mxu1 %vm17359_vm1, %v2753_v2 }
 0x370   : > { %2870 = vmatprep.mubr.f32.mxu1 %v17533_v37  ;;  %9714 = vmatpush1.bf16.msra.mxu1 %v11459_v28 }
 0x371   : > { %v12342_v26 = vpop.permute.xlu0 %2734  ;;  %9716 = vmatprep.subr.bf16.mxu1 %v11357_v51 }
 0x372   : > { %17540 = vst [vmem:[#allocation129_spill] sm:$0xff] %v12342_v26  ;;  %v2754_v59 = vsel %vm1188_vm0, %v12342_v26, %v12338_v7 }
 0x373   : > { %9272 = vmatmul.mubr.msk.f32.gmra.mrb[40].mxu1 %vm17359_vm1, %v2754_v59 }
 0x374   : > { %2876 = vmatprep.mubr.f32.mxu1 %v17533_v37 }
 0x375   : > { %v12354_v13 = vpop.permute.xlu0 %2736 }
 0x376   : > { %17542 = vst [vmem:[#allocation131_spill] sm:$0xff] %v12354_v13  ;;  %v2755_v62 = vsel %vm1188_vm0, %v12354_v13, %v12351_v54  ;;  %v12445_v13 = vadd.f32 %v11744_v29, %v11946_v55 }
 0x377   : > { %9273 = vmatmul.mubr.msk.f32.gmra.mrb[42].mxu1 %vm17359_vm1, %v2755_v62 }
 0x378   : > { %2882 = vmatprep.mubr.f32.mxu1 %v17533_v37 }
 0x379   : > { %v12365_v61 = vpop.permute.xlu0 %2738 }
 0x37a   : > { %17544 = vst [vmem:[#allocation133_spill] sm:$0xff] %v12365_v61  ;;  %v2756_v4 = vsel %vm1188_vm0, %v12365_v61, %v12362_v47 }
 0x37b   : > { %9274 = vmatmul.mubr.msk.f32.gmra.mrb[44].mxu1 %vm17359_vm1, %v2756_v4 }
 0x37c   : > { %2888 = vmatprep.mubr.f32.mxu1 %v17533_v37 }
 0x37d   : > { %v12375_v43 = vpop.permute.xlu1 %2740 }
 0x37e   : > { %17546 = vst [vmem:[#allocation135_spill] sm:$0xff] %v12375_v43  ;;  %v2757_v8 = vsel %vm1188_vm0, %v12375_v43, %v12372_v19 }
 0x37f   : > { %9275 = vmatmul.mubr.msk.f32.gmra.mrb[46].mxu1 %vm17359_vm1, %v2757_v8 }
 0x380   : > { %3473 = vmatprep.mubr.f32.mxu1 %v17533_v37 }
 0x436   : > { %v2848_v34 = vpop.f32.mrb[32].mxu1 }
 0x437   : > { %v2969_v17 = vadd.f32 %v2848_v34, %v11780_v30  ;;  %v12383_v24 = vpop.f32.mrb[33].mxu1 }
 0x438   : > { %v3185_v43 = vadd.f32 %v12383_v24, %v11860_v48 }
 0x439   : > { %2985 = vrot.lane.b32.xlu0 %v2969_v17, %s10844_s0 }
 0x43a   : > { %v2854_v2 = vpop.f32.mrb[34].mxu1 }
 0x43b   : > { %v2970_v44 = vadd.f32 %v2854_v2, %v11780_v30  ;;  %v12387_v45 = vpop.f32.mrb[35].mxu1  ;;  %v2914_v26 = vadd.f32 %v2854_v2, %v12445_v13 }
 0x43d   : > { %2987 = vrot.lane.b32.xlu1 %v2970_v44, %s10844_s0  ;;  %v9277_v10 = vmul.f32 -1.442695, %v2914_v26  ;;  %v12465_v26 = vadd.f32 %v11774_v12, %v11946_v55 }
 0x43e   : > { %v2860_v39 = vpop.f32.mrb[36].mxu1 }
 0x43f   : > { %v2971_v31 = vadd.f32 %v2860_v39, %v11780_v30  ;;  %v12391_v59 = vpop.f32.mrb[37].mxu1 }
 0x441   : > { %2989 = vrot.lane.b32.xlu0 %v2971_v31, %s10844_s0 }
 0x442   : > { %v2866_v18 = vpop.f32.mrb[38].mxu1 }
 0x443   : > { %v2972_v6 = vadd.f32 %v2866_v18, %v11780_v30  ;;  %v12395_v27 = vpop.f32.mrb[39].mxu1 }
 0x444   : > { %v3188_v42 = vadd.f32 %v12395_v27, %v11860_v48 }
 0x445   : > { %2991 = vrot.lane.b32.xlu1 %v2972_v6, %s10844_s0 }
 0x446   : > { %v2872_v63 = vpop.f32.mrb[40].mxu1 }
 0x447   : > { %v2973_v62 = vadd.f32 %v2872_v63, %v11780_v30  ;;  %v12399_v0 = vpop.f32.mrb[41].mxu1 }
 0x449   : > { %2993 = vrot.lane.b32.xlu0 %v2973_v62, %s10844_s0 }
 0x44a   : > { %v2878_v38 = vpop.f32.mrb[42].mxu1 }
 0x44b   : > { %v2974_v4 = vadd.f32 %v2878_v38, %v11780_v30  ;;  %v12403_v8 = vpop.f32.mrb[43].mxu1 }
 0x44d   : > { %2995 = vrot.lane.b32.xlu1 %v2974_v4, %s10844_s0  ;;  %v3186_v4 = vadd.f32 %v12387_v45, %v11860_v48 }
 0x44e   : > { %v2884_v17 = vpop.f32.mrb[44].mxu1 }
 0x44f   : > { %v2975_v44 = vadd.f32 %v2884_v17, %v11780_v30  ;;  %v12407_v31 = vpop.f32.mrb[45].mxu1 }
 0x451   : > { %2997 = vrot.lane.b32.xlu0 %v2975_v44, %s10844_s0  ;;  %v3187_v44 = vadd.f32 %v12391_v59, %v11860_v48 }
 0x452   : > { %v2890_v6 = vpop.f32.mrb[46].mxu1 }
 0x453   : > { %v2976_v62 = vadd.f32 %v2890_v6, %v11780_v30  ;;  %v12413_v61 = vpop.f32.mrb[47].mxu1 }
 0x455   : > { %3201 = vrot.lane.b32.xlu0 %v3185_v43, %s10844_s0  ;;  %2999 = vrot.lane.b32.xlu1 %v2976_v62, %s10844_s0  ;;  %v3189_v43 = vadd.f32 %v12399_v0, %v11860_v48  ;;  %v3190_v62 = vadd.f32 %v12403_v8, %v11860_v48 }
 0x459   : > { %3203 = vrot.lane.b32.xlu0 %v3186_v4, %s10844_s0  ;;  %v3191_v4 = vadd.f32 %v12407_v31, %v11860_v48 }
 0x45d   : > { %3205 = vrot.lane.b32.xlu0 %v3187_v44, %s10844_s0  ;;  %v3192_v44 = vadd.f32 %v12413_v61, %v11860_v48 }
 0x461   : > { %3207 = vrot.lane.b32.xlu0 %v3188_v42, %s10844_s0  ;;  %v12440_v42 = vadd.f32 %v11735_v21, %v11946_v55  ;;  %v12455_v21 = vadd.f32 %v11759_v40, %v11946_v55 }
 0x463   : > { %v2916_v29 = vadd.f32 %v2866_v18, %v12455_v21  ;;  %v12470_v18 = vadd.f32 %v11782_v32, %v11946_v55 }
 0x465   : > { %3209 = vrot.lane.b32.xlu0 %v3189_v43, %s10844_s0  ;;  %v2913_v43 = vadd.f32 %v2848_v34, %v12440_v42  ;;  %v9279_v2 = vmul.f32 -1.442695, %v2916_v29 }
 0x469   : > { %3211 = vrot.lane.b32.xlu0 %v3190_v62, %s10844_s0  ;;  %v9276_v62 = vmul.f32 -1.442695, %v2913_v43  ;;  %v12460_v43 = vadd.f32 %v11768_v56, %v11946_v55  ;;  %v12474_v56 = vadd.f32 %v12076_v53, %v11602_v16 }
 0x46b   : > { %9969 = vpow2.f32 %v9276_v62 }
 0x46c   : > { %9971 = vpow2.f32 %v9277_v10  ;;  %v2918_v10 = vadd.f32 %v2878_v38, %v12465_v26  ;;  %v12479_v38 = vadd.f32 %v11795_v49, %v11946_v55 }
 0x46d   : > { %3213 = vrot.lane.b32.xlu0 %v3191_v4, %s10844_s0  ;;  %v12450_v4 = vadd.f32 %v11753_v35, %v11946_v55  ;;  %v2917_v35 = vadd.f32 %v2872_v63, %v12460_v43 }
 0x46e   : > { %v9281_v63 = vmul.f32 -1.442695, %v2918_v10 }
 0x46f   : > { %v9280_v40 = vmul.f32 -1.442695, %v2917_v35  ;;  %v2920_v35 = vadd.f32 %v2890_v6, %v12479_v38 }
 0x471   : > { %3215 = vrot.lane.b32.xlu0 %v3192_v44, %s10844_s0  ;;  %v2915_v44 = vadd.f32 %v2860_v39, %v12450_v4  ;;  %v9283_v49 = vmul.f32 -1.442695, %v2920_v35 }
 0x473   : > { %v9278_v34 = vmul.f32 -1.442695, %v2915_v44 }
 0x475   : > { %9973 = vpow2.f32 %v9278_v34  ;;  %v9970_v62 = vpop.eup %9969  ;;  %v2919_v34 = vadd.f32 %v2884_v17, %v12470_v18 }
 0x476   : > { %9975 = vpow2.f32 %v9279_v2  ;;  %v2945_v39 = vadd.f32 1.0, %v9970_v62  ;;  %v9972_v44 = vpop.eup %9971  ;;  %v3129_v2 = vadd.f32 %v12383_v24, %v12474_v56 }
 0x477   : > { %9977 = vpow2.f32 %v9280_v40  ;;  %v2946_v12 = vadd.f32 1.0, %v9972_v44  ;;  %v9282_v32 = vmul.f32 -1.442695, %v2919_v34  ;;  %v17547_v40 = vld [vmem:[#allocation99_spill] sm:$0xff] }
 0x478   : > { %9979 = vrcp.f32 %v2945_v39  ;;  %v12486_v17 = vadd.f32 %v17547_v40, %v11602_v16  ;;  %v9284_v10 = vmul.f32 -1.442695, %v3129_v2 }
 0x479   : > { %9981 = vpow2.f32 %v9281_v63  ;;  %v17548_v63 = vld [vmem:[#allocation101_spill] sm:$0xff] }
 0x47a   : > { %9983 = vrcp.f32 %v2946_v12  ;;  %v3130_v39 = vadd.f32 %v12387_v45, %v12486_v17  ;;  %v12492_v34 = vadd.f32 %v17548_v63, %v11602_v16  ;;  %v17550_v63 = vld [vmem:[#allocation105_spill] sm:$0xff] }
 0x47b   : > { %9985 = vpow2.f32 %v9282_v32 }
 0x47c   : > { %v3131_v2 = vadd.f32 %v12391_v59, %v12492_v34 }
 0x47f   : > { %v9974_v29 = vpop.eup %9973 }
 0x480   : > { %v2947_v53 = vadd.f32 1.0, %v9974_v29  ;;  %v9976_v62 = vpop.eup %9975  ;;  %v9285_v29 = vmul.f32 -1.442695, %v3130_v39  ;;  %v9286_v39 = vmul.f32 -1.442695, %v3131_v2 }
 0x481   : > { %v2948_v44 = vadd.f32 1.0, %v9976_v62  ;;  %v9978_v24 = vpop.eup %9977 }
 0x482   : > { %9987 = vrcp.f32 %v2947_v53  ;;  %v12494_v6 = vpop.eup %9979  ;;  %v2949_v32 = vadd.f32 1.0, %v9978_v24  ;;  %v17549_v53 = vld [vmem:[#allocation103_spill] sm:$0xff] }
 0x483   : > { %9989 = vpow2.f32 %v9284_v10  ;;  %v9982_v35 = vpop.eup %9981  ;;  %v12501_v62 = vadd.f32 %v17549_v53, %v11602_v16 }
 0x484   : > { %9991 = vpow2.f32 %v9283_v49  ;;  %v12504_v40 = vpop.eup %9983 }
 0x485   : > { %9993 = vrcp.f32 %v2948_v44  ;;  %v3132_v59 = vadd.f32 %v12395_v27, %v12501_v62  ;;  %v2950_v44 = vadd.f32 1.0, %v9982_v35  ;;  %v9986_v24 = vpop.eup %9985 }
 0x486   : > { %9995 = vpow2.f32 %v9285_v29 }
 0x487   : > { %9997 = vrcp.f32 %v2949_v32  ;;  %v9287_v29 = vmul.f32 -1.442695, %v3132_v59  ;;  %v2951_v32 = vadd.f32 1.0, %v9986_v24 }
 0x488   : > { %9999 = vpow2.f32 %v9286_v39 }
 0x489   : > { %10001 = vrcp.f32 %v2950_v44 }
 0x48a   : > { %10003 = vpow2.f32 %v9287_v29 }
 0x48b   : > { %10005 = vrcp.f32 %v2951_v32 }
 0x4ab   : > { %v2986_v12 = vpop.permute.xlu0 %2985 }
 0x4ac   : > { %v3009_v45 = vmul.f32 %v12494_v6, %v2986_v12  ;;  %v12511_v12 = vadd.f32 %v17550_v63, %v11602_v16 }
 0x4ae   : > { %3025 = vrot.lane.b32.xlu1 %v3009_v45, %s10844_s0  ;;  %v12514_v45 = vpop.eup %9987  ;;  %v3133_v27 = vadd.f32 %v12399_v0, %v12511_v12 }
 0x4af   : > { %v2988_v10 = vpop.permute.xlu1 %2987  ;;  %v9990_v36 = vpop.eup %9989 }
 0x4b0   : > { %v3010_v49 = vmul.f32 %v12504_v40, %v2988_v10  ;;  %v9992_v35 = vpop.eup %9991  ;;  %v17551_v10 = vld [vmem:[#allocation107_spill] sm:$0xff]  ;;  %v3161_v11 = vadd.f32 1.0, %v9990_v36  ;;  %v9288_v39 = vmul.f32 -1.442695, %v3133_v27 }
 0x4b1   : > { %v12521_v63 = vadd.f32 %v17551_v10, %v11602_v16  ;;  %v2952_v44 = vadd.f32 1.0, %v9992_v35  ;;  %v17553_v35 = vld [vmem:[#allocation111_spill] sm:$0xff] }
 0x4b2   : > { %3027 = vrot.lane.b32.xlu1 %v3010_v49, %s10844_s0  ;;  %v12524_v49 = vpop.eup %9993  ;;  %10007 = vrcp.f32 %v3161_v11 }
 0x4b3   : > { %v2990_v53 = vpop.permute.xlu0 %2989  ;;  %v3134_v0 = vadd.f32 %v12403_v8, %v12521_v63  ;;  %v9996_v24 = vpop.eup %9995  ;;  %10009 = vpow2.f32 %v9288_v39 }
 0x4b4   : > { %v3011_v2 = vmul.f32 %v12514_v45, %v2990_v53  ;;  %v17552_v53 = vld [vmem:[#allocation109_spill] sm:$0xff]  ;;  %v3162_v27 = vadd.f32 1.0, %v9996_v24  ;;  %10011 = vrcp.f32 %v2952_v44 }
 0x4b5   : > { %v12531_v10 = vadd.f32 %v17552_v53, %v11602_v16  ;;  %v9289_v29 = vmul.f32 -1.442695, %v3134_v0  ;;  %v12541_v53 = vadd.f32 %v17553_v35, %v11602_v16 }
 0x4b6   : > { %3029 = vrot.lane.b32.xlu1 %v3011_v2, %s10844_s0  ;;  %v12534_v2 = vpop.eup %9997 }
 0x4b7   : > { %v2992_v55 = vpop.permute.xlu1 %2991  ;;  %v3135_v8 = vadd.f32 %v12407_v31, %v12531_v10  ;;  %v10000_v32 = vpop.eup %9999  ;;  %10013 = vpow2.f32 %v9289_v29  ;;  %v3136_v0 = vadd.f32 %v12413_v61, %v12541_v53 }
 0x4b8   : > { %v3012_v59 = vmul.f32 %v12524_v49, %v2992_v55  ;;  %10015 = vrcp.f32 %v3162_v27  ;;  %v3163_v24 = vadd.f32 1.0, %v10000_v32 }
 0x4b9   : > { %v9290_v39 = vmul.f32 -1.442695, %v3135_v8 }
 0x4ba   : > { %3031 = vrot.lane.b32.xlu1 %v3012_v59, %s10844_s0  ;;  %v12544_v59 = vpop.eup %10001 }
 0x4bb   : > { %v2994_v36 = vpop.permute.xlu0 %2993  ;;  %v10004_v44 = vpop.eup %10003  ;;  %10017 = vpow2.f32 %v9290_v39 }
 0x4bc   : > { %v3013_v55 = vmul.f32 %v12534_v2, %v2994_v36  ;;  %v12550_v36 = vpop.eup %10005  ;;  %10019 = vrcp.f32 %v3163_v24  ;;  %v3164_v29 = vadd.f32 1.0, %v10004_v44 }
 0x4bd   : > { %v12553_v48 = vpop.eup %10007 }
 0x4be   : > { %3033 = vrot.lane.b32.xlu1 %v3013_v55, %s10844_s0  ;;  %v9291_v55 = vmul.f32 -1.442695, %v3136_v0  ;;  %v10010_v8 = vpop.eup %10009 }
 0x4bf   : > { %v2996_v11 = vpop.permute.xlu1 %2995  ;;  %v12556_v61 = vpop.eup %10011  ;;  %v3165_v39 = vadd.f32 1.0, %v10010_v8 }
 0x4c0   : > { %v3014_v31 = vmul.f32 %v12544_v59, %v2996_v11  ;;  %10021 = vpow2.f32 %v9291_v55 }
 0x4c1   : > { %10023 = vrcp.f32 %v3164_v29  ;;  %v10014_v0 = vpop.eup %10013 }
 0x4c2   : > { %3035 = vrot.lane.b32.xlu1 %v3014_v31, %s10844_s0  ;;  %v12562_v24 = vpop.eup %10015  ;;  %10025 = vrcp.f32 %v3165_v39 }
 0x4c3   : > { %v2998_v35 = vpop.permute.xlu0 %2997 }
 0x4c4   : > { %v3015_v16 = vmul.f32 %v12550_v36, %v2998_v35  ;;  %v3166_v35 = vadd.f32 1.0, %v10014_v0 }
 0x4c5   : > { %v10018_v30 = vpop.eup %10017 }
 0x4c6   : > { %3037 = vrot.lane.b32.xlu1 %v3015_v16, %s10844_s0  ;;  %v12566_v55 = vpop.eup %10019  ;;  %10027 = vrcp.f32 %v3166_v35  ;;  %v3167_v8 = vadd.f32 1.0, %v10018_v30 }
 0x4c7   : > { %v3202_v27 = vpop.permute.xlu0 %3201  ;;  %v3000_v32 = vpop.permute.xlu1 %2999 }
 0x4c8   : > { %v3225_v11 = vmul.f32 %v12553_v48, %v3202_v27  ;;  %v3016_v31 = vmul.f32 %v12556_v61, %v3000_v32  ;;  %10029 = vrcp.f32 %v3167_v8 }
 0x4ca   : > { %3241 = vrot.lane.b32.xlu0 %v3225_v11, %s10844_s0  ;;  %3039 = vrot.lane.b32.xlu1 %v3016_v31, %s10844_s0  ;;  %v10022_v32 = vpop.eup %10021 }
 0x4cb   : > { %v3204_v44 = vpop.permute.xlu0 %3203  ;;  %v12570_v11 = vpop.eup %10023  ;;  %v3168_v39 = vadd.f32 1.0, %v10022_v32 }
 0x4cc   : > { %v3226_v16 = vmul.f32 %v12562_v24, %v3204_v44  ;;  %v12574_v0 = vpop.eup %10025 }
 0x4cd   : > { %10031 = vrcp.f32 %v3168_v39 }
 0x4ce   : > { %3243 = vrot.lane.b32.xlu1 %v3226_v16, %s10844_s0 }
 0x4cf   : > { %v3206_v27 = vpop.permute.xlu0 %3205 }
 0x4d0   : > { %v3227_v29 = vmul.f32 %v12566_v55, %v3206_v27  ;;  %v12578_v30 = vpop.eup %10027 }
 0x4d2   : > { %3245 = vrot.lane.b32.xlu0 %v3227_v29, %s10844_s0  ;;  %v12582_v29 = vpop.eup %10029 }
 0x4d3   : > { %v3208_v31 = vpop.permute.xlu0 %3207  ;;  %17554 = vst [vmem:[#allocation99_spill] sm:$0xff] %v12582_v29 }
 0x4d4   : > { %v3228_v44 = vmul.f32 %v12570_v11, %v3208_v31 }
 0x4d6   : > { %3247 = vrot.lane.b32.xlu1 %v3228_v44, %s10844_s0 }
 0x4d7   : > { %v3210_v16 = vpop.permute.xlu0 %3209  ;;  %v12586_v31 = vpop.eup %10031 }
 0x4d8   : > { %v3229_v19 = vmul.f32 %v12574_v0, %v3210_v16 }
 0x4da   : > { %3249 = vrot.lane.b32.xlu1 %v3229_v19, %s10844_s0 }
 0x4db   : > { %v3212_v35 = vpop.permute.xlu0 %3211 }
 0x4dc   : > { %v3230_v27 = vmul.f32 %v12578_v30, %v3212_v35 }
 0x4de   : > { %3251 = vrot.lane.b32.xlu1 %v3230_v27, %s10844_s0 }
 0x4df   : > { %v3214_v8 = vpop.permute.xlu0 %3213 }
 0x4e0   : > { %v3231_v32 = vmul.f32 %v12582_v29, %v3214_v8 }
 0x4e2   : > { %3253 = vrot.lane.b32.xlu1 %v3231_v32, %s10844_s0 }
 0x4e3   : > { %v3216_v44 = vpop.permute.xlu0 %3215 }
 0x4e4   : > { %v3232_v39 = vmul.f32 %v12586_v31, %v3216_v44 }
 0x4e6   : > { %3255 = vrot.lane.b32.xlu1 %v3232_v39, %s10844_s0 }
 0x520   : > { %v3026_v19 = vpop.permute.xlu1 %3025 }
 0x521   : > { %v3049_v16 = vadd.f32 %v3026_v19, %v12440_v42 }
 0x523   : > { %10033 = vtanh.f32 %v3049_v16 }
 0x524   : > { %v3028_v35 = vpop.permute.xlu1 %3027 }
 0x525   : > { %v3050_v27 = vadd.f32 %v3028_v35, %v12445_v13 }
 0x527   : > { %10035 = vtanh.f32 %v3050_v27 }
 0x528   : > { %v3030_v47 = vpop.permute.xlu1 %3029 }
 0x529   : > { %v3051_v8 = vadd.f32 %v3030_v47, %v12450_v4 }
 0x52b   : > { %10037 = vtanh.f32 %v3051_v8 }
 0x52c   : > { %v3032_v32 = vpop.permute.xlu1 %3031 }
 0x52d   : > { %v10034_v29 = vpop.eup %10033  ;;  %v3052_v54 = vadd.f32 %v3032_v32, %v12455_v21 }
 0x52e   : > { %3081 = vrot.lane.b32.xlu0 %v10034_v29, %s10845_s18 }
 0x52f   : > { %10039 = vtanh.f32 %v3052_v54 }
 0x530   : > { %v3034_v44 = vpop.permute.xlu1 %3033 }
 0x531   : > { %v10036_v39 = vpop.eup %10035  ;;  %v3053_v42 = vadd.f32 %v3034_v44, %v12460_v43 }
 0x532   : > { %3083 = vrot.lane.b32.xlu0 %v10036_v39, %s10845_s18 }
 0x533   : > { %10041 = vtanh.f32 %v3053_v42 }
 0x534   : > { %v3036_v13 = vpop.permute.xlu1 %3035 }
 0x535   : > { %v10038_v19 = vpop.eup %10037  ;;  %v3054_v16 = vadd.f32 %v3036_v13, %v12465_v26 }
 0x536   : > { %3085 = vrot.lane.b32.xlu0 %v10038_v19, %s10845_s18 }
 0x537   : > { %10043 = vtanh.f32 %v3054_v16 }
 0x538   : > { %v3038_v47 = vpop.permute.xlu1 %3037 }
 0x539   : > { %v10040_v4 = vpop.eup %10039  ;;  %v3055_v21 = vadd.f32 %v3038_v47, %v12470_v18 }
 0x53a   : > { %3087 = vrot.lane.b32.xlu0 %v10040_v4, %s10845_s18 }
 0x53b   : > { %10045 = vtanh.f32 %v3055_v21 }
 0x53c   : > { %v3242_v54 = vpop.permute.xlu0 %3241  ;;  %v3040_v29 = vpop.permute.xlu1 %3039 }
 0x53d   : > { %v10042_v43 = vpop.eup %10041  ;;  %v3265_v35 = vadd.f32 %v3242_v54, %v12474_v56  ;;  %v3056_v27 = vadd.f32 %v3040_v29, %v12479_v38 }
 0x53e   : > { %3089 = vrot.lane.b32.xlu0 %v10042_v43, %s10845_s18 }
 0x53f   : > { %10047 = vtanh.f32 %v3265_v35 }
 0x540   : > { %10049 = vtanh.f32 %v3056_v27  ;;  %v3244_v26 = vpop.permute.xlu1 %3243 }
 0x541   : > { %v10044_v8 = vpop.eup %10043  ;;  %v3266_v32 = vadd.f32 %v3244_v26, %v12486_v17 }
 0x542   : > { %3091 = vrot.lane.b32.xlu1 %v10044_v8, %s10845_s18  ;;  %v3113_v8 = vmul.f32 %v12494_v6, %v12240_v52  ;;  %v3115_v52 = vmul.f32 %v12514_v45, %v12252_v57  ;;  %v3069_v57 = vsub.f32 1.0, %v12534_v2 }
 0x543   : > { %10051 = vtanh.f32 %v3266_v32 }
 0x544   : > { %v3246_v18 = vpop.permute.xlu0 %3245 }
 0x545   : > { %v10046_v44 = vpop.eup %10045  ;;  %v3267_v39 = vadd.f32 %v3246_v18, %v12492_v34  ;;  %v3066_v18 = vsub.f32 1.0, %v12504_v40 }
 0x546   : > { %3093 = vrot.lane.b32.xlu0 %v10046_v44, %s10845_s18 }
 0x547   : > { %10053 = vtanh.f32 %v3267_v39  ;;  %v3114_v39 = vmul.f32 %v12504_v40, %v12246_v25  ;;  %v3068_v25 = vsub.f32 1.0, %v12524_v49 }
 0x548   : > { %v3248_v56 = vpop.permute.xlu1 %3247 }
 0x549   : > { %v10048_v38 = vpop.eup %10047  ;;  %v3268_v42 = vadd.f32 %v3248_v56, %v12501_v62 }
 0x54a   : > { %v10050_v13 = vpop.eup %10049  ;;  %3297 = vrot.lane.b32.xlu0 %v10048_v38, %s10845_s18 }
 0x54b   : > { %10055 = vtanh.f32 %v3268_v42  ;;  %3095 = vrot.lane.b32.xlu1 %v10050_v13, %s10845_s18  ;;  %v3067_v42 = vsub.f32 1.0, %v12514_v45 }
 0x54c   : > { %v3250_v17 = vpop.permute.xlu1 %3249 }
 0x54d   : > { %v10052_v19 = vpop.eup %10051  ;;  %v3269_v16 = vadd.f32 %v3250_v17, %v12511_v12 }
 0x54f   : > { %10057 = vtanh.f32 %v3269_v16  ;;  %3299 = vrot.lane.b32.xlu1 %v10052_v19, %s10845_s18  ;;  %v3116_v19 = vmul.f32 %v12524_v49, %v12258_v60  ;;  %v3070_v60 = vsub.f32 1.0, %v12544_v59 }
 0x550   : > { %v3252_v34 = vpop.permute.xlu1 %3251 }
 0x551   : > { %v10054_v47 = vpop.eup %10053  ;;  %v3270_v4 = vadd.f32 %v3252_v34, %v12521_v63 }
 0x553   : > { %10059 = vtanh.f32 %v3270_v4  ;;  %3301 = vrot.lane.b32.xlu1 %v10054_v47, %s10845_s18  ;;  %v3117_v47 = vmul.f32 %v12534_v2, %v12264_v5  ;;  %v3071_v5 = vsub.f32 1.0, %v12550_v36 }
 0x554   : > { %v3254_v62 = vpop.permute.xlu1 %3253 }
 0x555   : > { %v10056_v21 = vpop.eup %10055  ;;  %v3271_v54 = vadd.f32 %v3254_v62, %v12531_v10  ;;  %v3065_v10 = vsub.f32 1.0, %v12494_v6 }
 0x557   : > { %10061 = vtanh.f32 %v3271_v54  ;;  %3303 = vrot.lane.b32.xlu1 %v10056_v21, %s10845_s18  ;;  %v3118_v21 = vmul.f32 %v12544_v59, %v12270_v46  ;;  %v3072_v46 = vsub.f32 1.0, %v12556_v61 }
 0x558   : > { %v3256_v29 = vpop.permute.xlu1 %3255 }
 0x559   : > { %v10058_v43 = vpop.eup %10057  ;;  %v3272_v12 = vadd.f32 %v3256_v29, %v12541_v53 }
 0x55b   : > { %10063 = vtanh.f32 %v3272_v12  ;;  %3305 = vrot.lane.b32.xlu1 %v10058_v43, %s10845_s18  ;;  %v3119_v43 = vmul.f32 %v12550_v36, %v12276_v1 }
 0x55d   : > { %v10060_v35 = vpop.eup %10059 }
 0x55f   : > { %3307 = vrot.lane.b32.xlu1 %v10060_v35, %s10845_s18 }
 0x561   : > { %v10062_v63 = vpop.eup %10061 }
 0x563   : > { %3309 = vrot.lane.b32.xlu1 %v10062_v63, %s10845_s18  ;;  %v3120_v63 = vmul.f32 %v12556_v61, %v12282_v33 }
 0x565   : > { %v10064_v27 = vpop.eup %10063 }
 0x567   : > { %3311 = vrot.lane.b32.xlu1 %v10064_v27, %s10845_s18 }
 0x5a0   : > { %v3082_v26 = vpop.permute.xlu0 %3081 }
 0x5a1   : > { %v3105_v32 = vmul.f32 %v3082_v26, %v3065_v10 }
 0x5a3   : > { %v12625_v53 = vadd.f32 %v3113_v8, %v3105_v32  ;;  %v3281_v8 = vsub.f32 1.0, %v12553_v48 }
 0x5a4   : > { %v3084_v44 = vpop.permute.xlu0 %3083 }
 0x5a5   : > { %v3106_v56 = vmul.f32 %v3084_v44, %v3066_v18  ;;  %3353 = vrot.lane.b32.xlu0 %v12625_v53, %s10845_s18  ;;  %v3329_v18 = vmul.f32 %v12553_v48, %v12289_v15  ;;  %v3282_v44 = vsub.f32 1.0, %v12562_v24 }
 0x5a7   : > { %v12632_v38 = vadd.f32 %v3114_v39, %v3106_v56 }
 0x5a8   : > { %v3086_v13 = vpop.permute.xlu0 %3085 }
 0x5a9   : > { %v3107_v6 = vmul.f32 %v3086_v13, %v3067_v42  ;;  %3355 = vrot.lane.b32.xlu0 %v12632_v38, %s10845_s18  ;;  %v3330_v42 = vmul.f32 %v12562_v24, %v12299_v22  ;;  %v3283_v13 = vsub.f32 1.0, %v12566_v55  ;;  %v3331_v24 = vmul.f32 %v12566_v55, %v12312_v50 }
 0x5aa   : > { %v3332_v55 = vmul.f32 %v12570_v11, %v12325_v41 }
 0x5ab   : > { %v12639_v17 = vadd.f32 %v3115_v52, %v3107_v6 }
 0x5ac   : > { %v3088_v40 = vpop.permute.xlu0 %3087 }
 0x5ad   : > { %v3108_v16 = vmul.f32 %v3088_v40, %v3068_v25  ;;  %3357 = vrot.lane.b32.xlu0 %v12639_v17, %s10845_s18 }
 0x5af   : > { %v12646_v34 = vadd.f32 %v3116_v19, %v3108_v16  ;;  %v3284_v19 = vsub.f32 1.0, %v12570_v11  ;;  %v3333_v11 = vmul.f32 %v12574_v0, %v12338_v7  ;;  %v17579_v7 = vld [vmem:[#allocation33_spill] sm:$0xff] }
 0x5b0   : > { %v3090_v45 = vpop.permute.xlu0 %3089 }
 0x5b1   : > { %v3109_v4 = vmul.f32 %v3090_v45, %v3069_v57  ;;  %3359 = vrot.lane.b32.xlu0 %v12646_v34, %s10845_s18 }
 0x5b3   : > { %v12653_v62 = vadd.f32 %v3117_v47, %v3109_v4  ;;  %v3285_v4 = vsub.f32 1.0, %v12574_v0  ;;  %v17565_v0 = vld [vmem:[#allocation130_spill] sm:$0xff] }
 0x5b4   : > { %v3092_v49 = vpop.permute.xlu1 %3091 }
 0x5b5   : > { %v3110_v54 = vmul.f32 %v3092_v49, %v3070_v60  ;;  %3361 = vrot.lane.b32.xlu0 %v12653_v62, %s10845_s18 }
 0x5b7   : > { %v12660_v29 = vadd.f32 %v3118_v21, %v3110_v54 }
 0x5b8   : > { %v3094_v2 = vpop.permute.xlu0 %3093 }
 0x5b9   : > { %v3111_v12 = vmul.f32 %v3094_v2, %v3071_v5  ;;  %3363 = vrot.lane.b32.xlu0 %v12660_v29, %s10845_s18  ;;  %v3286_v2 = vsub.f32 1.0, %v12578_v30 }
 0x5bb   : > { %v12667_v35 = vadd.f32 %v3119_v43, %v3111_v12 }
 0x5bc   : > { %v3298_v26 = vpop.permute.xlu0 %3297 }
 0x5bd   : > { %v3096_v59 = vpop.permute.xlu1 %3095  ;;  %3365 = vrot.lane.b32.xlu0 %v12667_v35, %s10845_s18  ;;  %v3321_v32 = vmul.f32 %v3298_v26, %v3281_v8 }
 0x5be   : > { %v3112_v27 = vmul.f32 %v3096_v59, %v3072_v46 }
 0x5bf   : > { %v12682_v56 = vadd.f32 %v3329_v18, %v3321_v32 }
 0x5c0   : > { %v12674_v10 = vadd.f32 %v3120_v63, %v3112_v27  ;;  %v3334_v27 = vmul.f32 %v12578_v30, %v17565_v0 }
 0x5c1   : > { %v3300_v1 = vpop.permute.xlu1 %3299  ;;  %17555 = vst [vmem:[#allocation101_spill] sm:$0xff] %v12682_v56 }
 0x5c2   : > { %3367 = vrot.lane.b32.xlu1 %v12674_v10, %s10845_s18  ;;  %v3322_v33 = vmul.f32 %v3300_v1, %v3282_v44  ;;  %v17566_v1 = vld [vmem:[#allocation99_spill] sm:$0xff]  ;;  %v17569_v44 = vld [vmem:[#allocation132_spill] sm:$0xff] }
 0x5c4   : > { %v12693_v48 = vadd.f32 %v3330_v42, %v3322_v33  ;;  %v3288_v42 = vsub.f32 1.0, %v12586_v31 }
 0x5c5   : > { %v3302_v36 = vpop.permute.xlu1 %3301 }
 0x5c6   : > { %17557 = vst [vmem:[#allocation105_spill] sm:$0xff] %v12693_v48  ;;  %v3323_v6 = vmul.f32 %v3302_v36, %v3283_v13  ;;  %v3287_v36 = vsub.f32 1.0, %v17566_v1 }
 0x5c8   : > { %v12707_v57 = vadd.f32 %v3331_v24, %v3323_v6  ;;  %v17572_v24 = vld [vmem:[#allocation134_spill] sm:$0xff] }
 0x5c9   : > { %v3304_v39 = vpop.permute.xlu1 %3303 }
 0x5ca   : > { %17559 = vst [vmem:[#allocation109_spill] sm:$0xff] %v12707_v57  ;;  %v3324_v45 = vmul.f32 %v3304_v39, %v3284_v19  ;;  %v3335_v39 = vmul.f32 %v17566_v1, %v17569_v44  ;;  %v3336_v19 = vmul.f32 %v12586_v31, %v17572_v24  ;;  %v17578_v44 = vld [vmem:[#allocation31_spill] sm:$0xff] }
 0x5cc   : > { %v12721_v21 = vadd.f32 %v3332_v55, %v3324_v45 }
 0x5cd   : > { %v3306_v25 = vpop.permute.xlu1 %3305 }
 0x5ce   : > { %17561 = vst [vmem:[#allocation136_spill] sm:$0xff] %v12721_v21  ;;  %v3325_v54 = vmul.f32 %v3306_v25, %v3285_v4 }
 0x5d0   : > { %v12735_v12 = vadd.f32 %v3333_v11, %v3325_v54 }
 0x5d1   : > { %v3308_v60 = vpop.permute.xlu1 %3307 }
 0x5d2   : > { %17563 = vst [vmem:[#allocation138_spill] sm:$0xff] %v12735_v12  ;;  %v3326_v46 = vmul.f32 %v3308_v60, %v3286_v2  ;;  %v17575_v60 = vld [vmem:[#allocation27_spill] sm:$0xff] }
 0x5d4   : > { %v12749_v8 = vadd.f32 %v3334_v27, %v3326_v46 }
 0x5d5   : > { %v3310_v59 = vpop.permute.xlu1 %3309 }
 0x5d6   : > { %17567 = vst [vmem:[#allocation99_spill] sm:$0xff] %v12749_v8  ;;  %v3327_v32 = vmul.f32 %v3310_v59, %v3287_v36 }
 0x5d8   : > { %v12761_v13 = vadd.f32 %v3335_v39, %v3327_v32 }
 0x5d9   : > { %v3312_v33 = vpop.permute.xlu1 %3311 }
 0x5da   : > { %17570 = vst [vmem:[#allocation141_spill] sm:$0xff] %v12761_v13 }
 0x617   : > { %v12684_v61 = vpop.permute.xlu0 %3353 }
 0x618   : > { %17556 = vst [vmem:[#allocation103_spill] sm:$0xff] %v12684_v61  ;;  %v3377_v52 = vsel %vm1188_vm0, %v12684_v61, %v12682_v56 }
 0x619   : > { %9292 = vmatmul.mubr.msk.f32.vlgmr.msra.gmra.mrb[48].mxu1 %vm17359_vm1, %v3377_v52  ;;  %v3328_v52 = vmul.f32 %v3312_v33, %v3288_v42 }
 0x61a   : > { %3479 = vmatprep.mubr.f32.mxu1 %v17533_v37  ;;  %9718 = vmatpush1.bf16.msra.mxu1 %v11372_v58 }
 0x61b   : > { %v12697_v40 = vpop.permute.xlu0 %3355  ;;  %9720 = vmatprep.subr.bf16.mxu1 %v11399_v3 }
 0x61c   : > { %17558 = vst [vmem:[#allocation107_spill] sm:$0xff] %v12697_v40  ;;  %v3378_v16 = vsel %vm1188_vm0, %v12697_v40, %v12693_v48 }
 0x61d   : > { %9293 = vmatmul.mubr.msk.f32.gmra.mrb[50].mxu1 %vm17359_vm1, %v3378_v16  ;;  %v12773_v16 = vadd.f32 %v3336_v19, %v3328_v52 }
 0x61e   : > { %3485 = vmatprep.mubr.f32.mxu1 %v17533_v37  ;;  %9722 = vmatpush1.bf16.msra.mxu1 %v11410_v9 }
 0x61f   : > { %v12711_v47 = vpop.permute.xlu0 %3357  ;;  %9724 = vmatprep.subr.bf16.mxu1 %v11425_v14  ;;  %17573 = vst [vmem:[#allocation143_spill] sm:$0xff] %v12773_v16 }
 0x620   : > { %17560 = vst [vmem:[#allocation111_spill] sm:$0xff] %v12711_v47  ;;  %v3379_v49 = vsel %vm1188_vm0, %v12711_v47, %v12707_v57 }
 0x621   : > { %9294 = vmatmul.mubr.msk.f32.gmra.mrb[52].mxu1 %vm17359_vm1, %v3379_v49 }
 0x622   : > { %3491 = vmatprep.mubr.f32.mxu1 %v17533_v37  ;;  %9726 = vmatpush1.bf16.msra.mxu1 %v11437_v20 }
 0x623   : > { %v12725_v5 = vpop.permute.xlu0 %3359  ;;  %9728 = vmatprep.subr.bf16.mxu1 %v11447_v23 }
 0x624   : > { %17562 = vst [vmem:[#allocation137_spill] sm:$0xff] %v12725_v5  ;;  %v3380_v43 = vsel %vm1188_vm0, %v12725_v5, %v12721_v21 }
 0x625   : > { %9295 = vmatmul.mubr.msk.f32.gmra.mrb[54].mxu1 %vm17359_vm1, %v3380_v43 }
 0x626   : > { %3497 = vmatprep.mubr.f32.mxu1 %v17533_v37  ;;  %9730 = vmatpush1.bf16.msra.mxu1 %v11459_v28 }
 0x627   : > { %v12739_v63 = vpop.permute.xlu0 %3361  ;;  %9732 = vmatprep.subr.bf16.mxu1 %v11357_v51 }
 0x628   : > { %17564 = vst [vmem:[#allocation139_spill] sm:$0xff] %v12739_v63  ;;  %v3381_v26 = vsel %vm1188_vm0, %v12739_v63, %v12735_v12 }
 0x629   : > { %9296 = vmatmul.mubr.msk.f32.gmra.mrb[56].mxu1 %vm17359_vm1, %v3381_v26 }
 0x62a   : > { %3503 = vmatprep.mubr.f32.mxu1 %v17533_v37 }
 0x62b   : > { %v12752_v18 = vpop.permute.xlu0 %3363 }
 0x62c   : > { %17568 = vst [vmem:[#allocation140_spill] sm:$0xff] %v12752_v18  ;;  %v3382_v30 = vsel %vm1188_vm0, %v12752_v18, %v12749_v8 }
 0x62d   : > { %9297 = vmatmul.mubr.msk.f32.gmra.mrb[58].mxu1 %vm17359_vm1, %v3382_v30 }
 0x62e   : > { %3509 = vmatprep.mubr.f32.mxu1 %v17533_v37 }
 0x62f   : > { %v12764_v6 = vpop.permute.xlu0 %3365 }
 0x630   : > { %17571 = vst [vmem:[#allocation142_spill] sm:$0xff] %v12764_v6  ;;  %v3383_v25 = vsel %vm1188_vm0, %v12764_v6, %v12761_v13 }
 0x631   : > { %9298 = vmatmul.mubr.msk.f32.gmra.mrb[60].mxu1 %vm17359_vm1, %v3383_v25 }
 0x632   : > { %3515 = vmatprep.mubr.f32.mxu1 %v17533_v37 }
 0x634   : > { %v12775_v45 = vpop.permute.xlu1 %3367 }
 0x635   : > { %17574 = vst [vmem:[#allocation144_spill] sm:$0xff] %v12775_v45  ;;  %v3384_v55 = vsel %vm1188_vm0, %v12775_v45, %v12773_v16 }
 0x636   : > { %9299 = vmatmul.mubr.msk.f32.gmra.mrb[62].mxu1 %vm17359_vm1, %v3384_v55  ;;  %v17576_v55 = vld [vmem:[#allocation41_spill] sm:$0xff] }
 0x637   : > { %4100 = vmatprep.mubr.f32.mxu1 %v17533_v37 }
 0x6ec   : > { %v3475_v4 = vpop.f32.mrb[48].mxu1 }
 0x6ed   : > { %v3596_v49 = vadd.f32 %v3475_v4, %v17575_v60  ;;  %v12783_v31 = vpop.f32.mrb[49].mxu1 }
 0x6ef   : > { %3612 = vrot.lane.b32.xlu0 %v3596_v49, %s10844_s0  ;;  %v3812_v49 = vadd.f32 %v12783_v31, %v17576_v55 }
 0x6f0   : > { %v3481_v54 = vpop.f32.mrb[50].mxu1 }
 0x6f1   : > { %v3597_v11 = vadd.f32 %v3481_v54, %v17575_v60  ;;  %v12787_v2 = vpop.f32.mrb[51].mxu1 }
 0x6f3   : > { %3614 = vrot.lane.b32.xlu1 %v3597_v11, %s10844_s0 }
 0x6f4   : > { %v3487_v43 = vpop.f32.mrb[52].mxu1 }
 0x6f5   : > { %v3598_v46 = vadd.f32 %v3487_v43, %v17575_v60  ;;  %v12791_v59 = vpop.f32.mrb[53].mxu1 }
 0x6f7   : > { %3616 = vrot.lane.b32.xlu0 %v3598_v46, %s10844_s0 }
 0x6f8   : > { %v3493_v27 = vpop.f32.mrb[54].mxu1 }
 0x6f9   : > { %v3599_v1 = vadd.f32 %v3493_v27, %v17575_v60  ;;  %v12795_v36 = vpop.f32.mrb[55].mxu1 }
 0x6fb   : > { %3618 = vrot.lane.b32.xlu1 %v3599_v1, %s10844_s0 }
 0x6fc   : > { %v3499_v26 = vpop.f32.mrb[56].mxu1 }
 0x6fd   : > { %v3600_v32 = vadd.f32 %v3499_v26, %v17575_v60  ;;  %v12799_v39 = vpop.f32.mrb[57].mxu1 }
 0x6ff   : > { %3620 = vrot.lane.b32.xlu0 %v3600_v32, %s10844_s0  ;;  %v3813_v32 = vadd.f32 %v12787_v2, %v17576_v55 }
 0x700   : > { %v3505_v33 = vpop.f32.mrb[58].mxu1 }
 0x701   : > { %v3601_v30 = vadd.f32 %v3505_v33, %v17575_v60  ;;  %v12803_v42 = vpop.f32.mrb[59].mxu1 }
 0x703   : > { %3622 = vrot.lane.b32.xlu1 %v3601_v30, %s10844_s0  ;;  %v3814_v30 = vadd.f32 %v12791_v59, %v17576_v55 }
 0x704   : > { %v3511_v52 = vpop.f32.mrb[60].mxu1 }
 0x705   : > { %v3602_v25 = vadd.f32 %v3511_v52, %v17575_v60  ;;  %v12807_v19 = vpop.f32.mrb[61].mxu1 }
 0x707   : > { %3624 = vrot.lane.b32.xlu0 %v3602_v25, %s10844_s0  ;;  %v3815_v25 = vadd.f32 %v12795_v36, %v17576_v55 }
 0x709   : > { %v3517_v11 = vpop.f32.mrb[62].mxu1 }
 0x70a   : > { %v3603_v46 = vadd.f32 %v3517_v11, %v17575_v60  ;;  %v12813_v1 = vpop.f32.mrb[63].mxu1 }
 0x70b   : > { %3828 = vrot.lane.b32.xlu0 %v3812_v49, %s10844_s0  ;;  %v3816_v49 = vadd.f32 %v12799_v39, %v17576_v55 }
 0x70c   : > { %3626 = vrot.lane.b32.xlu1 %v3603_v46, %s10844_s0  ;;  %v3817_v46 = vadd.f32 %v12803_v42, %v17576_v55 }
 0x70f   : > { %3830 = vrot.lane.b32.xlu0 %v3813_v32, %s10844_s0  ;;  %v3818_v32 = vadd.f32 %v12807_v19, %v17576_v55 }
 0x713   : > { %3832 = vrot.lane.b32.xlu0 %v3814_v30, %s10844_s0  ;;  %v3819_v30 = vadd.f32 %v12813_v1, %v17576_v55 }
 0x717   : > { %3834 = vrot.lane.b32.xlu0 %v3815_v25, %s10844_s0  ;;  %v17577_v25 = vld [vmem:[#allocation67_spill] sm:$0xff] }
 0x718   : > { %v12840_v24 = vadd.f32 %v17578_v44, %v17577_v25  ;;  %v12845_v0 = vadd.f32 %v17579_v7, %v17577_v25  ;;  %v17581_v44 = vld [vmem:[#allocation37_spill] sm:$0xff] }
 0x719   : > { %v12855_v15 = vadd.f32 %v17581_v44, %v17577_v25 }
 0x71a   : > { %v3541_v41 = vadd.f32 %v3481_v54, %v12845_v0 }
 0x71b   : > { %3836 = vrot.lane.b32.xlu0 %v3816_v49, %s10844_s0  ;;  %v3540_v49 = vadd.f32 %v3475_v4, %v12840_v24  ;;  %v3543_v4 = vadd.f32 %v3493_v27, %v12855_v15 }
 0x71c   : > { %v9301_v50 = vmul.f32 -1.442695, %v3541_v41  ;;  %v17583_v41 = vld [vmem:[#allocation42_spill] sm:$0xff] }
 0x71d   : > { %v9303_v54 = vmul.f32 -1.442695, %v3543_v4 }
 0x71f   : > { %3838 = vrot.lane.b32.xlu0 %v3817_v46, %s10844_s0  ;;  %v9300_v46 = vmul.f32 -1.442695, %v3540_v49  ;;  %v17582_v49 = vld [vmem:[#allocation39_spill] sm:$0xff] }
 0x720   : > { %v12860_v45 = vadd.f32 %v17582_v49, %v17577_v25  ;;  %v17586_v49 = vld [vmem:[#allocation82_spill] sm:$0xff] }
 0x721   : > { %10065 = vpow2.f32 %v9300_v46 }
 0x722   : > { %10067 = vpow2.f32 %v9301_v50 }
 0x723   : > { %3840 = vrot.lane.b32.xlu0 %v3818_v32, %s10844_s0  ;;  %v17580_v32 = vld [vmem:[#allocation35_spill] sm:$0xff] }
 0x724   : > { %v12850_v22 = vadd.f32 %v17580_v32, %v17577_v25  ;;  %v3544_v32 = vadd.f32 %v3499_v26, %v12860_v45  ;;  %v17585_v26 = vld [vmem:[#allocation5_spill] sm:$0xff] }
 0x725   : > { %v12875_v63 = vadd.f32 %v17586_v49, %v17585_v26  ;;  %v17588_v49 = vld [vmem:[#allocation84_spill] sm:$0xff] }
 0x726   : > { %v9304_v44 = vmul.f32 -1.442695, %v3544_v32  ;;  %v17587_v32 = vld [vmem:[#allocation46_spill] sm:$0xff]  ;;  %v12886_v5 = vadd.f32 %v17588_v49, %v17585_v26 }
 0x727   : > { %3842 = vrot.lane.b32.xlu0 %v3819_v30, %s10844_s0  ;;  %v3542_v30 = vadd.f32 %v3487_v43, %v12850_v22  ;;  %v12865_v43 = vadd.f32 %v17583_v41, %v17577_v25 }
 0x729   : > { %v9302_v7 = vmul.f32 -1.442695, %v3542_v30  ;;  %v3545_v6 = vadd.f32 %v3505_v33, %v12865_v43  ;;  %v17584_v30 = vld [vmem:[#allocation44_spill] sm:$0xff]  ;;  %v12879_v33 = vadd.f32 %v17587_v32, %v17577_v25 }
 0x72a   : > { %v12870_v18 = vadd.f32 %v17584_v30, %v17577_v25 }
 0x72b   : > { %10069 = vpow2.f32 %v9302_v7  ;;  %v10066_v46 = vpop.eup %10065  ;;  %v9305_v4 = vmul.f32 -1.442695, %v3545_v6 }
 0x72c   : > { %10071 = vpow2.f32 %v9303_v54  ;;  %v3572_v27 = vadd.f32 1.0, %v10066_v46  ;;  %v10068_v50 = vpop.eup %10067  ;;  %v3546_v7 = vadd.f32 %v3511_v52, %v12870_v18  ;;  %v3756_v46 = vadd.f32 %v12783_v31, %v12875_v63 }
 0x72d   : > { %10073 = vpow2.f32 %v9304_v44  ;;  %v3573_v41 = vadd.f32 1.0, %v10068_v50  ;;  %v3547_v52 = vadd.f32 %v3517_v11, %v12879_v33  ;;  %v3757_v50 = vadd.f32 %v12787_v2, %v12886_v5 }
 0x72e   : > { %10075 = vrcp.f32 %v3572_v27  ;;  %v9306_v30 = vmul.f32 -1.442695, %v3546_v7  ;;  %v9308_v27 = vmul.f32 -1.442695, %v3756_v46 }
 0x72f   : > { %10077 = vpow2.f32 %v9305_v4  ;;  %v9307_v61 = vmul.f32 -1.442695, %v3547_v52  ;;  %v17589_v4 = vld [vmem:[#allocation86_spill] sm:$0xff] }
 0x730   : > { %10079 = vrcp.f32 %v3573_v41  ;;  %v12892_v7 = vadd.f32 %v17589_v4, %v17585_v26  ;;  %v17591_v4 = vld [vmem:[#allocation90_spill] sm:$0xff] }
 0x731   : > { %10081 = vpow2.f32 %v9306_v30 }
 0x732   : > { %v3758_v46 = vadd.f32 %v12791_v59, %v12892_v7 }
 0x735   : > { %v10070_v54 = vpop.eup %10069 }
 0x736   : > { %v10072_v44 = vpop.eup %10071  ;;  %v3574_v6 = vadd.f32 1.0, %v10070_v54  ;;  %v9309_v54 = vmul.f32 -1.442695, %v3757_v50  ;;  %v9310_v50 = vmul.f32 -1.442695, %v3758_v46 }
 0x737   : > { %v3575_v32 = vadd.f32 1.0, %v10072_v44  ;;  %v10074_v31 = vpop.eup %10073 }
 0x738   : > { %10083 = vrcp.f32 %v3574_v6  ;;  %v12894_v41 = vpop.eup %10075  ;;  %v3576_v44 = vadd.f32 1.0, %v10074_v31  ;;  %v17590_v6 = vld [vmem:[#allocation88_spill] sm:$0xff] }
 0x739   : > { %10085 = vpow2.f32 %v9308_v27  ;;  %v10078_v30 = vpop.eup %10077  ;;  %v12901_v52 = vadd.f32 %v17590_v6, %v17585_v26 }
 0x73a   : > { %10087 = vrcp.f32 %v3575_v32  ;;  %v12904_v49 = vpop.eup %10079  ;;  %v3577_v31 = vadd.f32 1.0, %v10078_v30 }
 0x73b   : > { %10089 = vpow2.f32 %v9307_v61  ;;  %v3759_v59 = vadd.f32 %v12795_v36, %v12901_v52  ;;  %v10082_v61 = vpop.eup %10081 }
 0x73c   : > { %10091 = vpow2.f32 %v9309_v54 }
 0x73d   : > { %10093 = vrcp.f32 %v3576_v44  ;;  %v9311_v54 = vmul.f32 -1.442695, %v3759_v59  ;;  %v3578_v44 = vadd.f32 1.0, %v10082_v61  ;;  %v17593_v61 = vld [vmem:[#allocation94_spill] sm:$0xff] }
 0x73e   : > { %10095 = vpow2.f32 %v9310_v50  ;;  %v12931_v25 = vadd.f32 %v17593_v61, %v17585_v26 }
 0x73f   : > { %10097 = vrcp.f32 %v3577_v31 }
 0x740   : > { %10099 = vpow2.f32 %v9311_v54 }
 0x741   : > { %10101 = vrcp.f32 %v3578_v44  ;;  %v17594_v44 = vld [vmem:[#allocation96_spill] sm:$0xff] }
 0x742   : > { %v12941_v61 = vadd.f32 %v17594_v44, %v17585_v26 }
 0x761   : > { %v3613_v11 = vpop.permute.xlu0 %3612 }
 0x762   : > { %v3636_v2 = vmul.f32 %v12894_v41, %v3613_v11  ;;  %v12911_v11 = vadd.f32 %v17591_v4, %v17585_v26  ;;  %v17592_v4 = vld [vmem:[#allocation92_spill] sm:$0xff] }
 0x763   : > { %v12923_v47 = vadd.f32 %v17592_v4, %v17585_v26 }
 0x764   : > { %3652 = vrot.lane.b32.xlu1 %v3636_v2, %s10844_s0  ;;  %v12914_v2 = vpop.eup %10083  ;;  %v3760_v46 = vadd.f32 %v12799_v39, %v12911_v11 }
 0x765   : > { %v3615_v27 = vpop.permute.xlu1 %3614  ;;  %v3761_v39 = vadd.f32 %v12803_v42, %v12923_v47  ;;  %v3762_v42 = vadd.f32 %v12807_v19, %v12931_v25  ;;  %v3763_v19 = vadd.f32 %v12813_v1, %v12941_v61 }
 0x766   : > { %v3637_v32 = vmul.f32 %v12904_v49, %v3615_v27  ;;  %v10086_v27 = vpop.eup %10085  ;;  %v9312_v50 = vmul.f32 -1.442695, %v3760_v46 }
 0x767   : > { %v12919_v30 = vpop.eup %10087  ;;  %v9313_v54 = vmul.f32 -1.442695, %v3761_v39 }
 0x768   : > { %3654 = vrot.lane.b32.xlu1 %v3637_v32, %s10844_s0  ;;  %v10090_v32 = vpop.eup %10089  ;;  %10103 = vpow2.f32 %v9312_v50  ;;  %v9314_v50 = vmul.f32 -1.442695, %v3762_v42 }
 0x769   : > { %v3617_v6 = vpop.permute.xlu0 %3616  ;;  %v10092_v31 = vpop.eup %10091  ;;  %v3579_v4 = vadd.f32 1.0, %v10090_v32 }
 0x76a   : > { %v3638_v36 = vmul.f32 %v12914_v2, %v3617_v6  ;;  %v3788_v6 = vadd.f32 1.0, %v10086_v27  ;;  %v3789_v46 = vadd.f32 1.0, %v10092_v31 }
 0x76c   : > { %3656 = vrot.lane.b32.xlu1 %v3638_v36, %s10844_s0  ;;  %v12934_v36 = vpop.eup %10093  ;;  %10105 = vrcp.f32 %v3788_v6 }
 0x76d   : > { %v3619_v40 = vpop.permute.xlu1 %3618  ;;  %v10096_v27 = vpop.eup %10095  ;;  %10107 = vrcp.f32 %v3579_v4 }
 0x76e   : > { %v3639_v59 = vmul.f32 %v12919_v30, %v3619_v40  ;;  %v12944_v32 = vpop.eup %10097  ;;  %10109 = vpow2.f32 %v9313_v54  ;;  %v3790_v39 = vadd.f32 1.0, %v10096_v27 }
 0x76f   : > { %10111 = vrcp.f32 %v3789_v46  ;;  %v10100_v6 = vpop.eup %10099 }
 0x770   : > { %3658 = vrot.lane.b32.xlu1 %v3639_v59, %s10844_s0  ;;  %v12950_v31 = vpop.eup %10101  ;;  %10113 = vpow2.f32 %v9314_v50  ;;  %v3791_v54 = vadd.f32 1.0, %v10100_v6 }
 0x771   : > { %v3621_v55 = vpop.permute.xlu0 %3620  ;;  %10115 = vrcp.f32 %v3790_v39 }
 0x772   : > { %v3640_v40 = vmul.f32 %v12934_v36, %v3621_v55  ;;  %v10104_v42 = vpop.eup %10103 }
 0x773   : > { %v3792_v26 = vadd.f32 1.0, %v10104_v42 }
 0x774   : > { %3660 = vrot.lane.b32.xlu1 %v3640_v40, %s10844_s0  ;;  %v9315_v40 = vmul.f32 -1.442695, %v3763_v19 }
 0x775   : > { %v3623_v59 = vpop.permute.xlu1 %3622 }
 0x776   : > { %v3641_v55 = vmul.f32 %v12944_v32, %v3623_v59  ;;  %v12954_v1 = vpop.eup %10105  ;;  %10117 = vpow2.f32 %v9315_v40 }
 0x777   : > { %v12956_v46 = vpop.eup %10107  ;;  %10119 = vrcp.f32 %v3791_v54 }
 0x778   : > { %3662 = vrot.lane.b32.xlu1 %v3641_v55, %s10844_s0  ;;  %v10110_v19 = vpop.eup %10109  ;;  %10121 = vrcp.f32 %v3792_v26 }
 0x779   : > { %v3625_v4 = vpop.permute.xlu0 %3624  ;;  %v12961_v39 = vpop.eup %10111 }
 0x77a   : > { %v3642_v44 = vmul.f32 %v12950_v31, %v3625_v4  ;;  %v10114_v40 = vpop.eup %10113 }
 0x77b   : > { %v12965_v60 = vpop.eup %10115 }
 0x77c   : > { %3664 = vrot.lane.b32.xlu1 %v3642_v44, %s10844_s0  ;;  %v3793_v44 = vadd.f32 1.0, %v10110_v19 }
 0x77d   : > { %v3829_v59 = vpop.permute.xlu0 %3828 }
 0x77e   : > { %v3852_v27 = vmul.f32 %v12954_v1, %v3829_v59  ;;  %v3627_v55 = vpop.permute.xlu1 %3626  ;;  %10123 = vrcp.f32 %v3793_v44  ;;  %v3794_v59 = vadd.f32 1.0, %v10114_v40 }
 0x77f   : > { %v3643_v50 = vmul.f32 %v12956_v46, %v3627_v55 }
 0x780   : > { %3868 = vrot.lane.b32.xlu0 %v3852_v27, %s10844_s0  ;;  %v10118_v27 = vpop.eup %10117  ;;  %10125 = vrcp.f32 %v3794_v59 }
 0x781   : > { %3666 = vrot.lane.b32.xlu1 %v3643_v50, %s10844_s0  ;;  %v3831_v6 = vpop.permute.xlu0 %3830  ;;  %v12970_v55 = vpop.eup %10119  ;;  %v3795_v26 = vadd.f32 1.0, %v10118_v27 }
 0x782   : > { %v3853_v4 = vmul.f32 %v12961_v39, %v3831_v6  ;;  %v12974_v19 = vpop.eup %10121 }
 0x783   : > { %10127 = vrcp.f32 %v3795_v26 }
 0x785   : > { %3870 = vrot.lane.b32.xlu1 %v3853_v4, %s10844_s0  ;;  %v3833_v54 = vpop.permute.xlu0 %3832 }
 0x786   : > { %v3854_v42 = vmul.f32 %v12965_v60, %v3833_v54 }
 0x788   : > { %3872 = vrot.lane.b32.xlu0 %v3854_v42, %s10844_s0  ;;  %v12978_v44 = vpop.eup %10123 }
 0x789   : > { %v3835_v50 = vpop.permute.xlu0 %3834 }
 0x78a   : > { %v3855_v6 = vmul.f32 %v12970_v55, %v3835_v50  ;;  %v12982_v42 = vpop.eup %10125 }
 0x78b   : > { %17595 = vst [vmem:[#allocation31_spill] sm:$0xff] %v12982_v42 }
 0x78c   : > { %3874 = vrot.lane.b32.xlu1 %v3855_v6, %s10844_s0 }
 0x78d   : > { %v3837_v4 = vpop.permute.xlu0 %3836  ;;  %v12986_v50 = vpop.eup %10127 }
 0x78e   : > { %v3856_v16 = vmul.f32 %v12974_v19, %v3837_v4 }
 0x790   : > { %3876 = vrot.lane.b32.xlu1 %v3856_v16, %s10844_s0 }
 0x791   : > { %v3839_v40 = vpop.permute.xlu0 %3838 }
 0x792   : > { %v3857_v54 = vmul.f32 %v12978_v44, %v3839_v40 }
 0x794   : > { %3878 = vrot.lane.b32.xlu1 %v3857_v54, %s10844_s0 }
 0x795   : > { %v3841_v59 = vpop.permute.xlu0 %3840 }
 0x796   : > { %v3858_v27 = vmul.f32 %v12982_v42, %v3841_v59 }
 0x798   : > { %3880 = vrot.lane.b32.xlu1 %v3858_v27, %s10844_s0 }
 0x799   : > { %v3843_v6 = vpop.permute.xlu0 %3842 }
 0x79a   : > { %v3859_v26 = vmul.f32 %v12986_v50, %v3843_v6 }
 0x79c   : > { %3882 = vrot.lane.b32.xlu1 %v3859_v26, %s10844_s0 }
 0x7d6   : > { %v3653_v16 = vpop.permute.xlu1 %3652 }
 0x7d7   : > { %v3676_v4 = vadd.f32 %v3653_v16, %v12840_v24 }
 0x7d9   : > { %10129 = vtanh.f32 %v3676_v4 }
 0x7da   : > { %v3655_v40 = vpop.permute.xlu1 %3654 }
 0x7db   : > { %v3677_v54 = vadd.f32 %v3655_v40, %v12845_v0 }
 0x7dd   : > { %10131 = vtanh.f32 %v3677_v54 }
 0x7de   : > { %v3657_v13 = vpop.permute.xlu1 %3656 }
 0x7df   : > { %v3678_v59 = vadd.f32 %v3657_v13, %v12850_v22 }
 0x7e1   : > { %10133 = vtanh.f32 %v3678_v59 }
 0x7e2   : > { %v3659_v27 = vpop.permute.xlu1 %3658 }
 0x7e3   : > { %v10130_v42 = vpop.eup %10129  ;;  %v3679_v8 = vadd.f32 %v3659_v27, %v12855_v15 }
 0x7e4   : > { %3708 = vrot.lane.b32.xlu0 %v10130_v42, %s10845_s18 }
 0x7e5   : > { %10135 = vtanh.f32 %v3679_v8 }
 0x7e6   : > { %v3661_v6 = vpop.permute.xlu1 %3660 }
 0x7e7   : > { %v10132_v26 = vpop.eup %10131  ;;  %v3680_v24 = vadd.f32 %v3661_v6, %v12860_v45 }
 0x7e8   : > { %3710 = vrot.lane.b32.xlu0 %v10132_v26, %s10845_s18 }
 0x7e9   : > { %10137 = vtanh.f32 %v3680_v24 }
 0x7ea   : > { %v3663_v0 = vpop.permute.xlu1 %3662 }
 0x7eb   : > { %v10134_v16 = vpop.eup %10133  ;;  %v3681_v4 = vadd.f32 %v3663_v0, %v12865_v43 }
 0x7ec   : > { %3712 = vrot.lane.b32.xlu0 %v10134_v16, %s10845_s18 }
 0x7ed   : > { %10139 = vtanh.f32 %v3681_v4 }
 0x7ee   : > { %v3665_v22 = vpop.permute.xlu1 %3664 }
 0x7ef   : > { %v10136_v13 = vpop.eup %10135  ;;  %v3682_v15 = vadd.f32 %v3665_v22, %v12870_v18 }
 0x7f0   : > { %3714 = vrot.lane.b32.xlu0 %v10136_v13, %s10845_s18 }
 0x7f1   : > { %10141 = vtanh.f32 %v3682_v15 }
 0x7f2   : > { %v3869_v8 = vpop.permute.xlu0 %3868 }
 0x7f3   : > { %v10138_v42 = vpop.eup %10137  ;;  %v3892_v45 = vadd.f32 %v3869_v8, %v12875_v63  ;;  %v3667_v40 = vpop.permute.xlu1 %3666 }
 0x7f4   : > { %v3683_v54 = vadd.f32 %v3667_v40, %v12879_v33  ;;  %3716 = vrot.lane.b32.xlu0 %v10138_v42, %s10845_s18 }
 0x7f5   : > { %10143 = vtanh.f32 %v3892_v45 }
 0x7f6   : > { %10145 = vtanh.f32 %v3683_v54 }
 0x7f7   : > { %v10140_v43 = vpop.eup %10139  ;;  %v3871_v59 = vpop.permute.xlu1 %3870 }
 0x7f8   : > { %v3893_v27 = vadd.f32 %v3871_v59, %v12886_v5  ;;  %3718 = vrot.lane.b32.xlu1 %v10140_v43, %s10845_s18  ;;  %v3740_v59 = vmul.f32 %v12894_v41, %v12625_v53  ;;  %v3742_v53 = vmul.f32 %v12914_v2, %v12639_v17  ;;  %v3696_v17 = vsub.f32 1.0, %v12934_v36 }
 0x7fa   : > { %10147 = vtanh.f32 %v3893_v27  ;;  %v3873_v18 = vpop.permute.xlu0 %3872 }
 0x7fb   : > { %v10142_v6 = vpop.eup %10141  ;;  %v3894_v26 = vadd.f32 %v3873_v18, %v12892_v7  ;;  %v3693_v18 = vsub.f32 1.0, %v12904_v49 }
 0x7fc   : > { %3720 = vrot.lane.b32.xlu0 %v10142_v6, %s10845_s18 }
 0x7fd   : > { %10149 = vtanh.f32 %v3894_v26  ;;  %v3741_v26 = vmul.f32 %v12904_v49, %v12632_v38  ;;  %v3695_v38 = vsub.f32 1.0, %v12919_v30 }
 0x7fe   : > { %v3875_v63 = vpop.permute.xlu1 %3874 }
 0x7ff   : > { %v10144_v33 = vpop.eup %10143  ;;  %v3895_v24 = vadd.f32 %v3875_v63, %v12901_v52 }
 0x800   : > { %v10146_v0 = vpop.eup %10145  ;;  %3924 = vrot.lane.b32.xlu0 %v10144_v33, %s10845_s18 }
 0x801   : > { %10151 = vtanh.f32 %v3895_v24  ;;  %3722 = vrot.lane.b32.xlu1 %v10146_v0, %s10845_s18  ;;  %v3694_v24 = vsub.f32 1.0, %v12914_v2 }
 0x802   : > { %v3877_v5 = vpop.permute.xlu1 %3876 }
 0x803   : > { %v3896_v16 = vadd.f32 %v3877_v5, %v12911_v11 }
 0x804   : > { %v10148_v4 = vpop.eup %10147 }
 0x805   : > { %10153 = vtanh.f32 %v3896_v16  ;;  %3926 = vrot.lane.b32.xlu1 %v10148_v4, %s10845_s18  ;;  %v3743_v16 = vmul.f32 %v12919_v30, %v12646_v34  ;;  %v3697_v34 = vsub.f32 1.0, %v12944_v32 }
 0x806   : > { %v3879_v7 = vpop.permute.xlu1 %3878 }
 0x807   : > { %v10150_v22 = vpop.eup %10149  ;;  %v3897_v13 = vadd.f32 %v3879_v7, %v12923_v47 }
 0x809   : > { %10155 = vtanh.f32 %v3897_v13  ;;  %3928 = vrot.lane.b32.xlu1 %v10150_v22, %s10845_s18  ;;  %v3744_v22 = vmul.f32 %v12934_v36, %v12653_v62  ;;  %v3698_v62 = vsub.f32 1.0, %v12950_v31 }
 0x80a   : > { %v3881_v52 = vpop.permute.xlu1 %3880 }
 0x80b   : > { %v10152_v15 = vpop.eup %10151  ;;  %v3898_v8 = vadd.f32 %v3881_v52, %v12931_v25  ;;  %v3692_v25 = vsub.f32 1.0, %v12894_v41 }
 0x80d   : > { %10157 = vtanh.f32 %v3898_v8  ;;  %3930 = vrot.lane.b32.xlu1 %v10152_v15, %s10845_s18  ;;  %v3745_v15 = vmul.f32 %v12944_v32, %v12660_v29  ;;  %v3699_v29 = vsub.f32 1.0, %v12956_v46 }
 0x80e   : > { %v3883_v42 = vpop.permute.xlu1 %3882 }
 0x80f   : > { %v10154_v11 = vpop.eup %10153  ;;  %v3899_v45 = vadd.f32 %v3883_v42, %v12941_v61 }
 0x811   : > { %10159 = vtanh.f32 %v3899_v45  ;;  %3932 = vrot.lane.b32.xlu1 %v10154_v11, %s10845_s18  ;;  %v3746_v11 = vmul.f32 %v12950_v31, %v12667_v35 }
 0x813   : > { %v10156_v40 = vpop.eup %10155 }
 0x815   : > { %3934 = vrot.lane.b32.xlu1 %v10156_v40, %s10845_s18 }
 0x817   : > { %v10158_v47 = vpop.eup %10157 }
 0x819   : > { %3936 = vrot.lane.b32.xlu1 %v10158_v47, %s10845_s18  ;;  %v3747_v47 = vmul.f32 %v12956_v46, %v12674_v10 }
 0x81b   : > { %v10160_v54 = vpop.eup %10159 }
 0x81d   : > { %3938 = vrot.lane.b32.xlu1 %v10160_v54, %s10845_s18 }
 0x856   : > { %v3709_v43 = vpop.permute.xlu0 %3708 }
 0x857   : > { %v3732_v27 = vmul.f32 %v3709_v43, %v3692_v25 }
 0x859   : > { %v13025_v61 = vadd.f32 %v3740_v59, %v3732_v27  ;;  %v3908_v59 = vsub.f32 1.0, %v12954_v1 }
 0x85a   : > { %v3711_v6 = vpop.permute.xlu0 %3710 }
 0x85b   : > { %v3733_v63 = vmul.f32 %v3711_v6, %v3693_v18  ;;  %3980 = vrot.lane.b32.xlu0 %v13025_v61, %s10845_s18  ;;  %v3956_v18 = vmul.f32 %v12954_v1, %v12682_v56  ;;  %v3909_v6 = vsub.f32 1.0, %v12961_v39 }
 0x85d   : > { %v13032_v33 = vadd.f32 %v3741_v26, %v3733_v63 }
 0x85e   : > { %v3713_v0 = vpop.permute.xlu0 %3712 }
 0x85f   : > { %v3734_v41 = vmul.f32 %v3713_v0, %v3694_v24  ;;  %3982 = vrot.lane.b32.xlu0 %v13032_v33, %s10845_s18  ;;  %v3957_v24 = vmul.f32 %v12961_v39, %v12693_v48  ;;  %v3910_v0 = vsub.f32 1.0, %v12965_v60  ;;  %v3958_v39 = vmul.f32 %v12965_v60, %v12707_v57 }
 0x860   : > { %v3959_v60 = vmul.f32 %v12970_v55, %v12721_v21 }
 0x861   : > { %v13039_v5 = vadd.f32 %v3742_v53, %v3734_v41 }
 0x862   : > { %v3715_v49 = vpop.permute.xlu0 %3714 }
 0x863   : > { %v3735_v4 = vmul.f32 %v3715_v49, %v3695_v38  ;;  %3984 = vrot.lane.b32.xlu0 %v13039_v5, %s10845_s18 }
 0x865   : > { %v13046_v7 = vadd.f32 %v3743_v16, %v3735_v4  ;;  %v3911_v16 = vsub.f32 1.0, %v12970_v55  ;;  %v3960_v55 = vmul.f32 %v12974_v19, %v12735_v12  ;;  %v17620_v12 = vld [vmem:[#allocation50_spill] sm:$0xff] }
 0x866   : > { %v3717_v2 = vpop.permute.xlu0 %3716 }
 0x867   : > { %v3736_v13 = vmul.f32 %v3717_v2, %v3696_v17  ;;  %3986 = vrot.lane.b32.xlu0 %v13046_v7, %s10845_s18 }
 0x869   : > { %v13053_v52 = vadd.f32 %v3744_v22, %v3736_v13  ;;  %v3912_v13 = vsub.f32 1.0, %v12974_v19  ;;  %v17606_v19 = vld [vmem:[#allocation99_spill] sm:$0xff] }
 0x86a   : > { %v3719_v30 = vpop.permute.xlu1 %3718 }
 0x86b   : > { %v3737_v8 = vmul.f32 %v3719_v30, %v3697_v34  ;;  %3988 = vrot.lane.b32.xlu0 %v13053_v52, %s10845_s18 }
 0x86d   : > { %v13060_v42 = vadd.f32 %v3745_v15, %v3737_v8 }
 0x86e   : > { %v3721_v36 = vpop.permute.xlu0 %3720 }
 0x86f   : > { %v3738_v45 = vmul.f32 %v3721_v36, %v3698_v62  ;;  %3990 = vrot.lane.b32.xlu0 %v13060_v42, %s10845_s18  ;;  %v3913_v36 = vsub.f32 1.0, %v12978_v44 }
 0x871   : > { %v13067_v40 = vadd.f32 %v3746_v11, %v3738_v45 }
 0x872   : > { %v3925_v43 = vpop.permute.xlu0 %3924 }
 0x873   : > { %v3723_v32 = vpop.permute.xlu1 %3722  ;;  %3992 = vrot.lane.b32.xlu0 %v13067_v40, %s10845_s18  ;;  %v3948_v27 = vmul.f32 %v3925_v43, %v3908_v59 }
 0x874   : > { %v3739_v54 = vmul.f32 %v3723_v32, %v3699_v29 }
 0x875   : > { %v13082_v63 = vadd.f32 %v3956_v18, %v3948_v27 }
 0x876   : > { %v13074_v25 = vadd.f32 %v3747_v47, %v3739_v54  ;;  %v3961_v54 = vmul.f32 %v12978_v44, %v17606_v19 }
 0x877   : > { %v3927_v35 = vpop.permute.xlu1 %3926  ;;  %17596 = vst [vmem:[#allocation33_spill] sm:$0xff] %v13082_v63 }
 0x878   : > { %3994 = vrot.lane.b32.xlu1 %v13074_v25, %s10845_s18  ;;  %v3949_v10 = vmul.f32 %v3927_v35, %v3909_v6  ;;  %v17607_v35 = vld [vmem:[#allocation31_spill] sm:$0xff]  ;;  %v17610_v6 = vld [vmem:[#allocation141_spill] sm:$0xff] }
 0x87a   : > { %v13093_v1 = vadd.f32 %v3957_v24, %v3949_v10  ;;  %v3915_v24 = vsub.f32 1.0, %v12986_v50 }
 0x87b   : > { %v3929_v31 = vpop.permute.xlu1 %3928 }
 0x87c   : > { %17598 = vst [vmem:[#allocation37_spill] sm:$0xff] %v13093_v1  ;;  %v3950_v41 = vmul.f32 %v3929_v31, %v3910_v0  ;;  %v3914_v31 = vsub.f32 1.0, %v17607_v35 }
 0x87e   : > { %v13107_v17 = vadd.f32 %v3958_v39, %v3950_v41  ;;  %v17613_v39 = vld [vmem:[#allocation143_spill] sm:$0xff] }
 0x87f   : > { %v3931_v26 = vpop.permute.xlu1 %3930 }
 0x880   : > { %17600 = vst [vmem:[#allocation42_spill] sm:$0xff] %v13107_v17  ;;  %v3951_v2 = vmul.f32 %v3931_v26, %v3911_v16  ;;  %v3962_v26 = vmul.f32 %v17607_v35, %v17610_v6  ;;  %v3963_v16 = vmul.f32 %v12986_v50, %v17613_v39  ;;  %v17619_v39 = vld [vmem:[#allocation48_spill] sm:$0xff] }
 0x882   : > { %v13121_v15 = vadd.f32 %v3959_v60, %v3951_v2 }
 0x883   : > { %v3933_v38 = vpop.permute.xlu1 %3932 }
 0x884   : > { %17602 = vst [vmem:[#allocation82_spill] sm:$0xff] %v13121_v15  ;;  %v3952_v8 = vmul.f32 %v3933_v38, %v3912_v13 }
 0x886   : > { %v13135_v45 = vadd.f32 %v3960_v55, %v3952_v8 }
 0x887   : > { %v3935_v34 = vpop.permute.xlu1 %3934 }
 0x888   : > { %17604 = vst [vmem:[#allocation84_spill] sm:$0xff] %v13135_v45  ;;  %v3953_v29 = vmul.f32 %v3935_v34, %v3913_v36  ;;  %v17616_v34 = vld [vmem:[#allocation27_spill] sm:$0xff] }
 0x88a   : > { %v13149_v59 = vadd.f32 %v3961_v54, %v3953_v29 }
 0x88b   : > { %v3937_v32 = vpop.permute.xlu1 %3936 }
 0x88c   : > { %17608 = vst [vmem:[#allocation88_spill] sm:$0xff] %v13149_v59  ;;  %v3954_v27 = vmul.f32 %v3937_v32, %v3914_v31 }
 0x88e   : > { %v13161_v0 = vadd.f32 %v3962_v26, %v3954_v27 }
 0x88f   : > { %v3939_v10 = vpop.permute.xlu1 %3938 }
 0x890   : > { %17611 = vst [vmem:[#allocation92_spill] sm:$0xff] %v13161_v0 }
 0x8cd   : > { %v13084_v46 = vpop.permute.xlu0 %3980 }
 0x8ce   : > { %17597 = vst [vmem:[#allocation35_spill] sm:$0xff] %v13084_v46  ;;  %v4004_v53 = vsel %vm1188_vm0, %v13084_v46, %v13082_v63 }
 0x8cf   : > { %9316 = vmatmul.mubr.msk.f32.vlgmr.msra.gmra.mrb[64].mxu1 %vm17359_vm1, %v4004_v53  ;;  %v3955_v53 = vmul.f32 %v3939_v10, %v3915_v24 }
 0x8d0   : > { %4106 = vmatprep.mubr.f32.mxu1 %v17533_v37  ;;  %9734 = vmatpush1.bf16.msra.mxu1 %v11372_v58 }
 0x8d1   : > { %v13097_v49 = vpop.permute.xlu0 %3982  ;;  %9736 = vmatprep.subr.bf16.mxu1 %v11399_v3 }
 0x8d2   : > { %17599 = vst [vmem:[#allocation39_spill] sm:$0xff] %v13097_v49  ;;  %v4005_v4 = vsel %vm1188_vm0, %v13097_v49, %v13093_v1 }
 0x8d3   : > { %9317 = vmatmul.mubr.msk.f32.gmra.mrb[66].mxu1 %vm17359_vm1, %v4005_v4  ;;  %v13173_v4 = vadd.f32 %v3963_v16, %v3955_v53 }
 0x8d4   : > { %4112 = vmatprep.mubr.f32.mxu1 %v17533_v37  ;;  %9738 = vmatpush1.bf16.msra.mxu1 %v11410_v9 }
 0x8d5   : > { %v13111_v22 = vpop.permute.xlu0 %3984  ;;  %9740 = vmatprep.subr.bf16.mxu1 %v11425_v14  ;;  %17614 = vst [vmem:[#allocation96_spill] sm:$0xff] %v13173_v4 }
 0x8d6   : > { %17601 = vst [vmem:[#allocation44_spill] sm:$0xff] %v13111_v22  ;;  %v4006_v30 = vsel %vm1188_vm0, %v13111_v22, %v13107_v17 }
 0x8d7   : > { %9318 = vmatmul.mubr.msk.f32.gmra.mrb[68].mxu1 %vm17359_vm1, %v4006_v30 }
 0x8d8   : > { %4118 = vmatprep.mubr.f32.mxu1 %v17533_v37  ;;  %9742 = vmatpush1.bf16.msra.mxu1 %v11437_v20 }
 0x8d9   : > { %v13125_v62 = vpop.permute.xlu0 %3986  ;;  %9744 = vmatprep.subr.bf16.mxu1 %v11447_v23 }
 0x8da   : > { %17603 = vst [vmem:[#allocation46_spill] sm:$0xff] %v13125_v62  ;;  %v4007_v11 = vsel %vm1188_vm0, %v13125_v62, %v13121_v15 }
 0x8db   : > { %9319 = vmatmul.mubr.msk.f32.gmra.mrb[70].mxu1 %vm17359_vm1, %v4007_v11 }
 0x8dc   : > { %4124 = vmatprep.mubr.f32.mxu1 %v17533_v37  ;;  %9746 = vmatpush1.bf16.msra.mxu1 %v11459_v28 }
 0x8dd   : > { %v13139_v47 = vpop.permute.xlu0 %3988  ;;  %9748 = vmatprep.subr.bf16.mxu1 %v11357_v51 }
 0x8de   : > { %17605 = vst [vmem:[#allocation86_spill] sm:$0xff] %v13139_v47  ;;  %v4008_v43 = vsel %vm1188_vm0, %v13139_v47, %v13135_v45 }
 0x8df   : > { %9320 = vmatmul.mubr.msk.f32.gmra.mrb[72].mxu1 %vm17359_vm1, %v4008_v43 }
 0x8e0   : > { %4130 = vmatprep.mubr.f32.mxu1 %v17533_v37 }
 0x8e1   : > { %v13152_v18 = vpop.permute.xlu0 %3990 }
 0x8e2   : > { %17609 = vst [vmem:[#allocation90_spill] sm:$0xff] %v13152_v18  ;;  %v4009_v44 = vsel %vm1188_vm0, %v13152_v18, %v13149_v59 }
 0x8e3   : > { %9321 = vmatmul.mubr.msk.f32.gmra.mrb[74].mxu1 %vm17359_vm1, %v4009_v44 }
 0x8e4   : > { %4136 = vmatprep.mubr.f32.mxu1 %v17533_v37 }
 0x8e5   : > { %v13164_v41 = vpop.permute.xlu0 %3992 }
 0x8e6   : > { %17612 = vst [vmem:[#allocation94_spill] sm:$0xff] %v13164_v41  ;;  %v4010_v38 = vsel %vm1188_vm0, %v13164_v41, %v13161_v0 }
 0x8e7   : > { %9322 = vmatmul.mubr.msk.f32.gmra.mrb[76].mxu1 %vm17359_vm1, %v4010_v38 }
 0x8e8   : > { %4142 = vmatprep.mubr.f32.mxu1 %v17533_v37 }
 0x8ea   : > { %v13175_v2 = vpop.permute.xlu1 %3994 }
 0x8eb   : > { %17615 = vst [vmem:[#allocation31_spill] sm:$0xff] %v13175_v2  ;;  %v4011_v60 = vsel %vm1188_vm0, %v13175_v2, %v13173_v4 }
 0x8ec   : > { %9323 = vmatmul.mubr.msk.f32.gmra.mrb[78].mxu1 %vm17359_vm1, %v4011_v60  ;;  %v17617_v60 = vld [vmem:[#allocation41_spill] sm:$0xff] }
 0x8ed   : > { %4727 = vmatprep.mubr.f32.mxu1 %v17533_v37 }
 0x9a2   : > { %v4102_v13 = vpop.f32.mrb[64].mxu1 }
 0x9a3   : > { %v4223_v30 = vadd.f32 %v4102_v13, %v17616_v34  ;;  %v13183_v50 = vpop.f32.mrb[65].mxu1 }
 0x9a5   : > { %4239 = vrot.lane.b32.xlu0 %v4223_v30, %s10844_s0  ;;  %v4439_v30 = vadd.f32 %v13183_v50, %v17617_v60 }
 0x9a6   : > { %v4108_v8 = vpop.f32.mrb[66].mxu1 }
 0x9a7   : > { %v4224_v55 = vadd.f32 %v4108_v8, %v17616_v34  ;;  %v13187_v36 = vpop.f32.mrb[67].mxu1 }
 0x9a9   : > { %4241 = vrot.lane.b32.xlu1 %v4224_v55, %s10844_s0 }
 0x9aa   : > { %v4114_v11 = vpop.f32.mrb[68].mxu1 }
 0x9ab   : > { %v4225_v29 = vadd.f32 %v4114_v11, %v17616_v34  ;;  %v13191_v32 = vpop.f32.mrb[69].mxu1 }
 0x9ad   : > { %4243 = vrot.lane.b32.xlu0 %v4225_v29, %s10844_s0 }
 0x9ae   : > { %v4120_v54 = vpop.f32.mrb[70].mxu1 }
 0x9af   : > { %v4226_v35 = vadd.f32 %v4120_v54, %v17616_v34  ;;  %v13195_v31 = vpop.f32.mrb[71].mxu1 }
 0x9b1   : > { %4245 = vrot.lane.b32.xlu1 %v4226_v35, %s10844_s0 }
 0x9b2   : > { %v4126_v43 = vpop.f32.mrb[72].mxu1 }
 0x9b3   : > { %v4227_v27 = vadd.f32 %v4126_v43, %v17616_v34  ;;  %v13199_v26 = vpop.f32.mrb[73].mxu1 }
 0x9b5   : > { %4247 = vrot.lane.b32.xlu0 %v4227_v27, %s10844_s0  ;;  %v4440_v27 = vadd.f32 %v13187_v36, %v17617_v60 }
 0x9b6   : > { %v4132_v10 = vpop.f32.mrb[74].mxu1 }
 0x9b7   : > { %v4228_v44 = vadd.f32 %v4132_v10, %v17616_v34  ;;  %v13203_v24 = vpop.f32.mrb[75].mxu1 }
 0x9b9   : > { %4249 = vrot.lane.b32.xlu1 %v4228_v44, %s10844_s0  ;;  %v4441_v44 = vadd.f32 %v13191_v32, %v17617_v60 }
 0x9ba   : > { %v4138_v53 = vpop.f32.mrb[76].mxu1 }
 0x9bb   : > { %v4229_v38 = vadd.f32 %v4138_v53, %v17616_v34  ;;  %v13207_v16 = vpop.f32.mrb[77].mxu1 }
 0x9bd   : > { %4251 = vrot.lane.b32.xlu0 %v4229_v38, %s10844_s0  ;;  %v4442_v38 = vadd.f32 %v13195_v31, %v17617_v60 }
 0x9bf   : > { %v4144_v55 = vpop.f32.mrb[78].mxu1 }
 0x9c0   : > { %v4230_v29 = vadd.f32 %v4144_v55, %v17616_v34  ;;  %v13213_v35 = vpop.f32.mrb[79].mxu1 }
 0x9c1   : > { %4455 = vrot.lane.b32.xlu0 %v4439_v30, %s10844_s0  ;;  %v4443_v30 = vadd.f32 %v13199_v26, %v17617_v60 }
 0x9c2   : > { %4253 = vrot.lane.b32.xlu1 %v4230_v29, %s10844_s0  ;;  %v4444_v29 = vadd.f32 %v13203_v24, %v17617_v60 }
 0x9c5   : > { %4457 = vrot.lane.b32.xlu0 %v4440_v27, %s10844_s0  ;;  %v4445_v27 = vadd.f32 %v13207_v16, %v17617_v60 }
 0x9c9   : > { %4459 = vrot.lane.b32.xlu0 %v4441_v44, %s10844_s0  ;;  %v4446_v44 = vadd.f32 %v13213_v35, %v17617_v60 }
 0x9cd   : > { %4461 = vrot.lane.b32.xlu0 %v4442_v38, %s10844_s0  ;;  %v17618_v38 = vld [vmem:[#allocation67_spill] sm:$0xff] }
 0x9ce   : > { %v13240_v19 = vadd.f32 %v17619_v39, %v17618_v38  ;;  %v13245_v6 = vadd.f32 %v17620_v12, %v17618_v38  ;;  %v17622_v39 = vld [vmem:[#allocation54_spill] sm:$0xff] }
 0x9cf   : > { %v13255_v48 = vadd.f32 %v17622_v39, %v17618_v38 }
 0x9d0   : > { %v4168_v21 = vadd.f32 %v4108_v8, %v13245_v6 }
 0x9d1   : > { %4463 = vrot.lane.b32.xlu0 %v4443_v30, %s10844_s0  ;;  %v4167_v30 = vadd.f32 %v4102_v13, %v13240_v19  ;;  %v4170_v13 = vadd.f32 %v4120_v54, %v13255_v48 }
 0x9d2   : > { %v9325_v56 = vmul.f32 -1.442695, %v4168_v21  ;;  %v17624_v21 = vld [vmem:[#allocation58_spill] sm:$0xff] }
 0x9d3   : > { %v9327_v8 = vmul.f32 -1.442695, %v4170_v13 }
 0x9d5   : > { %4465 = vrot.lane.b32.xlu0 %v4444_v29, %s10844_s0  ;;  %v9324_v29 = vmul.f32 -1.442695, %v4167_v30  ;;  %v17623_v30 = vld [vmem:[#allocation56_spill] sm:$0xff] }
 0x9d6   : > { %v13260_v2 = vadd.f32 %v17623_v30, %v17618_v38  ;;  %v17627_v30 = vld [vmem:[#allocation65_spill] sm:$0xff] }
 0x9d7   : > { %10161 = vpow2.f32 %v9324_v29 }
 0x9d8   : > { %10163 = vpow2.f32 %v9325_v56 }
 0x9d9   : > { %4467 = vrot.lane.b32.xlu0 %v4445_v27, %s10844_s0  ;;  %v17621_v27 = vld [vmem:[#allocation52_spill] sm:$0xff] }
 0x9da   : > { %v13250_v57 = vadd.f32 %v17621_v27, %v17618_v38  ;;  %v4171_v27 = vadd.f32 %v4126_v43, %v13260_v2  ;;  %v17626_v43 = vld [vmem:[#allocation5_spill] sm:$0xff] }
 0x9db   : > { %v13275_v47 = vadd.f32 %v17627_v30, %v17626_v43  ;;  %v17629_v30 = vld [vmem:[#allocation68_spill] sm:$0xff] }
 0x9dc   : > { %v9328_v39 = vmul.f32 -1.442695, %v4171_v27  ;;  %v17628_v27 = vld [vmem:[#allocation62_spill] sm:$0xff]  ;;  %v13286_v62 = vadd.f32 %v17629_v30, %v17626_v43 }
 0x9dd   : > { %4469 = vrot.lane.b32.xlu0 %v4446_v44, %s10844_s0  ;;  %v4169_v44 = vadd.f32 %v4114_v11, %v13250_v57  ;;  %v13265_v11 = vadd.f32 %v17624_v21, %v17618_v38 }
 0x9df   : > { %v9326_v12 = vmul.f32 -1.442695, %v4169_v44  ;;  %v4172_v41 = vadd.f32 %v4132_v10, %v13265_v11  ;;  %v17625_v44 = vld [vmem:[#allocation60_spill] sm:$0xff]  ;;  %v13279_v10 = vadd.f32 %v17628_v27, %v17618_v38 }
 0x9e0   : > { %v13270_v18 = vadd.f32 %v17625_v44, %v17618_v38 }
 0x9e1   : > { %10165 = vpow2.f32 %v9326_v12  ;;  %v10162_v29 = vpop.eup %10161  ;;  %v9329_v13 = vmul.f32 -1.442695, %v4172_v41 }
 0x9e2   : > { %10167 = vpow2.f32 %v9327_v8  ;;  %v4199_v54 = vadd.f32 1.0, %v10162_v29  ;;  %v10164_v56 = vpop.eup %10163  ;;  %v4173_v12 = vadd.f32 %v4138_v53, %v13270_v18  ;;  %v4383_v29 = vadd.f32 %v13183_v50, %v13275_v47 }
 0x9e3   : > { %10169 = vpow2.f32 %v9328_v39  ;;  %v4200_v21 = vadd.f32 1.0, %v10164_v56  ;;  %v4174_v53 = vadd.f32 %v4144_v55, %v13279_v10  ;;  %v4384_v56 = vadd.f32 %v13187_v36, %v13286_v62 }
 0x9e4   : > { %10171 = vrcp.f32 %v4199_v54  ;;  %v9330_v44 = vmul.f32 -1.442695, %v4173_v12  ;;  %v9332_v54 = vmul.f32 -1.442695, %v4383_v29 }
 0x9e5   : > { %10173 = vpow2.f32 %v9329_v13  ;;  %v9331_v22 = vmul.f32 -1.442695, %v4174_v53  ;;  %v17630_v13 = vld [vmem:[#allocation70_spill] sm:$0xff] }
 0x9e6   : > { %10175 = vrcp.f32 %v4200_v21  ;;  %v13292_v12 = vadd.f32 %v17630_v13, %v17626_v43  ;;  %v17632_v13 = vld [vmem:[#allocation74_spill] sm:$0xff] }
 0x9e7   : > { %10177 = vpow2.f32 %v9330_v44 }
 0x9e8   : > { %v4385_v29 = vadd.f32 %v13191_v32, %v13292_v12 }
 0x9eb   : > { %v10166_v8 = vpop.eup %10165 }
 0x9ec   : > { %v10168_v39 = vpop.eup %10167  ;;  %v4201_v41 = vadd.f32 1.0, %v10166_v8  ;;  %v9333_v8 = vmul.f32 -1.442695, %v4384_v56  ;;  %v9334_v56 = vmul.f32 -1.442695, %v4385_v29 }
 0x9ed   : > { %v4202_v27 = vadd.f32 1.0, %v10168_v39  ;;  %v10170_v50 = vpop.eup %10169 }
 0x9ee   : > { %10179 = vrcp.f32 %v4201_v41  ;;  %v13294_v21 = vpop.eup %10171  ;;  %v4203_v39 = vadd.f32 1.0, %v10170_v50  ;;  %v17631_v41 = vld [vmem:[#allocation72_spill] sm:$0xff] }
 0x9ef   : > { %10181 = vpow2.f32 %v9332_v54  ;;  %v10174_v44 = vpop.eup %10173  ;;  %v13301_v53 = vadd.f32 %v17631_v41, %v17626_v43 }
 0x9f0   : > { %10183 = vrcp.f32 %v4202_v27  ;;  %v13304_v30 = vpop.eup %10175  ;;  %v4204_v50 = vadd.f32 1.0, %v10174_v44 }
 0x9f1   : > { %10185 = vpow2.f32 %v9331_v22  ;;  %v4386_v32 = vadd.f32 %v13195_v31, %v13301_v53  ;;  %v10178_v22 = vpop.eup %10177 }
 0x9f2   : > { %10187 = vpow2.f32 %v9333_v8 }
 0x9f3   : > { %10189 = vrcp.f32 %v4203_v39  ;;  %v9335_v8 = vmul.f32 -1.442695, %v4386_v32  ;;  %v4205_v39 = vadd.f32 1.0, %v10178_v22  ;;  %v17634_v22 = vld [vmem:[#allocation78_spill] sm:$0xff] }
 0x9f4   : > { %10191 = vpow2.f32 %v9334_v56  ;;  %v13331_v38 = vadd.f32 %v17634_v22, %v17626_v43 }
 0x9f5   : > { %10193 = vrcp.f32 %v4204_v50 }
 0x9f6   : > { %10195 = vpow2.f32 %v9335_v8 }
 0x9f7   : > { %10197 = vrcp.f32 %v4205_v39  ;;  %v17635_v39 = vld [vmem:[#allocation80_spill] sm:$0xff] }
 0x9f8   : > { %v13341_v22 = vadd.f32 %v17635_v39, %v17626_v43 }
 0xa17   : > { %v4240_v55 = vpop.permute.xlu0 %4239 }
 0xa18   : > { %v4263_v36 = vmul.f32 %v13294_v21, %v4240_v55  ;;  %v13311_v55 = vadd.f32 %v17632_v13, %v17626_v43  ;;  %v17633_v13 = vld [vmem:[#allocation76_spill] sm:$0xff] }
 0xa19   : > { %v13323_v46 = vadd.f32 %v17633_v13, %v17626_v43 }
 0xa1a   : > { %4279 = vrot.lane.b32.xlu1 %v4263_v36, %s10844_s0  ;;  %v13314_v36 = vpop.eup %10179  ;;  %v4387_v29 = vadd.f32 %v13199_v26, %v13311_v55 }
 0xa1b   : > { %v4242_v54 = vpop.permute.xlu1 %4241  ;;  %v4388_v26 = vadd.f32 %v13203_v24, %v13323_v46  ;;  %v4389_v24 = vadd.f32 %v13207_v16, %v13331_v38  ;;  %v4390_v16 = vadd.f32 %v13213_v35, %v13341_v22 }
 0xa1c   : > { %v4264_v27 = vmul.f32 %v13304_v30, %v4242_v54  ;;  %v10182_v54 = vpop.eup %10181  ;;  %v9336_v56 = vmul.f32 -1.442695, %v4387_v29 }
 0xa1d   : > { %v13319_v44 = vpop.eup %10183  ;;  %v9337_v8 = vmul.f32 -1.442695, %v4388_v26 }
 0xa1e   : > { %4281 = vrot.lane.b32.xlu1 %v4264_v27, %s10844_s0  ;;  %v10186_v27 = vpop.eup %10185  ;;  %10199 = vpow2.f32 %v9336_v56  ;;  %v9338_v56 = vmul.f32 -1.442695, %v4389_v24 }
 0xa1f   : > { %v4244_v41 = vpop.permute.xlu0 %4243  ;;  %v10188_v50 = vpop.eup %10187  ;;  %v4206_v13 = vadd.f32 1.0, %v10186_v27 }
 0xa20   : > { %v4265_v31 = vmul.f32 %v13314_v36, %v4244_v41  ;;  %v4415_v41 = vadd.f32 1.0, %v10182_v54  ;;  %v4416_v29 = vadd.f32 1.0, %v10188_v50 }
 0xa22   : > { %4283 = vrot.lane.b32.xlu1 %v4265_v31, %s10844_s0  ;;  %v13334_v31 = vpop.eup %10189  ;;  %10201 = vrcp.f32 %v4415_v41 }
 0xa23   : > { %v4246_v49 = vpop.permute.xlu1 %4245  ;;  %v10192_v54 = vpop.eup %10191  ;;  %10203 = vrcp.f32 %v4206_v13 }
 0xa24   : > { %v4266_v32 = vmul.f32 %v13319_v44, %v4246_v49  ;;  %v13344_v27 = vpop.eup %10193  ;;  %10205 = vpow2.f32 %v9337_v8  ;;  %v4417_v26 = vadd.f32 1.0, %v10192_v54 }
 0xa25   : > { %10207 = vrcp.f32 %v4416_v29  ;;  %v10196_v41 = vpop.eup %10195 }
 0xa26   : > { %4285 = vrot.lane.b32.xlu1 %v4266_v32, %s10844_s0  ;;  %v13350_v50 = vpop.eup %10197  ;;  %10209 = vpow2.f32 %v9338_v56  ;;  %v4418_v8 = vadd.f32 1.0, %v10196_v41 }
 0xa27   : > { %v4248_v60 = vpop.permute.xlu0 %4247  ;;  %10211 = vrcp.f32 %v4417_v26 }
 0xa28   : > { %v4267_v49 = vmul.f32 %v13334_v31, %v4248_v60  ;;  %v10200_v24 = vpop.eup %10199 }
 0xa29   : > { %v4419_v43 = vadd.f32 1.0, %v10200_v24 }
 0xa2a   : > { %4287 = vrot.lane.b32.xlu1 %v4267_v49, %s10844_s0  ;;  %v9339_v49 = vmul.f32 -1.442695, %v4390_v16 }
 0xa2b   : > { %v4250_v32 = vpop.permute.xlu1 %4249 }
 0xa2c   : > { %v4268_v60 = vmul.f32 %v13344_v27, %v4250_v32  ;;  %v13354_v35 = vpop.eup %10201  ;;  %10213 = vpow2.f32 %v9339_v49 }
 0xa2d   : > { %v13356_v29 = vpop.eup %10203  ;;  %10215 = vrcp.f32 %v4418_v8 }
 0xa2e   : > { %4289 = vrot.lane.b32.xlu1 %v4268_v60, %s10844_s0  ;;  %v10206_v16 = vpop.eup %10205  ;;  %10217 = vrcp.f32 %v4419_v43 }
 0xa2f   : > { %v4252_v13 = vpop.permute.xlu0 %4251  ;;  %v13361_v26 = vpop.eup %10207 }
 0xa30   : > { %v4269_v39 = vmul.f32 %v13350_v50, %v4252_v13  ;;  %v10210_v49 = vpop.eup %10209 }
 0xa31   : > { %v13365_v34 = vpop.eup %10211 }
 0xa32   : > { %4291 = vrot.lane.b32.xlu1 %v4269_v39, %s10844_s0  ;;  %v4420_v39 = vadd.f32 1.0, %v10206_v16 }
 0xa33   : > { %v4456_v32 = vpop.permute.xlu0 %4455 }
 0xa34   : > { %v4479_v54 = vmul.f32 %v13354_v35, %v4456_v32  ;;  %v4254_v60 = vpop.permute.xlu1 %4253  ;;  %10219 = vrcp.f32 %v4420_v39  ;;  %v4421_v32 = vadd.f32 1.0, %v10210_v49 }
 0xa35   : > { %v4270_v56 = vmul.f32 %v13356_v29, %v4254_v60 }
 0xa36   : > { %4495 = vrot.lane.b32.xlu0 %v4479_v54, %s10844_s0  ;;  %v10214_v54 = vpop.eup %10213  ;;  %10221 = vrcp.f32 %v4421_v32 }
 0xa37   : > { %4293 = vrot.lane.b32.xlu1 %v4270_v56, %s10844_s0  ;;  %v4458_v41 = vpop.permute.xlu0 %4457  ;;  %v13370_v60 = vpop.eup %10215  ;;  %v4422_v43 = vadd.f32 1.0, %v10214_v54 }
 0xa38   : > { %v4480_v13 = vmul.f32 %v13361_v26, %v4458_v41  ;;  %v13374_v16 = vpop.eup %10217 }
 0xa39   : > { %10223 = vrcp.f32 %v4422_v43 }
 0xa3b   : > { %4497 = vrot.lane.b32.xlu1 %v4480_v13, %s10844_s0  ;;  %v4460_v8 = vpop.permute.xlu0 %4459 }
 0xa3c   : > { %v4481_v24 = vmul.f32 %v13365_v34, %v4460_v8 }
 0xa3e   : > { %4499 = vrot.lane.b32.xlu0 %v4481_v24, %s10844_s0  ;;  %v13378_v39 = vpop.eup %10219 }
 0xa3f   : > { %v4462_v56 = vpop.permute.xlu0 %4461 }
 0xa40   : > { %v4482_v41 = vmul.f32 %v13370_v60, %v4462_v56  ;;  %v13382_v24 = vpop.eup %10221 }
 0xa41   : > { %17636 = vst [vmem:[#allocation48_spill] sm:$0xff] %v13382_v24 }
 0xa42   : > { %4501 = vrot.lane.b32.xlu1 %v4482_v41, %s10844_s0 }
 0xa43   : > { %v4464_v13 = vpop.permute.xlu0 %4463  ;;  %v13386_v56 = vpop.eup %10223 }
 0xa44   : > { %v4483_v4 = vmul.f32 %v13374_v16, %v4464_v13 }
 0xa46   : > { %4503 = vrot.lane.b32.xlu1 %v4483_v4, %s10844_s0 }
 0xa47   : > { %v4466_v49 = vpop.permute.xlu0 %4465 }
 0xa48   : > { %v4484_v8 = vmul.f32 %v13378_v39, %v4466_v49 }
 0xa4a   : > { %4505 = vrot.lane.b32.xlu1 %v4484_v8, %s10844_s0 }
 0xa4b   : > { %v4468_v32 = vpop.permute.xlu0 %4467 }
 0xa4c   : > { %v4485_v54 = vmul.f32 %v13382_v24, %v4468_v32 }
 0xa4e   : > { %4507 = vrot.lane.b32.xlu1 %v4485_v54, %s10844_s0 }
 0xa4f   : > { %v4470_v41 = vpop.permute.xlu0 %4469 }
 0xa50   : > { %v4486_v43 = vmul.f32 %v13386_v56, %v4470_v41 }
 0xa52   : > { %4509 = vrot.lane.b32.xlu1 %v4486_v43, %s10844_s0 }
 0xa8c   : > { %v4280_v4 = vpop.permute.xlu1 %4279 }
 0xa8d   : > { %v4303_v13 = vadd.f32 %v4280_v4, %v13240_v19 }
 0xa8f   : > { %10225 = vtanh.f32 %v4303_v13 }
 0xa90   : > { %v4282_v49 = vpop.permute.xlu1 %4281 }
 0xa91   : > { %v4304_v8 = vadd.f32 %v4282_v49, %v13245_v6 }
 0xa93   : > { %10227 = vtanh.f32 %v4304_v8 }
 0xa94   : > { %v4284_v0 = vpop.permute.xlu1 %4283 }
 0xa95   : > { %v4305_v32 = vadd.f32 %v4284_v0, %v13250_v57 }
 0xa97   : > { %10229 = vtanh.f32 %v4305_v32 }
 0xa98   : > { %v4286_v54 = vpop.permute.xlu1 %4285 }
 0xa99   : > { %v10226_v24 = vpop.eup %10225  ;;  %v4306_v59 = vadd.f32 %v4286_v54, %v13255_v48 }
 0xa9a   : > { %4335 = vrot.lane.b32.xlu0 %v10226_v24, %s10845_s18 }
 0xa9b   : > { %10231 = vtanh.f32 %v4306_v59 }
 0xa9c   : > { %v4288_v41 = vpop.permute.xlu1 %4287 }
 0xa9d   : > { %v10228_v43 = vpop.eup %10227  ;;  %v4307_v19 = vadd.f32 %v4288_v41, %v13260_v2 }
 0xa9e   : > { %4337 = vrot.lane.b32.xlu0 %v10228_v43, %s10845_s18 }
 0xa9f   : > { %10233 = vtanh.f32 %v4307_v19 }
 0xaa0   : > { %v4290_v6 = vpop.permute.xlu1 %4289 }
 0xaa1   : > { %v10230_v4 = vpop.eup %10229  ;;  %v4308_v13 = vadd.f32 %v4290_v6, %v13265_v11 }
 0xaa2   : > { %4339 = vrot.lane.b32.xlu0 %v10230_v4, %s10845_s18 }
 0xaa3   : > { %10235 = vtanh.f32 %v4308_v13 }
 0xaa4   : > { %v4292_v57 = vpop.permute.xlu1 %4291 }
 0xaa5   : > { %v10232_v0 = vpop.eup %10231  ;;  %v4309_v48 = vadd.f32 %v4292_v57, %v13270_v18 }
 0xaa6   : > { %4341 = vrot.lane.b32.xlu0 %v10232_v0, %s10845_s18 }
 0xaa7   : > { %10237 = vtanh.f32 %v4309_v48 }
 0xaa8   : > { %v4496_v59 = vpop.permute.xlu0 %4495 }
 0xaa9   : > { %v10234_v24 = vpop.eup %10233  ;;  %v4519_v2 = vadd.f32 %v4496_v59, %v13275_v47  ;;  %v4294_v49 = vpop.permute.xlu1 %4293 }
 0xaaa   : > { %v4310_v8 = vadd.f32 %v4294_v49, %v13279_v10  ;;  %4343 = vrot.lane.b32.xlu0 %v10234_v24, %s10845_s18 }
 0xaab   : > { %10239 = vtanh.f32 %v4519_v2 }
 0xaac   : > { %10241 = vtanh.f32 %v4310_v8 }
 0xaad   : > { %v10236_v11 = vpop.eup %10235  ;;  %v4498_v32 = vpop.permute.xlu1 %4497 }
 0xaae   : > { %v4520_v54 = vadd.f32 %v4498_v32, %v13286_v62  ;;  %4345 = vrot.lane.b32.xlu1 %v10236_v11, %s10845_s18  ;;  %v4367_v32 = vmul.f32 %v13294_v21, %v13025_v61  ;;  %v4369_v61 = vmul.f32 %v13314_v36, %v13039_v5  ;;  %v4323_v5 = vsub.f32 1.0, %v13334_v31 }
 0xab0   : > { %10243 = vtanh.f32 %v4520_v54  ;;  %v4500_v18 = vpop.permute.xlu0 %4499 }
 0xab1   : > { %v10238_v41 = vpop.eup %10237  ;;  %v4521_v43 = vadd.f32 %v4500_v18, %v13292_v12  ;;  %v4320_v18 = vsub.f32 1.0, %v13304_v30 }
 0xab2   : > { %4347 = vrot.lane.b32.xlu0 %v10238_v41, %s10845_s18 }
 0xab3   : > { %10245 = vtanh.f32 %v4521_v43  ;;  %v4368_v43 = vmul.f32 %v13304_v30, %v13032_v33  ;;  %v4322_v33 = vsub.f32 1.0, %v13319_v44 }
 0xab4   : > { %v4502_v47 = vpop.permute.xlu1 %4501 }
 0xab5   : > { %v10240_v10 = vpop.eup %10239  ;;  %v4522_v19 = vadd.f32 %v4502_v47, %v13301_v53 }
 0xab6   : > { %v10242_v6 = vpop.eup %10241  ;;  %4551 = vrot.lane.b32.xlu0 %v10240_v10, %s10845_s18 }
 0xab7   : > { %10247 = vtanh.f32 %v4522_v19  ;;  %4349 = vrot.lane.b32.xlu1 %v10242_v6, %s10845_s18  ;;  %v4321_v19 = vsub.f32 1.0, %v13314_v36 }
 0xab8   : > { %v4504_v62 = vpop.permute.xlu1 %4503 }
 0xab9   : > { %v4523_v4 = vadd.f32 %v4504_v62, %v13311_v55 }
 0xaba   : > { %v10244_v13 = vpop.eup %10243 }
 0xabb   : > { %10249 = vtanh.f32 %v4523_v4  ;;  %4553 = vrot.lane.b32.xlu1 %v10244_v13, %s10845_s18  ;;  %v4370_v4 = vmul.f32 %v13319_v44, %v13046_v7  ;;  %v4324_v7 = vsub.f32 1.0, %v13344_v27 }
 0xabc   : > { %v4506_v12 = vpop.permute.xlu1 %4505 }
 0xabd   : > { %v10246_v57 = vpop.eup %10245  ;;  %v4524_v0 = vadd.f32 %v4506_v12, %v13323_v46 }
 0xabf   : > { %10251 = vtanh.f32 %v4524_v0  ;;  %4555 = vrot.lane.b32.xlu1 %v10246_v57, %s10845_s18  ;;  %v4371_v57 = vmul.f32 %v13334_v31, %v13053_v52  ;;  %v4325_v52 = vsub.f32 1.0, %v13350_v50 }
 0xac0   : > { %v4508_v53 = vpop.permute.xlu1 %4507 }
 0xac1   : > { %v10248_v48 = vpop.eup %10247  ;;  %v4525_v59 = vadd.f32 %v4508_v53, %v13331_v38  ;;  %v4319_v38 = vsub.f32 1.0, %v13294_v21 }
 0xac3   : > { %10253 = vtanh.f32 %v4525_v59  ;;  %4557 = vrot.lane.b32.xlu1 %v10248_v48, %s10845_s18  ;;  %v4372_v48 = vmul.f32 %v13344_v27, %v13060_v42  ;;  %v4326_v42 = vsub.f32 1.0, %v13356_v29 }
 0xac4   : > { %v4510_v24 = vpop.permute.xlu1 %4509 }
 0xac5   : > { %v10250_v55 = vpop.eup %10249  ;;  %v4526_v2 = vadd.f32 %v4510_v24, %v13341_v22 }
 0xac7   : > { %10255 = vtanh.f32 %v4526_v2  ;;  %4559 = vrot.lane.b32.xlu1 %v10250_v55, %s10845_s18  ;;  %v4373_v55 = vmul.f32 %v13350_v50, %v13067_v40 }
 0xac9   : > { %v10252_v49 = vpop.eup %10251 }
 0xacb   : > { %4561 = vrot.lane.b32.xlu1 %v10252_v49, %s10845_s18 }
 0xacd   : > { %v10254_v46 = vpop.eup %10253 }
 0xacf   : > { %4563 = vrot.lane.b32.xlu1 %v10254_v46, %s10845_s18  ;;  %v4374_v46 = vmul.f32 %v13356_v29, %v13074_v25 }
 0xad1   : > { %v10256_v8 = vpop.eup %10255 }
 0xad3   : > { %4565 = vrot.lane.b32.xlu1 %v10256_v8, %s10845_s18 }
 0xb0c   : > { %v4336_v11 = vpop.permute.xlu0 %4335 }
 0xb0d   : > { %v4359_v54 = vmul.f32 %v4336_v11, %v4319_v38 }
 0xb0f   : > { %v13425_v22 = vadd.f32 %v4367_v32, %v4359_v54  ;;  %v4535_v32 = vsub.f32 1.0, %v13354_v35 }
 0xb10   : > { %v4338_v41 = vpop.permute.xlu0 %4337 }
 0xb11   : > { %v4360_v47 = vmul.f32 %v4338_v41, %v4320_v18  ;;  %4607 = vrot.lane.b32.xlu0 %v13425_v22, %s10845_s18  ;;  %v4583_v18 = vmul.f32 %v13354_v35, %v13082_v63  ;;  %v4536_v41 = vsub.f32 1.0, %v13361_v26 }
 0xb13   : > { %v13432_v10 = vadd.f32 %v4368_v43, %v4360_v47 }
 0xb14   : > { %v4340_v6 = vpop.permute.xlu0 %4339 }
 0xb15   : > { %v4361_v21 = vmul.f32 %v4340_v6, %v4321_v19  ;;  %4609 = vrot.lane.b32.xlu0 %v13432_v10, %s10845_s18  ;;  %v4584_v19 = vmul.f32 %v13361_v26, %v13093_v1  ;;  %v4537_v6 = vsub.f32 1.0, %v13365_v34  ;;  %v4585_v26 = vmul.f32 %v13365_v34, %v13107_v17 }
 0xb16   : > { %v4586_v34 = vmul.f32 %v13370_v60, %v13121_v15 }
 0xb17   : > { %v13439_v62 = vadd.f32 %v4369_v61, %v4361_v21 }
 0xb18   : > { %v4342_v30 = vpop.permute.xlu0 %4341 }
 0xb19   : > { %v4362_v13 = vmul.f32 %v4342_v30, %v4322_v33  ;;  %4611 = vrot.lane.b32.xlu0 %v13439_v62, %s10845_s18 }
 0xb1b   : > { %v13446_v12 = vadd.f32 %v4370_v4, %v4362_v13  ;;  %v4538_v4 = vsub.f32 1.0, %v13370_v60  ;;  %v4587_v60 = vmul.f32 %v13374_v16, %v13135_v45 }
 0xb1c   : > { %v4344_v36 = vpop.permute.xlu0 %4343 }
 0xb1d   : > { %v4363_v0 = vmul.f32 %v4344_v36, %v4323_v5  ;;  %4613 = vrot.lane.b32.xlu0 %v13446_v12, %s10845_s18 }
 0xb1f   : > { %v13453_v53 = vadd.f32 %v4371_v57, %v4363_v0  ;;  %v4539_v0 = vsub.f32 1.0, %v13374_v16  ;;  %v17647_v16 = vld [vmem:[#allocation88_spill] sm:$0xff] }
 0xb20   : > { %v4346_v44 = vpop.permute.xlu1 %4345 }
 0xb21   : > { %v4364_v59 = vmul.f32 %v4346_v44, %v4324_v7  ;;  %4615 = vrot.lane.b32.xlu0 %v13453_v53, %s10845_s18 }
 0xb23   : > { %v13460_v24 = vadd.f32 %v4372_v48, %v4364_v59 }
 0xb24   : > { %v4348_v31 = vpop.permute.xlu0 %4347 }
 0xb25   : > { %v4365_v2 = vmul.f32 %v4348_v31, %v4325_v52  ;;  %4617 = vrot.lane.b32.xlu0 %v13460_v24, %s10845_s18  ;;  %v4540_v31 = vsub.f32 1.0, %v13378_v39 }
 0xb27   : > { %v13467_v49 = vadd.f32 %v4373_v55, %v4365_v2 }
 0xb28   : > { %v4552_v11 = vpop.permute.xlu0 %4551 }
 0xb29   : > { %v4350_v27 = vpop.permute.xlu1 %4349  ;;  %4619 = vrot.lane.b32.xlu0 %v13467_v49, %s10845_s18  ;;  %v4575_v54 = vmul.f32 %v4552_v11, %v4535_v32 }
 0xb2a   : > { %v4366_v8 = vmul.f32 %v4350_v27, %v4326_v42 }
 0xb2b   : > { %v13482_v47 = vadd.f32 %v4583_v18, %v4575_v54 }
 0xb2c   : > { %v13474_v38 = vadd.f32 %v4374_v46, %v4366_v8  ;;  %v4588_v8 = vmul.f32 %v13378_v39, %v17647_v16 }
 0xb2d   : > { %v4554_v40 = vpop.permute.xlu1 %4553  ;;  %17637 = vst [vmem:[#allocation50_spill] sm:$0xff] %v13482_v47 }
 0xb2e   : > { %4621 = vrot.lane.b32.xlu1 %v13474_v38, %s10845_s18  ;;  %v4576_v25 = vmul.f32 %v4554_v40, %v4536_v41  ;;  %v17648_v40 = vld [vmem:[#allocation48_spill] sm:$0xff] }
 0xb2f   : > { %v17651_v41 = vld [vmem:[#allocation92_spill] sm:$0xff] }
 0xb30   : > { %v13493_v35 = vadd.f32 %v4584_v19, %v4576_v25  ;;  %v4542_v25 = vsub.f32 1.0, %v13386_v56 }
 0xb31   : > { %v4556_v50 = vpop.permute.xlu1 %4555 }
 0xb32   : > { %17639 = vst [vmem:[#allocation54_spill] sm:$0xff] %v13493_v35  ;;  %v4577_v21 = vmul.f32 %v4556_v50, %v4537_v6  ;;  %v4541_v50 = vsub.f32 1.0, %v17648_v40 }
 0xb34   : > { %v13507_v5 = vadd.f32 %v4585_v26, %v4577_v21 }
 0xb35   : > { %v4558_v43 = vpop.permute.xlu1 %4557 }
 0xb36   : > { %17641 = vst [vmem:[#allocation58_spill] sm:$0xff] %v13507_v5  ;;  %v4578_v36 = vmul.f32 %v4558_v43, %v4538_v4 }
 0xb38   : > { %v13521_v48 = vadd.f32 %v4586_v34, %v4578_v36 }
 0xb39   : > { %v4560_v33 = vpop.permute.xlu1 %4559 }
 0xb3a   : > { %17643 = vst [vmem:[#allocation65_spill] sm:$0xff] %v13521_v48  ;;  %v4579_v59 = vmul.f32 %v4560_v33, %v4539_v0  ;;  %v17654_v33 = vld [vmem:[#allocation96_spill] sm:$0xff]  ;;  %v17657_v0 = vld [vmem:[#allocation27_spill] sm:$0xff] }
 0xb3b   : > { %v4590_v26 = vmul.f32 %v13386_v56, %v17654_v33  ;;  %v17661_v33 = vld [vmem:[#allocation66_spill] sm:$0xff] }
 0xb3c   : > { %v13535_v2 = vadd.f32 %v4587_v60, %v4579_v59 }
 0xb3d   : > { %v4562_v7 = vpop.permute.xlu1 %4561 }
 0xb3e   : > { %17645 = vst [vmem:[#allocation68_spill] sm:$0xff] %v13535_v2  ;;  %v4580_v42 = vmul.f32 %v4562_v7, %v4540_v31 }
 0xb40   : > { %v13549_v32 = vadd.f32 %v4588_v8, %v4580_v42 }
 0xb41   : > { %v4564_v27 = vpop.permute.xlu1 %4563 }
 0xb42   : > { %17649 = vst [vmem:[#allocation72_spill] sm:$0xff] %v13549_v32  ;;  %v4581_v54 = vmul.f32 %v4564_v27, %v4541_v50 }
 0xb45   : > { %v4566_v43 = vpop.permute.xlu1 %4565 }
 0xb46   : > { %v4582_v6 = vmul.f32 %v4566_v43, %v4542_v25 }
 0xb48   : > { %v13573_v4 = vadd.f32 %v4590_v26, %v4582_v6  ;;  %v17658_v26 = vld [vmem:[#allocation41_spill] sm:$0xff] }
 0xb4a   : > { %17655 = vst [vmem:[#allocation80_spill] sm:$0xff] %v13573_v4 }
 0xb83   : > { %v13484_v29 = vpop.permute.xlu0 %4607 }
 0xb84   : > { %17638 = vst [vmem:[#allocation52_spill] sm:$0xff] %v13484_v29  ;;  %v4631_v61 = vsel %vm1188_vm0, %v13484_v29, %v13482_v47 }
 0xb85   : > { %9340 = vmatmul.mubr.msk.f32.vlgmr.msra.gmra.mrb[80].mxu1 %vm17359_vm1, %v4631_v61 }
 0xb86   : > { %4733 = vmatprep.mubr.f32.mxu1 %v17533_v37  ;;  %9750 = vmatpush1.bf16.msra.mxu1 %v11372_v58 }
 0xb87   : > { %v13497_v30 = vpop.permute.xlu0 %4609  ;;  %9752 = vmatprep.subr.bf16.mxu1 %v11399_v3 }
 0xb88   : > { %17640 = vst [vmem:[#allocation56_spill] sm:$0xff] %v13497_v30  ;;  %v4632_v13 = vsel %vm1188_vm0, %v13497_v30, %v13493_v35 }
 0xb89   : > { %9341 = vmatmul.mubr.msk.f32.gmra.mrb[82].mxu1 %vm17359_vm1, %v4632_v13 }
 0xb8a   : > { %4739 = vmatprep.mubr.f32.mxu1 %v17533_v37  ;;  %9754 = vmatpush1.bf16.msra.mxu1 %v11410_v9 }
 0xb8b   : > { %v13511_v57 = vpop.permute.xlu0 %4611  ;;  %9756 = vmatprep.subr.bf16.mxu1 %v11425_v14 }
 0xb8c   : > { %17642 = vst [vmem:[#allocation60_spill] sm:$0xff] %v13511_v57  ;;  %v4633_v44 = vsel %vm1188_vm0, %v13511_v57, %v13507_v5 }
 0xb8d   : > { %9342 = vmatmul.mubr.msk.f32.gmra.mrb[84].mxu1 %vm17359_vm1, %v4633_v44 }
 0xb8e   : > { %4745 = vmatprep.mubr.f32.mxu1 %v17533_v37  ;;  %9758 = vmatpush1.bf16.msra.mxu1 %v11437_v20 }
 0xb8f   : > { %v13525_v52 = vpop.permute.xlu0 %4613  ;;  %9760 = vmatprep.subr.bf16.mxu1 %v11447_v23 }
 0xb90   : > { %17644 = vst [vmem:[#allocation62_spill] sm:$0xff] %v13525_v52  ;;  %v4634_v55 = vsel %vm1188_vm0, %v13525_v52, %v13521_v48 }
 0xb91   : > { %9343 = vmatmul.mubr.msk.f32.gmra.mrb[86].mxu1 %vm17359_vm1, %v4634_v55 }
 0xb92   : > { %4751 = vmatprep.mubr.f32.mxu1 %v17533_v37  ;;  %9762 = vmatpush1.bf16.msra.mxu1 %v11459_v28 }
 0xb93   : > { %v13539_v46 = vpop.permute.xlu0 %4615  ;;  %9764 = vmatprep.subr.bf16.mxu1 %v11357_v51  ;;  %v4589_v51 = vmul.f32 %v17648_v40, %v17651_v41 }
 0xb94   : > { %17646 = vst [vmem:[#allocation70_spill] sm:$0xff] %v13539_v46  ;;  %v4635_v11 = vsel %vm1188_vm0, %v13539_v46, %v13535_v2 }
 0xb95   : > { %9344 = vmatmul.mubr.msk.f32.gmra.mrb[88].mxu1 %vm17359_vm1, %v4635_v11  ;;  %v13561_v19 = vadd.f32 %v4589_v51, %v4581_v54 }
 0xb96   : > { %4757 = vmatprep.mubr.f32.mxu1 %v17533_v37 }
 0xb97   : > { %v13552_v18 = vpop.permute.xlu0 %4617  ;;  %17652 = vst [vmem:[#allocation76_spill] sm:$0xff] %v13561_v19 }
 0xb98   : > { %17650 = vst [vmem:[#allocation74_spill] sm:$0xff] %v13552_v18  ;;  %v4636_v39 = vsel %vm1188_vm0, %v13552_v18, %v13549_v32 }
 0xb99   : > { %9345 = vmatmul.mubr.msk.f32.gmra.mrb[90].mxu1 %vm17359_vm1, %v4636_v39 }
 0xb9a   : > { %4763 = vmatprep.mubr.f32.mxu1 %v17533_v37 }
 0xb9b   : > { %v13564_v61 = vpop.permute.xlu0 %4619 }
 0xb9c   : > { %17653 = vst [vmem:[#allocation78_spill] sm:$0xff] %v13564_v61  ;;  %v4637_v21 = vsel %vm1188_vm0, %v13564_v61, %v13561_v19 }
 0xb9d   : > { %9346 = vmatmul.mubr.msk.f32.gmra.mrb[92].mxu1 %vm17359_vm1, %v4637_v21 }
 0xb9e   : > { %4769 = vmatprep.mubr.f32.mxu1 %v17533_v37 }
 0xba0   : > { %v13575_v13 = vpop.permute.xlu1 %4621 }
 0xba1   : > { %17656 = vst [vmem:[#allocation48_spill] sm:$0xff] %v13575_v13  ;;  %v4638_v36 = vsel %vm1188_vm0, %v13575_v13, %v13573_v4 }
 0xba2   : > { %9347 = vmatmul.mubr.msk.f32.gmra.mrb[94].mxu1 %vm17359_vm1, %v4638_v36 }
 0xba3   : > { %5352 = vmatprep.mubr.f32.mxu1 %v17533_v37 }
 0xc58   : > { %v4729_v34 = vpop.f32.mrb[80].mxu1 }
 0xc59   : > { %v4848_v7 = vadd.f32 %v4729_v34, %v17657_v0  ;;  %v13583_v56 = vpop.f32.mrb[81].mxu1 }
 0xc5a   : > { %v5064_v36 = vadd.f32 %v13583_v56, %v17658_v26 }
 0xc5b   : > { %4864 = vrot.lane.b32.xlu0 %v4848_v7, %s10844_s0 }
 0xc5c   : > { %v4735_v44 = vpop.f32.mrb[82].mxu1 }
 0xc5d   : > { %v4849_v59 = vadd.f32 %v4735_v44, %v17657_v0  ;;  %v13587_v60 = vpop.f32.mrb[83].mxu1 }
 0xc5f   : > { %4866 = vrot.lane.b32.xlu1 %v4849_v59, %s10844_s0 }
 0xc60   : > { %v4741_v31 = vpop.f32.mrb[84].mxu1 }
 0xc61   : > { %v4850_v55 = vadd.f32 %v4741_v31, %v17657_v0  ;;  %v13591_v42 = vpop.f32.mrb[85].mxu1 }
 0xc63   : > { %4868 = vrot.lane.b32.xlu0 %v4850_v55, %s10844_s0 }
 0xc64   : > { %v4747_v27 = vpop.f32.mrb[86].mxu1 }
 0xc65   : > { %v4851_v8 = vadd.f32 %v4747_v27, %v17657_v0  ;;  %v13595_v40 = vpop.f32.mrb[87].mxu1 }
 0xc67   : > { %4870 = vrot.lane.b32.xlu1 %v4851_v8, %s10844_s0  ;;  %v5065_v8 = vadd.f32 %v13587_v60, %v17658_v26 }
 0xc68   : > { %v4753_v50 = vpop.f32.mrb[88].mxu1 }
 0xc69   : > { %v4852_v11 = vadd.f32 %v4753_v50, %v17657_v0  ;;  %v13599_v54 = vpop.f32.mrb[89].mxu1 }
 0xc6b   : > { %4872 = vrot.lane.b32.xlu0 %v4852_v11, %s10844_s0  ;;  %v5066_v11 = vadd.f32 %v13591_v42, %v17658_v26 }
 0xc6c   : > { %v4759_v51 = vpop.f32.mrb[90].mxu1 }
 0xc6d   : > { %v4853_v43 = vadd.f32 %v4759_v51, %v17657_v0  ;;  %v13603_v39 = vpop.f32.mrb[91].mxu1 }
 0xc6f   : > { %4874 = vrot.lane.b32.xlu1 %v4853_v43, %s10844_s0  ;;  %v5067_v43 = vadd.f32 %v13595_v40, %v17658_v26 }
 0xc70   : > { %v4765_v25 = vpop.f32.mrb[92].mxu1 }
 0xc71   : > { %v4854_v6 = vadd.f32 %v4765_v25, %v17657_v0  ;;  %v13607_v21 = vpop.f32.mrb[93].mxu1 }
 0xc73   : > { %4876 = vrot.lane.b32.xlu0 %v4854_v6, %s10844_s0  ;;  %v5068_v6 = vadd.f32 %v13599_v54, %v17658_v26 }
 0xc75   : > { %v4771_v7 = vpop.f32.mrb[94].mxu1 }
 0xc76   : > { %v4855_v59 = vadd.f32 %v4771_v7, %v17657_v0  ;;  %v13613_v55 = vpop.f32.mrb[95].mxu1 }
 0xc77   : > { %5080 = vrot.lane.b32.xlu0 %v5064_v36, %s10844_s0  ;;  %v5069_v36 = vadd.f32 %v13603_v39, %v17658_v26 }
 0xc78   : > { %4878 = vrot.lane.b32.xlu1 %v4855_v59, %s10844_s0  ;;  %v5070_v59 = vadd.f32 %v13607_v21, %v17658_v26 }
 0xc7b   : > { %5082 = vrot.lane.b32.xlu0 %v5065_v8, %s10844_s0  ;;  %v5071_v8 = vadd.f32 %v13613_v55, %v17658_v26 }
 0xc7f   : > { %5084 = vrot.lane.b32.xlu0 %v5066_v11, %s10844_s0  ;;  %v17659_v11 = vld [vmem:[#allocation67_spill] sm:$0xff] }
 0xc80   : > { %v13645_v41 = vadd.f32 %v17661_v33, %v17659_v11 }
 0xc82   : > { %v4793_v16 = vadd.f32 %v4735_v44, %v13645_v41 }
 0xc83   : > { %5086 = vrot.lane.b32.xlu0 %v5067_v43, %s10844_s0  ;;  %v17660_v43 = vld [vmem:[#allocation64_spill] sm:$0xff] }
 0xc84   : > { %v13640_v13 = vadd.f32 %v17660_v43, %v17659_v11  ;;  %v9349_v45 = vmul.f32 -1.442695, %v4793_v16  ;;  %v17663_v43 = vld [vmem:[#allocation71_spill] sm:$0xff] }
 0xc85   : > { %v13655_v15 = vadd.f32 %v17663_v43, %v17659_v11  ;;  %v17665_v16 = vld [vmem:[#allocation75_spill] sm:$0xff] }
 0xc87   : > { %5088 = vrot.lane.b32.xlu0 %v5068_v6, %s10844_s0  ;;  %v4792_v6 = vadd.f32 %v4729_v34, %v13640_v13  ;;  %v4795_v34 = vadd.f32 %v4747_v27, %v13655_v15 }
 0xc89   : > { %v9351_v44 = vmul.f32 -1.442695, %v4795_v34 }
 0xc8b   : > { %5090 = vrot.lane.b32.xlu0 %v5069_v36, %s10844_s0  ;;  %v9348_v36 = vmul.f32 -1.442695, %v4792_v6  ;;  %v17664_v6 = vld [vmem:[#allocation73_spill] sm:$0xff] }
 0xc8c   : > { %v13660_v18 = vadd.f32 %v17664_v6, %v17659_v11  ;;  %v17668_v6 = vld [vmem:[#allocation49_spill] sm:$0xff] }
 0xc8d   : > { %10257 = vpow2.f32 %v9348_v36 }
 0xc8e   : > { %10259 = vpow2.f32 %v9349_v45 }
 0xc8f   : > { %5092 = vrot.lane.b32.xlu0 %v5070_v59, %s10844_s0  ;;  %v17662_v59 = vld [vmem:[#allocation69_spill] sm:$0xff] }
 0xc90   : > { %v13650_v61 = vadd.f32 %v17662_v59, %v17659_v11  ;;  %v4796_v59 = vadd.f32 %v4753_v50, %v13660_v18  ;;  %v17667_v50 = vld [vmem:[#allocation5_spill] sm:$0xff] }
 0xc91   : > { %v13675_v52 = vadd.f32 %v17668_v6, %v17667_v50  ;;  %v17670_v6 = vld [vmem:[#allocation51_spill] sm:$0xff] }
 0xc92   : > { %v9352_v43 = vmul.f32 -1.442695, %v4796_v59  ;;  %v17669_v59 = vld [vmem:[#allocation79_spill] sm:$0xff]  ;;  %v13686_v1 = vadd.f32 %v17670_v6, %v17667_v50 }
 0xc93   : > { %5094 = vrot.lane.b32.xlu0 %v5071_v8, %s10844_s0  ;;  %v4794_v8 = vadd.f32 %v4741_v31, %v13650_v61  ;;  %v13665_v31 = vadd.f32 %v17665_v16, %v17659_v11 }
 0xc95   : > { %v9350_v33 = vmul.f32 -1.442695, %v4794_v8  ;;  %v4797_v46 = vadd.f32 %v4759_v51, %v13665_v31  ;;  %v17666_v8 = vld [vmem:[#allocation77_spill] sm:$0xff]  ;;  %v13679_v51 = vadd.f32 %v17669_v59, %v17659_v11 }
 0xc96   : > { %v13670_v17 = vadd.f32 %v17666_v8, %v17659_v11 }
 0xc97   : > { %10261 = vpow2.f32 %v9350_v33  ;;  %v10258_v36 = vpop.eup %10257  ;;  %v9353_v34 = vmul.f32 -1.442695, %v4797_v46 }
 0xc98   : > { %10263 = vpow2.f32 %v9351_v44  ;;  %v4824_v27 = vadd.f32 1.0, %v10258_v36  ;;  %v10260_v45 = vpop.eup %10259  ;;  %v4798_v33 = vadd.f32 %v4765_v25, %v13670_v17  ;;  %v5008_v36 = vadd.f32 %v13583_v56, %v13675_v52 }
 0xc99   : > { %10265 = vpow2.f32 %v9352_v43  ;;  %v4825_v16 = vadd.f32 1.0, %v10260_v45  ;;  %v4799_v25 = vadd.f32 %v4771_v7, %v13679_v51  ;;  %v5009_v45 = vadd.f32 %v13587_v60, %v13686_v1 }
 0xc9a   : > { %10267 = vrcp.f32 %v4824_v27  ;;  %v9354_v8 = vmul.f32 -1.442695, %v4798_v33  ;;  %v9356_v27 = vmul.f32 -1.442695, %v5008_v36 }
 0xc9b   : > { %10269 = vpow2.f32 %v9353_v34  ;;  %v9355_v57 = vmul.f32 -1.442695, %v4799_v25  ;;  %v17671_v34 = vld [vmem:[#allocation53_spill] sm:$0xff] }
 0xc9c   : > { %10271 = vrcp.f32 %v4825_v16  ;;  %v13692_v33 = vadd.f32 %v17671_v34, %v17667_v50  ;;  %v17673_v34 = vld [vmem:[#allocation57_spill] sm:$0xff] }
 0xc9d   : > { %10273 = vpow2.f32 %v9354_v8 }
 0xc9e   : > { %v5010_v36 = vadd.f32 %v13591_v42, %v13692_v33 }
 0xca1   : > { %v10262_v44 = vpop.eup %10261 }
 0xca2   : > { %v10264_v43 = vpop.eup %10263  ;;  %v4826_v46 = vadd.f32 1.0, %v10262_v44  ;;  %v9357_v44 = vmul.f32 -1.442695, %v5009_v45  ;;  %v9358_v45 = vmul.f32 -1.442695, %v5010_v36 }
 0xca3   : > { %v4827_v59 = vadd.f32 1.0, %v10264_v43  ;;  %v10266_v56 = vpop.eup %10265 }
 0xca4   : > { %10275 = vrcp.f32 %v4826_v46  ;;  %v13694_v16 = vpop.eup %10267  ;;  %v4828_v43 = vadd.f32 1.0, %v10266_v56  ;;  %v17672_v46 = vld [vmem:[#allocation55_spill] sm:$0xff] }
 0xca5   : > { %10277 = vpow2.f32 %v9356_v27  ;;  %v10270_v8 = vpop.eup %10269  ;;  %v13701_v25 = vadd.f32 %v17672_v46, %v17667_v50 }
 0xca6   : > { %10279 = vrcp.f32 %v4827_v59  ;;  %v13704_v6 = vpop.eup %10271  ;;  %v4829_v56 = vadd.f32 1.0, %v10270_v8 }
 0xca7   : > { %10281 = vpow2.f32 %v9355_v57  ;;  %v5011_v42 = vadd.f32 %v13595_v40, %v13701_v25  ;;  %v10274_v57 = vpop.eup %10273 }
 0xca8   : > { %10283 = vpow2.f32 %v9357_v44 }
 0xca9   : > { %10285 = vrcp.f32 %v4828_v43  ;;  %v9359_v44 = vmul.f32 -1.442695, %v5011_v42  ;;  %v4830_v43 = vadd.f32 1.0, %v10274_v57  ;;  %v17675_v57 = vld [vmem:[#allocation61_spill] sm:$0xff] }
 0xcaa   : > { %10287 = vpow2.f32 %v9358_v45  ;;  %v13731_v30 = vadd.f32 %v17675_v57, %v17667_v50 }
 0xcab   : > { %10289 = vrcp.f32 %v4829_v56 }
 0xcac   : > { %10291 = vpow2.f32 %v9359_v44 }
 0xcad   : > { %10293 = vrcp.f32 %v4830_v43  ;;  %v17676_v43 = vld [vmem:[#allocation63_spill] sm:$0xff] }
 0xcae   : > { %v13741_v57 = vadd.f32 %v17676_v43, %v17667_v50 }
 0xccd   : > { %v4865_v7 = vpop.permute.xlu0 %4864 }
 0xcce   : > { %v4888_v60 = vmul.f32 %v13694_v16, %v4865_v7  ;;  %v13711_v7 = vadd.f32 %v17673_v34, %v17667_v50  ;;  %v17674_v34 = vld [vmem:[#allocation59_spill] sm:$0xff] }
 0xccf   : > { %v13723_v63 = vadd.f32 %v17674_v34, %v17667_v50 }
 0xcd0   : > { %4904 = vrot.lane.b32.xlu1 %v4888_v60, %s10844_s0  ;;  %v13714_v60 = vpop.eup %10275  ;;  %v5012_v36 = vadd.f32 %v13599_v54, %v13711_v7 }
 0xcd1   : > { %v4867_v27 = vpop.permute.xlu1 %4866  ;;  %v5013_v54 = vadd.f32 %v13603_v39, %v13723_v63  ;;  %v5014_v39 = vadd.f32 %v13607_v21, %v13731_v30  ;;  %v5015_v21 = vadd.f32 %v13613_v55, %v13741_v57 }
 0xcd2   : > { %v4889_v59 = vmul.f32 %v13704_v6, %v4867_v27  ;;  %v10278_v27 = vpop.eup %10277  ;;  %v9360_v45 = vmul.f32 -1.442695, %v5012_v36 }
 0xcd3   : > { %v13719_v8 = vpop.eup %10279  ;;  %v9361_v44 = vmul.f32 -1.442695, %v5013_v54 }
 0xcd4   : > { %4906 = vrot.lane.b32.xlu1 %v4889_v59, %s10844_s0  ;;  %v10282_v59 = vpop.eup %10281  ;;  %10295 = vpow2.f32 %v9360_v45  ;;  %v9362_v45 = vmul.f32 -1.442695, %v5014_v39 }
 0xcd5   : > { %v4869_v46 = vpop.permute.xlu0 %4868  ;;  %v10284_v56 = vpop.eup %10283  ;;  %v4831_v34 = vadd.f32 1.0, %v10282_v59 }
 0xcd6   : > { %v4890_v40 = vmul.f32 %v13714_v60, %v4869_v46  ;;  %v5040_v46 = vadd.f32 1.0, %v10278_v27  ;;  %v5041_v36 = vadd.f32 1.0, %v10284_v56 }
 0xcd8   : > { %4908 = vrot.lane.b32.xlu1 %v4890_v40, %s10844_s0  ;;  %v13734_v40 = vpop.eup %10285  ;;  %10297 = vrcp.f32 %v5040_v46 }
 0xcd9   : > { %v4871_v29 = vpop.permute.xlu1 %4870  ;;  %v10288_v27 = vpop.eup %10287  ;;  %10299 = vrcp.f32 %v4831_v34 }
 0xcda   : > { %v4891_v42 = vmul.f32 %v13719_v8, %v4871_v29  ;;  %v13744_v59 = vpop.eup %10289  ;;  %10301 = vpow2.f32 %v9361_v44  ;;  %v5042_v54 = vadd.f32 1.0, %v10288_v27 }
 0xcdb   : > { %10303 = vrcp.f32 %v5041_v36  ;;  %v10292_v46 = vpop.eup %10291 }
 0xcdc   : > { %4910 = vrot.lane.b32.xlu1 %v4891_v42, %s10844_s0  ;;  %v13750_v56 = vpop.eup %10293  ;;  %10305 = vpow2.f32 %v9362_v45  ;;  %v5043_v44 = vadd.f32 1.0, %v10292_v46 }
 0xcdd   : > { %v4873_v11 = vpop.permute.xlu0 %4872  ;;  %10307 = vrcp.f32 %v5042_v54 }
 0xcde   : > { %v4892_v29 = vmul.f32 %v13734_v40, %v4873_v11  ;;  %v10296_v39 = vpop.eup %10295 }
 0xcdf   : > { %v5044_v50 = vadd.f32 1.0, %v10296_v39 }
 0xce0   : > { %4912 = vrot.lane.b32.xlu1 %v4892_v29, %s10844_s0  ;;  %v9363_v29 = vmul.f32 -1.442695, %v5015_v21 }
 0xce1   : > { %v4875_v42 = vpop.permute.xlu1 %4874 }
 0xce2   : > { %v4893_v11 = vmul.f32 %v13744_v59, %v4875_v42  ;;  %v13754_v55 = vpop.eup %10297  ;;  %10309 = vpow2.f32 %v9363_v29 }
 0xce3   : > { %v13756_v36 = vpop.eup %10299  ;;  %10311 = vrcp.f32 %v5043_v44 }
 0xce4   : > { %4914 = vrot.lane.b32.xlu1 %v4893_v11, %s10844_s0  ;;  %v10302_v21 = vpop.eup %10301  ;;  %10313 = vrcp.f32 %v5044_v50 }
 0xce5   : > { %v4877_v34 = vpop.permute.xlu0 %4876  ;;  %v13761_v54 = vpop.eup %10303 }
 0xce6   : > { %v4894_v43 = vmul.f32 %v13750_v56, %v4877_v34  ;;  %v10306_v29 = vpop.eup %10305 }
 0xce7   : > { %v13765_v26 = vpop.eup %10307 }
 0xce8   : > { %4916 = vrot.lane.b32.xlu1 %v4894_v43, %s10844_s0  ;;  %v5045_v43 = vadd.f32 1.0, %v10302_v21 }
 0xce9   : > { %v5081_v42 = vpop.permute.xlu0 %5080 }
 0xcea   : > { %v5104_v27 = vmul.f32 %v13754_v55, %v5081_v42  ;;  %v4879_v11 = vpop.permute.xlu1 %4878  ;;  %10315 = vrcp.f32 %v5045_v43  ;;  %v5046_v42 = vadd.f32 1.0, %v10306_v29 }
 0xceb   : > { %v4895_v45 = vmul.f32 %v13756_v36, %v4879_v11 }
 0xcec   : > { %5120 = vrot.lane.b32.xlu0 %v5104_v27, %s10844_s0  ;;  %v10310_v27 = vpop.eup %10309  ;;  %10317 = vrcp.f32 %v5046_v42 }
 0xced   : > { %4918 = vrot.lane.b32.xlu1 %v4895_v45, %s10844_s0  ;;  %v5083_v46 = vpop.permute.xlu0 %5082  ;;  %v13770_v11 = vpop.eup %10311  ;;  %v5047_v50 = vadd.f32 1.0, %v10310_v27 }
 0xcee   : > { %v5105_v34 = vmul.f32 %v13761_v54, %v5083_v46  ;;  %v13774_v21 = vpop.eup %10313 }
 0xcef   : > { %10319 = vrcp.f32 %v5047_v50 }
 0xcf1   : > { %5122 = vrot.lane.b32.xlu1 %v5105_v34, %s10844_s0  ;;  %v5085_v44 = vpop.permute.xlu0 %5084 }
 0xcf2   : > { %v5106_v39 = vmul.f32 %v13765_v26, %v5085_v44 }
 0xcf4   : > { %5124 = vrot.lane.b32.xlu0 %v5106_v39, %s10844_s0  ;;  %v13778_v43 = vpop.eup %10315 }
 0xcf5   : > { %v5087_v45 = vpop.permute.xlu0 %5086 }
 0xcf6   : > { %v5107_v46 = vmul.f32 %v13770_v11, %v5087_v45  ;;  %v13782_v39 = vpop.eup %10317 }
 0xcf7   : > { %17677 = vst [vmem:[#allocation64_spill] sm:$0xff] %v13782_v39 }
 0xcf8   : > { %5126 = vrot.lane.b32.xlu1 %v5107_v46, %s10844_s0 }
 0xcf9   : > { %v5089_v34 = vpop.permute.xlu0 %5088  ;;  %v13786_v45 = vpop.eup %10319 }
 0xcfa   : > { %v5108_v0 = vmul.f32 %v13774_v21, %v5089_v34 }
 0xcfc   : > { %5128 = vrot.lane.b32.xlu1 %v5108_v0, %s10844_s0 }
 0xcfd   : > { %v5091_v29 = vpop.permute.xlu0 %5090 }
 0xcfe   : > { %v5109_v44 = vmul.f32 %v13778_v43, %v5091_v29 }
 0xd00   : > { %5130 = vrot.lane.b32.xlu1 %v5109_v44, %s10844_s0 }
 0xd01   : > { %v5093_v42 = vpop.permute.xlu0 %5092 }
 0xd02   : > { %v5110_v27 = vmul.f32 %v13782_v39, %v5093_v42 }
 0xd04   : > { %5132 = vrot.lane.b32.xlu1 %v5110_v27, %s10844_s0 }
 0xd05   : > { %v5095_v46 = vpop.permute.xlu0 %5094 }
 0xd06   : > { %v5111_v50 = vmul.f32 %v13786_v45, %v5095_v46 }
 0xd08   : > { %5134 = vrot.lane.b32.xlu1 %v5111_v50, %s10844_s0 }
 0xd42   : > { %v4905_v0 = vpop.permute.xlu1 %4904 }
 0xd43   : > { %v4928_v34 = vadd.f32 %v4905_v0, %v13640_v13 }
 0xd45   : > { %10321 = vtanh.f32 %v4928_v34 }
 0xd46   : > { %v4907_v29 = vpop.permute.xlu1 %4906 }
 0xd47   : > { %v4929_v44 = vadd.f32 %v4907_v29, %v13645_v41 }
 0xd49   : > { %10323 = vtanh.f32 %v4929_v44 }
 0xd4a   : > { %v4909_v4 = vpop.permute.xlu1 %4908 }
 0xd4b   : > { %v4930_v42 = vadd.f32 %v4909_v4, %v13650_v61 }
 0xd4d   : > { %10325 = vtanh.f32 %v4930_v42 }
 0xd4e   : > { %v4911_v27 = vpop.permute.xlu1 %4910 }
 0xd4f   : > { %v10322_v19 = vpop.eup %10321  ;;  %v4931_v39 = vadd.f32 %v4911_v27, %v13655_v15 }
 0xd50   : > { %4960 = vrot.lane.b32.xlu0 %v10322_v19, %s10845_s18 }
 0xd51   : > { %10327 = vtanh.f32 %v4931_v39 }
 0xd52   : > { %v4913_v46 = vpop.permute.xlu1 %4912 }
 0xd53   : > { %v10324_v50 = vpop.eup %10323  ;;  %v4932_v13 = vadd.f32 %v4913_v46, %v13660_v18 }
 0xd54   : > { %4962 = vrot.lane.b32.xlu0 %v10324_v50, %s10845_s18 }
 0xd55   : > { %10329 = vtanh.f32 %v4932_v13 }
 0xd56   : > { %v4915_v41 = vpop.permute.xlu1 %4914 }
 0xd57   : > { %v10326_v0 = vpop.eup %10325  ;;  %v4933_v34 = vadd.f32 %v4915_v41, %v13665_v31 }
 0xd58   : > { %4964 = vrot.lane.b32.xlu0 %v10326_v0, %s10845_s18 }
 0xd59   : > { %10331 = vtanh.f32 %v4933_v34 }
 0xd5a   : > { %v4917_v61 = vpop.permute.xlu1 %4916 }
 0xd5b   : > { %v10328_v4 = vpop.eup %10327  ;;  %v4934_v15 = vadd.f32 %v4917_v61, %v13670_v17 }
 0xd5c   : > { %4966 = vrot.lane.b32.xlu0 %v10328_v4, %s10845_s18 }
 0xd5d   : > { %10333 = vtanh.f32 %v4934_v15 }
 0xd5e   : > { %v5121_v19 = vpop.permute.xlu0 %5120 }
 0xd5f   : > { %v10330_v39 = vpop.eup %10329  ;;  %v5144_v18 = vadd.f32 %v5121_v19, %v13675_v52  ;;  %v4919_v29 = vpop.permute.xlu1 %4918 }
 0xd60   : > { %v4935_v44 = vadd.f32 %v4919_v29, %v13679_v51  ;;  %4968 = vrot.lane.b32.xlu0 %v10330_v39, %s10845_s18 }
 0xd61   : > { %10335 = vtanh.f32 %v5144_v18 }
 0xd62   : > { %10337 = vtanh.f32 %v4935_v44 }
 0xd63   : > { %v10332_v31 = vpop.eup %10331  ;;  %v5123_v42 = vpop.permute.xlu1 %5122 }
 0xd64   : > { %v5145_v27 = vadd.f32 %v5123_v42, %v13686_v1  ;;  %4970 = vrot.lane.b32.xlu1 %v10332_v31, %s10845_s18  ;;  %v4992_v42 = vmul.f32 %v13694_v16, %v13425_v22  ;;  %v4994_v22 = vmul.f32 %v13714_v60, %v13439_v62  ;;  %v4948_v62 = vsub.f32 1.0, %v13734_v40 }
 0xd66   : > { %10339 = vtanh.f32 %v5145_v27  ;;  %v5125_v17 = vpop.permute.xlu0 %5124 }
 0xd67   : > { %v10334_v46 = vpop.eup %10333  ;;  %v5146_v50 = vadd.f32 %v5125_v17, %v13692_v33  ;;  %v4945_v17 = vsub.f32 1.0, %v13704_v6 }
 0xd68   : > { %4972 = vrot.lane.b32.xlu0 %v10334_v46, %s10845_s18 }
 0xd69   : > { %10341 = vtanh.f32 %v5146_v50  ;;  %v4993_v50 = vmul.f32 %v13704_v6, %v13432_v10  ;;  %v4947_v10 = vsub.f32 1.0, %v13719_v8 }
 0xd6a   : > { %v5127_v52 = vpop.permute.xlu1 %5126 }
 0xd6b   : > { %v10336_v51 = vpop.eup %10335  ;;  %v5147_v13 = vadd.f32 %v5127_v52, %v13701_v25 }
 0xd6c   : > { %v10338_v41 = vpop.eup %10337  ;;  %5176 = vrot.lane.b32.xlu0 %v10336_v51, %s10845_s18 }
 0xd6d   : > { %10343 = vtanh.f32 %v5147_v13  ;;  %4974 = vrot.lane.b32.xlu1 %v10338_v41, %s10845_s18  ;;  %v4946_v13 = vsub.f32 1.0, %v13714_v60 }
 0xd6e   : > { %v5129_v1 = vpop.permute.xlu1 %5128 }
 0xd6f   : > { %v5148_v0 = vadd.f32 %v5129_v1, %v13711_v7 }
 0xd70   : > { %v10340_v34 = vpop.eup %10339 }
 0xd71   : > { %10345 = vtanh.f32 %v5148_v0  ;;  %5178 = vrot.lane.b32.xlu1 %v10340_v34, %s10845_s18  ;;  %v4995_v0 = vmul.f32 %v13719_v8, %v13446_v12  ;;  %v4949_v12 = vsub.f32 1.0, %v13744_v59 }
 0xd72   : > { %v5131_v33 = vpop.permute.xlu1 %5130 }
 0xd73   : > { %v10342_v61 = vpop.eup %10341  ;;  %v5149_v4 = vadd.f32 %v5131_v33, %v13723_v63 }
 0xd75   : > { %10347 = vtanh.f32 %v5149_v4  ;;  %5180 = vrot.lane.b32.xlu1 %v10342_v61, %s10845_s18  ;;  %v4996_v61 = vmul.f32 %v13734_v40, %v13453_v53  ;;  %v4950_v53 = vsub.f32 1.0, %v13750_v56 }
 0xd76   : > { %v5133_v25 = vpop.permute.xlu1 %5132 }
 0xd77   : > { %v10344_v15 = vpop.eup %10343  ;;  %v5150_v19 = vadd.f32 %v5133_v25, %v13731_v30  ;;  %v4944_v30 = vsub.f32 1.0, %v13694_v16 }
 0xd79   : > { %10349 = vtanh.f32 %v5150_v19  ;;  %5182 = vrot.lane.b32.xlu1 %v10344_v15, %s10845_s18  ;;  %v4997_v15 = vmul.f32 %v13744_v59, %v13460_v24  ;;  %v4951_v24 = vsub.f32 1.0, %v13756_v36 }
 0xd7a   : > { %v5135_v39 = vpop.permute.xlu1 %5134 }
 0xd7b   : > { %v10346_v7 = vpop.eup %10345  ;;  %v5151_v18 = vadd.f32 %v5135_v39, %v13741_v57 }
 0xd7d   : > { %10351 = vtanh.f32 %v5151_v18  ;;  %5184 = vrot.lane.b32.xlu1 %v10346_v7, %s10845_s18  ;;  %v4998_v7 = vmul.f32 %v13750_v56, %v13467_v49 }
 0xd7f   : > { %v10348_v29 = vpop.eup %10347 }
 0xd81   : > { %5186 = vrot.lane.b32.xlu1 %v10348_v29, %s10845_s18 }
 0xd83   : > { %v10350_v63 = vpop.eup %10349 }
 0xd85   : > { %5188 = vrot.lane.b32.xlu1 %v10350_v63, %s10845_s18  ;;  %v4999_v63 = vmul.f32 %v13756_v36, %v13474_v38 }
 0xd87   : > { %v10352_v44 = vpop.eup %10351 }
 0xd89   : > { %5190 = vrot.lane.b32.xlu1 %v10352_v44, %s10845_s18 }
 0xdc2   : > { %v4961_v31 = vpop.permute.xlu0 %4960 }
 0xdc3   : > { %v4984_v27 = vmul.f32 %v4961_v31, %v4944_v30 }
 0xdc5   : > { %v13825_v57 = vadd.f32 %v4992_v42, %v4984_v27  ;;  %v5160_v42 = vsub.f32 1.0, %v13754_v55 }
 0xdc6   : > { %v4963_v46 = vpop.permute.xlu0 %4962 }
 0xdc7   : > { %v4985_v52 = vmul.f32 %v4963_v46, %v4945_v17  ;;  %5232 = vrot.lane.b32.xlu0 %v13825_v57, %s10845_s18  ;;  %v5208_v17 = vmul.f32 %v13754_v55, %v13482_v47  ;;  %v5161_v46 = vsub.f32 1.0, %v13761_v54 }
 0xdc9   : > { %v13832_v51 = vadd.f32 %v4993_v50, %v4985_v52 }
 0xdca   : > { %v4965_v41 = vpop.permute.xlu0 %4964 }
 0xdcb   : > { %v4986_v16 = vmul.f32 %v4965_v41, %v4946_v13  ;;  %5234 = vrot.lane.b32.xlu0 %v13832_v51, %s10845_s18  ;;  %v5209_v13 = vmul.f32 %v13761_v54, %v13493_v35  ;;  %v5162_v41 = vsub.f32 1.0, %v13765_v26  ;;  %v5210_v54 = vmul.f32 %v13765_v26, %v13507_v5 }
 0xdcc   : > { %v5164_v26 = vsub.f32 1.0, %v13774_v21 }
 0xdcd   : > { %v13839_v1 = vadd.f32 %v4994_v22, %v4986_v16 }
 0xdce   : > { %v4967_v6 = vpop.permute.xlu0 %4966 }
 0xdcf   : > { %v4987_v34 = vmul.f32 %v4967_v6, %v4947_v10  ;;  %5236 = vrot.lane.b32.xlu0 %v13839_v1, %s10845_s18 }
 0xdd1   : > { %v13846_v33 = vadd.f32 %v4995_v0, %v4987_v34  ;;  %v5163_v0 = vsub.f32 1.0, %v13770_v11 }
 0xdd2   : > { %v4969_v60 = vpop.permute.xlu0 %4968 }
 0xdd3   : > { %v4988_v4 = vmul.f32 %v4969_v60, %v4948_v62  ;;  %5238 = vrot.lane.b32.xlu0 %v13846_v33, %s10845_s18 }
 0xdd5   : > { %v13853_v25 = vadd.f32 %v4996_v61, %v4988_v4 }
 0xdd6   : > { %v4971_v8 = vpop.permute.xlu1 %4970 }
 0xdd7   : > { %v4989_v19 = vmul.f32 %v4971_v8, %v4949_v12  ;;  %5240 = vrot.lane.b32.xlu0 %v13853_v25, %s10845_s18 }
 0xdd9   : > { %v13860_v39 = vadd.f32 %v4997_v15, %v4989_v19 }
 0xdda   : > { %v4973_v40 = vpop.permute.xlu0 %4972 }
 0xddb   : > { %v4990_v18 = vmul.f32 %v4973_v40, %v4950_v53  ;;  %5242 = vrot.lane.b32.xlu0 %v13860_v39, %s10845_s18 }
 0xddd   : > { %v13867_v29 = vadd.f32 %v4998_v7, %v4990_v18 }
 0xdde   : > { %v5177_v31 = vpop.permute.xlu0 %5176 }
 0xddf   : > { %v4975_v59 = vpop.permute.xlu1 %4974  ;;  %5244 = vrot.lane.b32.xlu0 %v13867_v29, %s10845_s18  ;;  %v5200_v27 = vmul.f32 %v5177_v31, %v5160_v42 }
 0xde0   : > { %v4991_v44 = vmul.f32 %v4975_v59, %v4951_v24 }
 0xde1   : > { %v13882_v52 = vadd.f32 %v5208_v17, %v5200_v27 }
 0xde2   : > { %v13874_v30 = vadd.f32 %v4999_v63, %v4991_v44 }
 0xde3   : > { %v5179_v49 = vpop.permute.xlu1 %5178 }
 0xde4   : > { %5246 = vrot.lane.b32.xlu1 %v13874_v30, %s10845_s18  ;;  %v5201_v38 = vmul.f32 %v5179_v49, %v5161_v46  ;;  %v17689_v46 = vld [vmem:[#allocation80_spill] sm:$0xff] }
 0xde6   : > { %v13893_v55 = vadd.f32 %v5209_v13, %v5201_v38 }
 0xde7   : > { %v5181_v56 = vpop.permute.xlu1 %5180 }
 0xde8   : > { %v5202_v16 = vmul.f32 %v5181_v56, %v5162_v41  ;;  %v5167_v56 = vsub.f32 1.0, %v13786_v45 }
 0xdea   : > { %v13907_v62 = vadd.f32 %v5210_v54, %v5202_v16  ;;  %v17692_v16 = vld [vmem:[#allocation27_spill] sm:$0xff] }
 0xdeb   : > { %v5183_v50 = vpop.permute.xlu1 %5182 }
 0xdec   : > { %v5203_v60 = vmul.f32 %v5183_v50, %v5163_v0  ;;  %v5215_v50 = vmul.f32 %v13786_v45, %v17689_v46 }
 0xdef   : > { %v5185_v10 = vpop.permute.xlu1 %5184 }
 0xdf0   : > { %v5204_v8 = vmul.f32 %v5185_v10, %v5164_v26 }
 0xdf3   : > { %v5187_v61 = vpop.permute.xlu1 %5186 }
 0xdf7   : > { %v5189_v40 = vpop.permute.xlu1 %5188 }
 0xdfb   : > { %v5191_v49 = vpop.permute.xlu1 %5190 }
 0xdfc   : > { %v5207_v42 = vmul.f32 %v5191_v49, %v5167_v56 }
 0xdfe   : > { %v13972_v38 = vadd.f32 %v5215_v50, %v5207_v42 }
 0xe00   : > { %17690 = vst [vmem:[#allocation53_spill] sm:$0xff] %v13972_v38 }
 0xe39   : > { %v13884_v36 = vpop.permute.xlu0 %5232 }
 0xe3a   : > { %17678 = vst [vmem:[#allocation66_spill] sm:$0xff] %v13884_v36  ;;  %v5256_v22 = vsel %vm1188_vm0, %v13884_v36, %v13882_v52 }
 0xe3b   : > { %9364 = vmatmul.mubr.msk.f32.vlgmr.msra.gmra.mrb[96].mxu1 %vm17359_vm1, %v5256_v22 }
 0xe3c   : > { %5358 = vmatprep.mubr.f32.mxu1 %v17533_v37  ;;  %9766 = vmatpush1.bf16.msra.mxu1 %v11372_v58 }
 0xe3d   : > { %v13897_v6 = vpop.permute.xlu0 %5234  ;;  %9768 = vmatprep.subr.bf16.mxu1 %v11399_v3  ;;  %v5211_v3 = vmul.f32 %v13770_v11, %v13521_v48  ;;  %v5165_v11 = vsub.f32 1.0, %v13778_v43 }
 0xe3e   : > { %17679 = vst [vmem:[#allocation69_spill] sm:$0xff] %v13897_v6  ;;  %v5257_v34 = vsel %vm1188_vm0, %v13897_v6, %v13893_v55 }
 0xe3f   : > { %9365 = vmatmul.mubr.msk.f32.gmra.mrb[98].mxu1 %vm17359_vm1, %v5257_v34  ;;  %v13921_v12 = vadd.f32 %v5211_v3, %v5203_v60  ;;  %v5205_v53 = vmul.f32 %v5187_v61, %v5165_v11 }
 0xe40   : > { %5364 = vmatprep.mubr.f32.mxu1 %v17533_v37  ;;  %9770 = vmatpush1.bf16.msra.mxu1 %v11410_v9 }
 0xe41   : > { %v13911_v58 = vpop.permute.xlu0 %5236  ;;  %9772 = vmatprep.subr.bf16.mxu1 %v11425_v14  ;;  %v5212_v14 = vmul.f32 %v13774_v21, %v13535_v2  ;;  %v17683_v21 = vld [vmem:[#allocation64_spill] sm:$0xff] }
 0xe42   : > { %17680 = vst [vmem:[#allocation71_spill] sm:$0xff] %v13911_v58  ;;  %v5258_v4 = vsel %vm1188_vm0, %v13911_v58, %v13907_v62  ;;  %v5166_v7 = vsub.f32 1.0, %v17683_v21 }
 0xe43   : > { %9366 = vmatmul.mubr.msk.f32.gmra.mrb[100].mxu1 %vm17359_vm1, %v5258_v4  ;;  %v13935_v19 = vadd.f32 %v5212_v14, %v5204_v8 }
 0xe44   : > { %5370 = vmatprep.mubr.f32.mxu1 %v17533_v37  ;;  %9774 = vmatpush1.bf16.msra.mxu1 %v11437_v20  ;;  %v5206_v59 = vmul.f32 %v5189_v40, %v5166_v7 }
 0xe45   : > { %v13925_v9 = vpop.permute.xlu0 %5238  ;;  %9776 = vmatprep.subr.bf16.mxu1 %v11447_v23  ;;  %v5213_v23 = vmul.f32 %v13778_v43, %v13549_v32 }
 0xe46   : > { %17681 = vst [vmem:[#allocation73_spill] sm:$0xff] %v13925_v9  ;;  %v5259_v15 = vsel %vm1188_vm0, %v13925_v9, %v13921_v12 }
 0xe47   : > { %9367 = vmatmul.mubr.msk.f32.gmra.mrb[102].mxu1 %vm17359_vm1, %v5259_v15  ;;  %v13948_v24 = vadd.f32 %v5213_v23, %v5205_v53 }
 0xe48   : > { %5376 = vmatprep.mubr.f32.mxu1 %v17533_v37  ;;  %9778 = vmatpush1.bf16.msra.mxu1 %v11459_v28  ;;  %v17686_v28 = vld [vmem:[#allocation76_spill] sm:$0xff] }
 0xe49   : > { %v13939_v20 = vpop.permute.xlu0 %5240  ;;  %17684 = vst [vmem:[#allocation77_spill] sm:$0xff] %v13948_v24  ;;  %v5214_v44 = vmul.f32 %v17683_v21, %v17686_v28 }
 0xe4a   : > { %17682 = vst [vmem:[#allocation75_spill] sm:$0xff] %v13939_v20  ;;  %v5260_v18 = vsel %vm1188_vm0, %v13939_v20, %v13935_v19 }
 0xe4b   : > { %9368 = vmatmul.mubr.msk.f32.gmra.mrb[104].mxu1 %vm17359_vm1, %v5260_v18  ;;  %v13960_v31 = vadd.f32 %v5214_v44, %v5206_v59  ;;  %v17693_v59 = vld [vmem:[#allocation41_spill] sm:$0xff] }
 0xe4c   : > { %5382 = vmatprep.mubr.f32.mxu1 %v17533_v37 }
 0xe4d   : > { %v13951_v63 = vpop.permute.xlu0 %5242  ;;  %17687 = vst [vmem:[#allocation79_spill] sm:$0xff] %v13960_v31 }
 0xe4e   : > { %17685 = vst [vmem:[#allocation49_spill] sm:$0xff] %v13951_v63  ;;  %v5261_v43 = vsel %vm1188_vm0, %v13951_v63, %v13948_v24 }
 0xe4f   : > { %9369 = vmatmul.mubr.msk.f32.gmra.mrb[106].mxu1 %vm17359_vm1, %v5261_v43 }
 0xe50   : > { %5388 = vmatprep.mubr.f32.mxu1 %v17533_v37 }
 0xe51   : > { %v13963_v27 = vpop.permute.xlu0 %5244 }
 0xe52   : > { %17688 = vst [vmem:[#allocation51_spill] sm:$0xff] %v13963_v27  ;;  %v5262_v17 = vsel %vm1188_vm0, %v13963_v27, %v13960_v31 }
 0xe53   : > { %9370 = vmatmul.mubr.msk.f32.gmra.mrb[108].mxu1 %vm17359_vm1, %v5262_v17 }
 0xe54   : > { %5394 = vmatprep.mubr.f32.mxu1 %v17533_v37 }
 0xe56   : > { %v13974_v13 = vpop.permute.xlu1 %5246 }
 0xe57   : > { %17691 = vst [vmem:[#allocation55_spill] sm:$0xff] %v13974_v13  ;;  %v5263_v41 = vsel %vm1188_vm0, %v13974_v13, %v13972_v38 }
 0xe58   : > { %9371 = vmatmul.mubr.msk.f32.gmra.mrb[110].mxu1 %vm17359_vm1, %v5263_v41 }
 0xe59   : > { %5977 = vmatprep.mubr.f32.mxu1 %v17533_v37 }
 0xf0e   : > { %v5354_v22 = vpop.f32.mrb[96].mxu1 }
 0xf0f   : > { %v5473_v10 = vadd.f32 %v5354_v22, %v17692_v16  ;;  %v13982_v45 = vpop.f32.mrb[97].mxu1 }
 0xf10   : > { %v5689_v44 = vadd.f32 %v13982_v45, %v17693_v59 }
 0xf11   : > { %5489 = vrot.lane.b32.xlu0 %v5473_v10, %s10844_s0 }
 0xf12   : > { %v5360_v54 = vpop.f32.mrb[98].mxu1 }
 0xf13   : > { %v5474_v0 = vadd.f32 %v5360_v54, %v17692_v16  ;;  %v13986_v34 = vpop.f32.mrb[99].mxu1 }
 0xf14   : > { %v5690_v42 = vadd.f32 %v13986_v34, %v17693_v59 }
 0xf15   : > { %5491 = vrot.lane.b32.xlu1 %v5474_v0, %s10844_s0 }
 0xf16   : > { %v5366_v60 = vpop.f32.mrb[100].mxu1 }
 0xf17   : > { %v5475_v3 = vadd.f32 %v5366_v60, %v17692_v16  ;;  %v13990_v26 = vpop.f32.mrb[101].mxu1 }
 0xf18   : > { %v5691_v17 = vadd.f32 %v13990_v26, %v17693_v59 }
 0xf19   : > { %5493 = vrot.lane.b32.xlu0 %v5475_v3, %s10844_s0 }
 0xf1a   : > { %v5372_v61 = vpop.f32.mrb[102].mxu1 }
 0xf1b   : > { %v5476_v4 = vadd.f32 %v5372_v61, %v17692_v16  ;;  %v13994_v8 = vpop.f32.mrb[103].mxu1 }
 0xf1c   : > { %v5692_v50 = vadd.f32 %v13994_v8, %v17693_v59 }
 0xf1d   : > { %5495 = vrot.lane.b32.xlu1 %v5476_v4, %s10844_s0  ;;  %v17694_v4 = vld [vmem:[#allocation67_spill] sm:$0xff] }
 0xf1e   : > { %v5378_v14 = vpop.f32.mrb[104].mxu1 }
 0xf1f   : > { %v5477_v11 = vadd.f32 %v5378_v14, %v17692_v16  ;;  %v13998_v15 = vpop.f32.mrb[105].mxu1 }
 0xf20   : > { %v5693_v41 = vadd.f32 %v13998_v15, %v17693_v59 }
 0xf21   : > { %5497 = vrot.lane.b32.xlu0 %v5477_v11, %s10844_s0  ;;  %v17695_v11 = vld [vmem:[#allocation81_spill] sm:$0xff] }
 0xf22   : > { %v5384_v53 = vpop.f32.mrb[106].mxu1 }
 0xf23   : > { %v5478_v40 = vadd.f32 %v5384_v53, %v17692_v16  ;;  %v14002_v23 = vpop.f32.mrb[107].mxu1 }
 0xf24   : > { %v5694_v10 = vadd.f32 %v14002_v23, %v17693_v59 }
 0xf25   : > { %5499 = vrot.lane.b32.xlu1 %v5478_v40, %s10844_s0  ;;  %v14039_v40 = vadd.f32 %v17695_v11, %v17694_v4 }
 0xf26   : > { %v5390_v21 = vpop.f32.mrb[108].mxu1 }
 0xf27   : > { %v5479_v7 = vadd.f32 %v5390_v21, %v17692_v16  ;;  %v14006_v18 = vpop.f32.mrb[109].mxu1 }
 0xf28   : > { %v5695_v0 = vadd.f32 %v14006_v18, %v17693_v59 }
 0xf29   : > { %5501 = vrot.lane.b32.xlu0 %v5479_v7, %s10844_s0  ;;  %v5417_v7 = vadd.f32 %v5354_v22, %v14039_v40 }
 0xf2b   : > { %v5396_v49 = vpop.f32.mrb[110].mxu1 }
 0xf2c   : > { %v5480_v43 = vadd.f32 %v5396_v49, %v17692_v16  ;;  %v14012_v56 = vpop.f32.mrb[111].mxu1 }
 0xf2d   : > { %5705 = vrot.lane.b32.xlu0 %v5689_v44, %s10844_s0  ;;  %v5696_v3 = vadd.f32 %v14012_v56, %v17693_v59  ;;  %v17696_v44 = vld [vmem:[#allocation83_spill] sm:$0xff] }
 0xf2e   : > { %5503 = vrot.lane.b32.xlu1 %v5480_v43, %s10844_s0  ;;  %v14044_v43 = vadd.f32 %v17696_v44, %v17694_v4 }
 0xf31   : > { %5707 = vrot.lane.b32.xlu0 %v5690_v42, %s10844_s0  ;;  %v9372_v42 = vmul.f32 -1.442695, %v5417_v7  ;;  %v17699_v7 = vld [vmem:[#allocation89_spill] sm:$0xff] }
 0xf32   : > { %v14059_v13 = vadd.f32 %v17699_v7, %v17694_v4  ;;  %v17703_v7 = vld [vmem:[#allocation32_spill] sm:$0xff] }
 0xf33   : > { %10353 = vpow2.f32 %v9372_v42 }
 0xf35   : > { %5709 = vrot.lane.b32.xlu0 %v5691_v17, %s10844_s0  ;;  %v5418_v17 = vadd.f32 %v5360_v54, %v14044_v43 }
 0xf39   : > { %5711 = vrot.lane.b32.xlu0 %v5692_v50, %s10844_s0  ;;  %v17697_v50 = vld [vmem:[#allocation85_spill] sm:$0xff] }
 0xf3d   : > { %5713 = vrot.lane.b32.xlu0 %v5693_v41, %s10844_s0  ;;  %v14049_v41 = vadd.f32 %v17697_v50, %v17694_v4  ;;  %v5421_v50 = vadd.f32 %v5378_v14, %v14059_v13  ;;  %v10354_v42 = vpop.eup %10353  ;;  %v17702_v14 = vld [vmem:[#allocation5_spill] sm:$0xff] }
 0xf3e   : > { %v14074_v28 = vadd.f32 %v17703_v7, %v17702_v14  ;;  %v17705_v7 = vld [vmem:[#allocation34_spill] sm:$0xff] }
 0xf3f   : > { %v14085_v63 = vadd.f32 %v17705_v7, %v17702_v14 }
 0xf41   : > { %5715 = vrot.lane.b32.xlu0 %v5694_v10, %s10844_s0  ;;  %v9373_v10 = vmul.f32 -1.442695, %v5418_v17  ;;  %v17700_v17 = vld [vmem:[#allocation91_spill] sm:$0xff] }
 0xf43   : > { %10355 = vpow2.f32 %v9373_v10 }
 0xf45   : > { %5717 = vrot.lane.b32.xlu0 %v5695_v0, %s10844_s0  ;;  %v5419_v0 = vadd.f32 %v5366_v60, %v14049_v41  ;;  %v14064_v60 = vadd.f32 %v17700_v17, %v17694_v4 }
 0xf47   : > { %v9374_v44 = vmul.f32 -1.442695, %v5419_v0  ;;  %v5422_v46 = vadd.f32 %v5384_v53, %v14064_v60  ;;  %v17701_v0 = vld [vmem:[#allocation93_spill] sm:$0xff] }
 0xf48   : > { %v14069_v27 = vadd.f32 %v17701_v0, %v17694_v4 }
 0xf49   : > { %5719 = vrot.lane.b32.xlu0 %v5696_v3, %s10844_s0  ;;  %v17698_v3 = vld [vmem:[#allocation87_spill] sm:$0xff]  ;;  %10357 = vpow2.f32 %v9374_v44 }
 0xf4a   : > { %v14054_v11 = vadd.f32 %v17698_v3, %v17694_v4  ;;  %v9376_v3 = vmul.f32 -1.442695, %v5421_v50  ;;  %v5423_v44 = vadd.f32 %v5390_v21, %v14069_v27  ;;  %v17704_v50 = vld [vmem:[#allocation95_spill] sm:$0xff] }
 0xf4b   : > { %v14078_v53 = vadd.f32 %v17704_v50, %v17694_v4 }
 0xf4c   : > { %v5420_v22 = vadd.f32 %v5372_v61, %v14054_v11  ;;  %v5449_v61 = vadd.f32 1.0, %v10354_v42  ;;  %v5633_v42 = vadd.f32 %v13982_v45, %v14074_v28  ;;  %v9378_v0 = vmul.f32 -1.442695, %v5423_v44 }
 0xf4d   : > { %v10356_v10 = vpop.eup %10355  ;;  %v5424_v21 = vadd.f32 %v5396_v49, %v14078_v53 }
 0xf4e   : > { %v9375_v54 = vmul.f32 -1.442695, %v5420_v22  ;;  %v9377_v22 = vmul.f32 -1.442695, %v5422_v46  ;;  %v5450_v17 = vadd.f32 1.0, %v10356_v10  ;;  %v5634_v10 = vadd.f32 %v13986_v34, %v14085_v63 }
 0xf4f   : > { %v9379_v32 = vmul.f32 -1.442695, %v5424_v21 }
 0xf50   : > { %10359 = vpow2.f32 %v9375_v54 }
 0xf51   : > { %10361 = vpow2.f32 %v9376_v3 }
 0xf52   : > { %10363 = vrcp.f32 %v5449_v61  ;;  %v9380_v61 = vmul.f32 -1.442695, %v5633_v42 }
 0xf53   : > { %v10358_v54 = vpop.eup %10357  ;;  %10365 = vpow2.f32 %v9377_v22  ;;  %v17706_v22 = vld [vmem:[#allocation36_spill] sm:$0xff] }
 0xf54   : > { %10367 = vrcp.f32 %v5450_v17  ;;  %v5451_v46 = vadd.f32 1.0, %v10358_v54  ;;  %v14091_v44 = vadd.f32 %v17706_v22, %v17702_v14  ;;  %v9381_v54 = vmul.f32 -1.442695, %v5634_v10  ;;  %v17708_v22 = vld [vmem:[#allocation40_spill] sm:$0xff] }
 0xf55   : > { %10369 = vpow2.f32 %v9378_v0 }
 0xf56   : > { %10371 = vrcp.f32 %v5451_v46  ;;  %v5635_v42 = vadd.f32 %v13990_v26, %v14091_v44  ;;  %v17707_v46 = vld [vmem:[#allocation38_spill] sm:$0xff] }
 0xf57   : > { %10373 = vpow2.f32 %v9380_v61  ;;  %v14100_v21 = vadd.f32 %v17707_v46, %v17702_v14 }
 0xf58   : > { %v9382_v10 = vmul.f32 -1.442695, %v5635_v42 }
 0xf59   : > { %v5636_v26 = vadd.f32 %v13994_v8, %v14100_v21 }
 0xf5a   : > { %v10360_v3 = vpop.eup %10359 }
 0xf5b   : > { %v5452_v50 = vadd.f32 1.0, %v10360_v3  ;;  %v10362_v45 = vpop.eup %10361 }
 0xf5c   : > { %v14093_v17 = vpop.eup %10363  ;;  %v5453_v3 = vadd.f32 1.0, %v10362_v45 }
 0xf5d   : > { %10375 = vrcp.f32 %v5452_v50  ;;  %v10366_v0 = vpop.eup %10365 }
 0xf5e   : > { %10377 = vpow2.f32 %v9379_v32  ;;  %v14103_v7 = vpop.eup %10367  ;;  %v5454_v45 = vadd.f32 1.0, %v10366_v0 }
 0xf5f   : > { %10379 = vpow2.f32 %v9381_v54  ;;  %v10370_v32 = vpop.eup %10369  ;;  %v9383_v54 = vmul.f32 -1.442695, %v5636_v26 }
 0xf60   : > { %10381 = vrcp.f32 %v5453_v3  ;;  %v5455_v3 = vadd.f32 1.0, %v10370_v32  ;;  %v17710_v32 = vld [vmem:[#allocation45_spill] sm:$0xff] }
 0xf61   : > { %10383 = vpow2.f32 %v9382_v10  ;;  %v14130_v9 = vadd.f32 %v17710_v32, %v17702_v14 }
 0xf62   : > { %10385 = vrcp.f32 %v5454_v45 }
 0xf63   : > { %10387 = vpow2.f32 %v9383_v54 }
 0xf64   : > { %10389 = vrcp.f32 %v5455_v3  ;;  %v17711_v3 = vld [vmem:[#allocation47_spill] sm:$0xff] }
 0xf65   : > { %v14140_v32 = vadd.f32 %v17711_v3, %v17702_v14 }
 0xf83   : > { %v5490_v49 = vpop.permute.xlu0 %5489 }
 0xf84   : > { %v5513_v34 = vmul.f32 %v14093_v17, %v5490_v49  ;;  %v14110_v49 = vadd.f32 %v17708_v22, %v17702_v14  ;;  %v17709_v22 = vld [vmem:[#allocation43_spill] sm:$0xff] }
 0xf85   : > { %v14122_v20 = vadd.f32 %v17709_v22, %v17702_v14 }
 0xf86   : > { %5529 = vrot.lane.b32.xlu1 %v5513_v34, %s10844_s0  ;;  %v14113_v34 = vpop.eup %10371  ;;  %v5637_v42 = vadd.f32 %v13998_v15, %v14110_v49 }
 0xf87   : > { %v5492_v61 = vpop.permute.xlu1 %5491  ;;  %v5638_v15 = vadd.f32 %v14002_v23, %v14122_v20  ;;  %v5639_v23 = vadd.f32 %v14006_v18, %v14130_v9  ;;  %v5640_v18 = vadd.f32 %v14012_v56, %v14140_v32 }
 0xf88   : > { %v5514_v50 = vmul.f32 %v14103_v7, %v5492_v61  ;;  %v10374_v61 = vpop.eup %10373  ;;  %v9384_v10 = vmul.f32 -1.442695, %v5637_v42 }
 0xf89   : > { %v14118_v0 = vpop.eup %10375  ;;  %v9385_v54 = vmul.f32 -1.442695, %v5638_v15 }
 0xf8a   : > { %5531 = vrot.lane.b32.xlu1 %v5514_v50, %s10844_s0  ;;  %v10378_v50 = vpop.eup %10377  ;;  %10391 = vpow2.f32 %v9384_v10  ;;  %v9386_v10 = vmul.f32 -1.442695, %v5639_v23 }
 0xf8b   : > { %v5494_v46 = vpop.permute.xlu0 %5493  ;;  %v10380_v45 = vpop.eup %10379  ;;  %v5456_v22 = vadd.f32 1.0, %v10378_v50 }
 0xf8c   : > { %v5515_v8 = vmul.f32 %v14113_v34, %v5494_v46  ;;  %v5665_v46 = vadd.f32 1.0, %v10374_v61  ;;  %v5666_v42 = vadd.f32 1.0, %v10380_v45 }
 0xf8e   : > { %5533 = vrot.lane.b32.xlu1 %v5515_v8, %s10844_s0  ;;  %v14133_v8 = vpop.eup %10381  ;;  %10393 = vrcp.f32 %v5665_v46 }
 0xf8f   : > { %v5496_v2 = vpop.permute.xlu1 %5495  ;;  %v10384_v61 = vpop.eup %10383  ;;  %10395 = vrcp.f32 %v5456_v22 }
 0xf90   : > { %v5516_v26 = vmul.f32 %v14118_v0, %v5496_v2  ;;  %v14143_v50 = vpop.eup %10385  ;;  %10397 = vpow2.f32 %v9385_v54  ;;  %v5667_v15 = vadd.f32 1.0, %v10384_v61 }
 0xf91   : > { %10399 = vrcp.f32 %v5666_v42  ;;  %v10388_v46 = vpop.eup %10387 }
 0xf92   : > { %5535 = vrot.lane.b32.xlu1 %v5516_v26, %s10844_s0  ;;  %v14149_v45 = vpop.eup %10389  ;;  %10401 = vpow2.f32 %v9386_v10  ;;  %v5668_v54 = vadd.f32 1.0, %v10388_v46 }
 0xf93   : > { %v5498_v48 = vpop.permute.xlu0 %5497  ;;  %10403 = vrcp.f32 %v5667_v15 }
 0xf94   : > { %v5517_v2 = vmul.f32 %v14133_v8, %v5498_v48  ;;  %v10392_v23 = vpop.eup %10391 }
 0xf95   : > { %v5669_v58 = vadd.f32 1.0, %v10392_v23 }
 0xf96   : > { %5537 = vrot.lane.b32.xlu1 %v5517_v2, %s10844_s0  ;;  %v9387_v2 = vmul.f32 -1.442695, %v5640_v18 }
 0xf97   : > { %v5500_v26 = vpop.permute.xlu1 %5499 }
 0xf98   : > { %v5518_v48 = vmul.f32 %v14143_v50, %v5500_v26  ;;  %v14153_v56 = vpop.eup %10393  ;;  %10405 = vpow2.f32 %v9387_v2 }
 0xf99   : > { %v14155_v42 = vpop.eup %10395  ;;  %10407 = vrcp.f32 %v5668_v54 }
 0xf9a   : > { %5539 = vrot.lane.b32.xlu1 %v5518_v48, %s10844_s0  ;;  %v10398_v18 = vpop.eup %10397  ;;  %10409 = vrcp.f32 %v5669_v58 }
 0xf9b   : > { %v5502_v22 = vpop.permute.xlu0 %5501  ;;  %v14160_v15 = vpop.eup %10399 }
 0xf9c   : > { %v5519_v3 = vmul.f32 %v14149_v45, %v5502_v22  ;;  %v10402_v2 = vpop.eup %10401 }
 0xf9d   : > { %v14164_v5 = vpop.eup %10403 }
 0xf9e   : > { %5541 = vrot.lane.b32.xlu1 %v5519_v3, %s10844_s0  ;;  %v5670_v3 = vadd.f32 1.0, %v10398_v18 }
 0xf9f   : > { %v5706_v26 = vpop.permute.xlu0 %5705 }
 0xfa0   : > { %v5729_v61 = vmul.f32 %v14153_v56, %v5706_v26  ;;  %v5504_v48 = vpop.permute.xlu1 %5503  ;;  %10411 = vrcp.f32 %v5670_v3  ;;  %v5671_v26 = vadd.f32 1.0, %v10402_v2 }
 0xfa1   : > { %v5520_v10 = vmul.f32 %v14155_v42, %v5504_v48 }
 0xfa2   : > { %5745 = vrot.lane.b32.xlu0 %v5729_v61, %s10844_s0  ;;  %v10406_v61 = vpop.eup %10405  ;;  %10413 = vrcp.f32 %v5671_v26 }
 0xfa3   : > { %5543 = vrot.lane.b32.xlu1 %v5520_v10, %s10844_s0  ;;  %v5708_v46 = vpop.permute.xlu0 %5707  ;;  %v14169_v48 = vpop.eup %10407  ;;  %v5672_v58 = vadd.f32 1.0, %v10406_v61 }
 0xfa4   : > { %v5730_v22 = vmul.f32 %v14160_v15, %v5708_v46  ;;  %v14173_v18 = vpop.eup %10409 }
 0xfa5   : > { %10415 = vrcp.f32 %v5672_v58 }
 0xfa7   : > { %5747 = vrot.lane.b32.xlu1 %v5730_v22, %s10844_s0  ;;  %v5710_v54 = vpop.permute.xlu0 %5709 }
 0xfa8   : > { %v5731_v23 = vmul.f32 %v14164_v5, %v5710_v54 }
 0xfaa   : > { %5749 = vrot.lane.b32.xlu0 %v5731_v23, %s10844_s0  ;;  %v14177_v3 = vpop.eup %10411 }
 0xfab   : > { %v5712_v10 = vpop.permute.xlu0 %5711 }
 0xfac   : > { %v5732_v46 = vmul.f32 %v14169_v48, %v5712_v10  ;;  %v14181_v23 = vpop.eup %10413 }
 0xfae   : > { %5751 = vrot.lane.b32.xlu1 %v5732_v46, %s10844_s0 }
 0xfaf   : > { %v5714_v22 = vpop.permute.xlu0 %5713  ;;  %v14185_v10 = vpop.eup %10415 }
 0xfb0   : > { %v5733_v6 = vmul.f32 %v14173_v18, %v5714_v22 }
 0xfb2   : > { %5753 = vrot.lane.b32.xlu1 %v5733_v6, %s10844_s0 }
 0xfb3   : > { %v5716_v2 = vpop.permute.xlu0 %5715 }
 0xfb4   : > { %v5734_v54 = vmul.f32 %v14177_v3, %v5716_v2 }
 0xfb6   : > { %5755 = vrot.lane.b32.xlu1 %v5734_v54, %s10844_s0 }
 0xfb7   : > { %v5718_v26 = vpop.permute.xlu0 %5717 }
 0xfb8   : > { %v5735_v61 = vmul.f32 %v14181_v23, %v5718_v26 }
 0xfba   : > { %5757 = vrot.lane.b32.xlu1 %v5735_v61, %s10844_s0 }
 0xfbb   : > { %v5720_v46 = vpop.permute.xlu0 %5719 }
 0xfbc   : > { %v5736_v58 = vmul.f32 %v14185_v10, %v5720_v46 }
 0xfbe   : > { %5759 = vrot.lane.b32.xlu1 %v5736_v58, %s10844_s0 }
 0xff8   : > { %v5530_v6 = vpop.permute.xlu1 %5529 }
 0xff9   : > { %v5553_v22 = vadd.f32 %v5530_v6, %v14039_v40 }
 0xffb   : > { %10417 = vtanh.f32 %v5553_v22 }
 0xffc   : > { %v5532_v2 = vpop.permute.xlu1 %5531 }
 0xffd   : > { %v5554_v54 = vadd.f32 %v5532_v2, %v14044_v43 }
 0xfff   : > { %10419 = vtanh.f32 %v5554_v54 }
0x1000   : > { %v5534_v35 = vpop.permute.xlu1 %5533 }
0x1001   : > { %v5555_v26 = vadd.f32 %v5534_v35, %v14049_v41 }
0x1003   : > { %10421 = vtanh.f32 %v5555_v26 }
0x1004   : > { %v5536_v61 = vpop.permute.xlu1 %5535 }
0x1005   : > { %v10418_v36 = vpop.eup %10417  ;;  %v5556_v47 = vadd.f32 %v5536_v61, %v14054_v11 }
0x1006   : > { %5585 = vrot.lane.b32.xlu0 %v10418_v36, %s10845_s18 }
0x1007   : > { %10423 = vtanh.f32 %v5556_v47 }
0x1008   : > { %v5538_v46 = vpop.permute.xlu1 %5537 }
0x1009   : > { %v10420_v58 = vpop.eup %10419  ;;  %v5557_v40 = vadd.f32 %v5538_v46, %v14059_v13 }
0x100a   : > { %5587 = vrot.lane.b32.xlu0 %v10420_v58, %s10845_s18 }
0x100b   : > { %10425 = vtanh.f32 %v5557_v40 }
0x100c   : > { %v5540_v43 = vpop.permute.xlu1 %5539 }
0x100d   : > { %v10422_v6 = vpop.eup %10421  ;;  %v5558_v22 = vadd.f32 %v5540_v43, %v14064_v60 }
0x100e   : > { %5589 = vrot.lane.b32.xlu0 %v10422_v6, %s10845_s18 }
0x100f   : > { %10427 = vtanh.f32 %v5558_v22 }
0x1010   : > { %v5542_v35 = vpop.permute.xlu1 %5541 }
0x1011   : > { %v10424_v41 = vpop.eup %10423  ;;  %v5559_v11 = vadd.f32 %v5542_v35, %v14069_v27 }
0x1012   : > { %5591 = vrot.lane.b32.xlu0 %v10424_v41, %s10845_s18 }
0x1013   : > { %10429 = vtanh.f32 %v5559_v11 }
0x1014   : > { %v5746_v47 = vpop.permute.xlu0 %5745 }
0x1015   : > { %v10426_v36 = vpop.eup %10425  ;;  %v5769_v13 = vadd.f32 %v5746_v47, %v14074_v28  ;;  %v5544_v2 = vpop.permute.xlu1 %5543 }
0x1016   : > { %v5560_v54 = vadd.f32 %v5544_v2, %v14078_v53  ;;  %5593 = vrot.lane.b32.xlu0 %v10426_v36, %s10845_s18 }
0x1017   : > { %10431 = vtanh.f32 %v5769_v13 }
0x1018   : > { %10433 = vtanh.f32 %v5560_v54 }
0x1019   : > { %v10428_v60 = vpop.eup %10427  ;;  %v5748_v26 = vpop.permute.xlu1 %5747 }
0x101a   : > { %v5770_v61 = vadd.f32 %v5748_v26, %v14085_v63  ;;  %5595 = vrot.lane.b32.xlu1 %v10428_v60, %s10845_s18  ;;  %v5617_v26 = vmul.f32 %v14093_v17, %v13825_v57  ;;  %v5619_v57 = vmul.f32 %v14113_v34, %v13839_v1  ;;  %v5573_v1 = vsub.f32 1.0, %v14133_v8 }
0x101c   : > { %10435 = vtanh.f32 %v5770_v61  ;;  %v5750_v27 = vpop.permute.xlu0 %5749 }
0x101d   : > { %v10430_v46 = vpop.eup %10429  ;;  %v5771_v58 = vadd.f32 %v5750_v27, %v14091_v44  ;;  %v5570_v27 = vsub.f32 1.0, %v14103_v7 }
0x101e   : > { %5597 = vrot.lane.b32.xlu0 %v10430_v46, %s10845_s18 }
0x101f   : > { %10437 = vtanh.f32 %v5771_v58  ;;  %v5618_v58 = vmul.f32 %v14103_v7, %v13832_v51  ;;  %v5572_v51 = vsub.f32 1.0, %v14118_v0 }
0x1020   : > { %v5752_v28 = vpop.permute.xlu1 %5751 }
0x1021   : > { %v10432_v53 = vpop.eup %10431  ;;  %v5772_v40 = vadd.f32 %v5752_v28, %v14100_v21 }
0x1022   : > { %v10434_v43 = vpop.eup %10433  ;;  %5801 = vrot.lane.b32.xlu0 %v10432_v53, %s10845_s18 }
0x1023   : > { %10439 = vtanh.f32 %v5772_v40  ;;  %5599 = vrot.lane.b32.xlu1 %v10434_v43, %s10845_s18  ;;  %v5571_v40 = vsub.f32 1.0, %v14113_v34 }
0x1024   : > { %v5754_v63 = vpop.permute.xlu1 %5753 }
0x1025   : > { %v5773_v6 = vadd.f32 %v5754_v63, %v14110_v49 }
0x1026   : > { %v10436_v22 = vpop.eup %10435 }
0x1027   : > { %10441 = vtanh.f32 %v5773_v6  ;;  %5803 = vrot.lane.b32.xlu1 %v10436_v22, %s10845_s18  ;;  %v5620_v6 = vmul.f32 %v14118_v0, %v13846_v33  ;;  %v5574_v33 = vsub.f32 1.0, %v14143_v50 }
0x1028   : > { %v5756_v44 = vpop.permute.xlu1 %5755 }
0x1029   : > { %v10438_v35 = vpop.eup %10437  ;;  %v5774_v41 = vadd.f32 %v5756_v44, %v14122_v20 }
0x102b   : > { %10443 = vtanh.f32 %v5774_v41  ;;  %5805 = vrot.lane.b32.xlu1 %v10438_v35, %s10845_s18  ;;  %v5621_v35 = vmul.f32 %v14133_v8, %v13853_v25  ;;  %v5575_v25 = vsub.f32 1.0, %v14149_v45 }
0x102c   : > { %v5758_v21 = vpop.permute.xlu1 %5757 }
0x102d   : > { %v10440_v11 = vpop.eup %10439  ;;  %v5775_v47 = vadd.f32 %v5758_v21, %v14130_v9  ;;  %v5569_v9 = vsub.f32 1.0, %v14093_v17 }
0x102f   : > { %10445 = vtanh.f32 %v5775_v47  ;;  %5807 = vrot.lane.b32.xlu1 %v10440_v11, %s10845_s18  ;;  %v5622_v11 = vmul.f32 %v14143_v50, %v13860_v39  ;;  %v5576_v39 = vsub.f32 1.0, %v14155_v42 }
0x1030   : > { %v5760_v36 = vpop.permute.xlu1 %5759 }
0x1031   : > { %v10442_v49 = vpop.eup %10441  ;;  %v5776_v13 = vadd.f32 %v5760_v36, %v14140_v32 }
0x1033   : > { %10447 = vtanh.f32 %v5776_v13  ;;  %5809 = vrot.lane.b32.xlu1 %v10442_v49, %s10845_s18  ;;  %v5623_v49 = vmul.f32 %v14149_v45, %v13867_v29 }
0x1035   : > { %v10444_v2 = vpop.eup %10443 }
0x1037   : > { %5811 = vrot.lane.b32.xlu1 %v10444_v2, %s10845_s18 }
0x1039   : > { %v10446_v20 = vpop.eup %10445 }
0x103b   : > { %5813 = vrot.lane.b32.xlu1 %v10446_v20, %s10845_s18  ;;  %v5624_v20 = vmul.f32 %v14155_v42, %v13874_v30 }
0x103d   : > { %v10448_v54 = vpop.eup %10447 }
0x103f   : > { %5815 = vrot.lane.b32.xlu1 %v10448_v54, %s10845_s18 }
0x1078   : > { %v5586_v60 = vpop.permute.xlu0 %5585 }
0x1079   : > { %v5609_v61 = vmul.f32 %v5586_v60, %v5569_v9 }
0x107b   : > { %v14224_v32 = vadd.f32 %v5617_v26, %v5609_v61  ;;  %v5785_v26 = vsub.f32 1.0, %v14153_v56 }
0x107c   : > { %v5588_v46 = vpop.permute.xlu0 %5587 }
0x107d   : > { %v5610_v28 = vmul.f32 %v5588_v46, %v5570_v27  ;;  %5857 = vrot.lane.b32.xlu0 %v14224_v32, %s10845_s18  ;;  %v5833_v27 = vmul.f32 %v14153_v56, %v13882_v52  ;;  %v5786_v46 = vsub.f32 1.0, %v14160_v15 }
0x107f   : > { %v14231_v53 = vadd.f32 %v5618_v58, %v5610_v28 }
0x1080   : > { %v5590_v43 = vpop.permute.xlu0 %5589 }
0x1081   : > { %v5611_v17 = vmul.f32 %v5590_v43, %v5571_v40  ;;  %5859 = vrot.lane.b32.xlu0 %v14231_v53, %s10845_s18  ;;  %v5834_v40 = vmul.f32 %v14160_v15, %v13893_v55  ;;  %v5787_v43 = vsub.f32 1.0, %v14164_v5  ;;  %v5788_v15 = vsub.f32 1.0, %v14169_v48 }
0x1083   : > { %v14238_v63 = vadd.f32 %v5619_v57, %v5611_v17 }
0x1084   : > { %v5592_v7 = vpop.permute.xlu0 %5591 }
0x1085   : > { %v5612_v22 = vmul.f32 %v5592_v7, %v5572_v51  ;;  %5861 = vrot.lane.b32.xlu0 %v14238_v63, %s10845_s18 }
0x1087   : > { %v14245_v44 = vadd.f32 %v5620_v6, %v5612_v22  ;;  %v5835_v6 = vmul.f32 %v14164_v5, %v13907_v62  ;;  %v5789_v5 = vsub.f32 1.0, %v14173_v18 }
0x1088   : > { %v5594_v34 = vpop.permute.xlu0 %5593 }
0x1089   : > { %v5613_v41 = vmul.f32 %v5594_v34, %v5573_v1  ;;  %5863 = vrot.lane.b32.xlu0 %v14245_v44, %s10845_s18 }
0x108b   : > { %v14252_v21 = vadd.f32 %v5621_v35, %v5613_v41  ;;  %v5836_v41 = vmul.f32 %v14169_v48, %v13921_v12  ;;  %v5790_v48 = vsub.f32 1.0, %v14177_v3 }
0x108c   : > { %v5596_v0 = vpop.permute.xlu1 %5595 }
0x108d   : > { %v5614_v47 = vmul.f32 %v5596_v0, %v5574_v33  ;;  %5865 = vrot.lane.b32.xlu0 %v14252_v21, %s10845_s18 }
0x108f   : > { %v14259_v36 = vadd.f32 %v5622_v11, %v5614_v47 }
0x1090   : > { %v5598_v8 = vpop.permute.xlu0 %5597 }
0x1091   : > { %v5615_v13 = vmul.f32 %v5598_v8, %v5575_v25  ;;  %5867 = vrot.lane.b32.xlu0 %v14259_v36, %s10845_s18  ;;  %v5837_v8 = vmul.f32 %v14173_v18, %v13935_v19  ;;  %v5791_v18 = vsub.f32 1.0, %v14181_v23 }
0x1093   : > { %v14266_v2 = vadd.f32 %v5623_v49, %v5615_v13 }
0x1094   : > { %v5802_v60 = vpop.permute.xlu0 %5801 }
0x1095   : > { %v5600_v50 = vpop.permute.xlu1 %5599  ;;  %5869 = vrot.lane.b32.xlu0 %v14266_v2, %s10845_s18  ;;  %v5825_v61 = vmul.f32 %v5802_v60, %v5785_v26 }
0x1096   : > { %v5616_v54 = vmul.f32 %v5600_v50, %v5576_v39 }
0x1097   : > { %v14281_v28 = vadd.f32 %v5833_v27, %v5825_v61  ;;  %v5839_v61 = vmul.f32 %v14181_v23, %v13960_v31 }
0x1098   : > { %v14273_v9 = vadd.f32 %v5624_v20, %v5616_v54  ;;  %v5838_v54 = vmul.f32 %v14177_v3, %v13948_v24 }
0x1099   : > { %v5804_v29 = vpop.permute.xlu1 %5803 }
0x109a   : > { %5871 = vrot.lane.b32.xlu1 %v14273_v9, %s10845_s18  ;;  %v5826_v30 = vmul.f32 %v5804_v29, %v5786_v46  ;;  %v5792_v46 = vsub.f32 1.0, %v14185_v10 }
0x109c   : > { %v14292_v56 = vadd.f32 %v5834_v40, %v5826_v30 }
0x109d   : > { %v5806_v45 = vpop.permute.xlu1 %5805 }
0x109e   : > { %v5827_v17 = vmul.f32 %v5806_v45, %v5787_v43  ;;  %v5840_v43 = vmul.f32 %v14185_v10, %v13972_v38 }
0x10a0   : > { %v14304_v1 = vadd.f32 %v5835_v6, %v5827_v17 }
0x10a1   : > { %v5808_v58 = vpop.permute.xlu1 %5807 }
0x10a2   : > { %v5828_v34 = vmul.f32 %v5808_v58, %v5788_v15 }
0x10a4   : > { %v14316_v11 = vadd.f32 %v5836_v41, %v5828_v34 }
0x10a5   : > { %v5810_v51 = vpop.permute.xlu1 %5809 }
0x10a6   : > { %v5829_v47 = vmul.f32 %v5810_v51, %v5789_v5 }
0x10a8   : > { %v14328_v13 = vadd.f32 %v5837_v8, %v5829_v47 }
0x10a9   : > { %v5812_v33 = vpop.permute.xlu1 %5811 }
0x10aa   : > { %v5830_v39 = vmul.f32 %v5812_v33, %v5790_v48 }
0x10ac   : > { %v14340_v45 = vadd.f32 %v5838_v54, %v5830_v39 }
0x10ad   : > { %v5814_v50 = vpop.permute.xlu1 %5813 }
0x10ae   : > { %v5831_v60 = vmul.f32 %v5814_v50, %v5791_v18 }
0x10b0   : > { %v14352_v58 = vadd.f32 %v5839_v61, %v5831_v60 }
0x10b1   : > { %v5816_v27 = vpop.permute.xlu1 %5815 }
0x10b2   : > { %17715 = vst [vmem:[#allocation63_spill] sm:$0xff] %v14352_v58  ;;  %v5832_v30 = vmul.f32 %v5816_v27, %v5792_v46 }
0x10ef   : > { %v14283_v42 = vpop.permute.xlu0 %5857 }
0x10f0   : > { %v5881_v57 = vsel %vm1188_vm0, %v14283_v42, %v14281_v28 }
0x10f1   : > { %9388 = vmatmul.mubr.msk.f32.vlgmr.msra.gmra.mrb[112].mxu1 %vm17359_vm1, %v5881_v57  ;;  %v14364_v57 = vadd.f32 %v5840_v43, %v5832_v30 }
0x10f2   : > { %5983 = vmatprep.mubr.f32.mxu1 %v17533_v37 }
0x10f3   : > { %v14295_v7 = vpop.permute.xlu0 %5859  ;;  %17717 = vst [vmem:[#allocation81_spill] sm:$0xff] %v14364_v57 }
0x10f4   : > { %v5882_v22 = vsel %vm1188_vm0, %v14295_v7, %v14292_v56 }
0x10f5   : > { %9389 = vmatmul.mubr.msk.f32.gmra.mrb[114].mxu1 %vm17359_vm1, %v5882_v22 }
0x10f6   : > { %5989 = vmatprep.mubr.f32.mxu1 %v17533_v37 }
0x10f7   : > { %v14307_v35 = vpop.permute.xlu0 %5861 }
0x10f8   : > { %v5883_v0 = vsel %vm1188_vm0, %v14307_v35, %v14304_v1 }
0x10f9   : > { %9390 = vmatmul.mubr.msk.f32.gmra.mrb[116].mxu1 %vm17359_vm1, %v5883_v0 }
0x10fa   : > { %5995 = vmatprep.mubr.f32.mxu1 %v17533_v37 }
0x10fb   : > { %v14319_v25 = vpop.permute.xlu0 %5863 }
0x10fc   : > { %17712 = vst [vmem:[#allocation57_spill] sm:$0xff] %v14319_v25  ;;  %v5884_v49 = vsel %vm1188_vm0, %v14319_v25, %v14316_v11 }
0x10fd   : > { %9391 = vmatmul.mubr.msk.f32.gmra.mrb[118].mxu1 %vm17359_vm1, %v5884_v49 }
0x10fe   : > { %6001 = vmatprep.mubr.f32.mxu1 %v17533_v37 }
0x10ff   : > { %v14331_v20 = vpop.permute.xlu0 %5865 }
0x1100   : > { %17713 = vst [vmem:[#allocation59_spill] sm:$0xff] %v14331_v20  ;;  %v5885_v29 = vsel %vm1188_vm0, %v14331_v20, %v14328_v13 }
0x1101   : > { %9392 = vmatmul.mubr.msk.f32.gmra.mrb[120].mxu1 %vm17359_vm1, %v5885_v29 }
0x1102   : > { %6007 = vmatprep.mubr.f32.mxu1 %v17533_v37 }
0x1103   : > { %v14343_v26 = vpop.permute.xlu0 %5867 }
0x1104   : > { %17714 = vst [vmem:[#allocation61_spill] sm:$0xff] %v14343_v26  ;;  %v5886_v3 = vsel %vm1188_vm0, %v14343_v26, %v14340_v45 }
0x1105   : > { %9393 = vmatmul.mubr.msk.f32.gmra.mrb[122].mxu1 %vm17359_vm1, %v5886_v3 }
0x1106   : > { %6013 = vmatprep.mubr.f32.mxu1 %v17533_v37 }
0x1107   : > { %v14355_v40 = vpop.permute.xlu0 %5869 }
0x1108   : > { %17716 = vst [vmem:[#allocation64_spill] sm:$0xff] %v14355_v40  ;;  %v5887_v23 = vsel %vm1188_vm0, %v14355_v40, %v14352_v58 }
0x1109   : > { %9394 = vmatmul.mubr.msk.f32.gmra.mrb[124].mxu1 %vm17359_vm1, %v5887_v23 }
0x110a   : > { %6019 = vmatprep.mubr.f32.mxu1 %v17533_v37 }
0x110c   : > { %v14366_v17 = vpop.permute.xlu1 %5871 }
0x110d   : > { %17718 = vst [vmem:[#allocation83_spill] sm:$0xff] %v14366_v17  ;;  %v5888_v51 = vsel %vm1188_vm0, %v14366_v17, %v14364_v57 }
0x110e   : > { %9395 = vmatmul.mubr.msk.f32.gmra.mrb[126].mxu1 %vm17359_vm1, %v5888_v51 }
0x11c4   : > { %v5979_v6 = vpop.f32.mrb[112].mxu1 }
0x11c5   : > { %v6098_v15 = vadd.f32 %v5979_v6, %v17692_v16  ;;  %v14373_v22 = vpop.f32.mrb[113].mxu1 }
0x11c6   : > { %v6314_v3 = vadd.f32 %v14373_v22, %v17693_v59 }
0x11c7   : > { %6114 = vrot.lane.b32.xlu0 %v6098_v15, %s10844_s0 }
0x11c8   : > { %v5985_v10 = vpop.f32.mrb[114].mxu1 }
0x11c9   : > { %v6099_v34 = vadd.f32 %v5985_v10, %v17692_v16  ;;  %v14377_v41 = vpop.f32.mrb[115].mxu1 }
0x11ca   : > { %v6315_v43 = vadd.f32 %v14377_v41, %v17693_v59 }
0x11cb   : > { %6116 = vrot.lane.b32.xlu1 %v6099_v34, %s10844_s0 }
0x11cc   : > { %v5991_v5 = vpop.f32.mrb[116].mxu1 }
0x11cd   : > { %v6100_v33 = vadd.f32 %v5991_v5, %v17692_v16  ;;  %v14381_v0 = vpop.f32.mrb[117].mxu1 }
0x11ce   : > { %v6316_v51 = vadd.f32 %v14381_v0, %v17693_v59 }
0x11cf   : > { %6118 = vrot.lane.b32.xlu0 %v6100_v33, %s10844_s0 }
0x11d0   : > { %v5997_v47 = vpop.f32.mrb[118].mxu1 }
0x11d1   : > { %v6101_v8 = vadd.f32 %v5997_v47, %v17692_v16  ;;  %v14385_v48 = vpop.f32.mrb[119].mxu1 }
0x11d2   : > { %v6317_v15 = vadd.f32 %v14385_v48, %v17693_v59 }
0x11d3   : > { %6120 = vrot.lane.b32.xlu1 %v6101_v8, %s10844_s0 }
0x11d4   : > { %v6003_v49 = vpop.f32.mrb[120].mxu1 }
0x11d5   : > { %v6102_v39 = vadd.f32 %v6003_v49, %v17692_v16  ;;  %v14389_v50 = vpop.f32.mrb[121].mxu1 }
0x11d6   : > { %v6318_v34 = vadd.f32 %v14389_v50, %v17693_v59 }
0x11d7   : > { %6122 = vrot.lane.b32.xlu0 %v6102_v39, %s10844_s0 }
0x11d8   : > { %v6009_v54 = vpop.f32.mrb[122].mxu1 }
0x11d9   : > { %v6103_v18 = vadd.f32 %v6009_v54, %v17692_v16  ;;  %v14393_v29 = vpop.f32.mrb[123].mxu1 }
0x11da   : > { %v6319_v33 = vadd.f32 %v14393_v29, %v17693_v59 }
0x11db   : > { %6124 = vrot.lane.b32.xlu1 %v6103_v18, %s10844_s0  ;;  %v17719_v18 = vld [vmem:[#allocation97_spill] sm:$0xff] }
0x11dc   : > { %v6015_v60 = vpop.f32.mrb[124].mxu1 }
0x11dd   : > { %v6104_v61 = vadd.f32 %v6015_v60, %v17692_v16  ;;  %v14397_v27 = vpop.f32.mrb[125].mxu1 }
0x11de   : > { %v6320_v8 = vadd.f32 %v14397_v27, %v17693_v59 }
0x11df   : > { %6126 = vrot.lane.b32.xlu0 %v6104_v61, %s10844_s0  ;;  %v14430_v61 = vadd.f32 %v17719_v18, %v17694_v4  ;;  %v17722_v18 = vld [vmem:[#allocation102_spill] sm:$0xff] }
0x11e0   : > { %v14445_v38 = vadd.f32 %v17722_v18, %v17694_v4 }
0x11e1   : > { %v6021_v46 = vpop.f32.mrb[126].mxu1 }
0x11e2   : > { %v6105_v30 = vadd.f32 %v6021_v46, %v17692_v16  ;;  %v14403_v23 = vpop.f32.mrb[127].mxu1 }
0x11e3   : > { %6330 = vrot.lane.b32.xlu0 %v6314_v3, %s10844_s0  ;;  %v6321_v39 = vadd.f32 %v14403_v23, %v17693_v59  ;;  %v6042_v3 = vadd.f32 %v5979_v6, %v14430_v61  ;;  %v6045_v6 = vadd.f32 %v5997_v47, %v14445_v38 }
0x11e4   : > { %6128 = vrot.lane.b32.xlu1 %v6105_v30, %s10844_s0  ;;  %v17720_v30 = vld [vmem:[#allocation98_spill] sm:$0xff] }
0x11e7   : > { %6332 = vrot.lane.b32.xlu0 %v6315_v43, %s10844_s0  ;;  %v14435_v43 = vadd.f32 %v17720_v30, %v17694_v4 }
0x11eb   : > { %6334 = vrot.lane.b32.xlu0 %v6316_v51, %s10844_s0  ;;  %v9396_v51 = vmul.f32 -1.442695, %v6042_v3  ;;  %v17723_v3 = vld [vmem:[#allocation104_spill] sm:$0xff] }
0x11ec   : > { %v14450_v17 = vadd.f32 %v17723_v3, %v17694_v4 }
0x11ed   : > { %10449 = vpow2.f32 %v9396_v51 }
0x11ef   : > { %6336 = vrot.lane.b32.xlu0 %v6317_v15, %s10844_s0  ;;  %v6043_v15 = vadd.f32 %v5985_v10, %v14435_v43  ;;  %v9399_v10 = vmul.f32 -1.442695, %v6045_v6 }
0x11f3   : > { %6338 = vrot.lane.b32.xlu0 %v6318_v34, %s10844_s0  ;;  %v17721_v34 = vld [vmem:[#allocation100_spill] sm:$0xff] }
0x11f7   : > { %6340 = vrot.lane.b32.xlu0 %v6319_v33, %s10844_s0  ;;  %v14440_v33 = vadd.f32 %v17721_v34, %v17694_v4  ;;  %v6046_v34 = vadd.f32 %v6003_v49, %v14450_v17  ;;  %v10450_v51 = vpop.eup %10449  ;;  %v17726_v49 = vld [vmem:[#allocation16_spill] sm:$0xff] }
0x11f8   : > { %v6074_v47 = vadd.f32 1.0, %v10450_v51  ;;  %v14465_v3 = vadd.f32 %v17726_v49, %v17702_v14  ;;  %v17728_v49 = vld [vmem:[#allocation18_spill] sm:$0xff] }
0x11f9   : > { %v9400_v18 = vmul.f32 -1.442695, %v6046_v34  ;;  %v17727_v34 = vld [vmem:[#allocation110_spill] sm:$0xff]  ;;  %v14476_v59 = vadd.f32 %v17728_v49, %v17702_v14 }
0x11fa   : > { %v6258_v51 = vadd.f32 %v14373_v22, %v14465_v3 }
0x11fb   : > { %6342 = vrot.lane.b32.xlu0 %v6320_v8, %s10844_s0  ;;  %v9397_v8 = vmul.f32 -1.442695, %v6043_v15  ;;  %v17724_v15 = vld [vmem:[#allocation106_spill] sm:$0xff] }
0x11fd   : > { %10451 = vpow2.f32 %v9397_v8 }
0x11ff   : > { %6344 = vrot.lane.b32.xlu0 %v6321_v39, %s10844_s0  ;;  %v6044_v39 = vadd.f32 %v5991_v5, %v14440_v33  ;;  %v14455_v5 = vadd.f32 %v17724_v15, %v17694_v4 }
0x1201   : > { %v9398_v30 = vmul.f32 -1.442695, %v6044_v39  ;;  %v6047_v40 = vadd.f32 %v6009_v54, %v14455_v5  ;;  %v17725_v39 = vld [vmem:[#allocation108_spill] sm:$0xff]  ;;  %v14469_v54 = vadd.f32 %v17727_v34, %v17694_v4 }
0x1202   : > { %v14460_v26 = vadd.f32 %v17725_v39, %v17694_v4 }
0x1203   : > { %10453 = vpow2.f32 %v9398_v30  ;;  %v9401_v6 = vmul.f32 -1.442695, %v6047_v40 }
0x1204   : > { %10455 = vpow2.f32 %v9399_v10  ;;  %v6048_v30 = vadd.f32 %v6015_v60, %v14460_v26  ;;  %v6049_v60 = vadd.f32 %v6021_v46, %v14469_v54 }
0x1205   : > { %10457 = vpow2.f32 %v9400_v18 }
0x1206   : > { %10459 = vrcp.f32 %v6074_v47  ;;  %v9402_v39 = vmul.f32 -1.442695, %v6048_v30  ;;  %v9404_v47 = vmul.f32 -1.442695, %v6258_v51  ;;  %v9403_v4 = vmul.f32 -1.442695, %v6049_v60 }
0x1207   : > { %v10452_v8 = vpop.eup %10451  ;;  %10461 = vpow2.f32 %v9401_v6  ;;  %v17729_v6 = vld [vmem:[#allocation20_spill] sm:$0xff] }
0x1208   : > { %v6075_v15 = vadd.f32 1.0, %v10452_v8  ;;  %v6259_v8 = vadd.f32 %v14377_v41, %v14476_v59  ;;  %v14482_v30 = vadd.f32 %v17729_v6, %v17702_v14  ;;  %v17731_v6 = vld [vmem:[#allocation23_spill] sm:$0xff] }
0x120a   : > { %10463 = vrcp.f32 %v6075_v15  ;;  %v6260_v51 = vadd.f32 %v14381_v0, %v14482_v30 }
0x120b   : > { %10465 = vpow2.f32 %v9402_v39 }
0x120d   : > { %v10454_v10 = vpop.eup %10453 }
0x120e   : > { %v10456_v18 = vpop.eup %10455  ;;  %v6076_v40 = vadd.f32 1.0, %v10454_v10  ;;  %v9405_v10 = vmul.f32 -1.442695, %v6259_v8  ;;  %v9406_v8 = vmul.f32 -1.442695, %v6260_v51 }
0x120f   : > { %v6077_v34 = vadd.f32 1.0, %v10456_v18  ;;  %v10458_v22 = vpop.eup %10457 }
0x1210   : > { %10467 = vrcp.f32 %v6076_v40  ;;  %v14484_v15 = vpop.eup %10459  ;;  %v6078_v18 = vadd.f32 1.0, %v10458_v22  ;;  %v17730_v40 = vld [vmem:[#allocation21_spill] sm:$0xff] }
0x1211   : > { %10469 = vpow2.f32 %v9404_v47  ;;  %v10462_v39 = vpop.eup %10461  ;;  %v14491_v60 = vadd.f32 %v17730_v40, %v17702_v14 }
0x1212   : > { %10471 = vrcp.f32 %v6077_v34  ;;  %v6079_v22 = vadd.f32 1.0, %v10462_v39 }
0x1213   : > { %10473 = vpow2.f32 %v9403_v4  ;;  %v6261_v0 = vadd.f32 %v14385_v48, %v14491_v60 }
0x1214   : > { %v14494_v49 = vpop.eup %10463  ;;  %10475 = vpow2.f32 %v9405_v10 }
0x1215   : > { %10477 = vrcp.f32 %v6078_v18  ;;  %v10466_v4 = vpop.eup %10465  ;;  %v9407_v10 = vmul.f32 -1.442695, %v6261_v0 }
0x1216   : > { %10479 = vpow2.f32 %v9406_v8  ;;  %v6080_v18 = vadd.f32 1.0, %v10466_v4  ;;  %v17733_v4 = vld [vmem:[#allocation28_spill] sm:$0xff] }
0x1217   : > { %10481 = vrcp.f32 %v6079_v22  ;;  %v14521_v31 = vadd.f32 %v17733_v4, %v17702_v14 }
0x1218   : > { %10483 = vpow2.f32 %v9407_v10 }
0x1219   : > { %10485 = vrcp.f32 %v6080_v18  ;;  %v17734_v18 = vld [vmem:[#allocation30_spill] sm:$0xff] }
0x121a   : > { %v14531_v4 = vadd.f32 %v17734_v18, %v17702_v14 }
0x1239   : > { %v6115_v46 = vpop.permute.xlu0 %6114 }
0x123a   : > { %v6138_v41 = vmul.f32 %v14484_v15, %v6115_v46  ;;  %v14501_v46 = vadd.f32 %v17731_v6, %v17702_v14  ;;  %v17732_v6 = vld [vmem:[#allocation25_spill] sm:$0xff] }
0x123b   : > { %v14513_v16 = vadd.f32 %v17732_v6, %v17702_v14 }
0x123c   : > { %6154 = vrot.lane.b32.xlu1 %v6138_v41, %s10844_s0  ;;  %v14504_v41 = vpop.eup %10467  ;;  %v6262_v51 = vadd.f32 %v14389_v50, %v14501_v46 }
0x123d   : > { %v6117_v47 = vpop.permute.xlu1 %6116  ;;  %v6263_v50 = vadd.f32 %v14393_v29, %v14513_v16  ;;  %v6264_v29 = vadd.f32 %v14397_v27, %v14521_v31  ;;  %v6265_v27 = vadd.f32 %v14403_v23, %v14531_v4 }
0x123e   : > { %v6139_v34 = vmul.f32 %v14494_v49, %v6117_v47  ;;  %v10470_v47 = vpop.eup %10469  ;;  %v9408_v8 = vmul.f32 -1.442695, %v6262_v51 }
0x123f   : > { %v14509_v39 = vpop.eup %10471  ;;  %v9409_v10 = vmul.f32 -1.442695, %v6263_v50 }
0x1240   : > { %6156 = vrot.lane.b32.xlu1 %v6139_v34, %s10844_s0  ;;  %v10474_v34 = vpop.eup %10473  ;;  %10487 = vpow2.f32 %v9408_v8  ;;  %v9410_v8 = vmul.f32 -1.442695, %v6264_v29 }
0x1241   : > { %v6119_v40 = vpop.permute.xlu0 %6118  ;;  %v10476_v22 = vpop.eup %10475  ;;  %v6081_v6 = vadd.f32 1.0, %v10474_v34 }
0x1242   : > { %v6140_v48 = vmul.f32 %v14504_v41, %v6119_v40  ;;  %v6290_v40 = vadd.f32 1.0, %v10470_v47  ;;  %v6291_v51 = vadd.f32 1.0, %v10476_v22 }
0x1244   : > { %6158 = vrot.lane.b32.xlu1 %v6140_v48, %s10844_s0  ;;  %v14524_v48 = vpop.eup %10477  ;;  %10489 = vrcp.f32 %v6290_v40 }
0x1245   : > { %v6121_v37 = vpop.permute.xlu1 %6120  ;;  %v10480_v47 = vpop.eup %10479  ;;  %10491 = vrcp.f32 %v6081_v6 }
0x1246   : > { %v6141_v0 = vmul.f32 %v14509_v39, %v6121_v37  ;;  %v14534_v34 = vpop.eup %10481  ;;  %10493 = vpow2.f32 %v9409_v10  ;;  %v6292_v50 = vadd.f32 1.0, %v10480_v47 }
0x1247   : > { %10495 = vrcp.f32 %v6291_v51  ;;  %v10484_v40 = vpop.eup %10483 }
0x1248   : > { %6160 = vrot.lane.b32.xlu1 %v6141_v0, %s10844_s0  ;;  %v14540_v22 = vpop.eup %10485  ;;  %10497 = vpow2.f32 %v9410_v8  ;;  %v6293_v10 = vadd.f32 1.0, %v10484_v40 }
0x1249   : > { %v6123_v20 = vpop.permute.xlu0 %6122  ;;  %10499 = vrcp.f32 %v6292_v50 }
0x124a   : > { %v6142_v37 = vmul.f32 %v14524_v48, %v6123_v20  ;;  %v10488_v29 = vpop.eup %10487 }
0x124b   : > { %v6294_v14 = vadd.f32 1.0, %v10488_v29 }
0x124c   : > { %6162 = vrot.lane.b32.xlu1 %v6142_v37, %s10844_s0  ;;  %v9411_v37 = vmul.f32 -1.442695, %v6265_v27 }
0x124d   : > { %v6125_v0 = vpop.permute.xlu1 %6124 }
0x124e   : > { %v6143_v20 = vmul.f32 %v14534_v34, %v6125_v0  ;;  %v14544_v23 = vpop.eup %10489  ;;  %10501 = vpow2.f32 %v9411_v37 }
0x124f   : > { %v14546_v51 = vpop.eup %10491  ;;  %10503 = vrcp.f32 %v6293_v10 }
0x1250   : > { %6164 = vrot.lane.b32.xlu1 %v6143_v20, %s10844_s0  ;;  %v10494_v27 = vpop.eup %10493  ;;  %10505 = vrcp.f32 %v6294_v14 }
0x1251   : > { %v6127_v6 = vpop.permute.xlu0 %6126  ;;  %v14551_v50 = vpop.eup %10495 }
0x1252   : > { %v6144_v18 = vmul.f32 %v14540_v22, %v6127_v6  ;;  %v10498_v37 = vpop.eup %10497 }
0x1253   : > { %v14555_v57 = vpop.eup %10499 }
0x1254   : > { %6166 = vrot.lane.b32.xlu1 %v6144_v18, %s10844_s0  ;;  %v6295_v18 = vadd.f32 1.0, %v10494_v27 }
0x1255   : > { %v6331_v0 = vpop.permute.xlu0 %6330 }
0x1256   : > { %v6354_v47 = vmul.f32 %v14544_v23, %v6331_v0  ;;  %v6129_v20 = vpop.permute.xlu1 %6128  ;;  %10507 = vrcp.f32 %v6295_v18  ;;  %v6296_v0 = vadd.f32 1.0, %v10498_v37 }
0x1257   : > { %v6145_v8 = vmul.f32 %v14546_v51, %v6129_v20 }
0x1258   : > { %6370 = vrot.lane.b32.xlu0 %v6354_v47, %s10844_s0  ;;  %v10502_v47 = vpop.eup %10501  ;;  %10509 = vrcp.f32 %v6296_v0 }
0x1259   : > { %6168 = vrot.lane.b32.xlu1 %v6145_v8, %s10844_s0  ;;  %v6333_v40 = vpop.permute.xlu0 %6332  ;;  %v14560_v20 = vpop.eup %10503  ;;  %v6297_v14 = vadd.f32 1.0, %v10502_v47 }
0x125a   : > { %v6355_v6 = vmul.f32 %v14551_v50, %v6333_v40  ;;  %v14564_v27 = vpop.eup %10505 }
0x125b   : > { %10511 = vrcp.f32 %v6297_v14 }
0x125d   : > { %6372 = vrot.lane.b32.xlu1 %v6355_v6, %s10844_s0  ;;  %v6335_v10 = vpop.permute.xlu0 %6334 }
0x125e   : > { %v6356_v29 = vmul.f32 %v14555_v57, %v6335_v10 }
0x1260   : > { %6374 = vrot.lane.b32.xlu0 %v6356_v29, %s10844_s0  ;;  %v14568_v18 = vpop.eup %10507 }
0x1261   : > { %v6337_v8 = vpop.permute.xlu0 %6336 }
0x1262   : > { %v6357_v40 = vmul.f32 %v14560_v20, %v6337_v8  ;;  %v14572_v29 = vpop.eup %10509 }
0x1263   : > { %17735 = vst [vmem:[#allocation85_spill] sm:$0xff] %v14572_v29 }
0x1264   : > { %6376 = vrot.lane.b32.xlu1 %v6357_v40, %s10844_s0 }
0x1265   : > { %v6339_v6 = vpop.permute.xlu0 %6338  ;;  %v14576_v8 = vpop.eup %10511 }
0x1266   : > { %v6358_v58 = vmul.f32 %v14564_v27, %v6339_v6 }
0x1268   : > { %6378 = vrot.lane.b32.xlu1 %v6358_v58, %s10844_s0 }
0x1269   : > { %v6341_v37 = vpop.permute.xlu0 %6340 }
0x126a   : > { %v6359_v10 = vmul.f32 %v14568_v18, %v6341_v37 }
0x126c   : > { %6380 = vrot.lane.b32.xlu1 %v6359_v10, %s10844_s0 }
0x126d   : > { %v6343_v0 = vpop.permute.xlu0 %6342 }
0x126e   : > { %v6360_v47 = vmul.f32 %v14572_v29, %v6343_v0 }
0x1270   : > { %6382 = vrot.lane.b32.xlu1 %v6360_v47, %s10844_s0 }
0x1271   : > { %v6345_v40 = vpop.permute.xlu0 %6344 }
0x1272   : > { %v6361_v14 = vmul.f32 %v14576_v8, %v6345_v40 }
0x1274   : > { %6384 = vrot.lane.b32.xlu1 %v6361_v14, %s10844_s0 }
0x12ae   : > { %v6155_v58 = vpop.permute.xlu1 %6154 }
0x12af   : > { %v6178_v6 = vadd.f32 %v6155_v58, %v14430_v61 }
0x12b1   : > { %10513 = vtanh.f32 %v6178_v6 }
0x12b2   : > { %v6157_v37 = vpop.permute.xlu1 %6156 }
0x12b3   : > { %v6179_v10 = vadd.f32 %v6157_v37, %v14435_v43 }
0x12b5   : > { %10515 = vtanh.f32 %v6179_v10 }
0x12b6   : > { %v6159_v25 = vpop.permute.xlu1 %6158 }
0x12b7   : > { %v6180_v0 = vadd.f32 %v6159_v25, %v14440_v33 }
0x12b9   : > { %10517 = vtanh.f32 %v6180_v0 }
0x12ba   : > { %v6161_v47 = vpop.permute.xlu1 %6160 }
0x12bb   : > { %v10514_v29 = vpop.eup %10513  ;;  %v6181_v24 = vadd.f32 %v6161_v47, %v14445_v38 }
0x12bc   : > { %6210 = vrot.lane.b32.xlu0 %v10514_v29, %s10845_s18 }
0x12bd   : > { %10519 = vtanh.f32 %v6181_v24 }
0x12be   : > { %v6163_v40 = vpop.permute.xlu1 %6162 }
0x12bf   : > { %v10516_v14 = vpop.eup %10515  ;;  %v6182_v61 = vadd.f32 %v6163_v40, %v14450_v17 }
0x12c0   : > { %6212 = vrot.lane.b32.xlu0 %v10516_v14, %s10845_s18 }
0x12c1   : > { %10521 = vtanh.f32 %v6182_v61 }
0x12c2   : > { %v6165_v43 = vpop.permute.xlu1 %6164 }
0x12c3   : > { %v10518_v58 = vpop.eup %10517  ;;  %v6183_v6 = vadd.f32 %v6165_v43, %v14455_v5 }
0x12c4   : > { %6214 = vrot.lane.b32.xlu0 %v10518_v58, %s10845_s18 }
0x12c5   : > { %10523 = vtanh.f32 %v6183_v6 }
0x12c6   : > { %v6167_v25 = vpop.permute.xlu1 %6166 }
0x12c7   : > { %v10520_v33 = vpop.eup %10519  ;;  %v6184_v38 = vadd.f32 %v6167_v25, %v14460_v26 }
0x12c8   : > { %6216 = vrot.lane.b32.xlu0 %v10520_v33, %s10845_s18 }
0x12c9   : > { %10525 = vtanh.f32 %v6184_v38 }
0x12ca   : > { %v6371_v24 = vpop.permute.xlu0 %6370 }
0x12cb   : > { %v10522_v29 = vpop.eup %10521  ;;  %v6394_v17 = vadd.f32 %v6371_v24, %v14465_v3  ;;  %v6169_v37 = vpop.permute.xlu1 %6168 }
0x12cc   : > { %v6185_v10 = vadd.f32 %v6169_v37, %v14469_v54  ;;  %6218 = vrot.lane.b32.xlu0 %v10522_v29, %s10845_s18 }
0x12cd   : > { %10527 = vtanh.f32 %v6394_v17 }
0x12ce   : > { %10529 = vtanh.f32 %v6185_v10 }
0x12cf   : > { %v10524_v5 = vpop.eup %10523  ;;  %v6373_v0 = vpop.permute.xlu1 %6372 }
0x12d0   : > { %v6395_v47 = vadd.f32 %v6373_v0, %v14476_v59  ;;  %6220 = vrot.lane.b32.xlu1 %v10524_v5, %s10845_s18  ;;  %v6242_v0 = vmul.f32 %v14484_v15, %v14224_v32  ;;  %v6244_v32 = vmul.f32 %v14504_v41, %v14238_v63  ;;  %v6198_v63 = vsub.f32 1.0, %v14524_v48 }
0x12d2   : > { %10531 = vtanh.f32 %v6395_v47  ;;  %v6375_v26 = vpop.permute.xlu0 %6374 }
0x12d3   : > { %v10526_v40 = vpop.eup %10525  ;;  %v6396_v14 = vadd.f32 %v6375_v26, %v14482_v30  ;;  %v6195_v26 = vsub.f32 1.0, %v14494_v49 }
0x12d4   : > { %6222 = vrot.lane.b32.xlu0 %v10526_v40, %s10845_s18 }
0x12d5   : > { %10533 = vtanh.f32 %v6396_v14  ;;  %v6243_v14 = vmul.f32 %v14494_v49, %v14231_v53  ;;  %v6197_v53 = vsub.f32 1.0, %v14509_v39 }
0x12d6   : > { %v6377_v3 = vpop.permute.xlu1 %6376 }
0x12d7   : > { %v10528_v54 = vpop.eup %10527  ;;  %v6397_v61 = vadd.f32 %v6377_v3, %v14491_v60 }
0x12d8   : > { %v10530_v43 = vpop.eup %10529  ;;  %6426 = vrot.lane.b32.xlu0 %v10528_v54, %s10845_s18 }
0x12d9   : > { %10535 = vtanh.f32 %v6397_v61  ;;  %6224 = vrot.lane.b32.xlu1 %v10530_v43, %s10845_s18  ;;  %v6196_v61 = vsub.f32 1.0, %v14504_v41 }
0x12da   : > { %v6379_v59 = vpop.permute.xlu1 %6378 }
0x12db   : > { %v6398_v58 = vadd.f32 %v6379_v59, %v14501_v46 }
0x12dc   : > { %v10532_v6 = vpop.eup %10531 }
0x12dd   : > { %10537 = vtanh.f32 %v6398_v58  ;;  %6428 = vrot.lane.b32.xlu1 %v10532_v6, %s10845_s18  ;;  %v6245_v58 = vmul.f32 %v14509_v39, %v14245_v44  ;;  %v6199_v44 = vsub.f32 1.0, %v14534_v34 }
0x12de   : > { %v6381_v30 = vpop.permute.xlu1 %6380 }
0x12df   : > { %v10534_v25 = vpop.eup %10533  ;;  %v6399_v33 = vadd.f32 %v6381_v30, %v14513_v16 }
0x12e1   : > { %10539 = vtanh.f32 %v6399_v33  ;;  %6430 = vrot.lane.b32.xlu1 %v10534_v25, %s10845_s18  ;;  %v6246_v25 = vmul.f32 %v14524_v48, %v14252_v21  ;;  %v6200_v21 = vsub.f32 1.0, %v14540_v22 }
0x12e2   : > { %v6383_v60 = vpop.permute.xlu1 %6382 }
0x12e3   : > { %v10536_v38 = vpop.eup %10535  ;;  %v6400_v24 = vadd.f32 %v6383_v60, %v14521_v31  ;;  %v6194_v31 = vsub.f32 1.0, %v14484_v15 }
0x12e5   : > { %10541 = vtanh.f32 %v6400_v24  ;;  %6432 = vrot.lane.b32.xlu1 %v10536_v38, %s10845_s18  ;;  %v6247_v38 = vmul.f32 %v14534_v34, %v14259_v36  ;;  %v6201_v36 = vsub.f32 1.0, %v14546_v51 }
0x12e6   : > { %v6385_v29 = vpop.permute.xlu1 %6384 }
0x12e7   : > { %v10538_v46 = vpop.eup %10537  ;;  %v6401_v17 = vadd.f32 %v6385_v29, %v14531_v4 }
0x12e9   : > { %10543 = vtanh.f32 %v6401_v17  ;;  %6434 = vrot.lane.b32.xlu1 %v10538_v46, %s10845_s18  ;;  %v6248_v46 = vmul.f32 %v14540_v22, %v14266_v2  ;;  %v6411_v22 = vsub.f32 1.0, %v14551_v50 }
0x12eb   : > { %v10540_v37 = vpop.eup %10539 }
0x12ed   : > { %6436 = vrot.lane.b32.xlu1 %v10540_v37, %s10845_s18 }
0x12ef   : > { %v10542_v16 = vpop.eup %10541 }
0x12f1   : > { %6438 = vrot.lane.b32.xlu1 %v10542_v16, %s10845_s18  ;;  %v6249_v16 = vmul.f32 %v14546_v51, %v14273_v9  ;;  %v6410_v9 = vsub.f32 1.0, %v14544_v23 }
0x12f3   : > { %v10544_v10 = vpop.eup %10543 }
0x12f5   : > { %6440 = vrot.lane.b32.xlu1 %v10544_v10, %s10845_s18 }
0x132e   : > { %v6211_v5 = vpop.permute.xlu0 %6210 }
0x132f   : > { %v6234_v47 = vmul.f32 %v6211_v5, %v6194_v31 }
0x1331   : > { %v14615_v4 = vadd.f32 %v6242_v0, %v6234_v47  ;;  %v6459_v0 = vmul.f32 %v14551_v50, %v14292_v56  ;;  %v14685_v50 = vld [vmem:[%s17179_s7] ss:$0 sm:$0xff] }
0x1332   : > { %v6213_v40 = vpop.permute.xlu0 %6212 }
0x1333   : > { %v6235_v3 = vmul.f32 %v6213_v40, %v6195_v26  ;;  %6482 = vrot.lane.b32.xlu0 %v14615_v4, %s10845_s18  ;;  %v6412_v40 = vsub.f32 1.0, %v14555_v57 }
0x1335   : > { %v14622_v54 = vadd.f32 %v6243_v14, %v6235_v3  ;;  %v17736_v3 = vld [vmem:[#allocation107_spill] sm:$0xff] }
0x1336   : > { %v6215_v43 = vpop.permute.xlu0 %6214 }
0x1337   : > { %v6236_v15 = vmul.f32 %v6215_v43, %v6196_v61  ;;  %6484 = vrot.lane.b32.xlu0 %v14622_v54, %s10845_s18 }
0x1339   : > { %v14629_v59 = vadd.f32 %v6244_v32, %v6236_v15  ;;  %v6460_v32 = vmul.f32 %v14555_v57, %v14304_v1 }
0x133a   : > { %v6217_v49 = vpop.permute.xlu0 %6216 }
0x133b   : > { %v6237_v6 = vmul.f32 %v6217_v49, %v6197_v53  ;;  %6486 = vrot.lane.b32.xlu0 %v14629_v59, %s10845_s18  ;;  %v6458_v53 = vmul.f32 %v14544_v23, %v14281_v28 }
0x133d   : > { %v14636_v30 = vadd.f32 %v6245_v58, %v6237_v6  ;;  %v17738_v58 = vld [vmem:[#allocation39_spill] sm:$0xff] }
0x133e   : > { %v6219_v41 = vpop.permute.xlu0 %6218  ;;  %v14696_v6 = vsel %vm1188_vm0, %v17738_v58, %v14292_v56 }
0x133f   : > { %v6238_v33 = vmul.f32 %v6219_v41, %v6198_v63  ;;  %6488 = vrot.lane.b32.xlu0 %v14636_v30, %s10845_s18  ;;  %17739 = vst [vmem:[#allocation89_spill] sm:$0xff] %v14696_v6 }
0x1341   : > { %v14643_v60 = vadd.f32 %v6246_v25, %v6238_v33  ;;  %v7219_v25 = vmul.f32 %v14685_v50, %v14696_v6  ;;  %v17740_v33 = vld [vmem:[#allocation111_spill] sm:$0xff] }
0x1342   : > { %v6221_v39 = vpop.permute.xlu1 %6220 }
0x1343   : > { %v6239_v24 = vmul.f32 %v6221_v39, %v6199_v44  ;;  %6490 = vrot.lane.b32.xlu0 %v14643_v60, %s10845_s18  ;;  %v17742_v44 = vld [vmem:[#allocation103_spill] sm:$0xff]  ;;  %v7317_v56 = vsel %vm17359_vm1, %v7219_v25, 0.0  ;;  %v6415_v25 = vsub.f32 1.0, %v14568_v18 }
0x1345   : > { %v14650_v29 = vadd.f32 %v6247_v38, %v6239_v24  ;;  %v6413_v24 = vsub.f32 1.0, %v14560_v20 }
0x1346   : > { %v6223_v48 = vpop.permute.xlu0 %6222 }
0x1347   : > { %v6240_v17 = vmul.f32 %v6223_v48, %v6200_v21  ;;  %6492 = vrot.lane.b32.xlu0 %v14650_v29, %s10845_s18  ;;  %v17744_v21 = vld [vmem:[#allocation56_spill] sm:$0xff] }
0x1348   : > { %v14720_v48 = vsel %vm1188_vm0, %v17744_v21, %v13893_v55  ;;  %v17749_v55 = vld [vmem:[#allocation66_spill] sm:$0xff]  ;;  %v17758_v21 = vld [vmem:[#allocation139_spill] sm:$0xff] }
0x1349   : > { %v14657_v37 = vadd.f32 %v6248_v46, %v6240_v17  ;;  %17745 = vst [vmem:[#allocation32_spill] sm:$0xff] %v14720_v48 }
0x134a   : > { %v6427_v14 = vpop.permute.xlu0 %6426 }
0x134b   : > { %v6225_v34 = vpop.permute.xlu1 %6224  ;;  %6494 = vrot.lane.b32.xlu0 %v14657_v37, %s10845_s18  ;;  %v6450_v43 = vmul.f32 %v6427_v14, %v6410_v9 }
0x134c   : > { %v6241_v10 = vmul.f32 %v6225_v34, %v6201_v36  ;;  %v6414_v34 = vsub.f32 1.0, %v14564_v27 }
0x134d   : > { %v14698_v63 = vadd.f32 %v6458_v53, %v6450_v43  ;;  %v17754_v53 = vld [vmem:[#allocation69_spill] sm:$0xff] }
0x134e   : > { %v14664_v31 = vadd.f32 %v6249_v16, %v6241_v10  ;;  %v17746_v16 = vld [vmem:[#allocation35_spill] sm:$0xff] }
0x134f   : > { %v6429_v2 = vpop.permute.xlu1 %6428  ;;  %v14711_v39 = vsel %vm1188_vm0, %v17742_v44, %v14698_v63  ;;  %v14728_v10 = vsel %vm1188_vm0, %v17746_v16, %v14281_v28  ;;  %v17760_v16 = vld [vmem:[#allocation44_spill] sm:$0xff] }
0x1350   : > { %6496 = vrot.lane.b32.xlu1 %v14664_v31, %s10845_s18  ;;  %v6451_v5 = vmul.f32 %v6429_v2, %v6411_v22  ;;  %17743 = vst [vmem:[#allocation93_spill] sm:$0xff] %v14711_v39  ;;  %v7210_v17 = vmul.f32 %v14685_v50, %v14711_v39  ;;  %17747 = vst [vmem:[#allocation95_spill] sm:$0xff] %v14728_v10  ;;  %v7227_v22 = vmul.f32 %v14685_v50, %v14720_v48 }
0x1351   : > { %v7218_v28 = vmul.f32 %v14685_v50, %v14728_v10  ;;  %v17854_v10 = vld [vmem:[#allocation112_spill] sm:$0xff] }
0x1352   : > { %v14671_v47 = vadd.f32 %v6459_v0, %v6451_v5  ;;  %v17748_v5 = vld [vmem:[#allocation50_spill] sm:$0xff]  ;;  %v7290_v14 = vsel %vm17359_vm1, %v7210_v17, 0.0 }
0x1353   : > { %v6431_v26 = vpop.permute.xlu1 %6430  ;;  %v14736_v0 = vsel %vm1188_vm0, %v17749_v55, %v17748_v5  ;;  %v17762_v55 = vld [vmem:[#allocation33_spill] sm:$0xff] }
0x1354   : > { %v6452_v51 = vmul.f32 %v6431_v26, %v6412_v40  ;;  %v14678_v61 = vsel %vm1188_vm0, %v17736_v3, %v14671_v47  ;;  %17750 = vst [vmem:[#allocation34_spill] sm:$0xff] %v14736_v0  ;;  %v6461_v26 = vmul.f32 %v14560_v20, %v14316_v11  ;;  %v17751_v3 = vld [vmem:[#allocation52_spill] sm:$0xff]  ;;  %v7341_v20 = vsel %vm17359_vm1, %v7227_v22, 0.0 }
0x1355   : > { %17737 = vst [vmem:[#allocation87_spill] sm:$0xff] %v14678_v61  ;;  %v7211_v15 = vmul.f32 %v14685_v50, %v14678_v61  ;;  %v14750_v43 = vsel %vm1188_vm0, %v17751_v3, %v13882_v52  ;;  %v17766_v3 = vld [vmem:[#allocation140_spill] sm:$0xff] }
0x1356   : > { %v14691_v49 = vadd.f32 %v6460_v32, %v6452_v51  ;;  %v6462_v51 = vmul.f32 %v14564_v27, %v14328_v13  ;;  %17752 = vst [vmem:[#allocation36_spill] sm:$0xff] %v14750_v43  ;;  %v7234_v32 = vmul.f32 %v14685_v50, %v14736_v0  ;;  %v7226_v52 = vmul.f32 %v14685_v50, %v14750_v43  ;;  %v17853_v43 = vld [vmem:[#allocation67_spill] sm:$0xff] }
0x1357   : > { %v6433_v57 = vpop.permute.xlu1 %6432  ;;  %v7293_v41 = vsel %vm17359_vm1, %v7211_v15, 0.0  ;;  %v17753_v15 = vld [vmem:[#allocation54_spill] sm:$0xff]  ;;  %v15188_v39 = vadd.f32 %v17854_v10, %v17853_v43  ;;  %v17860_v10 = vld [vmem:[#allocation7_spill] sm:$0xff] }
0x1358   : > { %v14706_v23 = vsel %vm1188_vm0, %v17740_v33, %v14691_v49  ;;  %v6453_v36 = vmul.f32 %v6433_v57, %v6413_v24  ;;  %v14758_v58 = vsel %vm1188_vm0, %v17754_v53, %v17753_v15  ;;  %v17756_v33 = vld [vmem:[#allocation137_spill] sm:$0xff]  ;;  %v7338_v17 = vsel %vm17359_vm1, %v7226_v52, 0.0 }
0x1359   : > { %17741 = vst [vmem:[#allocation91_spill] sm:$0xff] %v14706_v23  ;;  %v7212_v38 = vmul.f32 %v14685_v50, %v14706_v23  ;;  %17755 = vst [vmem:[#allocation38_spill] sm:$0xff] %v14758_v58  ;;  %v17770_v52 = vld [vmem:[#allocation37_spill] sm:$0xff] }
0x135a   : > { %v14743_v9 = vadd.f32 %v6461_v26, %v6453_v36  ;;  %v14795_v26 = vsel %vm1188_vm0, %v14283_v42, %v17762_v55 }
0x135b   : > { %v6435_v46 = vpop.permute.xlu1 %6434  ;;  %v7296_v2 = vsel %vm17359_vm1, %v7212_v38, 0.0  ;;  %v7235_v38 = vmul.f32 %v14685_v50, %v14758_v58  ;;  %17763 = vst [vmem:[#allocation47_spill] sm:$0xff] %v14795_v26  ;;  %v7242_v42 = vmul.f32 %v14685_v50, %v14795_v26 }
0x135c   : > { %v6454_v40 = vmul.f32 %v6435_v46, %v6414_v34  ;;  %v14769_v44 = vsel %vm1188_vm0, %v17756_v33, %v14743_v9  ;;  %v6463_v34 = vmul.f32 %v14568_v18, %v14340_v45 }
0x135d   : > { %17757 = vst [vmem:[#allocation40_spill] sm:$0xff] %v14769_v44  ;;  %v7213_v36 = vmul.f32 %v14685_v50, %v14769_v44  ;;  %v7365_v22 = vsel %vm17359_vm1, %v7235_v38, 0.0 }
0x135e   : > { %v14760_v57 = vadd.f32 %v6462_v51, %v6454_v40 }
0x135f   : > { %v6437_v27 = vpop.permute.xlu1 %6436  ;;  %v7299_v18 = vsel %vm17359_vm1, %v7213_v36, 0.0 }
0x1360   : > { %v6455_v24 = vmul.f32 %v6437_v27, %v6415_v25  ;;  %v14777_v46 = vsel %vm1188_vm0, %v17758_v21, %v14760_v57  ;;  %v7386_v27 = vsel %vm17359_vm1, %v7242_v42, 0.0  ;;  %v14829_v25 = vsel %vm1188_vm0, %v14295_v7, %v17770_v52  ;;  %v17775_v7 = vld [vmem:[#allocation71_spill] sm:$0xff]  ;;  %v17781_v42 = vld [vmem:[#allocation65_spill] sm:$0xff]  ;;  %v17786_v52 = vld [vmem:[#allocation70_spill] sm:$0xff] }
0x1361   : > { %17759 = vst [vmem:[#allocation43_spill] sm:$0xff] %v14777_v46  ;;  %v7214_v5 = vmul.f32 %v14685_v50, %v14777_v46  ;;  %17771 = vst [vmem:[#allocation102_spill] sm:$0xff] %v14829_v25  ;;  %v7243_v21 = vmul.f32 %v14685_v50, %v14829_v25 }
0x1362   : > { %v14797_v40 = vadd.f32 %v6463_v34, %v6455_v24 }
0x1363   : > { %v7302_v51 = vsel %vm17359_vm1, %v7214_v5, 0.0  ;;  %v7389_v5 = vsel %vm17359_vm1, %v7243_v21, 0.0 }
0x136a   : > { %7294 = vadd.xlane.f32.xlu0 %v7293_v41  ;;  %v7314_v41 = vsel %vm17359_vm1, %v7218_v28, 0.0 }
0x136e   : > { %7318 = vadd.xlane.f32.xlu0 %v7317_v56  ;;  %v7362_v56 = vsel %vm17359_vm1, %v7234_v32, 0.0 }
0x1372   : > { %7297 = vadd.xlane.f32.xlu0 %v7296_v2  ;;  %v14787_v2 = vsel %vm1188_vm0, %v17760_v16, %v14304_v1  ;;  %v17764_v1 = vld [vmem:[#allocation46_spill] sm:$0xff] }
0x1373   : > { %17761 = vst [vmem:[#allocation45_spill] sm:$0xff] %v14787_v2  ;;  %v14805_v28 = vsel %vm1188_vm0, %v17764_v1, %v14316_v11  ;;  %v17768_v11 = vld [vmem:[#allocation60_spill] sm:$0xff] }
0x1374   : > { %7291 = vadd.xlane.f32.xlu1 %v7290_v14  ;;  %v7220_v14 = vmul.f32 %v14685_v50, %v14787_v2  ;;  %17765 = vst [vmem:[#allocation97_spill] sm:$0xff] %v14805_v28  ;;  %v7221_v15 = vmul.f32 %v14685_v50, %v14805_v28  ;;  %v14821_v53 = vsel %vm1188_vm0, %v17768_v11, %v13907_v62  ;;  %v17772_v62 = vld [vmem:[#allocation62_spill] sm:$0xff] }
0x1375   : > { %17769 = vst [vmem:[#allocation100_spill] sm:$0xff] %v14821_v53  ;;  %v14837_v38 = vsel %vm1188_vm0, %v17772_v62, %v13921_v12  ;;  %v17777_v12 = vld [vmem:[#allocation86_spill] sm:$0xff] }
0x1376   : > { %7342 = vadd.xlane.f32.xlu0 %v7341_v20  ;;  %v14813_v20 = vsel %vm1188_vm0, %v17766_v3, %v14797_v40  ;;  %v7320_v32 = vsel %vm17359_vm1, %v7220_v14, 0.0  ;;  %v7323_v33 = vsel %vm17359_vm1, %v7221_v15, 0.0  ;;  %17773 = vst [vmem:[#allocation104_spill] sm:$0xff] %v14837_v38  ;;  %v7229_v16 = vmul.f32 %v14685_v50, %v14837_v38  ;;  %v17782_v3 = vld [vmem:[#allocation73_spill] sm:$0xff]  ;;  %v17784_v11 = vld [vmem:[#allocation42_spill] sm:$0xff] }
0x1377   : > { %17767 = vst [vmem:[#allocation98_spill] sm:$0xff] %v14813_v20 }
0x1378   : > { %7315 = vadd.xlane.f32.xlu1 %v7314_v41  ;;  %v7215_v41 = vmul.f32 %v14685_v50, %v14813_v20  ;;  %v7347_v1 = vsel %vm17359_vm1, %v7229_v16, 0.0  ;;  %v17791_v16 = vld [vmem:[#allocation82_spill] sm:$0xff] }
0x137a   : > { %7363 = vadd.xlane.f32.xlu0 %v7362_v56  ;;  %v7228_v56 = vmul.f32 %v14685_v50, %v14821_v53  ;;  %v7305_v24 = vsel %vm17359_vm1, %v7215_v41, 0.0 }
0x137c   : > { %7339 = vadd.xlane.f32.xlu1 %v7338_v17  ;;  %v17774_v17 = vld [vmem:[#allocation58_spill] sm:$0xff]  ;;  %v7344_v34 = vsel %vm17359_vm1, %v7228_v56, 0.0 }
0x137d   : > { %v14845_v36 = vsel %vm1188_vm0, %v17775_v7, %v17774_v17  ;;  %v6439_v17 = vpop.permute.xlu1 %6438 }
0x137e   : > { %7366 = vadd.xlane.f32.xlu0 %v7365_v22  ;;  %17776 = vst [vmem:[#allocation106_spill] sm:$0xff] %v14845_v36  ;;  %v14853_v22 = vsel %vm1188_vm0, %v17777_v12, %v14328_v13  ;;  %v7236_v55 = vmul.f32 %v14685_v50, %v14845_v36  ;;  %v14869_v13 = vsel %vm1188_vm0, %v17782_v3, %v17781_v42 }
0x137f   : > { %17778 = vst [vmem:[#allocation108_spill] sm:$0xff] %v14853_v22  ;;  %17783 = vst [vmem:[#allocation110_spill] sm:$0xff] %v14869_v13  ;;  %v7237_v41 = vmul.f32 %v14685_v50, %v14869_v13 }
0x1380   : > { %7300 = vadd.xlane.f32.xlu1 %v7299_v18  ;;  %v17779_v18 = vld [vmem:[#allocation90_spill] sm:$0xff] }
0x1381   : > { %v14861_v14 = vsel %vm1188_vm0, %v17779_v18, %v14340_v45  ;;  %v14877_v45 = vsel %vm1188_vm0, %v14307_v35, %v17784_v11  ;;  %v17788_v35 = vld [vmem:[#allocation77_spill] sm:$0xff]  ;;  %v7371_v7 = vsel %vm17359_vm1, %v7237_v41, 0.0  ;;  %v17794_v18 = vld [vmem:[#allocation68_spill] sm:$0xff]  ;;  %v17798_v11 = vld [vmem:[#allocation63_spill] sm:$0xff] }
0x1382   : > { %7303 = vadd.xlane.f32.xlu0 %v7302_v51  ;;  %17780 = vst [vmem:[#allocation16_spill] sm:$0xff] %v14861_v14  ;;  %v7222_v51 = vmul.f32 %v14685_v50, %v14853_v22  ;;  %v7223_v15 = vmul.f32 %v14685_v50, %v14861_v14  ;;  %17785 = vst [vmem:[#allocation18_spill] sm:$0xff] %v14877_v45  ;;  %v7244_v62 = vmul.f32 %v14685_v50, %v14877_v45 }
0x1384   : > { %7321 = vadd.xlane.f32.xlu1 %v7320_v32  ;;  %v7368_v32 = vsel %vm17359_vm1, %v7236_v55, 0.0  ;;  %v7329_v56 = vsel %vm17359_vm1, %v7223_v15, 0.0 }
0x1386   : > { %7387 = vadd.xlane.f32.xlu0 %v7386_v27  ;;  %v7326_v27 = vsel %vm17359_vm1, %v7222_v51, 0.0 }
0x1388   : > { %7324 = vadd.xlane.f32.xlu1 %v7323_v33  ;;  %v14885_v33 = vsel %vm1188_vm0, %v17786_v52, %v13935_v19  ;;  %v17792_v19 = vld [vmem:[#allocation57_spill] sm:$0xff]  ;;  %v6441_v52 = vpop.permute.xlu1 %6440 }
0x1389   : > { %17787 = vst [vmem:[#allocation20_spill] sm:$0xff] %v14885_v33  ;;  %v14901_v12 = vsel %vm1188_vm0, %v17792_v19, %v17791_v16 }
0x138a   : > { %7306 = vadd.xlane.f32.xlu0 %v7305_v24  ;;  %v17789_v24 = vld [vmem:[#allocation74_spill] sm:$0xff]  ;;  %17793 = vst [vmem:[#allocation23_spill] sm:$0xff] %v14901_v12  ;;  %v7245_v3 = vmul.f32 %v14685_v50, %v14901_v12 }
0x138b   : > { %v14893_v21 = vsel %vm1188_vm0, %v17789_v24, %v17788_v35  ;;  %v6417_v24 = vsub.f32 1.0, %v14576_v8 }
0x138c   : > { %7345 = vadd.xlane.f32.xlu1 %v7344_v34  ;;  %17790 = vst [vmem:[#allocation21_spill] sm:$0xff] %v14893_v21  ;;  %v7230_v34 = vmul.f32 %v14685_v50, %v14885_v33  ;;  %v7231_v55 = vmul.f32 %v14685_v50, %v14893_v21  ;;  %v7395_v19 = vsel %vm17359_vm1, %v7245_v3, 0.0  ;;  %v17808_v3 = vld [vmem:[#allocation59_spill] sm:$0xff] }
0x138e   : > { %7390 = vadd.xlane.f32.xlu0 %v7389_v5  ;;  %v7392_v5 = vsel %vm17359_vm1, %v7244_v62, 0.0  ;;  %v7350_v42 = vsel %vm17359_vm1, %v7230_v34, 0.0  ;;  %v17802_v34 = vld [vmem:[#allocation31_spill] sm:$0xff] }
0x1390   : > { %7348 = vadd.xlane.f32.xlu1 %v7347_v1  ;;  %v17795_v1 = vld [vmem:[#allocation75_spill] sm:$0xff] }
0x1391   : > { %v14909_v51 = vsel %vm1188_vm0, %v17795_v1, %v17794_v18  ;;  %v17804_v18 = vld [vmem:[#allocation72_spill] sm:$0xff]  ;;  %v17805_v1 = vld [vmem:[#allocation49_spill] sm:$0xff] }
0x1392   : > { %7369 = vadd.xlane.f32.xlu0 %v7368_v32  ;;  %17796 = vst [vmem:[#allocation25_spill] sm:$0xff] %v14909_v51  ;;  %v17797_v32 = vld [vmem:[#allocation85_spill] sm:$0xff]  ;;  %v7238_v62 = vmul.f32 %v14685_v50, %v14909_v51 }
0x1393   : > { %v6416_v15 = vsub.f32 1.0, %v17797_v32 }
0x1394   : > { %7327 = vadd.xlane.f32.xlu1 %v7326_v27  ;;  %v17799_v27 = vld [vmem:[#allocation94_spill] sm:$0xff] }
0x1395   : > { %v14918_v41 = vsel %vm1188_vm0, %v17799_v27, %v17798_v11  ;;  %v6456_v35 = vmul.f32 %v6439_v17, %v6416_v15  ;;  %v6464_v17 = vmul.f32 %v17797_v32, %v17798_v11  ;;  %v7374_v15 = vsel %vm17359_vm1, %v7238_v62, 0.0  ;;  %v17810_v62 = vld [vmem:[#allocation79_spill] sm:$0xff] }
0x1396   : > { %7330 = vadd.xlane.f32.xlu0 %v7329_v56  ;;  %17800 = vst [vmem:[#allocation28_spill] sm:$0xff] %v14918_v41  ;;  %v7353_v56 = vsel %vm17359_vm1, %v7231_v55, 0.0  ;;  %v14935_v55 = vsel %vm1188_vm0, %v17805_v1, %v17804_v18 }
0x1397   : > { %17806 = vst [vmem:[#allocation107_spill] sm:$0xff] %v14935_v55  ;;  %v7239_v11 = vmul.f32 %v14685_v50, %v14935_v55 }
0x1398   : > { %7372 = vadd.xlane.f32.xlu1 %v7371_v7  ;;  %v17801_v7 = vld [vmem:[#allocation81_spill] sm:$0xff] }
0x1399   : > { %v14927_v16 = vsel %vm1188_vm0, %v17802_v34, %v17801_v7  ;;  %v6465_v18 = vmul.f32 %v14576_v8, %v17801_v7 }
0x139a   : > { %7393 = vadd.xlane.f32.xlu0 %v7392_v5  ;;  %17803 = vst [vmem:[#allocation30_spill] sm:$0xff] %v14927_v16  ;;  %v7224_v5 = vmul.f32 %v14685_v50, %v14918_v41  ;;  %v7225_v27 = vmul.f32 %v14685_v50, %v14927_v16  ;;  %v14947_v41 = vadd.f32 %v6464_v17, %v6456_v35 }
0x139c   : > { %7351 = vadd.xlane.f32.xlu1 %v7350_v42  ;;  %v6457_v42 = vmul.f32 %v6441_v52, %v6417_v24  ;;  %v7332_v32 = vsel %vm17359_vm1, %v7224_v5, 0.0  ;;  %v17811_v24 = vld [vmem:[#allocation78_spill] sm:$0xff]  ;;  %v7335_v35 = vsel %vm17359_vm1, %v7225_v27, 0.0  ;;  %v17815_v27 = vmov 0.0  }
0x139d   : > { %v17813_v5 = vld [vmem:[#allocation142_spill] sm:$0xff] }
0x139e   : > { %7354 = vadd.xlane.f32.xlu0 %v7353_v56  ;;  %v17807_v56 = vld [vmem:[#allocation84_spill] sm:$0xff]  ;;  %v14954_v52 = vadd.f32 %v6465_v18, %v6457_v42  ;;  %v14969_v17 = vsel %vm1188_vm0, %v17813_v5, %v14947_v41  ;;  %v7377_v42 = vsel %vm17359_vm1, %v7239_v11, 0.0 }
0x139f   : > { %v14945_v34 = vsel %vm1188_vm0, %v17808_v3, %v17807_v56  ;;  %17814 = vst [vmem:[#allocation103_spill] sm:$0xff] %v14969_v17  ;;  %v17816_v56 = vld [vmem:[#allocation144_spill] sm:$0xff] }
0x13a0   : > { %7396 = vadd.xlane.f32.xlu1 %v7395_v19  ;;  %17809 = vst [vmem:[#allocation39_spill] sm:$0xff] %v14945_v34  ;;  %v14959_v19 = vsel %vm1188_vm0, %v17811_v24, %v17810_v62  ;;  %v7246_v8 = vmul.f32 %v14685_v50, %v14945_v34  ;;  %v14979_v3 = vsel %vm1188_vm0, %v17816_v56, %v14954_v52  ;;  %v17818_v24 = vld [vmem:[#allocation105_spill] sm:$0xff] }
0x13a1   : > { %17812 = vst [vmem:[#allocation111_spill] sm:$0xff] %v14959_v19  ;;  %17817 = vst [vmem:[#allocation56_spill] sm:$0xff] %v14979_v3  ;;  %v7216_v62 = vmul.f32 %v14685_v50, %v14969_v17  ;;  %v7217_v5 = vmul.f32 %v14685_v50, %v14979_v3  ;;  %v17829_v3 = vld [vmem:[#allocation41_spill] sm:$0xff] }
0x13a2   : > { %7375 = vadd.xlane.f32.xlu0 %v7374_v15  ;;  %v7232_v15 = vmul.f32 %v14685_v50, %v14959_v19 }
0x13a4   : > { %7333 = vadd.xlane.f32.xlu1 %v7332_v32  ;;  %v7398_v32 = vsel %vm17359_vm1, %v7246_v8, 0.0 }
0x13a5   : > { %v6483_v1 = vpop.permute.xlu0 %6482 }
0x13a6   : > { %v6506_v7 = vsel %vm1188_vm0, %v6483_v1, %v14698_v63  ;;  %7336 = vadd.xlane.f32.xlu0 %v7335_v35 }
0x13a7   : > { %9412 = vmatmul.mubr.msk.f32.vlgmr.msra.gmra.mrb[128].mxu0 %vm17359_vm1, %v6506_v7  ;;  %v7356_v7 = vsel %vm17359_vm1, %v7232_v15, 0.0 }
0x13a8   : > { %7378 = vadd.xlane.f32.xlu1 %v7377_v42  ;;  %6608 = vmatprep.mubr.f32.mxu0 %v17815_v27  ;;  %v17820_v42 = vld [vmem:[#allocation101_spill] sm:$0xff] }
0x13a9   : > { %v6485_v18 = vpop.permute.xlu0 %6484  ;;  %v14996_v8 = vsel %vm1188_vm0, %v6483_v1, %v17820_v42 }
0x13aa   : > { %v14986_v11 = vsel %vm1188_vm0, %v6485_v18, %v17818_v24  ;;  %7399 = vadd.xlane.f32.xlu0 %v7398_v32  ;;  %v6507_v35 = vsel %vm1188_vm0, %v6485_v18, %v14671_v47  ;;  %17821 = vst [vmem:[#allocation50_spill] sm:$0xff] %v14996_v8  ;;  %v7308_v32 = vsel %vm17359_vm1, %v7216_v62, 0.0  ;;  %v7311_v24 = vsel %vm17359_vm1, %v7217_v5, 0.0 }
0x13ab   : > { %17819 = vst [vmem:[#allocation35_spill] sm:$0xff] %v14986_v11  ;;  %9413 = vmatmul.mubr.msk.f32.gmra.mrb[130].mxu0 %vm17359_vm1, %v6507_v35  ;;  %v7251_v18 = vmul.f32 %v14685_v50, %v14986_v11  ;;  %v7250_v1 = vmul.f32 %v14685_v50, %v14996_v8  ;;  %v17822_v35 = vld [vmem:[#allocation109_spill] sm:$0xff] }
0x13ac   : > { %7357 = vadd.xlane.f32.xlu1 %v7356_v7  ;;  %6614 = vmatprep.mubr.f32.mxu0 %v17815_v27 }
0x13ad   : > { %v6487_v56 = vpop.permute.xlu0 %6486  ;;  %v7413_v42 = vsel %vm17359_vm1, %v7251_v18, 0.0 }
0x13ae   : > { %7309 = vadd.xlane.f32.xlu0 %v7308_v32  ;;  %v6508_v15 = vsel %vm1188_vm0, %v6487_v56, %v14691_v49  ;;  %v15010_v7 = vsel %vm1188_vm0, %v6487_v56, %v17822_v35  ;;  %v17824_v32 = vld [vmem:[#allocation136_spill] sm:$0xff] }
0x13af   : > { %9414 = vmatmul.mubr.msk.f32.gmra.mrb[132].mxu0 %vm17359_vm1, %v6508_v15  ;;  %17823 = vst [vmem:[#allocation66_spill] sm:$0xff] %v15010_v7  ;;  %v7410_v15 = vsel %vm17359_vm1, %v7250_v1, 0.0 }
0x13b0   : > { %7312 = vadd.xlane.f32.xlu1 %v7311_v24  ;;  %6620 = vmatprep.mubr.f32.mxu0 %v17815_v27  ;;  %v7252_v24 = vmul.f32 %v14685_v50, %v15010_v7 }
0x13b1   : > { %v6489_v62 = vpop.permute.xlu0 %6488 }
0x13b2   : > { %v15016_v16 = vsel %vm1188_vm0, %v6489_v62, %v17824_v32  ;;  %7414 = vadd.xlane.f32.xlu0 %v7413_v42  ;;  %v6509_v5 = vsel %vm1188_vm0, %v6489_v62, %v14743_v9  ;;  %v7416_v1 = vsel %vm17359_vm1, %v7252_v24, 0.0 }
0x13b3   : > { %17825 = vst [vmem:[#allocation52_spill] sm:$0xff] %v15016_v16  ;;  %9415 = vmatmul.mubr.msk.f32.gmra.mrb[134].mxu0 %vm17359_vm1, %v6509_v5  ;;  %v7253_v56 = vmul.f32 %v14685_v50, %v15016_v16 }
0x13b4   : > { %7411 = vadd.xlane.f32.xlu1 %v7410_v15  ;;  %6626 = vmatprep.mubr.f32.mxu0 %v17815_v27 }
0x13b5   : > { %v15027_v18 = vpop.permute.xlu0 %6490  ;;  %v7419_v35 = vsel %vm17359_vm1, %v7253_v56, 0.0 }
0x13b6   : > { %7420 = vadd.xlane.f32.xlu0 %v7419_v35  ;;  %v6510_v62 = vsel %vm1188_vm0, %v15027_v18, %v14760_v57 }
0x13b7   : > { %9416 = vmatmul.mubr.msk.f32.gmra.mrb[136].mxu0 %vm17359_vm1, %v6510_v62  ;;  %v17827_v62 = vld [vmem:[#allocation27_spill] sm:$0xff] }
0x13b8   : > { %7417 = vadd.xlane.f32.xlu1 %v7416_v1  ;;  %6632 = vmatprep.mubr.f32.mxu0 %v17815_v27 }
0x13b9   : > { %v15036_v50 = vpop.permute.xlu0 %6492 }
0x13ba   : > { %v6511_v42 = vsel %vm1188_vm0, %v15036_v50, %v14797_v40 }
0x13bb   : > { %9417 = vmatmul.mubr.msk.f32.gmra.mrb[138].mxu0 %vm17359_vm1, %v6511_v42 }
0x13bc   : > { %6638 = vmatprep.mubr.f32.mxu0 %v17815_v27 }
0x13bd   : > { %v15043_v32 = vpop.permute.xlu0 %6494 }
0x13be   : > { %v6512_v5 = vsel %vm1188_vm0, %v15043_v32, %v14947_v41 }
0x13bf   : > { %9418 = vmatmul.mubr.msk.f32.gmra.mrb[140].mxu0 %vm17359_vm1, %v6512_v5 }
0x13c0   : > { %6644 = vmatprep.mubr.f32.mxu0 %v17815_v27 }
0x13c2   : > { %v15050_v15 = vpop.permute.xlu1 %6496 }
0x13c3   : > { %v6513_v56 = vsel %vm1188_vm0, %v15050_v15, %v14954_v52 }
0x13c4   : > { %9419 = vmatmul.mubr.msk.f32.gmra.mrb[142].mxu0 %vm17359_vm1, %v6513_v56 }
0x13f7   : > { %v15056_v24 = vpop.xlane.xlu0 %7294 }
0x13f8   : > { %17826 = vst [vmem:[#allocation54_spill] sm:$0xff] %v15056_v24 }
0x13fb   : > { %v15067_v5 = vpop.xlane.xlu0 %7318 }
0x13fc   : > { %17828 = vst [vmem:[#allocation69_spill] sm:$0xff] %v15067_v5 }
0x13ff   : > { %v15085_v20 = vpop.xlane.xlu0 %7297 }
0x1400   : > { %17830 = vst [vmem:[#allocation137_spill] sm:$0xff] %v15085_v20 }
0x1401   : > { %v15097_v33 = vpop.xlane.xlu1 %7291 }
0x1402   : > { %17831 = vst [vmem:[#allocation139_spill] sm:$0xff] %v15097_v33 }
0x147a   : > { %v15058_v35 = vpop.f32.mrb[128].mxu0 }
0x147b   : > { %v6723_v1 = vadd.f32 %v15058_v35, %v17827_v62  ;;  %v15062_v42 = vpop.f32.mrb[129].mxu0 }
0x147c   : > { %v6939_v19 = vadd.f32 %v15062_v42, %v17829_v3 }
0x147d   : > { %6739 = vrot.lane.b32.xlu0 %v6723_v1, %s10844_s0 }
0x147e   : > { %v15065_v27 = vpop.f32.mrb[130].mxu0 }
0x147f   : > { %v6724_v56 = vadd.f32 %v15065_v27, %v17827_v62  ;;  %v15073_v17 = vpop.f32.mrb[131].mxu0 }
0x1480   : > { %v6940_v1 = vadd.f32 %v15073_v17, %v17829_v3 }
0x1481   : > { %6955 = vrot.lane.b32.xlu0 %v6939_v19, %s10844_s0  ;;  %6741 = vrot.lane.b32.xlu1 %v6724_v56, %s10844_s0 }
0x1482   : > { %v15077_v21 = vpop.f32.mrb[132].mxu0 }
0x1483   : > { %v6725_v55 = vadd.f32 %v15077_v21, %v17827_v62  ;;  %v15083_v14 = vpop.f32.mrb[133].mxu0 }
0x1484   : > { %v6941_v19 = vadd.f32 %v15083_v14, %v17829_v3 }
0x1485   : > { %6743 = vrot.lane.b32.xlu0 %v6725_v55, %s10844_s0  ;;  %6957 = vrot.lane.b32.xlu1 %v6940_v1, %s10844_s0  ;;  %v15103_v55 = vpop.xlane.xlu0 %7342 }
0x1486   : > { %v15089_v34 = vpop.f32.mrb[134].mxu0  ;;  %17832 = vst [vmem:[#allocation44_spill] sm:$0xff] %v15103_v55 }
0x1487   : > { %v6726_v56 = vadd.f32 %v15089_v34, %v17827_v62  ;;  %v15095_v51 = vpop.f32.mrb[135].mxu0 }
0x1488   : > { %v6942_v1 = vadd.f32 %v15095_v51, %v17829_v3 }
0x1489   : > { %6959 = vrot.lane.b32.xlu0 %v6941_v19, %s10844_s0  ;;  %6745 = vrot.lane.b32.xlu1 %v6726_v56, %s10844_s0  ;;  %v15115_v19 = vpop.xlane.xlu1 %7315  ;;  %v15123_v28 = vpop.xlane.xlu0 %7363 }
0x148a   : > { %v15101_v46 = vpop.f32.mrb[136].mxu0  ;;  %17833 = vst [vmem:[#allocation33_spill] sm:$0xff] %v15115_v19  ;;  %17834 = vst [vmem:[#allocation46_spill] sm:$0xff] %v15123_v28 }
0x148b   : > { %v6727_v22 = vadd.f32 %v15101_v46, %v17827_v62  ;;  %v15109_v16 = vpop.f32.mrb[137].mxu0 }
0x148c   : > { %v6943_v56 = vadd.f32 %v15109_v16, %v17829_v3 }
0x148d   : > { %6747 = vrot.lane.b32.xlu0 %v6727_v22, %s10844_s0  ;;  %6961 = vrot.lane.b32.xlu1 %v6942_v1, %s10844_s0  ;;  %v15135_v7 = vpop.xlane.xlu1 %7339  ;;  %v15139_v36 = vpop.xlane.xlu0 %7366 }
0x148e   : > { %v15113_v12 = vpop.f32.mrb[138].mxu0  ;;  %17835 = vst [vmem:[#allocation140_spill] sm:$0xff] %v15135_v7  ;;  %17836 = vst [vmem:[#allocation60_spill] sm:$0xff] %v15139_v36 }
0x148f   : > { %v6728_v13 = vadd.f32 %v15113_v12, %v17827_v62  ;;  %v15121_v38 = vpop.f32.mrb[139].mxu0 }
0x1490   : > { %v6944_v1 = vadd.f32 %v15121_v38, %v17829_v3 }
0x1491   : > { %6963 = vrot.lane.b32.xlu0 %v6943_v56, %s10844_s0  ;;  %6749 = vrot.lane.b32.xlu1 %v6728_v13, %s10844_s0  ;;  %v15151_v2 = vpop.xlane.xlu1 %7300 }
0x1492   : > { %v15127_v22 = vpop.f32.mrb[140].mxu0  ;;  %17837 = vst [vmem:[#allocation37_spill] sm:$0xff] %v15151_v2 }
0x1493   : > { %v6729_v44 = vadd.f32 %v15127_v22, %v17827_v62  ;;  %v15133_v45 = vpop.f32.mrb[141].mxu0 }
0x1494   : > { %v6945_v13 = vadd.f32 %v15133_v45, %v17829_v3 }
0x1495   : > { %6751 = vrot.lane.b32.xlu0 %v6729_v44, %s10844_s0  ;;  %6965 = vrot.lane.b32.xlu1 %v6944_v1, %s10844_s0  ;;  %v15155_v1 = vpop.xlane.xlu0 %7303  ;;  %v15158_v11 = vpop.xlane.xlu1 %7321 }
0x1496   : > { %17838 = vst [vmem:[#allocation62_spill] sm:$0xff] %v15155_v1  ;;  %17839 = vst [vmem:[#allocation58_spill] sm:$0xff] %v15158_v11 }
0x1497   : > { %v15143_v56 = vpop.f32.mrb[142].mxu0 }
0x1498   : > { %v6730_v53 = vadd.f32 %v15143_v56, %v17827_v62  ;;  %v15147_v23 = vpop.f32.mrb[143].mxu0 }
0x1499   : > { %6967 = vrot.lane.b32.xlu0 %v6945_v13, %s10844_s0  ;;  %v6946_v44 = vadd.f32 %v15147_v23, %v17829_v3  ;;  %v15160_v25 = vpop.xlane.xlu0 %7387  ;;  %v15162_v62 = vpop.xlane.xlu1 %7324 }
0x149a   : > { %6753 = vrot.lane.b32.xlu1 %v6730_v53, %s10844_s0  ;;  %17840 = vst [vmem:[#allocation71_spill] sm:$0xff] %v15160_v25  ;;  %17841 = vst [vmem:[#allocation86_spill] sm:$0xff] %v15162_v62 }
0x149d   : > { %v15164_v58 = vpop.xlane.xlu0 %7306  ;;  %v15166_v13 = vpop.xlane.xlu1 %7345 }
0x149e   : > { %6969 = vrot.lane.b32.xlu1 %v6946_v44, %s10844_s0  ;;  %17842 = vst [vmem:[#allocation90_spill] sm:$0xff] %v15164_v58  ;;  %17843 = vst [vmem:[#allocation65_spill] sm:$0xff] %v15166_v13 }
0x14a1   : > { %v15168_v53 = vpop.xlane.xlu0 %7390  ;;  %v15170_v48 = vpop.xlane.xlu1 %7348 }
0x14a2   : > { %17844 = vst [vmem:[#allocation73_spill] sm:$0xff] %v15168_v53  ;;  %17845 = vst [vmem:[#allocation42_spill] sm:$0xff] %v15170_v48  ;;  %v17855_v53 = vld [vmem:[#allocation5_spill] sm:$0xff]  ;;  %v17856_v48 = vld [vmem:[#allocation6_spill] sm:$0xff] }
0x14a3   : > { %v15192_v13 = vadd.f32 %v17856_v48, %v17855_v53  ;;  %v15208_v25 = vadd.f32 %v17860_v10, %v17855_v53 }
0x14a5   : > { %v15172_v6 = vpop.xlane.xlu0 %7369  ;;  %v15174_v3 = vpop.xlane.xlu1 %7327 }
0x14a6   : > { %17846 = vst [vmem:[#allocation70_spill] sm:$0xff] %v15172_v6  ;;  %17847 = vst [vmem:[#allocation77_spill] sm:$0xff] %v15174_v3  ;;  %v6667_v3 = vadd.f32 %v15058_v35, %v15188_v39 }
0x14a8   : > { %v9420_v48 = vmul.f32 -1.442695, %v6667_v3  ;;  %v17865_v3 = vld [vmem:[#allocation115_spill] sm:$0xff] }
0x14a9   : > { %v15176_v61 = vpop.xlane.xlu0 %7330  ;;  %v15178_v44 = vpop.xlane.xlu1 %7372  ;;  %v15228_v36 = vadd.f32 %v17865_v3, %v17853_v43 }
0x14aa   : > { %17848 = vst [vmem:[#allocation74_spill] sm:$0xff] %v15176_v61  ;;  %17849 = vst [vmem:[#allocation82_spill] sm:$0xff] %v15178_v44  ;;  %10545 = vpow2.f32 %v9420_v48 }
0x14ad   : > { %v15180_v26 = vpop.xlane.xlu0 %7393  ;;  %v15182_v8 = vpop.xlane.xlu1 %7351 }
0x14ae   : > { %17850 = vst [vmem:[#allocation57_spill] sm:$0xff] %v15180_v26  ;;  %17851 = vst [vmem:[#allocation68_spill] sm:$0xff] %v15182_v8  ;;  %v6883_v8 = vadd.f32 %v15062_v42, %v15192_v13  ;;  %v17859_v26 = vld [vmem:[#allocation113_spill] sm:$0xff]  ;;  %v17862_v42 = vld [vmem:[#allocation114_spill] sm:$0xff] }
0x14af   : > { %v15204_v62 = vadd.f32 %v17859_v26, %v17853_v43  ;;  %v15218_v1 = vadd.f32 %v17862_v42, %v17853_v43  ;;  %v17863_v26 = vld [vmem:[#allocation8_spill] sm:$0xff] }
0x14b0   : > { %v9428_v35 = vmul.f32 -1.442695, %v6883_v8  ;;  %v15222_v2 = vadd.f32 %v17863_v26, %v17855_v53  ;;  %v6670_v26 = vadd.f32 %v15089_v34, %v15228_v36 }
0x14b1   : > { %v15184_v0 = vpop.xlane.xlu0 %7354  ;;  %v15194_v6 = vpop.xlane.xlu1 %7396  ;;  %v6669_v8 = vadd.f32 %v15077_v21, %v15218_v1 }
0x14b2   : > { %17852 = vst [vmem:[#allocation75_spill] sm:$0xff] %v15184_v0  ;;  %17857 = vst [vmem:[#allocation85_spill] sm:$0xff] %v15194_v6  ;;  %v6668_v6 = vadd.f32 %v15065_v27, %v15204_v62  ;;  %10547 = vpow2.f32 %v9428_v35  ;;  %v6885_v42 = vadd.f32 %v15083_v14, %v15222_v2  ;;  %v9423_v14 = vmul.f32 -1.442695, %v6670_v26 }
0x14b3   : > { %v9422_v48 = vmul.f32 -1.442695, %v6669_v8 }
0x14b4   : > { %v9421_v27 = vmul.f32 -1.442695, %v6668_v6  ;;  %v17868_v6 = vld [vmem:[#allocation116_spill] sm:$0xff] }
0x14b5   : > { %v15198_v44 = vpop.xlane.xlu0 %7375  ;;  %v15212_v11 = vpop.xlane.xlu1 %7333  ;;  %v15244_v3 = vadd.f32 %v17868_v6, %v17853_v43 }
0x14b6   : > { %17858 = vst [vmem:[#allocation63_spill] sm:$0xff] %v15198_v44  ;;  %17861 = vst [vmem:[#allocation94_spill] sm:$0xff] %v15212_v11  ;;  %v6884_v44 = vadd.f32 %v15073_v17, %v15208_v25  ;;  %10549 = vpow2.f32 %v9421_v27  ;;  %v10546_v6 = vpop.eup %10545 }
0x14b7   : > { %v6671_v35 = vadd.f32 %v15101_v46, %v15244_v3 }
0x14b8   : > { %v9429_v17 = vmul.f32 -1.442695, %v6884_v44  ;;  %v9430_v44 = vmul.f32 -1.442695, %v6885_v42 }
0x14b9   : > { %v15224_v10 = vpop.xlane.xlu0 %7336  ;;  %v15236_v11 = vpop.xlane.xlu1 %7378  ;;  %v9424_v28 = vmul.f32 -1.442695, %v6671_v35 }
0x14ba   : > { %17864 = vst [vmem:[#allocation81_spill] sm:$0xff] %v15224_v10  ;;  %17866 = vst [vmem:[#allocation31_spill] sm:$0xff] %v15236_v11  ;;  %v17867_v10 = vld [vmem:[#allocation9_spill] sm:$0xff]  ;;  %10551 = vpow2.f32 %v9429_v17 }
0x14bb   : > { %v15240_v7 = vadd.f32 %v17867_v10, %v17855_v53  ;;  %10553 = vpow2.f32 %v9422_v48  ;;  %v17870_v10 = vld [vmem:[#allocation10_spill] sm:$0xff] }
0x14bc   : > { %v15254_v27 = vadd.f32 %v17870_v10, %v17855_v53  ;;  %10555 = vpow2.f32 %v9430_v44  ;;  %v10548_v26 = vpop.eup %10547  ;;  %v17874_v10 = vld [vmem:[#allocation11_spill] sm:$0xff] }
0x14bd   : > { %v15246_v21 = vpop.xlane.xlu0 %7399  ;;  %v6886_v34 = vadd.f32 %v15095_v51, %v15240_v7  ;;  %v15256_v8 = vpop.xlane.xlu1 %7357  ;;  %10557 = vpow2.f32 %v9423_v14  ;;  %v15270_v44 = vadd.f32 %v17874_v10, %v17855_v53 }
0x14be   : > { %17869 = vst [vmem:[#allocation72_spill] sm:$0xff] %v15246_v21  ;;  %17871 = vst [vmem:[#allocation49_spill] sm:$0xff] %v15256_v8  ;;  %v17872_v21 = vld [vmem:[#allocation117_spill] sm:$0xff]  ;;  %v6887_v46 = vadd.f32 %v15109_v16, %v15254_v27  ;;  %v6699_v8 = vadd.f32 1.0, %v10546_v6 }
0x14bf   : > { %v15260_v17 = vadd.f32 %v17872_v21, %v17853_v43  ;;  %v9431_v42 = vmul.f32 -1.442695, %v6886_v34  ;;  %v17875_v21 = vld [vmem:[#allocation118_spill] sm:$0xff]  ;;  %v6915_v34 = vadd.f32 1.0, %v10548_v26  ;;  %v17878_v26 = vld [vmem:[#allocation12_spill] sm:$0xff] }
0x14c0   : > { %v10550_v19 = vpop.eup %10549  ;;  %v15274_v14 = vadd.f32 %v17875_v21, %v17853_v43  ;;  %v9432_v16 = vmul.f32 -1.442695, %v6887_v46  ;;  %v17879_v46 = vld [vmem:[#allocation119_spill] sm:$0xff] }
0x14c1   : > { %v15262_v51 = vpop.xlane.xlu0 %7309  ;;  %v6672_v48 = vadd.f32 %v15113_v12, %v15260_v17  ;;  %10559 = vpow2.f32 %v9431_v42  ;;  %v15276_v35 = vpop.xlane.xlu1 %7312  ;;  %v6888_v12 = vadd.f32 %v15121_v38, %v15270_v44  ;;  %v6700_v33 = vadd.f32 1.0, %v10550_v19 }
0x14c2   : > { %17873 = vst [vmem:[#allocation84_spill] sm:$0xff] %v15262_v51  ;;  %17876 = vst [vmem:[#allocation59_spill] sm:$0xff] %v15276_v35  ;;  %10561 = vpow2.f32 %v9424_v28  ;;  %v6673_v10 = vadd.f32 %v15127_v22, %v15274_v14  ;;  %v15286_v42 = vadd.f32 %v17878_v26, %v17855_v53  ;;  %v15290_v20 = vadd.f32 %v17879_v46, %v17853_v43  ;;  %v17881_v43 = vld [vmem:[#allocation14_spill] sm:$0xff] }
0x14c3   : > { %v9425_v55 = vmul.f32 -1.442695, %v6672_v48  ;;  %10563 = vrcp.f32 %v6699_v8  ;;  %v9433_v38 = vmul.f32 -1.442695, %v6888_v12  ;;  %v15300_v46 = vadd.f32 %v17881_v43, %v17855_v53 }
0x14c4   : > { %v10552_v51 = vpop.eup %10551  ;;  %10565 = vrcp.f32 %v6915_v34  ;;  %v9426_v22 = vmul.f32 -1.442695, %v6673_v10  ;;  %v6889_v19 = vadd.f32 %v15133_v45, %v15286_v42 }
0x14c5   : > { %v15282_v6 = vpop.xlane.xlu0 %7414  ;;  %v10554_v21 = vpop.eup %10553  ;;  %v6916_v35 = vadd.f32 1.0, %v10552_v51  ;;  %10567 = vpow2.f32 %v9432_v16  ;;  %v6674_v51 = vadd.f32 %v15143_v56, %v15290_v20 }
0x14c6   : > { %17877 = vst [vmem:[#allocation79_spill] sm:$0xff] %v15282_v6  ;;  %v10556_v28 = vpop.eup %10555  ;;  %10569 = vpow2.f32 %v9425_v55  ;;  %v15294_v8 = vpop.xlane.xlu1 %7411  ;;  %v6701_v26 = vadd.f32 1.0, %v10554_v21  ;;  %v9434_v45 = vmul.f32 -1.442695, %v6889_v19  ;;  %v6890_v21 = vadd.f32 %v15147_v23, %v15300_v46 }
0x14c7   : > { %v10558_v48 = vpop.eup %10557  ;;  %17880 = vst [vmem:[#allocation78_spill] sm:$0xff] %v15294_v8  ;;  %10571 = vrcp.f32 %v6700_v33  ;;  %v6917_v34 = vadd.f32 1.0, %v10556_v28  ;;  %v9427_v33 = vmul.f32 -1.442695, %v6674_v51 }
0x14c8   : > { %10573 = vrcp.f32 %v6916_v35  ;;  %v6702_v55 = vadd.f32 1.0, %v10558_v48  ;;  %v9435_v19 = vmul.f32 -1.442695, %v6890_v21 }
0x14c9   : > { %v15302_v16 = vpop.xlane.xlu0 %7420  ;;  %10575 = vpow2.f32 %v9433_v38 }
0x14ca   : > { %17882 = vst [vmem:[#allocation142_spill] sm:$0xff] %v15302_v16  ;;  %10577 = vpow2.f32 %v9426_v22  ;;  %v15308_v35 = vpop.xlane.xlu1 %7417 }
0x14cb   : > { %v10560_v12 = vpop.eup %10559  ;;  %10579 = vrcp.f32 %v6701_v26  ;;  %17883 = vst [vmem:[#allocation144_spill] sm:$0xff] %v15308_v35 }
0x14cc   : > { %v10562_v10 = vpop.eup %10561  ;;  %10581 = vrcp.f32 %v6917_v34  ;;  %v6918_v53 = vadd.f32 1.0, %v10560_v12 }
0x14cd   : > { %v15306_v56 = vpop.eup %10563  ;;  %10583 = vrcp.f32 %v6702_v55  ;;  %v6703_v38 = vadd.f32 1.0, %v10562_v10 }
0x14ce   : > { %v15310_v43 = vpop.eup %10565  ;;  %10585 = vpow2.f32 %v9434_v45 }
0x14cf   : > { %v10568_v22 = vpop.eup %10567  ;;  %10587 = vpow2.f32 %v9427_v33 }
0x14d0   : > { %v10570_v26 = vpop.eup %10569  ;;  %10589 = vrcp.f32 %v6918_v53  ;;  %v6919_v12 = vadd.f32 1.0, %v10568_v22 }
0x14d1   : > { %v15314_v23 = vpop.eup %10571  ;;  %10591 = vrcp.f32 %v6703_v38  ;;  %v6704_v16 = vadd.f32 1.0, %v10570_v26 }
0x14d2   : > { %v15316_v55 = vpop.eup %10573  ;;  %10593 = vpow2.f32 %v9435_v19 }
0x14d3   : > { %10595 = vrcp.f32 %v6919_v12 }
0x14d4   : > { %10597 = vrcp.f32 %v6704_v16 }
0x14ef   : > { %v6740_v28 = vpop.permute.xlu0 %6739 }
0x14f0   : > { %v6763_v48 = vmul.f32 %v15306_v56, %v6740_v28  ;;  %v10576_v28 = vpop.eup %10575 }
0x14f1   : > { %v10578_v33 = vpop.eup %10577  ;;  %v6920_v38 = vadd.f32 1.0, %v10576_v28 }
0x14f2   : > { %6779 = vrot.lane.b32.xlu0 %v6763_v48, %s10844_s0  ;;  %v15322_v21 = vpop.eup %10579  ;;  %v6705_v19 = vadd.f32 1.0, %v10578_v33 }
0x14f3   : > { %v6956_v51 = vpop.permute.xlu0 %6955  ;;  %v6742_v34 = vpop.permute.xlu1 %6741  ;;  %10599 = vrcp.f32 %v6920_v38 }
0x14f4   : > { %v6979_v10 = vmul.f32 %v15310_v43, %v6956_v51  ;;  %v6764_v45 = vmul.f32 %v15314_v23, %v6742_v34  ;;  %v15324_v35 = vpop.eup %10581  ;;  %10601 = vrcp.f32 %v6705_v19 }
0x14f5   : > { %v15328_v34 = vpop.eup %10583 }
0x14f6   : > { %6995 = vrot.lane.b32.xlu0 %v6979_v10, %s10844_s0  ;;  %6781 = vrot.lane.b32.xlu1 %v6764_v45, %s10844_s0  ;;  %v10586_v26 = vpop.eup %10585 }
0x14f7   : > { %v6744_v53 = vpop.permute.xlu0 %6743  ;;  %v6958_v48 = vpop.permute.xlu1 %6957 }
0x14f8   : > { %v6765_v22 = vmul.f32 %v15322_v21, %v6744_v53  ;;  %v6980_v51 = vmul.f32 %v15316_v55, %v6958_v48  ;;  %v10588_v10 = vpop.eup %10587  ;;  %v6921_v48 = vadd.f32 1.0, %v10586_v26 }
0x14f9   : > { %v15334_v53 = vpop.eup %10589  ;;  %v6706_v16 = vadd.f32 1.0, %v10588_v10 }
0x14fa   : > { %6783 = vrot.lane.b32.xlu0 %v6765_v22, %s10844_s0  ;;  %6997 = vrot.lane.b32.xlu1 %v6980_v51, %s10844_s0  ;;  %v15336_v6 = vpop.eup %10591  ;;  %10603 = vrcp.f32 %v6921_v48 }
0x14fb   : > { %v6960_v45 = vpop.permute.xlu0 %6959  ;;  %v6746_v8 = vpop.permute.xlu1 %6745  ;;  %10605 = vrcp.f32 %v6706_v16 }
0x14fc   : > { %v6981_v12 = vmul.f32 %v15324_v35, %v6960_v45  ;;  %v6766_v28 = vmul.f32 %v15328_v34, %v6746_v8  ;;  %v10594_v33 = vpop.eup %10593 }
0x14fd   : > { %v15342_v8 = vpop.eup %10595  ;;  %v6922_v19 = vadd.f32 1.0, %v10594_v33 }
0x14fe   : > { %6999 = vrot.lane.b32.xlu0 %v6981_v12, %s10844_s0  ;;  %6785 = vrot.lane.b32.xlu1 %v6766_v28, %s10844_s0  ;;  %v15346_v26 = vpop.eup %10597 }
0x14ff   : > { %v6748_v22 = vpop.permute.xlu0 %6747  ;;  %v6962_v51 = vpop.permute.xlu1 %6961  ;;  %10607 = vrcp.f32 %v6922_v19 }
0x1500   : > { %v6767_v38 = vmul.f32 %v15336_v6, %v6748_v22  ;;  %v6982_v45 = vmul.f32 %v15334_v53, %v6962_v51  ;;  %v15350_v22 = vpop.eup %10599 }
0x1501   : > { %v15354_v48 = vpop.eup %10601 }
0x1502   : > { %6787 = vrot.lane.b32.xlu0 %v6767_v38, %s10844_s0  ;;  %7001 = vrot.lane.b32.xlu1 %v6982_v45, %s10844_s0 }
0x1503   : > { %v6964_v10 = vpop.permute.xlu0 %6963  ;;  %v6750_v12 = vpop.permute.xlu1 %6749 }
0x1504   : > { %v6983_v28 = vmul.f32 %v15342_v8, %v6964_v10  ;;  %v6768_v5 = vmul.f32 %v15346_v26, %v6750_v12  ;;  %v15360_v45 = vpop.eup %10603 }
0x1505   : > { %v15362_v19 = vpop.eup %10605 }
0x1506   : > { %7003 = vrot.lane.b32.xlu0 %v6983_v28, %s10844_s0  ;;  %6789 = vrot.lane.b32.xlu1 %v6768_v5, %s10844_s0 }
0x1507   : > { %v6752_v16 = vpop.permute.xlu0 %6751  ;;  %v6966_v33 = vpop.permute.xlu1 %6965 }
0x1508   : > { %v6769_v51 = vmul.f32 %v15354_v48, %v6752_v16  ;;  %v6984_v38 = vmul.f32 %v15350_v22, %v6966_v33 }
0x1509   : > { %v15368_v16 = vpop.eup %10607 }
0x150a   : > { %6791 = vrot.lane.b32.xlu0 %v6769_v51, %s10844_s0  ;;  %7005 = vrot.lane.b32.xlu1 %v6984_v38, %s10844_s0 }
0x150b   : > { %v6968_v10 = vpop.permute.xlu0 %6967 }
0x150c   : > { %v6985_v12 = vmul.f32 %v15360_v45, %v6968_v10  ;;  %v6754_v5 = vpop.permute.xlu1 %6753 }
0x150d   : > { %v6770_v28 = vmul.f32 %v15362_v19, %v6754_v5 }
0x150e   : > { %7007 = vrot.lane.b32.xlu0 %v6985_v12, %s10844_s0 }
0x150f   : > { %6793 = vrot.lane.b32.xlu1 %v6770_v28, %s10844_s0 }
0x1510   : > { %v6970_v33 = vpop.permute.xlu1 %6969 }
0x1511   : > { %v6986_v51 = vmul.f32 %v15368_v16, %v6970_v33 }
0x1513   : > { %7009 = vrot.lane.b32.xlu1 %v6986_v51, %s10844_s0  ;;  %s15660_s0 = scalar_lea.vmem [#allocation4], %s11255_s28 }
0x1564   : > { %v6780_v38 = vpop.permute.xlu0 %6779 }
0x1565   : > { %v6803_v24 = vadd.f32 %v6780_v38, %v15188_v39 }
0x1567   : > { %10609 = vtanh.f32 %v6803_v24 }
0x1568   : > { %v6996_v11 = vpop.permute.xlu0 %6995  ;;  %v6782_v10 = vpop.permute.xlu1 %6781 }
0x1569   : > { %v7019_v0 = vadd.f32 %v6996_v11, %v15192_v13  ;;  %v6804_v5 = vadd.f32 %v6782_v10, %v15204_v62 }
0x156b   : > { %10611 = vtanh.f32 %v7019_v0 }
0x156c   : > { %10613 = vtanh.f32 %v6804_v5  ;;  %v6784_v12 = vpop.permute.xlu0 %6783  ;;  %v6998_v28 = vpop.permute.xlu1 %6997 }
0x156d   : > { %v6805_v61 = vadd.f32 %v6784_v12, %v15218_v1  ;;  %v7020_v33 = vadd.f32 %v6998_v28, %v15208_v25 }
0x156f   : > { %10615 = vtanh.f32 %v6805_v61 }
0x1570   : > { %10617 = vtanh.f32 %v7020_v33  ;;  %v7000_v51 = vpop.permute.xlu0 %6999  ;;  %v6786_v58 = vpop.permute.xlu1 %6785 }
0x1571   : > { %v10610_v39 = vpop.eup %10609  ;;  %v7021_v24 = vadd.f32 %v7000_v51, %v15222_v2  ;;  %v6806_v38 = vadd.f32 %v6786_v58, %v15228_v36 }
0x1572   : > { %6835 = vrot.lane.b32.xlu0 %v10610_v39, %s10845_s18 }
0x1573   : > { %10619 = vtanh.f32 %v7021_v24 }
0x1574   : > { %10621 = vtanh.f32 %v6806_v38  ;;  %v6788_v0 = vpop.permute.xlu0 %6787  ;;  %v7002_v11 = vpop.permute.xlu1 %7001 }
0x1575   : > { %v10612_v62 = vpop.eup %10611  ;;  %v6807_v1 = vadd.f32 %v6788_v0, %v15244_v3  ;;  %v7022_v25 = vadd.f32 %v7002_v11, %v15240_v7 }
0x1576   : > { %v10614_v61 = vpop.eup %10613  ;;  %7051 = vrot.lane.b32.xlu0 %v10612_v62, %s10845_s18 }
0x1577   : > { %10623 = vtanh.f32 %v6807_v1  ;;  %6837 = vrot.lane.b32.xlu1 %v10614_v61, %s10845_s18 }
0x1578   : > { %10625 = vtanh.f32 %v7022_v25  ;;  %v7004_v2 = vpop.permute.xlu0 %7003  ;;  %v6790_v58 = vpop.permute.xlu1 %6789 }
0x1579   : > { %v10616_v36 = vpop.eup %10615  ;;  %v7023_v13 = vadd.f32 %v7004_v2, %v15254_v27  ;;  %v6808_v10 = vadd.f32 %v6790_v58, %v15260_v17  ;;  %v6867_v58 = vmul.f32 %v15306_v56, %v14615_v4  ;;  %v6870_v4 = vmul.f32 %v15328_v34, %v14636_v30  ;;  %v15426_v30 = vld [vmem:[%s17179_s7] ss:$0 sm:$0xff] }
0x157a   : > { %v10618_v5 = vpop.eup %10617  ;;  %6839 = vrot.lane.b32.xlu0 %v10616_v36, %s10845_s18 }
0x157b   : > { %10627 = vtanh.f32 %v7023_v13  ;;  %7053 = vrot.lane.b32.xlu1 %v10618_v5, %s10845_s18 }
0x157c   : > { %10629 = vtanh.f32 %v6808_v10  ;;  %v6792_v7 = vpop.permute.xlu0 %6791  ;;  %v7006_v3 = vpop.permute.xlu1 %7005  ;;  %v6820_v10 = vsub.f32 1.0, %v15314_v23 }
0x157d   : > { %v10620_v12 = vpop.eup %10619  ;;  %v6809_v28 = vadd.f32 %v6792_v7, %v15274_v14  ;;  %v7024_v33 = vadd.f32 %v7006_v3, %v15270_v44  ;;  %v6868_v7 = vmul.f32 %v15314_v23, %v14622_v54  ;;  %v7083_v54 = vmul.f32 %v15310_v43, %v14698_v63 }
0x157e   : > { %v10622_v51 = vpop.eup %10621  ;;  %7055 = vrot.lane.b32.xlu0 %v10620_v12, %s10845_s18 }
0x157f   : > { %10631 = vtanh.f32 %v6809_v28  ;;  %6841 = vrot.lane.b32.xlu1 %v10622_v51, %s10845_s18 }
0x1580   : > { %10633 = vtanh.f32 %v7024_v33  ;;  %v7008_v27 = vpop.permute.xlu0 %7007  ;;  %v6822_v33 = vsub.f32 1.0, %v15328_v34 }
0x1581   : > { %v10624_v17 = vpop.eup %10623  ;;  %v7025_v39 = vadd.f32 %v7008_v27, %v15286_v42  ;;  %v6794_v24 = vpop.permute.xlu1 %6793 }
0x1582   : > { %v10626_v38 = vpop.eup %10625  ;;  %v6810_v0 = vadd.f32 %v6794_v24, %v15290_v20  ;;  %6843 = vrot.lane.b32.xlu0 %v10624_v17, %s10845_s18 }
0x1583   : > { %10635 = vtanh.f32 %v7025_v39  ;;  %7057 = vrot.lane.b32.xlu1 %v10626_v38, %s10845_s18  ;;  %v7035_v39 = vsub.f32 1.0, %v15310_v43  ;;  %v17884_v38 = vld [vmem:[#allocation121_spill] sm:$0xff]  ;;  %v7085_v43 = vmul.f32 %v15324_v35, %v14691_v49 }
0x1584   : > { %10637 = vtanh.f32 %v6810_v0 }
0x1585   : > { %v10628_v44 = vpop.eup %10627  ;;  %v7010_v14 = vpop.permute.xlu1 %7009 }
0x1586   : > { %v10630_v11 = vpop.eup %10629  ;;  %v7026_v62 = vadd.f32 %v7010_v14, %v15300_v46  ;;  %7059 = vrot.lane.b32.xlu0 %v10628_v44, %s10845_s18  ;;  %v6819_v46 = vsub.f32 1.0, %v15306_v56 }
0x1587   : > { %6845 = vrot.lane.b32.xlu1 %v10630_v11, %s10845_s18 }
0x1588   : > { %10639 = vtanh.f32 %v7026_v62  ;;  %v7037_v62 = vsub.f32 1.0, %v15324_v35  ;;  %v6824_v35 = vsub.f32 1.0, %v15346_v26 }
0x1589   : > { %v10632_v42 = vpop.eup %10631 }
0x158a   : > { %v10634_v1 = vpop.eup %10633  ;;  %6847 = vrot.lane.b32.xlu0 %v10632_v42, %s10845_s18 }
0x158b   : > { %7061 = vrot.lane.b32.xlu1 %v10634_v1, %s10845_s18  ;;  %v17886_v1 = vld [vmem:[#allocation125_spill] sm:$0xff] }
0x158d   : > { %v10636_v20 = vpop.eup %10635 }
0x158e   : > { %v10638_v25 = vpop.eup %10637  ;;  %7063 = vrot.lane.b32.xlu0 %v10636_v20, %s10845_s18 }
0x158f   : > { %6849 = vrot.lane.b32.xlu1 %v10638_v25, %s10845_s18 }
0x1592   : > { %v10640_v61 = vpop.eup %10639 }
0x1593   : > { %7065 = vrot.lane.b32.xlu1 %v10640_v61, %s10845_s18  ;;  %v6821_v61 = vsub.f32 1.0, %v15322_v21 }
0x15e4   : > { %v6836_v2 = vpop.permute.xlu0 %6835 }
0x15e5   : > { %v6859_v36 = vmul.f32 %v6836_v2, %v6819_v46 }
0x15e7   : > { %v6875_v13 = vadd.f32 %v6867_v58, %v6859_v36  ;;  %v6869_v58 = vmul.f32 %v15322_v21, %v14629_v59  ;;  %v7084_v59 = vmul.f32 %v15316_v55, %v14671_v47 }
0x15e8   : > { %v7052_v17 = vpop.permute.xlu0 %7051 }
0x15e9   : > { %v6838_v5 = vpop.permute.xlu1 %6837  ;;  %7163 = vrot.lane.b32.xlu0 %v6875_v13, %s10845_s18  ;;  %v7075_v24 = vmul.f32 %v7052_v17, %v7035_v39 }
0x15ea   : > { %v6860_v3 = vmul.f32 %v6838_v5, %v6820_v10  ;;  %v6872_v5 = vmul.f32 %v15346_v26, %v14650_v29  ;;  %v7039_v26 = vsub.f32 1.0, %v15342_v8 }
0x15eb   : > { %v7091_v23 = vadd.f32 %v7083_v54, %v7075_v24  ;;  %v17892_v54 = vld [vmem:[#allocation88_spill] sm:$0xff] }
0x15ec   : > { %v6876_v12 = vadd.f32 %v6868_v7, %v6860_v3  ;;  %v6840_v44 = vpop.permute.xlu0 %6839  ;;  %v7036_v3 = vsub.f32 1.0, %v15316_v55  ;;  %v17890_v55 = vld [vmem:[#allocation129_spill] sm:$0xff] }
0x15ed   : > { %v7054_v28 = vpop.permute.xlu1 %7053  ;;  %v15421_v0 = vsel %vm1188_vm0, %v17884_v38, %v7091_v23  ;;  %v6861_v46 = vmul.f32 %v6840_v44, %v6821_v61  ;;  %v17893_v23 = vld [vmem:[#allocation61_spill] sm:$0xff]  ;;  %v6823_v44 = vsub.f32 1.0, %v15336_v6  ;;  %v17899_v61 = vld [vmem:[#allocation55_spill] sm:$0xff] }
0x15ee   : > { %7165 = vrot.lane.b32.xlu1 %v6876_v12, %s10845_s18  ;;  %17885 = vst [vmem:[#allocation105_spill] sm:$0xff] %v15421_v0  ;;  %v7202_v34 = vmul.f32 %v15426_v30, %v15421_v0  ;;  %v7076_v12 = vmul.f32 %v7054_v28, %v7036_v3  ;;  %v7087_v28 = vmul.f32 %v15342_v8, %v14760_v57  ;;  %v17895_v8 = vld [vmem:[#allocation76_spill] sm:$0xff]  ;;  %v17905_v3 = vld [vmem:[#allocation83_spill] sm:$0xff] }
0x15ef   : > { %v6877_v36 = vadd.f32 %v6869_v58, %v6861_v46  ;;  %v15471_v38 = vsel %vm1188_vm0, %v17893_v23, %v17892_v54  ;;  %v17902_v58 = vld [vmem:[#allocation64_spill] sm:$0xff]  ;;  %v17911_v23 = vld [vmem:[#allocation127_spill] sm:$0xff] }
0x15f0   : > { %v7056_v14 = vpop.permute.xlu0 %7055  ;;  %v7266_v11 = vsel %vm17359_vm1, %v7202_v34, 0.0  ;;  %v7092_v21 = vadd.f32 %v7084_v59, %v7076_v12  ;;  %17894 = vst [vmem:[#allocation27_spill] sm:$0xff] %v15471_v38  ;;  %v7247_v57 = vmul.f32 %v15426_v30, %v15471_v38  ;;  %v15840_v38 = vld [vmem:[%s15660_s0 + $0xf0] sm:$0xff] }
0x15f1   : > { %v6842_v51 = vpop.permute.xlu1 %6841  ;;  %v7077_v63 = vmul.f32 %v7056_v14, %v7037_v62 }
0x15f2   : > { %v6862_v56 = vmul.f32 %v6842_v51, %v6822_v33  ;;  %v17888_v33 = vld [vmem:[#allocation123_spill] sm:$0xff] }
0x15f3   : > { %v7093_v42 = vadd.f32 %v7085_v43, %v7077_v63  ;;  %v15454_v51 = vsel %vm1188_vm0, %v17888_v33, %v7092_v21  ;;  %v6871_v63 = vmul.f32 %v15336_v6, %v14643_v60  ;;  %v17901_v6 = vld [vmem:[#allocation92_spill] sm:$0xff]  ;;  %v7088_v21 = vmul.f32 %v15350_v22, %v14797_v40 }
0x15f4   : > { %v6878_v27 = vadd.f32 %v6870_v4, %v6862_v56  ;;  %17889 = vst [vmem:[#allocation109_spill] sm:$0xff] %v15454_v51  ;;  %v6844_v4 = vpop.permute.xlu0 %6843  ;;  %v7203_v56 = vmul.f32 %v15426_v30, %v15454_v51 }
0x15f5   : > { %v15436_v20 = vsel %vm1188_vm0, %v17886_v1, %v7093_v42  ;;  %v7058_v13 = vpop.permute.xlu1 %7057  ;;  %v6863_v34 = vmul.f32 %v6844_v4, %v6823_v44  ;;  %v7401_v42 = vsel %vm17359_vm1, %v7247_v57, 0.0 }
0x15f6   : > { %7169 = vrot.lane.b32.xlu1 %v6878_v27, %s10845_s18  ;;  %17887 = vst [vmem:[#allocation101_spill] sm:$0xff] %v15436_v20  ;;  %v7204_v25 = vmul.f32 %v15426_v30, %v15436_v20  ;;  %v7269_v29 = vsel %vm17359_vm1, %v7203_v56, 0.0  ;;  %v17907_v56 = vld [vmem:[#allocation141_spill] sm:$0xff]  ;;  %v17960_v20 = vld [vmem:[#allocation46_spill] sm:$0xff] }
0x15f7   : > { %v6879_v43 = vadd.f32 %v6871_v63, %v6863_v34 }
0x15f8   : > { %v7272_v2 = vsel %vm17359_vm1, %v7204_v25, 0.0  ;;  %v7060_v27 = vpop.permute.xlu0 %7059  ;;  %v17898_v25 = vld [vmem:[#allocation80_spill] sm:$0xff] }
0x15f9   : > { %v6846_v49 = vpop.permute.xlu1 %6845  ;;  %v7079_v17 = vmul.f32 %v7060_v27, %v7039_v26  ;;  %v15490_v46 = vsel %vm1188_vm0, %v17899_v61, %v17898_v25  ;;  %v15518_v27 = vsel %vm1188_vm0, %v15043_v32, %v17907_v56  ;;  %v7038_v26 = vsub.f32 1.0, %v15334_v53  ;;  %v17922_v56 = vld [vmem:[#allocation138_spill] sm:$0xff] }
0x15fa   : > { %v6864_v10 = vmul.f32 %v6846_v49, %v6824_v35  ;;  %17900 = vst [vmem:[#allocation67_spill] sm:$0xff] %v15490_v46  ;;  %v7241_v60 = vmul.f32 %v15426_v30, %v15490_v46  ;;  %v7040_v35 = vsub.f32 1.0, %v15350_v22  ;;  %17908 = vst [vmem:[#allocation6_spill] sm:$0xff] %v15518_v27  ;;  %v7256_v40 = vmul.f32 %v15426_v30, %v15518_v27  ;;  %v17909_v22 = vld [vmem:[#allocation131_spill] sm:$0xff]  ;;  %v17954_v46 = vld [vmem:[#allocation54_spill] sm:$0xff] }
0x15fb   : > { %v7095_v47 = vadd.f32 %v7087_v28, %v7079_v17  ;;  %v7078_v17 = vmul.f32 %v7058_v13, %v7038_v26  ;;  %v17955_v27 = vld [vmem:[#allocation69_spill] sm:$0xff] }
0x15fc   : > { %v6880_v7 = vadd.f32 %v6872_v5, %v6864_v10  ;;  %v7383_v10 = vsel %vm17359_vm1, %v7241_v60, 0.0  ;;  %v6848_v63 = vpop.permute.xlu0 %6847 }
0x15fd   : > { %v15464_v39 = vsel %vm1188_vm0, %v17890_v55, %v7095_v47  ;;  %v7062_v49 = vpop.permute.xlu1 %7061  ;;  %v7086_v55 = vmul.f32 %v15334_v53, %v14743_v9  ;;  %v6826_v53 = vsub.f32 1.0, %v15362_v19 }
0x15fe   : > { %17891 = vst [vmem:[#allocation136_spill] sm:$0xff] %v15464_v39  ;;  %v7206_v24 = vmul.f32 %v15426_v30, %v15464_v39  ;;  %v7080_v59 = vmul.f32 %v7062_v49, %v7040_v35  ;;  %v17913_v49 = vld [vmem:[#allocation133_spill] sm:$0xff]  ;;  %v15852_v39 = vld [vmem:[%s15660_s0 + $0x78] sm:$0xff] }
0x15ff   : > { %v7094_v32 = vadd.f32 %v7086_v55, %v7078_v17 }
0x1600   : > { %v7278_v14 = vsel %vm17359_vm1, %v7206_v24, 0.0  ;;  %v7428_v24 = vsel %vm17359_vm1, %v7256_v40, 0.0  ;;  %v7064_v61 = vpop.permute.xlu0 %7063  ;;  %v7042_v40 = vsub.f32 1.0, %v15368_v16 }
0x1601   : > { %v15536_v44 = vsel %vm1188_vm0, %v17911_v23, %v7094_v32  ;;  %v6850_v9 = vpop.permute.xlu1 %6849  ;;  %v17924_v32 = vld [vmem:[#allocation99_spill] sm:$0xff] }
0x1602   : > { %17912 = vst [vmem:[#allocation7_spill] sm:$0xff] %v15536_v44  ;;  %v7205_v34 = vmul.f32 %v15426_v30, %v15536_v44  ;;  %v6866_v57 = vmul.f32 %v6850_v9, %v6826_v53  ;;  %v17959_v44 = vld [vmem:[#allocation33_spill] sm:$0xff] }
0x1608   : > { %7267 = vadd.xlane.f32.xlu0 %v7266_v11  ;;  %v17896_v11 = vld [vmem:[#allocation51_spill] sm:$0xff] }
0x1609   : > { %v15480_v62 = vsel %vm1188_vm0, %v17896_v11, %v17895_v8  ;;  %v6874_v8 = vmul.f32 %v15362_v19, %v14664_v31  ;;  %v7089_v31 = vmul.f32 %v15360_v45, %v14947_v41 }
0x160a   : > { %17897 = vst [vmem:[#allocation41_spill] sm:$0xff] %v15480_v62  ;;  %v7240_v1 = vmul.f32 %v15426_v30, %v15480_v62 }
0x160b   : > { %v6882_v11 = vadd.f32 %v6874_v8, %v6866_v57  ;;  %v17928_v8 = vld [vmem:[#allocation135_spill] sm:$0xff] }
0x161a   : > { %7273 = vadd.xlane.f32.xlu1 %v7272_v2  ;;  %v7380_v2 = vsel %vm17359_vm1, %v7240_v1, 0.0  ;;  %v6873_v1 = vmul.f32 %v15354_v48, %v14657_v37 }
0x161e   : > { %7167 = vrot.lane.b32.xlu0 %v6877_v36, %s10845_s18  ;;  %v15499_v36 = vsel %vm1188_vm0, %v17902_v58, %v17901_v6 }
0x161f   : > { %17903 = vst [vmem:[#allocation112_spill] sm:$0xff] %v15499_v36  ;;  %v7248_v5 = vmul.f32 %v15426_v30, %v15499_v36 }
0x1621   : > { %v7404_v33 = vsel %vm17359_vm1, %v7248_v5, 0.0 }
0x162b   : > { %7173 = vrot.lane.b32.xlu1 %v6880_v7, %s10845_s18  ;;  %v17904_v7 = vld [vmem:[#allocation96_spill] sm:$0xff] }
0x162c   : > { %v15508_v12 = vsel %vm1188_vm0, %v17905_v3, %v17904_v7  ;;  %v17918_v3 = vld [vmem:[#allocation48_spill] sm:$0xff] }
0x162d   : > { %17906 = vst [vmem:[#allocation5_spill] sm:$0xff] %v15508_v12  ;;  %v7249_v4 = vmul.f32 %v15426_v30, %v15508_v12  ;;  %v15783_v12 = vld [vmem:[%s15660_s0 + $0x150] sm:$0xff] }
0x162f   : > { %v7407_v28 = vsel %vm17359_vm1, %v7249_v4, 0.0 }
0x163d   : > { %7270 = vadd.xlane.f32.xlu0 %v7269_v29  ;;  %v7096_v29 = vadd.f32 %v7088_v21, %v7080_v59  ;;  %v17920_v21 = vld [vmem:[#allocation124_spill] sm:$0xff] }
0x163f   : > { %v15526_v47 = vsel %vm1188_vm0, %v17909_v22, %v7096_v29  ;;  %v15581_v29 = vsel %vm1188_vm0, %v15027_v18, %v17922_v56 }
0x1640   : > { %17910 = vst [vmem:[#allocation113_spill] sm:$0xff] %v15526_v47  ;;  %v7207_v54 = vmul.f32 %v15426_v30, %v15526_v47  ;;  %17923 = vst [vmem:[#allocation116_spill] sm:$0xff] %v15581_v29  ;;  %v7254_v55 = vmul.f32 %v15426_v30, %v15581_v29 }
0x1642   : > { %v7281_v13 = vsel %vm17359_vm1, %v7207_v54, 0.0  ;;  %v7422_v23 = vsel %vm17359_vm1, %v7254_v55, 0.0 }
0x164f   : > { %7279 = vadd.xlane.f32.xlu1 %v7278_v14  ;;  %v7275_v14 = vsel %vm17359_vm1, %v7205_v34, 0.0 }
0x1653   : > { %7402 = vadd.xlane.f32.xlu1 %v7401_v42  ;;  %7171 = vrot.lane.b32.xlu0 %v6879_v43, %s10845_s18  ;;  %v6825_v43 = vsub.f32 1.0, %v15354_v48  ;;  %v17915_v48 = vld [vmem:[#allocation120_spill] sm:$0xff] }
0x1655   : > { %v6865_v42 = vmul.f32 %v6848_v63, %v6825_v43 }
0x1657   : > { %7381 = vadd.xlane.f32.xlu1 %v7380_v2  ;;  %v6881_v25 = vadd.f32 %v6873_v1, %v6865_v42  ;;  %v7041_v2 = vsub.f32 1.0, %v15360_v45  ;;  %v17917_v45 = vld [vmem:[#allocation53_spill] sm:$0xff] }
0x1658   : > { %v15570_v59 = vsel %vm1188_vm0, %v17918_v3, %v17917_v45 }
0x1659   : > { %v7081_v60 = vmul.f32 %v7064_v61, %v7041_v2  ;;  %17919 = vst [vmem:[#allocation115_spill] sm:$0xff] %v15570_v59  ;;  %v7233_v4 = vmul.f32 %v15426_v30, %v15570_v59  ;;  %v17932_v61 = vld [vmem:[#allocation126_spill] sm:$0xff]  ;;  %v15786_v59 = vld [vmem:[%s15660_s0 + $0xe0] sm:$0xff] }
0x165b   : > { %7384 = vadd.xlane.f32.xlu1 %v7383_v10  ;;  %v7164_v19 = vpop.permute.xlu0 %7163  ;;  %v7097_v6 = vadd.f32 %v7089_v31, %v7081_v60  ;;  %v7359_v22 = vsel %vm17359_vm1, %v7233_v4, 0.0 }
0x165c   : > { %v15562_v10 = vsel %vm1188_vm0, %v7164_v19, %v17915_v48 }
0x165d   : > { %v15556_v35 = vsel %vm1188_vm0, %v17913_v49, %v7097_v6  ;;  %17916 = vst [vmem:[#allocation8_spill] sm:$0xff] %v15562_v10  ;;  %v7258_v7 = vmul.f32 %v15426_v30, %v15562_v10 }
0x165e   : > { %17914 = vst [vmem:[#allocation114_spill] sm:$0xff] %v15556_v35  ;;  %v7208_v37 = vmul.f32 %v15426_v30, %v15556_v35 }
0x165f   : > { %7405 = vadd.xlane.f32.xlu1 %v7404_v33  ;;  %v7434_v17 = vsel %vm17359_vm1, %v7258_v7, 0.0 }
0x1660   : > { %v7284_v41 = vsel %vm17359_vm1, %v7208_v37, 0.0 }
0x1663   : > { %7408 = vadd.xlane.f32.xlu1 %v7407_v28  ;;  %v7066_v28 = vpop.permute.xlu1 %7065 }
0x1664   : > { %v7082_v18 = vmul.f32 %v7066_v28, %v7042_v40 }
0x1667   : > { %7429 = vadd.xlane.f32.xlu1 %v7428_v24  ;;  %v15593_v24 = vsel %vm1188_vm0, %v15036_v50, %v17924_v32  ;;  %v7471_v32 = vld [vmem:[%s15660_s0 + $0x68] sm:$0xff] }
0x1668   : > { %17925 = vst [vmem:[#allocation10_spill] sm:$0xff] %v15593_v24  ;;  %v7255_v34 = vmul.f32 %v15426_v30, %v15593_v24  ;;  %vm7535_vm2 = vcmp.gt.f32.partialorder %v7471_v32, 0.0  ;;  %v15837_v24 = vld [vmem:[%s15660_s0 + $0x160] sm:$0xff] }
0x166a   : > { %v7425_v53 = vsel %vm17359_vm1, %v7255_v34, 0.0  ;;  %v10846_v34 = vmov 0  }
0x166b   : > { %7282 = vadd.xlane.f32.xlu1 %v7281_v13  ;;  %v7090_v13 = vmul.f32 %v15368_v16, %v14954_v52  ;;  %v7166_v16 = vpop.permute.xlu1 %7165  ;;  %9872 = vset.pattern.permute.xlu0 %v10846_v34 }
0x166c   : > { %9871 = vset.pattern.permute.xlu1 %v10846_v34 }
0x166d   : > { %v7098_v50 = vadd.f32 %v7090_v13, %v7082_v18  ;;  %v7479_v18 = vld [vmem:[%s15660_s0 + $0xa8] sm:$0xff] }
0x166e   : > { %vm7543_vm3 = vcmp.gt.f32.partialorder %v7479_v18, 0.0 }
0x166f   : > { %v15611_v52 = vsel %vm1188_vm0, %v17928_v8, %v7098_v50  ;;  %v7170_v42 = vpop.permute.xlu1 %7169  ;;  %v17940_v8 = vld [vmem:[#allocation74_spill] sm:$0xff] }
0x1670   : > { %17929 = vst [vmem:[#allocation11_spill] sm:$0xff] %v15611_v52  ;;  %v7209_v63 = vmul.f32 %v15426_v30, %v15611_v52  ;;  %v15625_v2 = vsel %vm1188_vm0, %v7170_v42, %v17932_v61  ;;  %v17956_v52 = vld [vmem:[#allocation137_spill] sm:$0xff] }
0x1671   : > { %17933 = vst [vmem:[#allocation12_spill] sm:$0xff] %v15625_v2  ;;  %v7261_v60 = vmul.f32 %v15426_v30, %v15625_v2  ;;  %v15849_v2 = vld [vmem:[%s15660_s0 + $0x70] sm:$0xff] }
0x1672   : > { %7276 = vadd.xlane.f32.xlu0 %v7275_v14  ;;  %v17926_v14 = vld [vmem:[#allocation143_spill] sm:$0xff] }
0x1673   : > { %v15604_v9 = vsel %vm1188_vm0, %v15050_v15, %v17926_v14  ;;  %v17930_v15 = vld [vmem:[#allocation122_spill] sm:$0xff]  ;;  %v7443_v19 = vsel %vm17359_vm1, %v7261_v60, 0.0 }
0x1674   : > { %17927 = vst [vmem:[#allocation117_spill] sm:$0xff] %v15604_v9  ;;  %v7257_v57 = vmul.f32 %v15426_v30, %v15604_v9  ;;  %v15618_v43 = vsel %vm1188_vm0, %v7166_v16, %v17930_v15  ;;  %v17938_v14 = vld [vmem:[#allocation90_spill] sm:$0xff]  ;;  %v15673_v16 = vsel %vm7543_vm3, %v17940_v8, -inf  ;;  %v15780_v9 = vld [vmem:[%s15660_s0 + $0x118] sm:$0xff] }
0x1675   : > { %17931 = vst [vmem:[#allocation118_spill] sm:$0xff] %v15618_v43  ;;  %v7259_v1 = vmul.f32 %v15426_v30, %v15618_v43  ;;  %v15669_v50 = vsel %vm7535_vm2, %v17938_v14, -inf  ;;  %17941 = vst [vmem:[#allocation125_spill] sm:$0xff] %v15673_v16  ;;  %v7729_v60 = vsel %vm7650_vm6, %v15673_v16, -inf  ;;  %v15773_v14 = vld [vmem:[%s15660_s0 + $0xa0] sm:$0xff]  ;;  %vm7557_vm3 = vcmp.gt.f32.partialorder %v15780_v9, 0.0 }
0x1676   : > { %17939 = vst [vmem:[#allocation121_spill] sm:$0xff] %v15669_v50  ;;  %v7727_v15 = vsel %vm7650_vm6, %v15669_v50, -inf  ;;  %v17975_v50 = vld [vmem:[#allocation65_spill] sm:$0xff] }
0x1677   : > { %v7437_v31 = vsel %vm17359_vm1, %v7259_v1, 0.0  ;;  %v17943_v1 = vld [vmem:[#allocation75_spill] sm:$0xff] }
0x167c   : > { %7177 = vrot.lane.b32.xlu1 %v6882_v11, %s10845_s18  ;;  %v7431_v11 = vsel %vm17359_vm1, %v7257_v57, 0.0 }
0x1688   : > { %7175 = vrot.lane.b32.xlu0 %v6881_v25, %s10845_s18  ;;  %v7287_v25 = vsel %vm17359_vm1, %v7209_v63, 0.0 }
0x1695   : > { %v15552_v58 = vpop.xlane.xlu0 %7267 }
0x1699   : > { %v7168_v5 = vpop.permute.xlu0 %7167 }
0x169a   : > { %v15574_v33 = vsel %vm1188_vm0, %v7168_v5, %v17920_v21  ;;  %v17934_v5 = vld [vmem:[#allocation130_spill] sm:$0xff] }
0x169b   : > { %17921 = vst [vmem:[#allocation9_spill] sm:$0xff] %v15574_v33  ;;  %v7260_v26 = vmul.f32 %v15426_v30, %v15574_v33 }
0x169d   : > { %v7440_v54 = vsel %vm17359_vm1, %v7260_v26, 0.0 }
0x16a0   : > { %7285 = vadd.xlane.f32.xlu1 %v7284_v41  ;;  %v17936_v41 = vld [vmem:[#allocation128_spill] sm:$0xff] }
0x16a4   : > { %7435 = vadd.xlane.f32.xlu1 %v7434_v17 }
0x16a7   : > { %7360 = vadd.xlane.f32.xlu0 %v7359_v22  ;;  %v15631_v6 = vpop.xlane.xlu1 %7273 }
0x16a8   : > { %7441 = vadd.xlane.f32.xlu1 %v7440_v54  ;;  %v7463_v54 = vld [vmem:[%s15660_s0 + $0x28] sm:$0xff] }
0x16a9   : > { %vm7527_vm4 = vcmp.gt.f32.partialorder %v7463_v54, 0.0 }
0x16ab   : > { %7423 = vadd.xlane.f32.xlu0 %v7422_v23  ;;  %v7174_v37 = vpop.permute.xlu1 %7173  ;;  %v7487_v23 = vld [vmem:[%s15660_s0 + $0xe8] sm:$0xff] }
0x16ac   : > { %v15637_v7 = vsel %vm1188_vm0, %v7174_v37, %v17934_v5  ;;  %vm7551_vm5 = vcmp.gt.f32.partialorder %v7487_v23, 0.0  ;;  %v17947_v5 = vld [vmem:[#allocation134_spill] sm:$0xff] }
0x16ad   : > { %17935 = vst [vmem:[#allocation119_spill] sm:$0xff] %v15637_v7  ;;  %v7263_v21 = vmul.f32 %v15426_v30, %v15637_v7  ;;  %v15834_v7 = vld [vmem:[%s15660_s0 + $0xb8] sm:$0xff] }
0x16af   : > { %7426 = vadd.xlane.f32.xlu0 %v7425_v53  ;;  %v7449_v56 = vsel %vm17359_vm1, %v7263_v21, 0.0  ;;  %v7495_v53 = vld [vmem:[%s15660_s0 + $0x128] sm:$0xff] }
0x16b0   : > { %vm7559_vm7 = vcmp.gt.f32.partialorder %v7495_v53, 0.0  ;;  %v17952_v53 = vld [vmem:[#allocation132_spill] sm:$0xff] }
0x16b3   : > { %7432 = vadd.xlane.f32.xlu0 %v7431_v11  ;;  %v7503_v11 = vld [vmem:[%s15660_s0 + $0x168] sm:$0xff] }
0x16b4   : > { %vm7567_vm8 = vcmp.gt.f32.partialorder %v7503_v11, 0.0 }
0x16b7   : > { %7288 = vadd.xlane.f32.xlu0 %v7287_v25  ;;  %v15683_v25 = vsel %vm7551_vm5, %v17943_v1, -inf  ;;  %v7468_v1 = vld [vmem:[%s15660_s0 + $0x50] sm:$0xff] }
0x16b8   : > { %17944 = vst [vmem:[#allocation129_spill] sm:$0xff] %v15683_v25  ;;  %vm7532_vm11 = vcmp.gt.f32.partialorder %v7468_v1, 0.0 }
0x16b9   : > { %v15800_v62 = vsel %vm7532_vm11, %v17956_v52, -inf  ;;  %vm7564_vm11 = vcmp.gt.f32.partialorder %v15783_v12, 0.0  ;;  %v15815_v52 = vld [vmem:[%s15660_s0 + $0x120] sm:$0xff] }
0x16ba   : > { %v7682_v47 = vsel %vm7650_vm6, %v15800_v62, -inf }
0x16bb   : > { %7438 = vadd.xlane.f32.xlu0 %v7437_v31 }
0x16bf   : > { %7444 = vadd.xlane.f32.xlu0 %v7443_v19  ;;  %v17945_v19 = vld [vmem:[#allocation31_spill] sm:$0xff] }
0x16c0   : > { %v15688_v37 = vsel %vm7559_vm7, %v17945_v19, -inf  ;;  %v15729_v19 = vld [vmem:[%s15660_s0 + $0x100] sm:$0xff] }
0x16c1   : > { %17946 = vst [vmem:[#allocation88_spill] sm:$0xff] %v15688_v37  ;;  %v7733_v18 = vsel %vm7650_vm6, %v15688_v37, -inf  ;;  %vm7554_vm15 = vcmp.gt.f32.partialorder %v15729_v19, 0.0  ;;  %v17967_v19 = vld [vmem:[#allocation62_spill] sm:$0xff] }
0x16ca   : > { %v15633_v49 = vpop.xlane.xlu0 %7270 }
0x16ce   : > { %v7172_v48 = vpop.permute.xlu0 %7171 }
0x16cf   : > { %v15641_v45 = vsel %vm1188_vm0, %v7172_v48, %v17936_v41 }
0x16d0   : > { %17937 = vst [vmem:[#allocation14_spill] sm:$0xff] %v15641_v45  ;;  %v7262_v3 = vmul.f32 %v15426_v30, %v15641_v45  ;;  %v17958_v45 = vld [vmem:[#allocation44_spill] sm:$0xff] }
0x16d2   : > { %v7446_v4 = vsel %vm17359_vm1, %v7262_v3, 0.0  ;;  %v7731_v3 = vsel %vm7650_vm6, %v15683_v25, -inf  ;;  %v17972_v25 = vld [vmem:[#allocation86_spill] sm:$0xff] }
0x16d3   : > { %7447 = vadd.xlane.f32.xlu0 %v7446_v4 }
0x16d7   : > { %7450 = vadd.xlane.f32.xlu0 %v7449_v56 }
0x16dc   : > { %v15649_v26 = vpop.xlane.xlu1 %7279 }
0x16e0   : > { %v7403_v17 = vpop.xlane.xlu1 %7402 }
0x16e1   : > { %v15698_v4 = vsel %vm7567_vm8, %v7403_v17, -inf }
0x16e2   : > { %17949 = vst [vmem:[#allocation76_spill] sm:$0xff] %v15698_v4  ;;  %v15709_v17 = vsel %vm7650_vm6, %v15698_v4, -inf  ;;  %v17970_v4 = vld [vmem:[#allocation71_spill] sm:$0xff] }
0x16e3   : > { %17951 = vst [vmem:[#allocation80_spill] sm:$0xff] %v15709_v17  ;;  %v17980_v17 = vld [vmem:[#allocation42_spill] sm:$0xff] }
0x16e4   : > { %v15651_v28 = vpop.xlane.xlu1 %7381 }
0x16e8   : > { %v15653_v40 = vpop.xlane.xlu1 %7384 }
0x16ec   : > { %v15655_v22 = vpop.xlane.xlu1 %7405 }
0x16f0   : > { %v15657_v55 = vpop.xlane.xlu1 %7408 }
0x16f4   : > { %v15665_v13 = vpop.xlane.xlu1 %7429 }
0x16f8   : > { %v7283_v57 = vpop.xlane.xlu1 %7282 }
0x16f9   : > { %v15676_v63 = vsel %vm7527_vm4, %v7283_v57, -inf }
0x16fa   : > { %17942 = vst [vmem:[#allocation123_spill] sm:$0xff] %v15676_v63  ;;  %v7726_v42 = vsel %vm7650_vm6, %v15676_v63, -inf }
0x16fb   : > { %v7728_v61 = vmax.f32 %v7726_v42, %v7727_v15  ;;  %v7467_v15 = vld [vmem:[%s15660_s0 + $0x48] sm:$0xff] }
0x16fc   : > { %v7178_v31 = vpop.permute.xlu1 %7177  ;;  %v7475_v42 = vld [vmem:[%s15660_s0 + $0x88] sm:$0xff]  ;;  %vm7531_vm9 = vcmp.gt.f32.partialorder %v7467_v15, 0.0  ;;  %v15818_v15 = vld [vmem:[%s15660_s0 + $0xb0] sm:$0xff] }
0x16fd   : > { %v7730_v48 = vmax.f32 %v7728_v61, %v7729_v60  ;;  %v15692_v41 = vsel %vm1188_vm0, %v7178_v31, %v17947_v5  ;;  %v7466_v61 = vld [vmem:[%s15660_s0 + $0x40] sm:$0xff]  ;;  %v7483_v60 = vld [vmem:[%s15660_s0 + $0xc8] sm:$0xff]  ;;  %v15738_v5 = vld [vmem:[%s15660_s0 + $0x58] sm:$0xff]  ;;  %vm7539_vm10 = vcmp.gt.f32.partialorder %v7475_v42, 0.0 }
0x16fe   : > { %17948 = vst [vmem:[#allocation61_spill] sm:$0xff] %v15692_v41  ;;  %v7265_v21 = vmul.f32 %v15426_v30, %v15692_v41  ;;  %v15726_v31 = vld [vmem:[%s15660_s0 + $0x80] sm:$0xff]  ;;  %vm7530_vm12 = vcmp.gt.f32.partialorder %v7466_v61, 0.0  ;;  %vm7547_vm13 = vcmp.gt.f32.partialorder %v7483_v60, 0.0  ;;  %v7460_v41 = vld [vmem:[%s15660_s0 + $0x10] sm:$0xff]  ;;  %v15794_v36 = vsel %vm7539_vm10, %v17955_v27, -inf }
0x16ff   : > { %v7732_v56 = vmax.f32 %v7730_v48, %v7731_v3  ;;  %v15700_v32 = vpop.xlane.xlu0 %7276  ;;  %v15732_v48 = vld [vmem:[%s15660_s0 + $0xc0] sm:$0xff]  ;;  %vm7538_vm14 = vcmp.gt.f32.partialorder %v15726_v31, 0.0  ;;  %vm7524_vm10 = vcmp.gt.f32.partialorder %v7460_v41, 0.0  ;;  %v7459_v42 = vld [vmem:[%s15660_s0 + $0x8] sm:$0xff]  ;;  %v15846_v29 = vsel %vm7547_vm13, %v17958_v45, -inf  ;;  %v17961_v60 = vld [vmem:[#allocation140_spill] sm:$0xff] }
0x1700   : > { %v7455_v54 = vsel %vm17359_vm1, %v7265_v21, 0.0  ;;  %v15741_v3 = vld [vmem:[%s15660_s0 + $0x60] sm:$0xff]  ;;  %v15744_v21 = vld [vmem:[%s15660_s0 + $0x90] sm:$0xff]  ;;  %v15863_v33 = vsel %vm7538_vm14, %v17959_v44, -inf  ;;  %v15868_v45 = vsel %vm7554_vm15, %v17960_v20, -inf  ;;  %vm7558_vm13 = vcmp.gt.f32.partialorder %v15815_v52, 0.0 }
0x1701   : > { %7456 = vadd.xlane.f32.xlu0 %v7455_v54  ;;  %v15705_v23 = vmax.f32 %v7732_v56, %v7733_v18  ;;  %v7458_v56 = vld [vmem:[%s15660_s0] sm:$0xff]  ;;  %v15752_v54 = vld [vmem:[%s15660_s0 + $0x98] sm:$0xff]  ;;  %vm7534_vm4 = vcmp.gt.f32.partialorder %v15741_v3, 0.0  ;;  %vm7540_vm5 = vcmp.gt.f32.partialorder %v15744_v21, 0.0  ;;  %vm17965_vm14 = vcmp.gt.f32.partialorder %v15738_v5, 0.0  ;;  %v17969_v5 = vld [vmem:[#allocation58_spill] sm:$0xff] }
0x1702   : > { %v15749_v18 = vld [vmem:[%s15660_s0 + $0x140] sm:$0xff]  ;;  %vm7522_vm7 = vcmp.gt.f32.partialorder %v7458_v56, 0.0  ;;  %v17957_v56 = vld [vmem:[#allocation139_spill] sm:$0xff]  ;;  %vm7544_vm15 = vcmp.gt.f32.partialorder %v15818_v15, 0.0  ;;  %v15905_v3 = vsel %vm7540_vm5, %v17969_v5, -inf  ;;  %v7658_v51 = vsel %vm7650_vm6, %v15868_v45, -inf }
0x1703   : > { %17950 = vst [vmem:[#allocation51_spill] sm:$0xff] %v15705_v23  ;;  %v7176_v34 = vpop.permute.xlu0 %7175  ;;  %v15809_v27 = vsel %vm7522_vm7, %v15552_v58, -inf  ;;  %v15827_v58 = vsel %vm7650_vm6, %v15794_v36, -inf  ;;  %v15831_v35 = vsel %vm7530_vm12, %v17957_v56, -inf  ;;  %v15858_v56 = vsel %vm7524_vm10, %v15631_v6, -inf  ;;  %v17962_v6 = vld [vmem:[#allocation60_spill] sm:$0xff] }
0x1704   : > { %v15715_v57 = vsel %vm1188_vm0, %v7176_v34, %v17952_v53  ;;  %v15755_v34 = vld [vmem:[%s15660_s0 + $0xd0] sm:$0xff]  ;;  %vm7546_vm0 = vcmp.gt.f32.partialorder %v15732_v48, 0.0  ;;  %v15762_v53 = vld [vmem:[%s15660_s0 + $0x148] sm:$0xff]  ;;  %v7651_v61 = vsel %vm7650_vm6, %v15809_v27, -inf  ;;  %vm7523_vm7 = vcmp.gt.f32.partialorder %v7459_v42, 0.0  ;;  %v17964_v20 = vld [vmem:[#allocation37_spill] sm:$0xff] }
0x1705   : > { %17953 = vst [vmem:[#allocation55_spill] sm:$0xff] %v15715_v57  ;;  %v7264_v8 = vmul.f32 %v15426_v30, %v15715_v57  ;;  %v15735_v30 = vld [vmem:[%s15660_s0 + $0x108] sm:$0xff]  ;;  %v15790_v57 = vsel %vm7531_vm9, %v17954_v46, -inf  ;;  %vm7542_vm9 = vcmp.gt.f32.partialorder %v15773_v14, 0.0  ;;  %v15805_v46 = vld [vmem:[%s15660_s0 + $0x158] sm:$0xff]  ;;  %v15873_v43 = vsel %vm7546_vm0, %v17961_v60, -inf }
0x1706   : > { %vm7555_vm2 = vcmp.gt.f32.partialorder %v15735_v30, 0.0  ;;  %v15823_v1 = vsel %vm7650_vm6, %v15790_v57, -inf  ;;  %vm7565_vm12 = vcmp.gt.f32.partialorder %v15805_v46, 0.0  ;;  %v7652_v44 = vsel %vm7650_vm6, %v15831_v35, -inf  ;;  %v15910_v60 = vld [vmem:[%s15660_s0 + $0x188] sm:$0xff]  ;;  %v15921_v5 = vld [vmem:[%s15660_s0 + $0x180] sm:$0xff] }
0x1707   : > { %v7452_v11 = vsel %vm17359_vm1, %v7264_v8, 0.0  ;;  %v15765_v8 = vld [vmem:[%s15660_s0 + $0xd8] sm:$0xff]  ;;  %vm7550_vm1 = vcmp.gt.f32.partialorder %v15786_v59, 0.0  ;;  %v15882_v41 = vsel %vm7555_vm2, %v17962_v6, -inf  ;;  %v15887_v31 = vsel %vm17965_vm14, %v17964_v20, -inf  ;;  %v15945_v42 = vld [vmem:[%s15660_s0 + $0x190] sm:$0xff] }
0x1708   : > { %7453 = vadd.xlane.f32.xlu1 %v7452_v11  ;;  %v15770_v11 = vld [vmem:[%s15660_s0 + $0x110] sm:$0xff]  ;;  %17963 = vst [vmem:[#allocation92_spill] sm:$0xff] %v15882_v41  ;;  %17966 = vst [vmem:[#allocation64_spill] sm:$0xff] %v15887_v31  ;;  %v15892_v48 = vsel %vm7534_vm4, %v17967_v19, -inf  ;;  %vm7545_vm0 = vcmp.gt.f32.partialorder %v15834_v7, 0.0  ;;  %vm7566_vm10 = vcmp.gt.f32.partialorder %v15837_v24, 0.0  ;;  %v7653_v6 = vmax.f32 %v7651_v61, %v7652_v44 }
0x1709   : > { %vm7556_vm8 = vcmp.gt.f32.partialorder %v15770_v11, 0.0  ;;  %17968 = vst [vmem:[#allocation96_spill] sm:$0xff] %v15892_v48  ;;  %v15900_v30 = vsel %vm7650_vm6, %v15846_v29, -inf  ;;  %v7681_v20 = vsel %vm7650_vm6, %v15858_v56, -inf  ;;  %v7654_v19 = vsel %vm7650_vm6, %v15863_v33, -inf  ;;  %v17999_v46 = vld [vmem:[#allocation72_spill] sm:$0xff] }
0x170a   : > { %v7656_v21 = vsel %vm7650_vm6, %v15873_v43, -inf  ;;  %v15925_v10 = vsel %vm7523_vm7, %v15633_v49, -inf  ;;  %v15929_v61 = vsel %vm7650_vm6, %v15882_v41, -inf  ;;  %v15933_v44 = vsel %vm7650_vm6, %v15887_v31, -inf  ;;  %v18001_v52 = vld [vmem:[#allocation49_spill] sm:$0xff]  ;;  %v7464_v41 = vld [vmem:[%s15660_s0 + $0x30] sm:$0xff] }
0x170b   : > { %v15937_v0 = vsel %vm7650_vm6, %v15892_v48, -inf  ;;  %vm17971_vm5 = vcmp.gt.f32.partialorder %v15749_v18, 0.0  ;;  %v7684_v49 = vsel %vm7650_vm6, %v15905_v3, -inf  ;;  %vm17973_vm7 = vcmp.gt.f32.partialorder %v15752_v54, 0.0  ;;  %v18004_v15 = vld [vmem:[#allocation84_spill] sm:$0xff]  ;;  %v18007_v7 = vld [vmem:[#allocation59_spill] sm:$0xff] }
0x170c   : > { %v15942_v37 = vsel %vm17971_vm5, %v17970_v4, -inf  ;;  %v15952_v16 = vsel %vm17973_vm7, %v17972_v25, -inf  ;;  %vm17976_vm14 = vcmp.gt.f32.partialorder %v15755_v34, 0.0  ;;  %vm7571_vm4 = vcmp.gt.f32.partialorder %v15910_v60, 0.0  ;;  %v17977_v4 = vld [vmem:[#allocation73_spill] sm:$0xff]  ;;  %v15972_v25 = vld [vmem:[%s15660_s0 + $0x198] sm:$0xff] }
0x170d   : > { %17974 = vst [vmem:[#allocation83_spill] sm:$0xff] %v15952_v16  ;;  %v15957_v63 = vsel %vm17976_vm14, %v17975_v50, -inf  ;;  %v7683_v18 = vmax.f32 %v7681_v20, %v7682_v47  ;;  %vm17978_vm5 = vcmp.gt.f32.partialorder %v15762_v53, 0.0  ;;  %vm17981_vm2 = vcmp.gt.f32.partialorder %v15765_v8, 0.0  ;;  %v17983_v34 = vld [vmem:[#allocation70_spill] sm:$0xff]  ;;  %v17984_v8 = vld [vmem:[#allocation77_spill] sm:$0xff] }
0x170e   : > { %v15963_v48 = vsel %vm17978_vm5, %v17977_v4, -inf  ;;  %v15968_v23 = vsel %vm17981_vm2, %v17980_v17, -inf  ;;  %vm7570_vm7 = vcmp.gt.f32.partialorder %v15921_v5, 0.0  ;;  %v7655_v54 = vmax.f32 %v7653_v6, %v7654_v19  ;;  %v17986_v20 = vld [vmem:[#allocation82_spill] sm:$0xff]  ;;  %v17988_v4 = vld [vmem:[#allocation57_spill] sm:$0xff] }
0x170f   : > { %17979 = vst [vmem:[#allocation141_spill] sm:$0xff] %v15963_v48  ;;  %17982 = vst [vmem:[#allocation131_spill] sm:$0xff] %v15968_v23  ;;  %v7666_v50 = vsel %vm7650_vm6, %v15925_v10, -inf  ;;  %v15978_v47 = vsel %vm7650_vm6, %v15942_v37, -inf  ;;  %v15983_v53 = vsel %vm7556_vm8, %v17983_v34, -inf  ;;  %v15988_v17 = vsel %vm7542_vm9, %v17984_v8, -inf }
0x1710   : > { %17985 = vst [vmem:[#allocation127_spill] sm:$0xff] %v15988_v17  ;;  %v15993_v6 = vsel %vm7557_vm3, %v17986_v20, -inf  ;;  %vm7572_vm2 = vcmp.gt.f32.partialorder %v15945_v42, 0.0  ;;  %v15998_v19 = vsel %vm7650_vm6, %v15952_v16, -inf  ;;  %v7686_v11 = vsel %vm7650_vm6, %v15957_v63, -inf  ;;  %v17989_v34 = vld [vmem:[#allocation68_spill] sm:$0xff] }
0x1711   : > { %17987 = vst [vmem:[#allocation133_spill] sm:$0xff] %v15993_v6  ;;  %v16005_v14 = vsel %vm7564_vm11, %v17988_v4, -inf  ;;  %v16010_v9 = vsel %vm7550_vm1, %v17989_v34, -inf  ;;  %v16014_v8 = vsel %vm7650_vm6, %v15963_v48, -inf  ;;  %v16018_v20 = vsel %vm7650_vm6, %v15968_v23, -inf  ;;  %v17997_v48 = vld [vmem:[#allocation81_spill] sm:$0xff] }
0x1712   : > { %17990 = vst [vmem:[#allocation120_spill] sm:$0xff] %v16010_v9  ;;  %vm7573_vm3 = vcmp.gt.f32.partialorder %v15972_v25, 0.0  ;;  %v7685_v12 = vmax.f32 %v7683_v18, %v7684_v49  ;;  %v7668_v4 = vmax.f32 %v7666_v50, %v15823_v1  ;;  %v7688_v16 = vsel %vm7650_vm6, %v15983_v53, -inf  ;;  %v17991_v1 = vld [vmem:[#allocation85_spill] sm:$0xff]  ;;  %v17993_v50 = vld [vmem:[#allocation63_spill] sm:$0xff]  ;;  %v18015_v42 = vld [vmem:[#allocation142_spill] sm:$0xff] }
0x1713   : > { %v16026_v59 = vsel %vm7650_vm6, %v15988_v17, -inf  ;;  %v16030_v34 = vsel %vm7650_vm6, %v15993_v6, -inf  ;;  %v7657_v31 = vmax.f32 %v7655_v54, %v7656_v21  ;;  %v16034_v23 = vsel %vm7650_vm6, %v16005_v14, -inf  ;;  %v7461_v6 = vld [vmem:[%s15660_s0 + $0x18] sm:$0xff]  ;;  %v17995_v21 = vld [vmem:[#allocation94_spill] sm:$0xff] }
0x1714   : > { %v16038_v49 = vsel %vm7650_vm6, %v16010_v9, -inf  ;;  %v16043_v18 = vsel %vm7565_vm12, %v17991_v1, -inf  ;;  %v16048_v17 = vsel %vm7558_vm13, %v17993_v50, -inf  ;;  %v16054_v54 = vsel %vm7544_vm15, %v17995_v21, -inf }
0x1715   : > { %17992 = vst [vmem:[#allocation53_spill] sm:$0xff] %v16043_v18  ;;  %17994 = vst [vmem:[#allocation48_spill] sm:$0xff] %v16048_v17  ;;  %v16059_v9 = vsel %vm7545_vm0, %v17997_v48, -inf  ;;  %v16064_v1 = vsel %vm7566_vm10, %v17999_v46, -inf  ;;  %vm18002_vm1 = vcmp.gt.f32.partialorder %v15840_v38, 0.0  ;;  %vm18005_vm8 = vcmp.gt.f32.partialorder %v15849_v2, 0.0 }
0x1716   : > { %17996 = vst [vmem:[#allocation124_spill] sm:$0xff] %v16054_v54  ;;  %17998 = vst [vmem:[#allocation138_spill] sm:$0xff] %v16059_v9  ;;  %v16069_v50 = vsel %vm18002_vm1, %v18001_v52, -inf  ;;  %v16075_v21 = vsel %vm18005_vm8, %v18004_v15, -inf  ;;  %vm18008_vm9 = vcmp.gt.f32.partialorder %v15852_v39, 0.0  ;;  %v7687_v24 = vmax.f32 %v7685_v12, %v7686_v11  ;;  %v7462_v11 = vld [vmem:[%s15660_s0 + $0x20] sm:$0xff] }
0x1717   : > { %18000 = vst [vmem:[#allocation99_spill] sm:$0xff] %v16064_v1  ;;  %18003 = vst [vmem:[#allocation143_spill] sm:$0xff] %v16069_v50  ;;  %v16080_v48 = vsel %vm18008_vm9, %v18007_v7, -inf  ;;  %v7670_v46 = vmax.f32 %v7668_v4, %v15827_v58  ;;  %v16085_v38 = vsel %vm7650_vm6, %v16043_v18, -inf  ;;  %v16089_v52 = vsel %vm7650_vm6, %v16048_v17, -inf  ;;  %v7496_v7 = vld [vmem:[%s15660_s0 + $0x130] sm:$0xff] }
0x1718   : > { %18006 = vst [vmem:[#allocation135_spill] sm:$0xff] %v16075_v21  ;;  %18009 = vst [vmem:[#allocation122_spill] sm:$0xff] %v16080_v48  ;;  %vm7525_vm11 = vcmp.gt.f32.partialorder %v7461_v6, 0.0  ;;  %v7659_v2 = vmax.f32 %v7657_v31, %v7658_v51  ;;  %v7744_v39 = vsel %vm7650_vm6, %v16054_v54, -inf  ;;  %v16095_v15 = vsel %vm7650_vm6, %v16059_v9, -inf  ;;  %v18011_v31 = vld [vmem:[#allocation79_spill] sm:$0xff] }
0x1719   : > { %v16099_v58 = vsel %vm7650_vm6, %v16064_v1, -inf  ;;  %vm7528_vm12 = vcmp.gt.f32.partialorder %v7464_v41, 0.0  ;;  %v7746_v12 = vsel %vm7650_vm6, %v16069_v50, -inf  ;;  %v7742_v6 = vsel %vm7650_vm6, %v16075_v21, -inf  ;;  %v7514_v54 = vld [vmem:[%s15660_s0 + $0x1c0] sm:$0xff]  ;;  %v18012_v9 = vld [vmem:[#allocation78_spill] sm:$0xff] }
0x171a   : > { %18010 = vst [vmem:[#allocation126_spill] sm:$0xff] %v16099_v58  ;;  %v16108_v51 = vsel %vm7650_vm6, %v16080_v48, -inf  ;;  %v16113_v4 = vsel %vm7571_vm4, %v18011_v31, -inf  ;;  %v16120_v41 = vsel %vm7570_vm7, %v18012_v9, -inf  ;;  %v7672_v50 = vmax.f32 %v7670_v46, %v15900_v30  ;;  %v18013_v17 = vld [vmem:[#allocation144_spill] sm:$0xff]  ;;  %v7504_v9 = vld [vmem:[%s15660_s0 + $0x170] sm:$0xff] }
0x171b   : > { %v16124_v21 = vsel %vm7525_vm11, %v15700_v32, -inf  ;;  %v7689_v1 = vmax.f32 %v7687_v24, %v7688_v16  ;;  %v16129_v60 = vsel %vm7572_vm2, %v18013_v17, -inf  ;;  %vm7526_vm13 = vcmp.gt.f32.partialorder %v7462_v11, 0.0  ;;  %v7516_v24 = vld [vmem:[%s15660_s0 + $0x1d0] sm:$0xff] }
0x171c   : > { %v7661_v5 = vmax.f32 %v7659_v2, %v15978_v47  ;;  %v16136_v30 = vsel %vm7650_vm6, %v16113_v4, -inf  ;;  %vm7560_vm15 = vcmp.gt.f32.partialorder %v7496_v7, 0.0  ;;  %vm7578_vm0 = vcmp.gt.f32.partialorder %v7514_v54, 0.0  ;;  %v7512_v11 = vld [vmem:[%s15660_s0 + $0x1b0] sm:$0xff] }
0x171d   : > { %v7662_v16 = vsel %vm7650_vm6, %v16120_v41, -inf  ;;  %v16145_v17 = vsel %vm7573_vm3, %v18015_v42, -inf  ;;  %v7696_v47 = vsel %vm7650_vm6, %v16124_v21, -inf  ;;  %v7692_v46 = vsel %vm7650_vm6, %v16129_v60, -inf }
0x171e   : > { %v16154_v2 = vsel %vm7526_vm13, %v15649_v26, -inf  ;;  %v16159_v25 = vmax.f32 %v7672_v50, %v15929_v61  ;;  %v16162_v42 = vsel %vm7560_vm15, %v15651_v28, -inf  ;;  %v7663_v58 = vmax.f32 %v7661_v5, %v7662_v16  ;;  %v16183_v16 = vld [vmem:[%s15660_s0 + $0x138] sm:$0xff] }
0x171f   : > { %vm7568_vm10 = vcmp.gt.f32.partialorder %v7504_v9, 0.0  ;;  %v7698_v26 = vmax.f32 %v7696_v47, %v15933_v44  ;;  %vm7580_vm4 = vcmp.gt.f32.partialorder %v7516_v24, 0.0  ;;  %vm7576_vm14 = vcmp.gt.f32.partialorder %v7512_v11, 0.0 }
0x1720   : > { %v16176_v54 = vsel %vm7650_vm6, %v16145_v17, -inf  ;;  %v7748_v50 = vsel %vm7650_vm6, %v16162_v42, -inf  ;;  %vm7561_vm5 = vcmp.gt.f32.partialorder %v16183_v16, 0.0 }
0x1721   : > { %v7700_v24 = vmax.f32 %v7698_v26, %v15998_v19 }
0x172d   : > { %v7286_v48 = vpop.xlane.xlu1 %7285 }
0x172e   : > { %v16131_v31 = vsel %vm7528_vm12, %v7286_v48, -inf }
0x172f   : > { %18014 = vst [vmem:[#allocation130_spill] sm:$0xff] %v16131_v31  ;;  %v7741_v32 = vsel %vm7650_vm6, %v16131_v31, -inf  ;;  %v7691_v31 = vmax.f32 %v7689_v1, %v16034_v23  ;;  %v7711_v23 = vsel %vm7650_vm6, %v16154_v2, -inf }
0x1730   : > { %v7743_v48 = vmax.f32 %v7741_v32, %v7742_v6 }
0x1731   : > { %v7436_v7 = vpop.xlane.xlu1 %7435  ;;  %v7693_v44 = vmax.f32 %v7691_v31, %v7692_v46  ;;  %v16196_v31 = vsel %vm7576_vm14, %v15665_v13, -inf }
0x1732   : > { %v7745_v18 = vmax.f32 %v7743_v48, %v7744_v39  ;;  %v16165_v6 = vsel %vm7578_vm0, %v7436_v7, -inf  ;;  %v7713_v48 = vmax.f32 %v7711_v23, %v15937_v0  ;;  %v7752_v23 = vsel %vm7650_vm6, %v16196_v31, -inf }
0x1733   : > { %v7664_v32 = vsel %vm7650_vm6, %v16165_v6, -inf }
0x1734   : > { %v7747_v28 = vmax.f32 %v7745_v18, %v7746_v12  ;;  %v7665_v61 = vmax.f32 %v7663_v58, %v7664_v32  ;;  %v16172_v1 = vpop.xlane.xlu0 %7360  ;;  %v16186_v18 = vsel %vm7568_vm10, %v15655_v22, -inf  ;;  %v16189_v58 = vld [vmem:[%s15660_s0 + $0x178] sm:$0xff] }
0x1735   : > { %v7442_v39 = vpop.xlane.xlu1 %7441  ;;  %v7750_v13 = vsel %vm7650_vm6, %v16186_v18, -inf  ;;  %vm7569_vm7 = vcmp.gt.f32.partialorder %v16189_v58, 0.0 }
0x1736   : > { %v7771_v12 = vmax.f32 %v7665_v61, -1e+30  ;;  %v16191_v9 = vsel %vm7580_vm4, %v7442_v39, -inf  ;;  %v7749_v47 = vmax.f32 %v7747_v28, %v7748_v50  ;;  %v16206_v28 = vld [vmem:[%s15660_s0 + $0xf8] sm:$0xff] }
0x1737   : > { %v7694_v46 = vsel %vm7650_vm6, %v16191_v9, -inf  ;;  %vm7553_vm2 = vcmp.gt.f32.partialorder %v16206_v28, 0.0 }
0x1738   : > { %v7779_v22 = vsub.f32 %v15809_v27, %v7771_v12  ;;  %v7787_v7 = vsub.f32 %v15831_v35, %v7771_v12  ;;  %v7795_v32 = vsub.f32 %v15863_v33, %v7771_v12  ;;  %v7803_v61 = vsub.f32 %v15873_v43, %v7771_v12  ;;  %v16208_v0 = vpop.xlane.xlu0 %7423 }
0x1739   : > { %v7811_v19 = vsub.f32 %v15868_v45, %v7771_v12  ;;  %v7819_v27 = vsub.f32 %v15942_v37, %v7771_v12  ;;  %v7827_v35 = vsub.f32 %v16120_v41, %v7771_v12  ;;  %v7695_v26 = vmax.f32 %v7693_v44, %v7694_v46 }
0x173a   : > { %v7843_v33 = vmul.f32 1.442695, %v7779_v22  ;;  %v7859_v11 = vmul.f32 1.442695, %v7787_v7  ;;  %v7875_v43 = vmul.f32 1.442695, %v7795_v32  ;;  %v7835_v50 = vsub.f32 %v16165_v6, %v7771_v12 }
0x173b   : > { %v7891_v39 = vmul.f32 1.442695, %v7803_v61  ;;  %v7751_v5 = vmax.f32 %v7749_v47, %v7750_v13  ;;  %v7702_v37 = vmax.f32 %v7700_v24, %v16018_v20  ;;  %v7907_v45 = vmul.f32 1.442695, %v7811_v19  ;;  %v7465_v6 = vld [vmem:[%s15660_s0 + $0x38] sm:$0xff]  ;;  %v16236_v7 = vld [vmem:[%s15660_s0 + $0x1a0] sm:$0xff] }
0x173c   : > { %10641 = vpow2.f32 %v7843_v33  ;;  %v16222_v41 = vmax.f32 %v7695_v26, -1e+30  ;;  %v16224_v22 = vpop.xlane.xlu0 %7426  ;;  %v7923_v44 = vmul.f32 1.442695, %v7819_v27  ;;  %v7939_v46 = vmul.f32 1.442695, %v7827_v35 }
0x173d   : > { %10643 = vpow2.f32 %v7859_v11  ;;  %v16227_v12 = vmax.f32 %v7751_v5, %v7752_v23  ;;  %v16239_v32 = vld [vmem:[%s15660_s0 + $0x1b8] sm:$0xff]  ;;  %v7515_v61 = vld [vmem:[%s15660_s0 + $0x1c8] sm:$0xff]  ;;  %v7715_v13 = vmax.f32 %v7713_v48, %v16026_v59  ;;  %v7955_v5 = vmul.f32 1.442695, %v7835_v50 }
0x173e   : > { %10645 = vpow2.f32 %v7875_v43  ;;  %v7781_v47 = vsub.f32 %v15858_v56, %v16222_v41  ;;  %v7789_v20 = vsub.f32 %v15800_v62, %v16222_v41  ;;  %v7797_v24 = vsub.f32 %v15905_v3, %v16222_v41  ;;  %v16246_v27 = vld [vmem:[%s15660_s0 + $0x1d8] sm:$0xff]  ;;  %v16251_v3 = vld [vmem:[%s15660_s0 + $0x1a8] sm:$0xff] }
0x173f   : > { %10647 = vpow2.f32 %v7891_v39  ;;  %v7805_v19 = vsub.f32 %v15957_v63, %v16222_v41  ;;  %v7813_v62 = vsub.f32 %v15983_v53, %v16222_v41  ;;  %vm7529_vm3 = vcmp.gt.f32.partialorder %v7465_v6, 0.0 }
0x1740   : > { %10649 = vpow2.f32 %v7907_v45  ;;  %v7847_v56 = vmul.f32 1.442695, %v7781_v47  ;;  %v7433_v35 = vpop.xlane.xlu0 %7432  ;;  %v7863_v33 = vmul.f32 1.442695, %v7789_v20  ;;  %vm7574_vm1 = vcmp.gt.f32.partialorder %v16236_v7, 0.0 }
0x1741   : > { %10651 = vpow2.f32 %v7923_v44  ;;  %vm7577_vm8 = vcmp.gt.f32.partialorder %v16239_v32, 0.0  ;;  %vm7579_vm9 = vcmp.gt.f32.partialorder %v7515_v61, 0.0  ;;  %v7704_v63 = vmax.f32 %v7702_v37, %v16030_v34 }
0x1742   : > { %10653 = vpow2.f32 %v7939_v46  ;;  %v7879_v59 = vmul.f32 1.442695, %v7797_v24  ;;  %v18016_v53 = vmax.f32 %v16159_v25, %v16014_v8  ;;  %vm7581_vm11 = vcmp.gt.f32.partialorder %v16246_v27, 0.0 }
0x1743   : > { %v7717_v11 = vmax.f32 %v7715_v13, %v16038_v49  ;;  %10655 = vpow2.f32 %v7955_v5  ;;  %v7821_v43 = vsub.f32 %v16005_v14, %v16222_v41  ;;  %v7895_v26 = vmul.f32 1.442695, %v7805_v19 }
0x1744   : > { %v16260_v48 = vmax.f32 %v18016_v53, %v16136_v30  ;;  %vm7575_vm12 = vcmp.gt.f32.partialorder %v16251_v3, 0.0  ;;  %v16270_v34 = vsel %vm7561_vm5, %v15653_v40, -inf  ;;  %v16275_v8 = vsel %vm7569_vm7, %v15657_v55, -inf  ;;  %v7289_v49 = vpop.xlane.xlu0 %7288 }
0x1745   : > { %10657 = vpow2.f32 %v7847_v56  ;;  %v7911_v30 = vmul.f32 1.442695, %v7813_v62  ;;  %v7829_v25 = vsub.f32 %v16129_v60, %v16222_v41  ;;  %v16280_v14 = vsel %vm7529_vm3, %v7289_v49, -inf }
0x1746   : > { %10659 = vpow2.f32 %v7863_v33  ;;  %v7706_v23 = vmax.f32 %v7704_v63, %v16085_v38  ;;  %v16283_v16 = vpop.eup %10641  ;;  %v16288_v40 = vsel %vm7553_vm2, %v16172_v1, -inf  ;;  %v7837_v55 = vsub.f32 %v16191_v9, %v16222_v41 }
0x1747   : > { %10661 = vpow2.f32 %v7879_v59  ;;  %v7756_v60 = vsel %vm7650_vm6, %v16280_v14, -inf  ;;  %v16294_v58 = vpop.eup %10643  ;;  %v7971_v50 = vsel %vm7650_vm6, %v16283_v16, 0.0  ;;  %v7927_v38 = vmul.f32 1.442695, %v7821_v43 }
0x1748   : > { %10663 = vpow2.f32 %v7895_v26  ;;  %v7758_v39 = vmax.f32 %v7756_v60, %v16108_v51  ;;  %v16299_v37 = vpop.eup %10645  ;;  %v7763_v1 = vsel %vm7650_vm6, %v16270_v34, -inf  ;;  %v7972_v9 = vsel %vm7650_vm6, %v16294_v58, 0.0  ;;  %v7439_v45 = vpop.xlane.xlu0 %7438 }
0x1749   : > { %10665 = vpow2.f32 %v7911_v30  ;;  %v16306_v28 = vmax.f32 %v7717_v11, %v16089_v52  ;;  %v16308_v41 = vpop.eup %10647  ;;  %v16312_v44 = vsel %vm7650_vm6, %v16275_v8, -inf  ;;  %v7973_v51 = vadd.f32 %v7972_v9, %v7971_v50 }
0x174a   : > { %v7943_v46 = vmul.f32 1.442695, %v7829_v25  ;;  %v7760_v6 = vmax.f32 %v7758_v39, %v16095_v15  ;;  %v16315_v47 = vpop.eup %10649  ;;  %v7974_v20 = vsel %vm7650_vm6, %v16299_v37, 0.0  ;;  %v7761_v52 = vsel %vm7650_vm6, %v16288_v40, -inf }
0x174b   : > { %v7959_v24 = vmul.f32 1.442695, %v7837_v55  ;;  %v16322_v13 = vsel %vm7579_vm9, %v7439_v45, -inf  ;;  %v16324_v5 = vpop.eup %10651  ;;  %v7975_v19 = vadd.f32 %v7974_v20, %v7973_v51  ;;  %10667 = vpow2.f32 %v7927_v38 }
0x174c   : > { %v7762_v62 = vmax.f32 %v7760_v6, %v7761_v52  ;;  %v16327_v56 = vmax.f32 %v7706_v23, %v16176_v54  ;;  %v16329_v15 = vpop.eup %10653  ;;  %v7976_v33 = vsel %vm7650_vm6, %v16308_v41, 0.0  ;;  %v16336_v63 = vsel %vm7574_vm1, %v16208_v0, -inf  ;;  %v7445_v53 = vpop.xlane.xlu0 %7444 }
0x174d   : > { %v16340_v61 = vsel %vm7577_vm8, %v7433_v35, -inf  ;;  %v7679_v59 = vsel %vm7650_vm6, %v16322_v13, -inf  ;;  %v16344_v54 = vpop.eup %10655  ;;  %v7977_v11 = vadd.f32 %v7976_v33, %v7975_v19  ;;  %10669 = vpow2.f32 %v7943_v46  ;;  %v18017_v33 = vld [vmem:[#allocation92_spill] sm:$0xff] }
0x174e   : > { %v7680_v43 = vmax.f32 %v16260_v48, %v7679_v59  ;;  %v16349_v26 = vsel %vm7581_vm11, %v7445_v53, -inf  ;;  %v7978_v7 = vsel %vm7650_vm6, %v16315_v47, 0.0  ;;  %10671 = vpow2.f32 %v7959_v24  ;;  %v18018_v53 = vld [vmem:[#allocation141_spill] sm:$0xff] }
0x174f   : > { %v16351_v0 = vpop.eup %10657  ;;  %v16358_v32 = vsel %vm7575_vm12, %v16224_v22, -inf  ;;  %v7764_v35 = vmax.f32 %v7762_v62, %v7763_v1  ;;  %v7979_v49 = vadd.f32 %v7978_v7, %v7977_v11  ;;  %v7767_v48 = vsel %vm7650_vm6, %v16340_v61, -inf }
0x1750   : > { %v16360_v30 = vpop.eup %10659  ;;  %v8001_v27 = vsel %vm7650_vm6, %v16351_v0, 0.0  ;;  %v7772_v25 = vmax.f32 %v7680_v43, -1e+30  ;;  %v7980_v55 = vsel %vm7650_vm6, %v16324_v5, 0.0  ;;  %v7709_v3 = vsel %vm7650_vm6, %v16349_v26, -inf }
0x1751   : > { %v16366_v23 = vpop.eup %10661  ;;  %v8002_v22 = vsel %vm7650_vm6, %v16360_v30, 0.0  ;;  %v7766_v60 = vmax.f32 %v7764_v35, %v16312_v44  ;;  %v7981_v38 = vadd.f32 %v7980_v55, %v7979_v49  ;;  %v7982_v39 = vsel %vm7650_vm6, %v16329_v15, 0.0 }
0x1752   : > { %v16375_v50 = vpop.eup %10663  ;;  %v8003_v1 = vadd.f32 %v8002_v22, %v8001_v27  ;;  %v7780_v9 = vsub.f32 %v15925_v10, %v7772_v25  ;;  %v7984_v51 = vsel %vm7650_vm6, %v16344_v54, 0.0  ;;  %v8004_v46 = vsel %vm7650_vm6, %v16366_v23, 0.0 }
0x1753   : > { %v16380_v45 = vpop.eup %10665  ;;  %v7788_v6 = vsub.f32 %v15790_v57, %v7772_v25  ;;  %v7796_v44 = vsub.f32 %v15794_v36, %v7772_v25  ;;  %v7983_v20 = vadd.f32 %v7982_v39, %v7981_v38  ;;  %v7804_v24 = vsub.f32 %v15846_v29, %v7772_v25 }
0x1754   : > { %v8005_v52 = vadd.f32 %v8004_v46, %v8003_v1  ;;  %v7710_v19 = vmax.f32 %v16327_v56, %v7709_v3  ;;  %v8006_v10 = vsel %vm7650_vm6, %v16375_v50, 0.0  ;;  %v8008_v62 = vsel %vm7650_vm6, %v16380_v45, 0.0 }
0x1755   : > { %v7812_v59 = vsub.f32 %v18017_v33, %v7772_v25  ;;  %v7820_v11 = vsub.f32 %v18018_v53, %v7772_v25  ;;  %v16396_v43 = vpop.eup %10667  ;;  %v7985_v57 = vadd.f32 %v7984_v51, %v7983_v20  ;;  %v7828_v7 = vsub.f32 %v16113_v4, %v7772_v25  ;;  %v7518_v20 = vld [vmem:[%s15660_s0 + $0x1e0] sm:$0xff] }
0x1756   : > { %v8007_v36 = vadd.f32 %v8006_v10, %v8005_v52  ;;  %v7845_v35 = vmul.f32 1.442695, %v7780_v9  ;;  %v7836_v29 = vsub.f32 %v16322_v13, %v7772_v25  ;;  %v7861_v56 = vmul.f32 1.442695, %v7788_v6 }
0x1757   : > { %v7877_v49 = vmul.f32 1.442695, %v7796_v44  ;;  %v16400_v27 = vmax.f32 %v7766_v60, %v7767_v48  ;;  %v16402_v55 = vpop.eup %10669  ;;  %vm8091_vm13 = vcmp.gt.f32.partialorder %v7985_v57, 0.0  ;;  %v7893_v3 = vmul.f32 1.442695, %v7804_v24  ;;  %v18019_v24 = vld [vmem:[#allocation64_spill] sm:$0xff] }
0x1758   : > { %v8009_v22 = vadd.f32 %v8008_v62, %v8007_v36  ;;  %10673 = vpow2.f32 %v7845_v35  ;;  %v16404_v38 = vpop.eup %10671  ;;  %v8099_v39 = vsel %vm8091_vm13, %v7985_v57, 1.0  ;;  %v8010_v4 = vsel %vm7650_vm6, %v16396_v43, 0.0  ;;  %v18020_v62 = vld [vmem:[#allocation83_spill] sm:$0xff]  ;;  %v18022_v36 = vld [vmem:[#allocation126_spill] sm:$0xff] }
0x1759   : > { %10675 = vpow2.f32 %v7861_v56  ;;  %v7909_v1 = vmul.f32 1.442695, %v7812_v59  ;;  %v7722_v48 = vsel %vm7650_vm6, %v16336_v63, -inf  ;;  %v7925_v25 = vmul.f32 1.442695, %v7820_v11  ;;  %v7519_v59 = vld [vmem:[%s15660_s0 + $0x1e8] sm:$0xff] }
0x175a   : > { %10677 = vrcp.f32 %v8099_v39  ;;  %v8011_v13 = vadd.f32 %v8010_v4, %v8009_v22  ;;  %v8012_v60 = vsel %vm7650_vm6, %v16402_v55, 0.0  ;;  %v7941_v9 = vmul.f32 1.442695, %v7828_v7  ;;  %v18021_v11 = vld [vmem:[#allocation131_spill] sm:$0xff]  ;;  %v18026_v4 = vld [vmem:[#allocation80_spill] sm:$0xff] }
0x175b   : > { %10679 = vpow2.f32 %v7877_v49  ;;  %v16412_v51 = vmax.f32 %v7710_v19, -1e+30  ;;  %v8014_v6 = vsel %vm7650_vm6, %v16404_v38, 0.0  ;;  %v7957_v44 = vmul.f32 1.442695, %v7836_v29  ;;  %v18024_v29 = vld [vmem:[#allocation53_spill] sm:$0xff] }
0x175c   : > { %v8013_v46 = vadd.f32 %v8012_v60, %v8011_v13  ;;  %10681 = vpow2.f32 %v7893_v3  ;;  %v7737_v53 = vsel %vm7650_vm6, %v16358_v32, -inf  ;;  %v7721_v7 = vmax.f32 %v16306_v28, %v18022_v36  ;;  %v18025_v39 = vld [vmem:[#allocation51_spill] sm:$0xff] }
0x175d   : > { %10683 = vpow2.f32 %v7909_v1  ;;  %v7782_v52 = vsub.f32 %v16124_v21, %v16412_v51  ;;  %v7790_v10 = vsub.f32 %v18019_v24, %v16412_v51  ;;  %v7798_v33 = vsub.f32 %v18020_v62, %v16412_v51  ;;  %v18023_v21 = vld [vmem:[#allocation133_spill] sm:$0xff] }
0x175e   : > { %v8015_v19 = vadd.f32 %v8014_v6, %v8013_v46  ;;  %10685 = vpow2.f32 %v7925_v25  ;;  %v7806_v57 = vsub.f32 %v18021_v11, %v16412_v51  ;;  %v7814_v35 = vsub.f32 %v18023_v21, %v16412_v51 }
0x175f   : > { %10687 = vpow2.f32 %v7941_v9  ;;  %vm7582_vm15 = vcmp.gt.f32.partialorder %v7518_v20, 0.0  ;;  %v7822_v56 = vsub.f32 %v18024_v29, %v16412_v51  ;;  %v7849_v49 = vmul.f32 1.442695, %v7782_v52 }
0x1760   : > { %v7865_v22 = vmul.f32 1.442695, %v7790_v10  ;;  %vm7583_vm0 = vcmp.gt.f32.partialorder %v7519_v59, 0.0  ;;  %v7723_v3 = vmax.f32 %v7721_v7, %v7722_v48  ;;  %v18027_v1 = vmax.f32 %v18025_v39, %v18026_v4  ;;  %v7448_v28 = vpop.xlane.xlu0 %7447 }
0x1761   : > { %10689 = vpow2.f32 %v7957_v44  ;;  %v7881_v25 = vmul.f32 1.442695, %v7798_v33  ;;  %vm8093_vm10 = vcmp.gt.f32.partialorder %v8015_v19, 0.0  ;;  %v7830_v9 = vsub.f32 %v16145_v17, %v16412_v51 }
0x1762   : > { %v16437_v13 = vmax.f32 %v18027_v1, %v7737_v53  ;;  %v16439_v60 = vpop.eup %10673  ;;  %v7838_v46 = vsub.f32 %v16349_v26, %v16412_v51  ;;  %v7897_v6 = vmul.f32 1.442695, %v7806_v57  ;;  %10691 = vpow2.f32 %v7849_v49 }
0x1763   : > { %v16445_v52 = vpop.eup %10675  ;;  %v7986_v48 = vsel %vm7650_vm6, %v16439_v60, 0.0  ;;  %v7913_v24 = vmul.f32 1.442695, %v7814_v35  ;;  %v16450_v44 = vsel %vm7582_vm15, %v7448_v28, -inf  ;;  %10693 = vpow2.f32 %v7865_v22 }
0x1764   : > { %v16452_v10 = vpop.eup %10677  ;;  %v7987_v62 = vsel %vm7650_vm6, %v16445_v52, 0.0  ;;  %v7929_v17 = vmul.f32 1.442695, %v7822_v56  ;;  %v7724_v26 = vsel %vm7650_vm6, %v16450_v44, -inf  ;;  %10695 = vpow2.f32 %v7881_v25  ;;  %v7451_v11 = vpop.xlane.xlu0 %7450 }
0x1765   : > { %v16458_v51 = vpop.eup %10679  ;;  %v7988_v33 = vadd.f32 %v7987_v62, %v7986_v48  ;;  %v7725_v53 = vmax.f32 %v7723_v3, %v7724_v26  ;;  %v8123_v20 = vmul.f32 %v16452_v10, %v16294_v58  ;;  %10697 = vpow2.f32 %v7897_v6 }
0x1766   : > { %v16462_v57 = vpop.eup %10681  ;;  %v7989_v36 = vsel %vm7650_vm6, %v16458_v51, 0.0  ;;  %v7945_v7 = vmul.f32 1.442695, %v7830_v9  ;;  %v8115_v21 = vmul.f32 %v16452_v10, %v16283_v16  ;;  %10699 = vpow2.f32 %v7913_v24  ;;  %v18029_v9 = vld [vmem:[#allocation127_spill] sm:$0xff] }
0x1767   : > { %v16468_v35 = vpop.eup %10683  ;;  %v7990_v29 = vadd.f32 %v7989_v36, %v7988_v33  ;;  %v16470_v56 = vmax.f32 %v7725_v53, -1e+30  ;;  %v16473_v49 = vsel %vm7583_vm0, %v7451_v11, -inf  ;;  %8221 = vperm.xlu0 %9872, %v8123_v20   ;;  %v8101_v22 = vsel %vm8093_vm10, %v8015_v19, 1.0  ;;  %v18028_v19 = vld [vmem:[#allocation96_spill] sm:$0xff]  ;;  %v18032_v53 = vld [vmem:[#allocation99_spill] sm:$0xff] }
0x1768   : > { %v16475_v58 = vpop.eup %10685  ;;  %v7991_v3 = vsel %vm7650_vm6, %v16462_v57, 0.0  ;;  %10701 = vpow2.f32 %v7929_v17  ;;  %v7961_v39 = vmul.f32 1.442695, %v7838_v46  ;;  %8181 = vperm.xlu1 %9871, %v8115_v21   ;;  %v7993_v1 = vsel %vm7650_vm6, %v16468_v35, 0.0 }
0x1769   : > { %v16480_v16 = vpop.eup %10687  ;;  %v7992_v4 = vadd.f32 %v7991_v3, %v7990_v29  ;;  %v7783_v59 = vsub.f32 %v16154_v2, %v16470_v56  ;;  %v8163_v25 = vmul.f32 %v16452_v10, %v16329_v15  ;;  %10703 = vpow2.f32 %v7945_v7  ;;  %v18030_v2 = vld [vmem:[#allocation120_spill] sm:$0xff] }
0x176a   : > { %v7791_v28 = vsub.f32 %v18028_v19, %v16470_v56  ;;  %v7799_v46 = vsub.f32 %v18029_v9, %v16470_v56  ;;  %v7739_v6 = vsel %vm7650_vm6, %v16473_v49, -inf  ;;  %v7995_v62 = vsel %vm7650_vm6, %v16475_v58, 0.0  ;;  %v18031_v15 = vld [vmem:[#allocation48_spill] sm:$0xff] }
0x176b   : > { %v16494_v48 = vpop.eup %10689  ;;  %v7994_v24 = vadd.f32 %v7993_v1, %v7992_v4  ;;  %v7807_v17 = vsub.f32 %v18030_v2, %v16470_v56  ;;  %v7815_v26 = vsub.f32 %v18031_v15, %v16470_v56  ;;  %8421 = vperm.xlu0 %9872, %v8163_v25   ;;  %v7997_v33 = vsel %vm7650_vm6, %v16480_v16, 0.0 }
0x176c   : > { %10705 = vpow2.f32 %v7961_v39  ;;  %v7823_v11 = vsub.f32 %v18032_v53, %v16470_v56  ;;  %v7851_v20 = vmul.f32 1.442695, %v7783_v59  ;;  %v16506_v36 = vpop.eup %10691  ;;  %v7867_v21 = vmul.f32 1.442695, %v7791_v28 }
0x176d   : > { %v7996_v7 = vadd.f32 %v7995_v62, %v7994_v24  ;;  %v7883_v29 = vmul.f32 1.442695, %v7799_v46  ;;  %v7899_v3 = vmul.f32 1.442695, %v7807_v17  ;;  %v16508_v4 = vpop.eup %10693  ;;  %v7999_v1 = vsel %vm7650_vm6, %v16494_v48, 0.0 }
0x176e   : > { %v8016_v25 = vsel %vm7650_vm6, %v16506_v36, 0.0  ;;  %v7831_v39 = vsub.f32 %v16336_v63, %v16470_v56  ;;  %10707 = vpow2.f32 %v7851_v20  ;;  %v16516_v19 = vpop.eup %10695  ;;  %v8017_v28 = vsel %vm7650_vm6, %v16508_v4, 0.0 }
0x176f   : > { %v7998_v59 = vadd.f32 %v7997_v33, %v7996_v7  ;;  %10709 = vpow2.f32 %v7867_v21  ;;  %v7915_v9 = vmul.f32 1.442695, %v7815_v26  ;;  %v16520_v46 = vpop.eup %10697  ;;  %v8018_v24 = vadd.f32 %v8017_v28, %v8016_v25  ;;  %v18035_v28 = vld [vmem:[#allocation125_spill] sm:$0xff] }
0x1770   : > { %v7839_v62 = vsub.f32 %v16450_v44, %v16470_v56  ;;  %10711 = vpow2.f32 %v7883_v29  ;;  %v7931_v2 = vmul.f32 1.442695, %v7823_v11  ;;  %v16524_v17 = vpop.eup %10699  ;;  %v8019_v15 = vsel %vm7650_vm6, %v16516_v19, 0.0 }
0x1771   : > { %v8000_v63 = vadd.f32 %v7999_v1, %v7998_v59  ;;  %10713 = vpow2.f32 %v7899_v3  ;;  %v7740_v33 = vmax.f32 %v16437_v13, %v7739_v6  ;;  %v8020_v26 = vadd.f32 %v8019_v15, %v8018_v24  ;;  %v18034_v1 = vld [vmem:[#allocation121_spill] sm:$0xff] }
0x1772   : > { %v16529_v53 = vpop.eup %10701  ;;  %10715 = vrcp.f32 %v8101_v22  ;;  %v7947_v20 = vmul.f32 1.442695, %v7831_v39  ;;  %v8131_v7 = vmul.f32 %v16452_v10, %v16299_v37  ;;  %v8021_v44 = vsel %vm7650_vm6, %v16520_v46, 0.0  ;;  %v18033_v37 = vld [vmem:[#allocation123_spill] sm:$0xff]  ;;  %v18036_v24 = vld [vmem:[#allocation129_spill] sm:$0xff] }
0x1773   : > { %vm8092_vm4 = vcmp.gt.f32.partialorder %v8000_v63, 0.0  ;;  %10717 = vpow2.f32 %v7915_v9  ;;  %v16535_v56 = vmax.f32 %v7740_v33, -1e+30  ;;  %v16537_v11 = vpop.eup %10703  ;;  %v8022_v29 = vadd.f32 %v8021_v44, %v8020_v26  ;;  %v18038_v33 = vld [vmem:[#allocation76_spill] sm:$0xff] }
0x1774   : > { %v8100_v21 = vsel %vm8092_vm4, %v8000_v63, 1.0  ;;  %v8023_v13 = vsel %vm7650_vm6, %v16524_v17, 0.0  ;;  %v7963_v22 = vmul.f32 1.442695, %v7839_v62  ;;  %8261 = vperm.xlu1 %9871, %v8131_v7   ;;  %v8025_v6 = vsel %vm7650_vm6, %v16529_v53, 0.0  ;;  %v18037_v63 = vld [vmem:[#allocation88_spill] sm:$0xff] }
0x1775   : > { %10719 = vpow2.f32 %v7931_v2  ;;  %v7784_v3 = vsub.f32 %v18033_v37, %v16535_v56  ;;  %v7792_v25 = vsub.f32 %v18034_v1, %v16535_v56  ;;  %v8024_v59 = vadd.f32 %v8023_v13, %v8022_v29 }
0x1776   : > { %v16547_v39 = vpop.eup %10705  ;;  %10721 = vpow2.f32 %v7947_v20  ;;  %v7800_v9 = vsub.f32 %v18035_v28, %v16535_v56  ;;  %v7808_v62 = vsub.f32 %v18036_v24, %v16535_v56  ;;  %v8027_v2 = vsel %vm7650_vm6, %v16537_v11, 0.0 }
0x1777   : > { %10723 = vrcp.f32 %v8100_v21  ;;  %v7816_v15 = vsub.f32 %v18037_v63, %v16535_v56  ;;  %v7824_v26 = vsub.f32 %v18038_v33, %v16535_v56  ;;  %v8026_v44 = vadd.f32 %v8025_v6, %v8024_v59 }
0x1778   : > { %v16559_v7 = vpop.eup %10707  ;;  %v7853_v20 = vmul.f32 1.442695, %v7784_v3  ;;  %v7869_v29 = vmul.f32 1.442695, %v7792_v25  ;;  %v7885_v13 = vmul.f32 1.442695, %v7800_v9  ;;  %10725 = vpow2.f32 %v7963_v22 }
0x1779   : > { %v16561_v37 = vpop.eup %10709  ;;  %v8031_v21 = vsel %vm7650_vm6, %v16559_v7, 0.0  ;;  %v7901_v1 = vmul.f32 1.442695, %v7808_v62  ;;  %v8171_v28 = vmul.f32 %v16452_v10, %v16344_v54  ;;  %v8028_v63 = vadd.f32 %v8027_v2, %v8026_v44 }
0x177a   : > { %v16567_v24 = vpop.eup %10711  ;;  %v8029_v33 = vsel %vm7650_vm6, %v16547_v39, 0.0  ;;  %v8032_v6 = vsel %vm7650_vm6, %v16561_v37, 0.0  ;;  %10727 = vpow2.f32 %v7853_v20  ;;  %v7832_v25 = vsub.f32 %v16358_v32, %v16535_v56 }
0x177b   : > { %v16573_v3 = vpop.eup %10713  ;;  %v8033_v22 = vadd.f32 %v8032_v6, %v8031_v21  ;;  %10729 = vpow2.f32 %v7869_v29  ;;  %v7917_v59 = vmul.f32 1.442695, %v7816_v15  ;;  %8461 = vperm.xlu0 %9872, %v8171_v28   ;;  %v8030_v9 = vadd.f32 %v8029_v33, %v8028_v63 }
0x177c   : > { %v16577_v54 = vpop.eup %10715  ;;  %v8034_v62 = vsel %vm7650_vm6, %v16567_v24, 0.0  ;;  %v7840_v2 = vsub.f32 %v16473_v49, %v16535_v56  ;;  %10731 = vpow2.f32 %v7885_v13  ;;  %v7933_v21 = vmul.f32 1.442695, %v7824_v26 }
0x177d   : > { %v16583_v44 = vpop.eup %10717  ;;  %v8035_v20 = vadd.f32 %v8034_v62, %v8033_v22  ;;  %10733 = vpow2.f32 %v7901_v1  ;;  %v8139_v32 = vmul.f32 %v16452_v10, %v16308_v41  ;;  %vm8094_vm14 = vcmp.gt.f32.partialorder %v8030_v9, 0.0 }
0x177e   : > { %v8036_v15 = vsel %vm7650_vm6, %v16573_v3, 0.0  ;;  %v8102_v28 = vsel %vm8094_vm14, %v8030_v9, 1.0  ;;  %10735 = vpow2.f32 %v7917_v59  ;;  %v7949_v33 = vmul.f32 1.442695, %v7832_v25 }
0x177f   : > { %v16589_v29 = vpop.eup %10719  ;;  %v8037_v63 = vadd.f32 %v8036_v15, %v8035_v20  ;;  %8301 = vperm.xlu1 %9871, %v8139_v32   ;;  %10737 = vrcp.f32 %v8102_v28  ;;  %v8038_v56 = vsel %vm7650_vm6, %v16583_v44, 0.0  ;;  %v8133_v41 = vmul.f32 %v16577_v54, %v16366_v23 }
0x1780   : > { %v16591_v49 = vpop.eup %10721  ;;  %10739 = vpow2.f32 %v7933_v21  ;;  %v7965_v1 = vmul.f32 1.442695, %v7840_v2  ;;  %v8147_v6 = vmul.f32 %v16452_v10, %v16315_v47  ;;  %v8040_v22 = vsel %vm7650_vm6, %v16589_v29, 0.0 }
0x1781   : > { %v16597_v26 = vpop.eup %10723  ;;  %v8039_v13 = vadd.f32 %v8038_v56, %v8037_v63  ;;  %8271 = vperm.xlu0 %9872, %v8133_v41   ;;  %10741 = vpow2.f32 %v7949_v33  ;;  %v8042_v23 = vsel %vm7650_vm6, %v16591_v49, 0.0  ;;  %v8141_v62 = vmul.f32 %v16577_v54, %v16375_v50 }
0x1782   : > { %v16603_v25 = vpop.eup %10725  ;;  %10743 = vpow2.f32 %v7965_v1  ;;  %v8155_v21 = vmul.f32 %v16452_v10, %v16324_v5  ;;  %v8116_v56 = vmul.f32 %v16597_v26, %v16439_v60  ;;  %v8165_v10 = vmul.f32 %v16577_v54, %v16402_v55  ;;  %v7521_v1 = vld [vmem:[%s15660_s0 + $0x1f8] sm:$0xff] }
0x1783   : > { %v8041_v59 = vadd.f32 %v8040_v22, %v8039_v13  ;;  %8341 = vperm.xlu1 %9871, %v8147_v6   ;;  %v8044_v15 = vsel %vm7650_vm6, %v16603_v25, 0.0  ;;  %v8173_v55 = vmul.f32 %v16577_v54, %v16404_v38  ;;  %vm7585_vm7 = vcmp.gt.f32.partialorder %v7521_v1, 0.0 }
0x1784   : > { %v16605_v9 = vpop.eup %10727 }
0x1785   : > { %v16611_v2 = vpop.eup %10729  ;;  %v8043_v47 = vadd.f32 %v8042_v23, %v8041_v59  ;;  %v8046_v20 = vsel %vm7650_vm6, %v16605_v9, 0.0  ;;  %8311 = vperm.xlu0 %9872, %v8141_v62  }
0x1786   : > { %v16617_v32 = vpop.eup %10731  ;;  %v8047_v28 = vsel %vm7650_vm6, %v16611_v2, 0.0 }
0x1787   : > { %v16623_v50 = vpop.eup %10733  ;;  %v8045_v63 = vadd.f32 %v8044_v15, %v8043_v47  ;;  %v8048_v33 = vadd.f32 %v8047_v28, %v8046_v20  ;;  %8381 = vperm.xlu1 %9871, %v8155_v21   ;;  %v8049_v5 = vsel %vm7650_vm6, %v16617_v32, 0.0  ;;  %v8124_v21 = vmul.f32 %v16597_v26, %v16445_v52 }
0x1788   : > { %v16631_v41 = vpop.eup %10735  ;;  %v8051_v22 = vsel %vm7650_vm6, %v16623_v50, 0.0 }
0x1789   : > { %vm8095_vm5 = vcmp.gt.f32.partialorder %v8045_v63, 0.0  ;;  %v8050_v13 = vadd.f32 %v8049_v5, %v8048_v33  ;;  %v16634_v6 = vpop.eup %10737  ;;  %8431 = vperm.xlu0 %9872, %v8165_v10   ;;  %v8053_v62 = vsel %vm7650_vm6, %v16631_v41, 0.0 }
0x178a   : > { %v16638_v59 = vpop.eup %10739  ;;  %v8103_v23 = vsel %vm8095_vm5, %v8045_v63, 1.0  ;;  %v16650_v15 = vmul.f32 %v16634_v6, %v16506_v36  ;;  %v16654_v28 = vmul.f32 %v16634_v6, %v16537_v11  ;;  %v8126_v38 = vmul.f32 %v16634_v6, %v16508_v4 }
0x178b   : > { %v8052_v60 = vadd.f32 %v8051_v22, %v8050_v13  ;;  %8186 = vperm.xlu1 %9871, %v8116_v56   ;;  %v16644_v47 = vpop.eup %10741  ;;  %v8055_v63 = vsel %vm7650_vm6, %v16638_v59, 0.0  ;;  %v16662_v33 = vmul.f32 %v16634_v6, %v16547_v39  ;;  %10745 = vrcp.f32 %v8103_v23 }
0x178c   : > { %v16664_v52 = vpop.eup %10743  ;;  %v8057_v11 = vsel %vm7650_vm6, %v16644_v47, 0.0  ;;  %v8132_v13 = vmul.f32 %v16597_v26, %v16458_v51 }
0x178d   : > { %v8054_v20 = vadd.f32 %v8053_v62, %v8052_v60  ;;  %8471 = vperm.xlu0 %9872, %v8173_v55   ;;  %v8059_v39 = vsel %vm7650_vm6, %v16664_v52, 0.0  ;;  %v7520_v60 = vld [vmem:[%s15660_s0 + $0x1f0] sm:$0xff]  ;;  %v8134_v62 = vmul.f32 %v16634_v6, %v16516_v19  ;;  %v8140_v55 = vmul.f32 %v16597_v26, %v16462_v57 }
0x178e   : > { %v7457_v56 = vpop.xlane.xlu0 %7456  ;;  %vm7584_vm3 = vcmp.gt.f32.partialorder %v7520_v60, 0.0  ;;  %v8142_v57 = vmul.f32 %v16634_v6, %v16520_v46 }
0x178f   : > { %v8056_v36 = vadd.f32 %v8055_v63, %v8054_v20  ;;  %8226 = vperm.xlu1 %9871, %v8124_v21   ;;  %v7649_v5 = vsel %vm7585_vm7, %v7457_v56, -inf  ;;  %v18039_v21 = vld [vmem:[#allocation122_spill] sm:$0xff] }
0x1790   : > { %v7769_v4 = vsel %vm7650_vm6, %v7649_v5, -inf }
0x1791   : > { %v8058_v10 = vadd.f32 %v8057_v11, %v8056_v36  ;;  %8236 = vperm.xlu0 %9872, %v8126_v38   ;;  %v7770_v22 = vmax.f32 %v16400_v27, %v7769_v4  ;;  %v18040_v38 = vld [vmem:[#allocation138_spill] sm:$0xff] }
0x1793   : > { %v8060_v23 = vadd.f32 %v8059_v39, %v8058_v10  ;;  %8266 = vperm.xlu1 %9871, %v8132_v13   ;;  %v7778_v1 = vmax.f32 %v7770_v22, -1e+30  ;;  %v8148_v39 = vmul.f32 %v16597_v26, %v16468_v35 }
0x1795   : > { %vm8096_vm2 = vcmp.gt.f32.partialorder %v8060_v23, 0.0  ;;  %8276 = vperm.xlu0 %9872, %v8134_v62   ;;  %v7786_v20 = vsub.f32 %v16280_v14, %v7778_v1  ;;  %v7794_v63 = vsub.f32 %v18039_v21, %v7778_v1  ;;  %v7802_v27 = vsub.f32 %v18040_v38, %v7778_v1  ;;  %v7454_v14 = vpop.xlane.xlu1 %7453  ;;  %v16689_v4 = vpop.eup %10745  ;;  %v18041_v21 = vld [vmem:[#allocation130_spill] sm:$0xff]  ;;  %v18042_v38 = vld [vmem:[#allocation135_spill] sm:$0xff] }
0x1796   : > { %v8104_v51 = vsel %vm8096_vm2, %v8060_v23, 1.0  ;;  %v7810_v36 = vsub.f32 %v16288_v40, %v7778_v1  ;;  %v7818_v19 = vsub.f32 %v16270_v34, %v7778_v1  ;;  %v7826_v56 = vsub.f32 %v16275_v8, %v7778_v1 }
0x1797   : > { %10747 = vrcp.f32 %v8104_v51  ;;  %8306 = vperm.xlu1 %9871, %v8140_v55   ;;  %v7834_v11 = vsub.f32 %v16340_v61, %v7778_v1  ;;  %v7857_v10 = vmul.f32 1.442695, %v7786_v20  ;;  %v7873_v13 = vmul.f32 1.442695, %v7794_v63 }
0x1798   : > { %v7889_v22 = vmul.f32 1.442695, %v7802_v27  ;;  %v7905_v23 = vmul.f32 1.442695, %v7810_v36  ;;  %v8150_v34 = vmul.f32 %v16634_v6, %v16524_v17  ;;  %v7842_v8 = vsub.f32 %v7649_v5, %v7778_v1  ;;  %v18043_v27 = vld [vmem:[#allocation124_spill] sm:$0xff] }
0x1799   : > { %8316 = vperm.xlu0 %9872, %v8142_v57   ;;  %10749 = vpow2.f32 %v7857_v10  ;;  %v8156_v40 = vmul.f32 %v16597_v26, %v16475_v58  ;;  %v7921_v61 = vmul.f32 1.442695, %v7818_v19  ;;  %v7937_v46 = vmul.f32 1.442695, %v7826_v56 }
0x179a   : > { %10751 = vpow2.f32 %v7873_v13  ;;  %v16698_v62 = vsel %vm7584_vm3, %v7454_v14, -inf  ;;  %v16704_v55 = vmul.f32 %v16689_v4, %v16561_v37  ;;  %v16708_v17 = vmul.f32 %v16689_v4, %v16583_v44 }
0x179b   : > { %8346 = vperm.xlu1 %9871, %v8148_v39   ;;  %10753 = vpow2.f32 %v7889_v22  ;;  %v7754_v35 = vsel %vm7650_vm6, %v16698_v62, -inf  ;;  %v16713_v5 = vmul.f32 %v16689_v4, %v16589_v29  ;;  %v16717_v60 = vmul.f32 %v16689_v4, %v16591_v49 }
0x179c   : > { %10755 = vpow2.f32 %v7905_v23  ;;  %v7755_v58 = vmax.f32 %v16227_v12, %v7754_v35  ;;  %v16721_v37 = vmul.f32 %v16689_v4, %v16603_v25  ;;  %v7953_v1 = vmul.f32 1.442695, %v7834_v11 }
0x179d   : > { %8356 = vperm.xlu0 %9872, %v8150_v34   ;;  %10757 = vpow2.f32 %v7921_v61  ;;  %v8164_v44 = vmul.f32 %v16597_v26, %v16480_v16  ;;  %v7969_v51 = vmul.f32 1.442695, %v7842_v8  ;;  %v8158_v29 = vmul.f32 %v16634_v6, %v16529_v53  ;;  %v18044_v53 = vld [vmem:[#allocation143_spill] sm:$0xff] }
0x179e   : > { %v16725_v12 = vmax.f32 %v7755_v58, -1e+30  ;;  %v8119_v49 = vmul.f32 %v16689_v4, %v16559_v7  ;;  %v8172_v20 = vmul.f32 %v16597_v26, %v16494_v48  ;;  %10759 = vpow2.f32 %v7937_v46  ;;  %v8699_v46 = vld [vmem:[%s17180_s8] sm:$0xff]  ;;  %v8702_v58 = vld [vmem:[%s17180_s8 + $0x18] sm:$0xff] }
0x179f   : > { %8386 = vperm.xlu1 %9871, %v8156_v40   ;;  %10761 = vpow2.f32 %v7953_v1  ;;  %v8135_v13 = vmul.f32 %v16689_v4, %v16567_v24 }
0x17a0   : > { %v7785_v63 = vsub.f32 %v18041_v21, %v16725_v12  ;;  %v7793_v16 = vsub.f32 %v18042_v38, %v16725_v12  ;;  %v7801_v36 = vsub.f32 %v18043_v27, %v16725_v12  ;;  %v7809_v6 = vsub.f32 %v18044_v53, %v16725_v12 }
0x17a1   : > { %v10748_v25 = vpop.eup %10747  ;;  %8396 = vperm.xlu0 %9872, %v8158_v29   ;;  %v7817_v7 = vsub.f32 %v16162_v42, %v16725_v12  ;;  %v7825_v48 = vsub.f32 %v16186_v18, %v16725_v12  ;;  %v7833_v26 = vsub.f32 %v16196_v31, %v16725_v12  ;;  %10763 = vpow2.f32 %v7969_v51 }
0x17a2   : > { %v7855_v19 = vmul.f32 1.442695, %v7785_v63  ;;  %v7871_v56 = vmul.f32 1.442695, %v7793_v16  ;;  %v7887_v57 = vmul.f32 1.442695, %v7801_v36  ;;  %v16752_v42 = vmul.f32 %v10748_v25, %v16605_v9 }
0x17a3   : > { %8426 = vperm.xlu1 %9871, %v8164_v44   ;;  %v16747_v11 = vpop.eup %10749  ;;  %v7903_v10 = vmul.f32 1.442695, %v7809_v6  ;;  %v7841_v31 = vsub.f32 %v16698_v62, %v16725_v12  ;;  %v7919_v39 = vmul.f32 1.442695, %v7817_v7  ;;  %v16765_v24 = vmul.f32 %v10748_v25, %v16631_v41  ;;  %v8700_v41 = vld [vmem:[%s17180_s8 + $0x8] sm:$0xff] }
0x17a4   : > { %v16754_v14 = vpop.eup %10751  ;;  %v8076_v18 = vsel %vm7650_vm6, %v16747_v11, 0.0  ;;  %10765 = vpow2.f32 %v7855_v19  ;;  %v16768_v9 = vmul.f32 %v10748_v25, %v16638_v59  ;;  %v7935_v40 = vmul.f32 1.442695, %v7825_v48 }
0x17a5   : > { %v16760_v22 = vpop.eup %10753  ;;  %v8077_v23 = vsel %vm7650_vm6, %v16754_v14, 0.0  ;;  %8201 = vperm.xlu0 %9872, %v8119_v49   ;;  %10767 = vpow2.f32 %v7871_v56  ;;  %v16773_v61 = vmul.f32 %v10748_v25, %v16611_v2  ;;  %v16784_v62 = vmul.f32 %v10748_v25, %v16617_v32  ;;  %v8701_v2 = vld [vmem:[%s17180_s8 + $0x10] sm:$0xff] }
0x17a6   : > { %v16770_v34 = vpop.eup %10755  ;;  %v8078_v8 = vadd.f32 %v8077_v23, %v8076_v18  ;;  %10769 = vpow2.f32 %v7887_v57  ;;  %v8079_v59 = vsel %vm7650_vm6, %v16760_v22, 0.0  ;;  %v16787_v35 = vmul.f32 %v10748_v25, %v16623_v50 }
0x17a7   : > { %8466 = vperm.xlu1 %9871, %v8172_v20   ;;  %10771 = vpow2.f32 %v7903_v10  ;;  %v16795_v1 = vpop.eup %10757  ;;  %v7951_v12 = vmul.f32 1.442695, %v7833_v26  ;;  %v8117_v51 = vmul.f32 %v16577_v54, %v16351_v0  ;;  %v16800_v32 = vmul.f32 %v10748_v25, %v16644_v47  ;;  %v8703_v0 = vld [vmem:[%s17180_s8 + $0x20] sm:$0xff]  ;;  %v8704_v47 = vld [vmem:[%s17180_s8 + $0x28] sm:$0xff] }
0x17a8   : > { %v8080_v44 = vadd.f32 %v8079_v59, %v8078_v8  ;;  %v8081_v50 = vsel %vm7650_vm6, %v16770_v34, 0.0  ;;  %10773 = vpow2.f32 %v7919_v39  ;;  %v16805_v29 = vmul.f32 %v10748_v25, %v16664_v52  ;;  %v16807_v20 = vpop.eup %10759 }
0x17a9   : > { %8281 = vperm.xlu0 %9872, %v8135_v13   ;;  %v9795_v49 = vpack.c.bf16 %v8700_v41, %v8699_v46  ;;  %v9799_v63 = vpack.c.bf16 %v8702_v58, %v8701_v2  ;;  %v8083_v38 = vsel %vm7650_vm6, %v16795_v1, 0.0  ;;  %10775 = vpow2.f32 %v7935_v40  ;;  %v16819_v16 = vpop.eup %10761 }
0x17aa   : > { %v8082_v21 = vadd.f32 %v8081_v50, %v8080_v44  ;;  %v7967_v52 = vmul.f32 1.442695, %v7841_v31  ;;  %v8143_v25 = vmul.f32 %v16689_v4, %v16573_v3  ;;  %v8125_v36 = vmul.f32 %v16577_v54, %v16360_v30  ;;  %v8705_v4 = vld [vmem:[%s17180_s8 + $0x30] sm:$0xff]  ;;  %v8706_v30 = vld [vmem:[%s17180_s8 + $0x38] sm:$0xff] }
0x17ab   : > { %8191 = vperm.xlu1 %9871, %v8117_v51   ;;  %9796 = vmatprep.subr.bf16.mxu1 %v9795_v49  ;;  %v16823_v53 = vpop.eup %10763  ;;  %v8085_v6 = vsel %vm7650_vm6, %v16807_v20, 0.0  ;;  %10777 = vpow2.f32 %v7951_v12  ;;  %v9803_v7 = vpack.c.bf16 %v8704_v47, %v8703_v0  ;;  %v8087_v19 = vsel %vm7650_vm6, %v16819_v16, 0.0 }
0x17ac   : > { %v8084_v27 = vadd.f32 %v8083_v38, %v8082_v21  ;;  %9798 = vmatpush3.bf16.msra.mxu1 %v9795_v49  ;;  %10779 = vpow2.f32 %v7967_v52  ;;  %v8149_v18 = vmul.f32 %v16577_v54, %v16380_v45  ;;  %v8089_v39 = vsel %vm7650_vm6, %v16823_v53, 0.0 }
0x17ad   : > { %8321 = vperm.xlu0 %9872, %v8143_v25   ;;  %9800 = vmatprep.subr.bf16.mxu1 %v9799_v63  ;;  %v9807_v8 = vpack.c.bf16 %v8706_v30, %v8705_v4  ;;  %v8157_v45 = vmul.f32 %v16577_v54, %v16396_v43  ;;  %v18050_v30 = vld [vmem:[#allocation36_spill] sm:$0xff] }
0x17ae   : > { %v16827_v48 = vpop.eup %10765  ;;  %v8086_v3 = vadd.f32 %v8085_v6, %v8084_v27 }
0x17af   : > { %8231 = vperm.xlu1 %9871, %v8125_v36   ;;  %v16835_v26 = vpop.eup %10767  ;;  %v8061_v56 = vsel %vm7650_vm6, %v16827_v48, 0.0 }
0x17b0   : > { %v10770_v57 = vpop.eup %10769  ;;  %v8088_v10 = vadd.f32 %v8087_v19, %v8086_v3  ;;  %v8062_v13 = vsel %vm7650_vm6, %v16835_v26, 0.0  ;;  %9802 = vmatpush3.bf16.msra.mxu1 %v9799_v63 }
0x17b1   : > { %v10772_v31 = vpop.eup %10771  ;;  %v8063_v23 = vadd.f32 %v8062_v13, %v8061_v56  ;;  %8206 = vperm.xlu0 %9872, %v16752_v42   ;;  %9804 = vmatprep.subr.bf16.mxu1 %v9803_v7  ;;  %v8064_v46 = vsel %vm7650_vm6, %v10770_v57, 0.0 }
0x17b2   : > { %v8090_v40 = vadd.f32 %v8089_v39, %v8088_v10  ;;  %v10774_v41 = vpop.eup %10773  ;;  %v8066_v2 = vsel %vm7650_vm6, %v10772_v31, 0.0 }
0x17b3   : > { %8351 = vperm.xlu1 %9871, %v8149_v18   ;;  %v8065_v59 = vadd.f32 %v8064_v46, %v8063_v23  ;;  %v10776_v58 = vpop.eup %10775  ;;  %v8068_v42 = vsel %vm7650_vm6, %v10774_v41, 0.0  ;;  %v18053_v18 = vld [vmem:[#allocation34_spill] sm:$0xff] }
0x17b4   : > { %vm8098_vm1 = vcmp.gt.f32.partialorder %v8090_v40, 0.0  ;;  %9806 = vmatpush3.bf16.msra.mxu1 %v9803_v7  ;;  %v8070_v49 = vsel %vm7650_vm6, %v10776_v58, 0.0 }
0x17b5   : > { %v8106_v44 = vsel %vm8098_vm1, %v8090_v40, 1.0  ;;  %v8067_v12 = vadd.f32 %v8066_v2, %v8065_v59  ;;  %8366 = vperm.xlu0 %9872, %v16765_v24   ;;  %9808 = vmatprep.subr.bf16.mxu1 %v9807_v8  ;;  %v10778_v51 = vpop.eup %10777  ;;  %v18056_v2 = vld [vmem:[#allocation47_spill] sm:$0xff] }
0x17b6   : > { %10781 = vrcp.f32 %v8106_v44  ;;  %v10780_v21 = vpop.eup %10779  ;;  %v8072_v43 = vsel %vm7650_vm6, %v10778_v51, 0.0  ;;  %v18057_v44 = vld [vmem:[#allocation8_spill] sm:$0xff] }
0x17b7   : > { %8391 = vperm.xlu1 %9871, %v8157_v45   ;;  %v8069_v50 = vadd.f32 %v8068_v42, %v8067_v12  ;;  %v8074_v24 = vsel %vm7650_vm6, %v10780_v21, 0.0  ;;  %vm18048_vm6 = vcmask 523264  }
0x17b8   : > { %9810 = vmatpush3.bf16.msra.mxu1 %v9807_v8  ;;  %vm18049_vm9 = vmmov %vm18048_vm6 }
0x17b9   : > { %v8071_v63 = vadd.f32 %v8070_v49, %v8069_v50  ;;  %8406 = vperm.xlu0 %9872, %v16768_v9   ;;  %vm18051_vm11 = vmmov %vm18048_vm6  ;;  %v8844_v50 = vld [vmem:[%s17183_s11] sm:$0xff]  ;;  %v8845_v49 = vld [vmem:[%s17183_s11 + $0x8] sm:$0xff] }
0x17ba   : > { %vm18052_vm12 = vmmov %vm18048_vm6 }
0x17bb   : > { %8196 = vperm.xlu1 %9871, %v16650_v15   ;;  %v8073_v54 = vadd.f32 %v8072_v43, %v8071_v63  ;;  %vm18054_vm13 = vmmov %vm18048_vm6 }
0x17bc   : > { %vm18058_vm15 = vmmov %vm18048_vm6 }
0x17bd   : > { %v8075_v0 = vadd.f32 %v8074_v24, %v8073_v54  ;;  %v9811_v54 = vpack.c.bf16 %v8845_v49, %v8844_v50  ;;  %v8847_v24 = vld [vmem:[%s17183_s11 + $0x18] sm:$0xff]  ;;  %vm18059_vm0 = vmmov %vm18048_vm6 }
0x17be   : > { %vm18060_vm10 = vmmov %vm18059_vm0 }
0x17bf   : > { %8436 = vperm.xlu1 %9871, %v16654_v28   ;;  %vm8097_vm8 = vcmp.gt.f32.partialorder %v8075_v0, 0.0  ;;  %9812 = vmatprep.subr.bf16.mxu0 %v9811_v54  ;;  %vm18061_vm4 = vmmov %vm18059_vm0 }
0x17c0   : > { %v10782_v47 = vpop.eup %10781  ;;  %v8105_v38 = vsel %vm8097_vm8, %v8075_v0, 1.0  ;;  %9814 = vmatpush3.bf16.msra.mxu0 %v9811_v54  ;;  %vm18062_vm14 = vmmov %vm18059_vm0 }
0x17c1   : > { %10783 = vrcp.f32 %v8105_v38  ;;  %v8130_v52 = vmul.f32 %v10782_v47, %v16754_v14  ;;  %v8122_v25 = vmul.f32 %v10782_v47, %v16747_v11  ;;  %v8154_v9 = vmul.f32 %v10782_v47, %v16795_v1  ;;  %v8848_v38 = vld [vmem:[%s17183_s11 + $0x20] sm:$0xff]  ;;  %vm18066_vm5 = vmmov %vm18059_vm0 }
0x17c2   : > { %v8138_v15 = vmul.f32 %v10782_v47, %v16760_v22  ;;  %v8162_v27 = vmul.f32 %v10782_v47, %v16807_v20  ;;  %v8146_v36 = vmul.f32 %v10782_v47, %v16770_v34  ;;  %v8170_v28 = vmul.f32 %v10782_v47, %v16819_v16  ;;  %vm18068_vm7 = vmmov %vm18059_vm0 }
0x17c3   : > { %8476 = vperm.xlu1 %9871, %v16662_v33   ;;  %v8178_v6 = vmul.f32 %v10782_v47, %v16823_v53  ;;  %vm18069_vm2 = vmmov %vm18059_vm0 }
0x17c4   : > { %vm18071_vm3 = vmmov %vm18059_vm0 }
0x17c5   : > { %vm18073_vm1 = vmmov %vm18059_vm0 }
0x17c6   : > { %vm18074_vm8 = vmmov %vm18059_vm0 }
0x17c7   : > { %8241 = vperm.xlu1 %9871, %v16704_v55  }
0x17cb   : > { %8361 = vperm.xlu1 %9871, %v16708_v17   ;;  %v10784_v14 = vpop.eup %10783 }
0x17cc   : > { %v8121_v11 = vmul.f32 %v10784_v14, %v16827_v48  ;;  %v8137_v1 = vmul.f32 %v10784_v14, %v10770_v57  ;;  %v8145_v7 = vmul.f32 %v10784_v14, %v10772_v31  ;;  %v8153_v33 = vmul.f32 %v10784_v14, %v10774_v41  ;;  %v18055_v41 = vld [vmem:[#allocation50_spill] sm:$0xff] }
0x17cd   : > { %v8161_v3 = vmul.f32 %v10784_v14, %v10776_v58  ;;  %v8169_v22 = vmul.f32 %v10784_v14, %v10778_v51  ;;  %v8129_v20 = vmul.f32 %v10784_v14, %v16835_v26  ;;  %v8177_v4 = vmul.f32 %v10784_v14, %v10780_v21  ;;  %v8846_v21 = vld [vmem:[%s17183_s11 + $0x10] sm:$0xff]  ;;  %v8851_v14 = vld [vmem:[%s17183_s11 + $0x38] sm:$0xff] }
0x17ce   : > { %8211 = vperm.xlu0 %9872, %v8121_v11   ;;  %v9815_v47 = vpack.c.bf16 %v8847_v24, %v8846_v21  ;;  %v18077_v24 = vld [vmem:[#allocation118_spill] sm:$0xff] }
0x17cf   : > { %8401 = vperm.xlu1 %9871, %v16713_v5  }
0x17d0   : > { %9816 = vmatprep.subr.bf16.mxu0 %v9815_v47 }
0x17d1   : > { %9818 = vmatpush3.bf16.msra.mxu0 %v9815_v47 }
0x17d2   : > { %8291 = vperm.xlu0 %9872, %v8137_v1  }
0x17d3   : > { %8441 = vperm.xlu1 %9871, %v16717_v60  }
0x17d6   : > { %8331 = vperm.xlu0 %9872, %v8145_v7  }
0x17d7   : > { %8481 = vperm.xlu1 %9871, %v16721_v37   ;;  %v18045_v37 = vld [vmem:[#allocation93_spill] sm:$0xff] }
0x17da   : > { %8371 = vperm.xlu0 %9872, %v8153_v33  }
0x17db   : > { %8246 = vperm.xlu1 %9871, %v16773_v61   ;;  %v18046_v61 = vld [vmem:[#allocation105_spill] sm:$0xff] }
0x17de   : > { %8411 = vperm.xlu0 %9872, %v8161_v3   ;;  %v8852_v3 = vld [vmem:[%s17183_s11 + $0x40] sm:$0xff] }
0x17df   : > { %8286 = vperm.xlu1 %9871, %v16784_v62  }
0x17e2   : > { %8451 = vperm.xlu0 %9872, %v8169_v22   ;;  %v8853_v22 = vld [vmem:[%s17183_s11 + $0x48] sm:$0xff] }
0x17e3   : > { %8326 = vperm.xlu1 %9871, %v16787_v35  }
0x17e6   : > { %8256 = vperm.xlu0 %9872, %v8130_v52   ;;  %v8222_v55 = vpop.permute.xlu0 %8221  ;;  %v8849_v52 = vld [vmem:[%s17183_s11 + $0x28] sm:$0xff] }
0x17e7   : > { %8446 = vperm.xlu1 %9871, %v16800_v32   ;;  %v8182_v17 = vpop.permute.xlu1 %8181  ;;  %v8507_v34 = vmul.f32 %v8222_v55, %v18045_v37  ;;  %v18047_v32 = vld [vmem:[#allocation95_spill] sm:$0xff]  ;;  %v9827_v55 = vpack.c.bf16 %v8853_v22, %v8852_v3  ;;  %v8855_v37 = vld [vmem:[%s17183_s11 + $0x58] sm:$0xff] }
0x17e8   : > { %v8499_v62 = vmul.f32 %v8182_v17, %v18046_v61  ;;  %v18063_v17 = vld [vmem:[#allocation87_spill] sm:$0xff]  ;;  %v18084_v3 = vld [vmem:[#allocation100_spill] sm:$0xff] }
0x17ea   : > { %8376 = vperm.xlu0 %9872, %v8154_v9   ;;  %v8422_v5 = vpop.permute.xlu0 %8421  ;;  %v8563_v48 = vsel %vm18049_vm9, %v8499_v62, 0.0  ;;  %v18065_v62 = vld [vmem:[#allocation89_spill] sm:$0xff]  ;;  %vm18078_vm9 = vmmov %vm18059_vm0 }
0x17eb   : > { %8486 = vperm.xlu1 %9871, %v16805_v29   ;;  %v8564_v29 = vsel %vm18048_vm6, %v8507_v34, 0.0  ;;  %v8547_v59 = vmul.f32 %v8422_v5, %v18055_v41  ;;  %v18064_v34 = vld [vmem:[#allocation109_spill] sm:$0xff]  ;;  %vm18076_vm6 = vmmov %vm18059_vm0 }
0x17ec   : > { %v8565_v57 = vadd.f32 %v8564_v29, %v8563_v48  ;;  %v18067_v48 = vld [vmem:[#allocation32_spill] sm:$0xff] }
0x17ed   : > { %v8574_v0 = vsel %vm18059_vm0, %v8547_v59, 0.0 }
0x17ee   : > { %8416 = vperm.xlu0 %9872, %v8162_v27  }
0x17ef   : > { %8251 = vperm.xlu1 %9871, %v8129_v20  }
0x17f2   : > { %8491 = vperm.xlu0 %9872, %v8177_v4  }
0x17f3   : > { %8216 = vperm.xlu1 %9871, %v8122_v25   ;;  %v8262_v60 = vpop.permute.xlu1 %8261 }
0x17f4   : > { %v8515_v16 = vmul.f32 %v8262_v60, %v18047_v32  ;;  %v8854_v60 = vld [vmem:[%s17183_s11 + $0x50] sm:$0xff] }
0x17f6   : > { %v8566_v19 = vsel %vm18051_vm11, %v8515_v16, 0.0  ;;  %vm18079_vm11 = vmmov %vm18059_vm0 }
0x17f7   : > { %8296 = vperm.xlu1 %9871, %v8138_v15   ;;  %v8567_v39 = vadd.f32 %v8566_v19, %v8565_v57  ;;  %v8857_v19 = vld [vmem:[%s17183_s11 + $0x68] sm:$0xff] }
0x17fa   : > { %v8462_v35 = vpop.permute.xlu0 %8461 }
0x17fb   : > { %8336 = vperm.xlu1 %9871, %v8146_v36   ;;  %v8555_v12 = vmul.f32 %v8462_v35, %v18057_v44 }
0x17fd   : > { %v8576_v9 = vsel %vm18060_vm10, %v8555_v12, 0.0  ;;  %vm18088_vm10 = vmmov %vm18059_vm0 }
0x17fe   : > { %v8302_v53 = vpop.permute.xlu1 %8301 }
0x17ff   : > { %v8523_v26 = vmul.f32 %v8302_v53, %v18050_v30  ;;  %8456 = vperm.xlu1 %9871, %v8170_v28   ;;  %v9819_v28 = vpack.c.bf16 %v8849_v52, %v8848_v38  ;;  %v9831_v53 = vpack.c.bf16 %v8855_v37, %v8854_v60 }
0x1800   : > { %v16888_v56 = vpop.permute.xlu0 %8271 }
0x1801   : > { %v8568_v13 = vsel %vm18052_vm12, %v8523_v26, 0.0  ;;  %9820 = vmatprep.subr.bf16.mxu0 %v9819_v28  ;;  %v8856_v26 = vld [vmem:[%s17183_s11 + $0x60] sm:$0xff]  ;;  %vm18080_vm12 = vmmov %vm18059_vm0 }
0x1802   : > { %v8342_v10 = vpop.permute.xlu1 %8341  ;;  %v8569_v40 = vadd.f32 %v8568_v13, %v8567_v39  ;;  %9822 = vmatpush3.bf16.msra.mxu0 %v9819_v28  ;;  %v18070_v13 = vld [vmem:[#allocation38_spill] sm:$0xff] }
0x1803   : > { %v8531_v31 = vmul.f32 %v8342_v10, %v18053_v18  ;;  %8496 = vperm.xlu1 %9871, %v8178_v6   ;;  %v8850_v6 = vld [vmem:[%s17183_s11 + $0x30] sm:$0xff] }
0x1804   : > { %v16893_v8 = vpop.permute.xlu0 %8311  ;;  %v9823_v33 = vpack.c.bf16 %v8851_v14, %v8850_v6  ;;  %v18082_v14 = vld [vmem:[#allocation45_spill] sm:$0xff] }
0x1805   : > { %v8570_v23 = vsel %vm18054_vm13, %v8531_v31, 0.0  ;;  %v8525_v22 = vmul.f32 %v16893_v8, %v18084_v3  ;;  %vm18085_vm13 = vmmov %vm18059_vm0 }
0x1806   : > { %v8382_v46 = vpop.permute.xlu1 %8381  ;;  %v8571_v58 = vadd.f32 %v8570_v23, %v8569_v40  ;;  %9824 = vmatprep.subr.bf16.mxu0 %v9823_v33  ;;  %v9835_v23 = vpack.c.bf16 %v8857_v19, %v8856_v26 }
0x1807   : > { %v8539_v45 = vmul.f32 %v8382_v46, %v18056_v2  ;;  %9826 = vmatpush3.bf16.msra.mxu0 %v9823_v33  ;;  %v18072_v46 = vld [vmem:[#allocation102_spill] sm:$0xff] }
0x1808   : > { %v16899_v51 = vpop.permute.xlu0 %8431  ;;  %9828 = vmatprep.subr.bf16.mxu0 %v9827_v55 }
0x1809   : > { %v8572_v42 = vsel %vm18058_vm15, %v8539_v45, 0.0  ;;  %vm18086_vm15 = vmmov %vm18059_vm0 }
0x180a   : > { %v8573_v63 = vadd.f32 %v8572_v42, %v8571_v58  ;;  %v8187_v43 = vpop.permute.xlu1 %8186  ;;  %v18075_v42 = vld [vmem:[#allocation35_spill] sm:$0xff] }
0x180b   : > { %v8500_v61 = vmul.f32 %v8187_v43, %v18064_v34  ;;  %9830 = vmatpush3.bf16.msra.mxu0 %v9827_v55  ;;  %v18087_v34 = vld [vmem:[#allocation106_spill] sm:$0xff] }
0x180c   : > { %v8575_v25 = vadd.f32 %v8574_v0, %v8573_v63  ;;  %v16922_v15 = vpop.permute.xlu0 %8471  ;;  %9832 = vmatprep.subr.bf16.mxu0 %v9831_v53 }
0x180d   : > { %v8578_v57 = vsel %vm18068_vm7, %v8500_v61, 0.0  ;;  %vm18098_vm7 = vmmov %vm18059_vm0 }
0x180e   : > { %v8577_v27 = vadd.f32 %v8576_v9, %v8575_v25  ;;  %v8227_v36 = vpop.permute.xlu1 %8226 }
0x180f   : > { %v8508_v5 = vmul.f32 %v8227_v36, %v18063_v17  ;;  %9834 = vmatpush3.bf16.msra.mxu0 %v9831_v53  ;;  %v18081_v36 = vld [vmem:[#allocation101_spill] sm:$0xff]  ;;  %v18089_v53 = vld [vmem:[#allocation66_spill] sm:$0xff] }
0x1810   : > { %v8683_v11 = vsel %vm18061_vm4, %v8577_v27, 0.0  ;;  %9571 = vmatprep.mubr.msk.f32.mxu1 %vm18062_vm14, %v8577_v27  ;;  %v16940_v1 = vpop.permute.xlu0 %8236  ;;  %9836 = vmatprep.subr.bf16.mxu0 %v9835_v23  ;;  %vm18090_vm4 = vmmov %vm18059_vm0 }
0x1811   : > { %8691 = vst [vmem:[%s16929_s27] sm:$0xff] %v8683_v11  ;;  %v8579_v29 = vsel %vm18066_vm5, %v8508_v5, 0.0  ;;  %v8517_v11 = vmul.f32 %v16888_v56, %v18082_v14  ;;  %vm18094_vm14 = vmmov %vm18059_vm0 }
0x1812   : > { %v8267_v7 = vpop.permute.xlu1 %8266  ;;  %v8580_v31 = vadd.f32 %v8579_v29, %v8578_v57  ;;  %v8549_v29 = vmul.f32 %v16899_v51, %v18089_v53  ;;  %v18092_v57 = vld [vmem:[#allocation9_spill] sm:$0xff]  ;;  %vm18095_vm5 = vmmov %vm18059_vm0 }
0x1813   : > { %v8516_v35 = vmul.f32 %v8267_v7, %v18065_v62  ;;  %9838 = vmatpush3.bf16.msra.mxu0 %v9835_v23  ;;  %v18083_v7 = vld [vmem:[#allocation91_spill] sm:$0xff]  ;;  %v8596_v37 = vsel %vm18059_vm0, %v8517_v11, 0.0  ;;  %v18111_v11 = vld [vmem:[#allocation136_spill] sm:$0xff] }
0x1814   : > { %v16948_v20 = vpop.permute.xlu0 %8276 }
0x1815   : > { %v8581_v10 = vsel %vm18069_vm2, %v8516_v35, 0.0  ;;  %v8598_v35 = vsel %vm18088_vm10, %v8525_v22, 0.0  ;;  %vm18099_vm2 = vmmov %vm18059_vm0 }
0x1816   : > { %v8307_v4 = vpop.permute.xlu1 %8306  ;;  %v8582_v59 = vadd.f32 %v8581_v10, %v8580_v31  ;;  %v8557_v10 = vmul.f32 %v16922_v15, %v18092_v57  ;;  %vm18118_vm10 = vmmov %vm18059_vm0  ;;  %v18123_v57 = vld [vmem:[#allocation25_spill] sm:$0xff] }
0x1817   : > { %v8524_v30 = vmul.f32 %v8307_v4, %v18067_v48  ;;  %v18091_v48 = vld [vmem:[#allocation18_spill] sm:$0xff] }
0x1818   : > { %v16959_v32 = vpop.permute.xlu0 %8316 }
0x1819   : > { %v8583_v40 = vsel %vm18071_vm3, %v8524_v30, 0.0  ;;  %vm18101_vm3 = vmmov %vm18059_vm0 }
0x181a   : > { %v8347_v16 = vpop.permute.xlu1 %8346  ;;  %v8584_v58 = vadd.f32 %v8583_v40, %v8582_v59  ;;  %v8604_v40 = vsel %vm18095_vm5, %v8549_v29, 0.0  ;;  %vm18121_vm5 = vmmov %vm18059_vm0 }
0x181b   : > { %v8532_v18 = vmul.f32 %v8347_v16, %v18070_v13  ;;  %v18093_v13 = vld [vmem:[#allocation40_spill] sm:$0xff] }
0x181c   : > { %v8357_v2 = vpop.permute.xlu0 %8356 }
0x181d   : > { %v8585_v45 = vsel %vm18073_vm1, %v8532_v18, 0.0  ;;  %v8510_v18 = vmul.f32 %v16940_v1, %v18093_v13  ;;  %vm18102_vm1 = vmmov %vm18059_vm0 }
0x181e   : > { %v8387_v39 = vpop.permute.xlu1 %8386  ;;  %v8586_v49 = vadd.f32 %v8585_v45, %v8584_v58  ;;  %v8606_v58 = vsel %vm18098_vm7, %v8557_v10, 0.0  ;;  %vm18122_vm7 = vmmov %vm18059_vm0 }
0x181f   : > { %v8540_v41 = vmul.f32 %v8387_v39, %v18072_v46  ;;  %v18096_v46 = vld [vmem:[#allocation97_spill] sm:$0xff]  ;;  %v8609_v15 = vsel %vm18099_vm2, %v8510_v18, 0.0  ;;  %vm18125_vm2 = vmmov %vm18059_vm0 }
0x1820   : > { %v8397_v63 = vpop.permute.xlu0 %8396  ;;  %v8518_v51 = vmul.f32 %v16948_v20, %v18096_v46 }
0x1821   : > { %v8587_v12 = vsel %vm18074_vm8, %v8540_v41, 0.0  ;;  %v18097_v41 = vld [vmem:[#allocation7_spill] sm:$0xff]  ;;  %vm18104_vm8 = vmmov %vm18059_vm0 }
0x1822   : > { %v8427_v44 = vpop.permute.xlu1 %8426  ;;  %v8588_v43 = vadd.f32 %v8587_v12, %v8586_v49  ;;  %v8611_v20 = vsel %vm18102_vm1, %v8518_v51, 0.0  ;;  %vm18128_vm1 = vmmov %vm18059_vm0 }
0x1823   : > { %v8548_v50 = vmul.f32 %v8427_v44, %v18075_v42  ;;  %v18100_v44 = vld [vmem:[#allocation104_spill] sm:$0xff] }
0x1824   : > { %v8202_v9 = vpop.permute.xlu0 %8201  ;;  %v8526_v1 = vmul.f32 %v16959_v32, %v18100_v44 }
0x1825   : > { %v8589_v21 = vsel %vm18076_vm6, %v8548_v50, 0.0  ;;  %vm18105_vm6 = vmmov %vm18059_vm0 }
0x1826   : > { %v8467_v54 = vpop.permute.xlu1 %8466  ;;  %v8590_v47 = vadd.f32 %v8589_v21, %v8588_v43  ;;  %v18103_v43 = vld [vmem:[#allocation110_spill] sm:$0xff] }
0x1827   : > { %v8556_v0 = vmul.f32 %v8467_v54, %v18077_v24  ;;  %v8534_v54 = vmul.f32 %v8357_v2, %v18103_v43 }
0x1828   : > { %v8282_v17 = vpop.permute.xlu0 %8281 }
0x1829   : > { %v8591_v38 = vsel %vm18078_vm9, %v8556_v0, 0.0  ;;  %vm18106_vm9 = vmmov %vm18059_vm0 }
0x182a   : > { %v8592_v52 = vadd.f32 %v8591_v38, %v8590_v47  ;;  %v8192_v25 = vpop.permute.xlu1 %8191  ;;  %v8613_v47 = vsel %vm18106_vm9, %v8526_v1, 0.0  ;;  %v18107_v38 = vld [vmem:[#allocation23_spill] sm:$0xff]  ;;  %vm18133_vm9 = vmmov %vm18059_vm0 }
0x182b   : > { %v8501_v28 = vmul.f32 %v8192_v25, %v18081_v36  ;;  %v8542_v32 = vmul.f32 %v8397_v63, %v18107_v38  ;;  %v18109_v36 = vld [vmem:[#allocation52_spill] sm:$0xff]  ;;  %v18134_v38 = vld [vmem:[#allocation113_spill] sm:$0xff] }
0x182c   : > { %v8684_v27 = vsel %vm18079_vm11, %v8592_v52, 0.0  ;;  %9572 = vmatmul.mubr.msk.f32.vlgmr.msra.gmra.mrb[128].mxu1 %vm18080_vm12, %v8592_v52  ;;  %v8322_v26 = vpop.permute.xlu0 %8321  ;;  %vm18108_vm11 = vmmov %vm18059_vm0 }
0x182d   : > { %8692 = vst [vmem:[%s16929_s27 + $0x8] sm:$0xff] %v8684_v27  ;;  %v8593_v4 = vsel %vm18085_vm13, %v8501_v28, 0.0  ;;  %v8615_v27 = vsel %vm18108_vm11, %v8534_v54, 0.0  ;;  %vm18110_vm12 = vmmov %vm18059_vm0 }
0x182e   : > { %v8232_v6 = vpop.permute.xlu1 %8231  ;;  %v8617_v2 = vsel %vm18110_vm12, %v8542_v32, 0.0  ;;  %vm18114_vm13 = vmmov %vm18059_vm0 }
0x182f   : > { %v8509_v33 = vmul.f32 %v8232_v6, %v18083_v7  ;;  %v8503_v7 = vmul.f32 %v8202_v9, %v18111_v11  ;;  %vm18135_vm11 = vmmov %vm18059_vm0 }
0x1830   : > { %v17012_v42 = vpop.permute.xlu0 %8206  ;;  %vm18137_vm12 = vmmov %vm18059_vm0 }
0x1831   : > { %v8594_v55 = vsel %vm18086_vm15, %v8509_v33, 0.0  ;;  %v18112_v33 = vld [vmem:[#allocation12_spill] sm:$0xff]  ;;  %vm18116_vm15 = vmmov %vm18059_vm0  ;;  %v8504_v32 = vmul.f32 %v17012_v42, %v18134_v38  ;;  %v18141_v42 = vld [vmem:[#allocation27_spill] sm:$0xff] }
0x1832   : > { %v8595_v5 = vadd.f32 %v8594_v55, %v8593_v4  ;;  %v8352_v60 = vpop.permute.xlu1 %8351  ;;  %v18113_v55 = vld [vmem:[#allocation108_spill] sm:$0xff] }
0x1833   : > { %v8533_v61 = vmul.f32 %v8352_v60, %v18087_v34  ;;  %v18115_v60 = vld [vmem:[#allocation43_spill] sm:$0xff]  ;;  %v18161_v38 = vld [vmem:[#allocation56_spill] sm:$0xff] }
0x1834   : > { %v8597_v62 = vadd.f32 %v8596_v37, %v8595_v5  ;;  %v8367_v6 = vpop.permute.xlu0 %8366  ;;  %v8519_v5 = vmul.f32 %v8282_v17, %v18113_v55 }
0x1835   : > { %v8600_v8 = vsel %vm18090_vm4, %v8533_v61, 0.0  ;;  %v8623_v61 = vsel %vm18116_vm15, %v8503_v7, 0.0  ;;  %vm18119_vm4 = vmmov %vm18059_vm0 }
0x1836   : > { %v8599_v56 = vadd.f32 %v8598_v35, %v8597_v62  ;;  %v8392_v16 = vpop.permute.xlu1 %8391  ;;  %v18117_v62 = vld [vmem:[#allocation20_spill] sm:$0xff]  ;;  %v8626_v17 = vsel %vm18119_vm4, %v8519_v5, 0.0  ;;  %vm18142_vm15 = vmmov %vm18059_vm0 }
0x1837   : > { %v8541_v30 = vmul.f32 %v8392_v16, %v18091_v48  ;;  %v8527_v35 = vmul.f32 %v8322_v26, %v18117_v62  ;;  %vm18145_vm4 = vmmov %vm18059_vm0 }
0x1838   : > { %v8601_v19 = vadd.f32 %v8600_v8, %v8599_v56  ;;  %v8407_v16 = vpop.permute.xlu0 %8406 }
0x1839   : > { %v8602_v31 = vsel %vm18094_vm14, %v8541_v30, 0.0  ;;  %vm18120_vm14 = vmmov %vm18059_vm0 }
0x183a   : > { %v8603_v39 = vadd.f32 %v8602_v31, %v8601_v19  ;;  %v8197_v23 = vpop.permute.xlu1 %8196  ;;  %v8628_v19 = vsel %vm18122_vm7, %v8527_v35, 0.0  ;;  %v18124_v31 = vld [vmem:[#allocation39_spill] sm:$0xff]  ;;  %v18143_v35 = vld [vmem:[#allocation10_spill] sm:$0xff]  ;;  %vm18152_vm7 = vmmov %vm18059_vm0 }
0x183b   : > { %v8502_v59 = vmul.f32 %v8197_v23, %v18097_v41 }
0x183c   : > { %v8605_v45 = vadd.f32 %v8604_v40, %v8603_v39 }
0x183d   : > { %v8608_v12 = vsel %vm18101_vm3, %v8502_v59, 0.0  ;;  %vm18126_vm3 = vmmov %vm18059_vm0  ;;  %v18127_v59 = vld [vmem:[#allocation116_spill] sm:$0xff] }
0x183e   : > { %v8610_v50 = vadd.f32 %v8609_v15, %v8608_v12  ;;  %v8437_v49 = vpop.permute.xlu1 %8436  ;;  %v8607_v21 = vadd.f32 %v8606_v58, %v8605_v45  ;;  %v18129_v12 = vld [vmem:[#allocation14_spill] sm:$0xff] }
0x183f   : > { %v8550_v28 = vmul.f32 %v8437_v49, %v18109_v36  ;;  %v18136_v36 = vld [vmem:[#allocation16_spill] sm:$0xff] }
0x1840   : > { %v8612_v24 = vadd.f32 %v8611_v20, %v8610_v50  ;;  %v8685_v0 = vsel %vm18104_vm8, %v8607_v21, 0.0  ;;  %9574 = vmatprep.mubr.msk.f32.mxu1 %vm18105_vm6, %v8607_v21  ;;  %vm18130_vm8 = vmmov %vm18059_vm0 }
0x1841   : > { %8693 = vst [vmem:[%s16929_s27 + $0x10] sm:$0xff] %v8685_v0  ;;  %v8619_v63 = vsel %vm18114_vm13, %v8550_v28, 0.0  ;;  %vm18132_vm6 = vmmov %vm18059_vm0 }
0x1842   : > { %v8614_v52 = vadd.f32 %v8613_v47, %v8612_v24  ;;  %v8477_v25 = vpop.permute.xlu1 %8476  ;;  %v18131_v24 = vld [vmem:[#allocation98_spill] sm:$0xff]  ;;  %vm18138_vm13 = vmmov %vm18059_vm0 }
0x1843   : > { %v8558_v3 = vmul.f32 %v8477_v25, %v18112_v33 }
0x1844   : > { %v8616_v14 = vadd.f32 %v8615_v27, %v8614_v52 }
0x1845   : > { %v8621_v56 = vsel %vm18059_vm0, %v8558_v3, 0.0  ;;  %v18139_v3 = vld [vmem:[#allocation107_spill] sm:$0xff] }
0x1846   : > { %v8618_v22 = vadd.f32 %v8617_v2, %v8616_v14  ;;  %v8242_v4 = vpop.permute.xlu1 %8241  ;;  %v8638_v14 = vsel %vm18137_vm12, %v8504_v32, 0.0  ;;  %vm18168_vm12 = vmmov %vm18059_vm0 }
0x1847   : > { %v8511_v37 = vmul.f32 %v8242_v4, %v18115_v60  ;;  %v18140_v4 = vld [vmem:[#allocation21_spill] sm:$0xff] }
0x1848   : > { %v8620_v34 = vadd.f32 %v8619_v63, %v8618_v22  ;;  %v8536_v22 = vmul.f32 %v8367_v6, %v18139_v3  ;;  %v8544_v63 = vmul.f32 %v8407_v16, %v18141_v42 }
0x1849   : > { %v8624_v9 = vsel %vm18118_vm10, %v8511_v37, 0.0  ;;  %vm18144_vm10 = vmmov %vm18059_vm0 }
0x184a   : > { %v8622_v53 = vadd.f32 %v8621_v56, %v8620_v34  ;;  %v8625_v29 = vadd.f32 %v8624_v9, %v8623_v61  ;;  %v8362_v8 = vpop.permute.xlu1 %8361  ;;  %v8645_v62 = vsel %vm18059_vm0, %v8536_v22, 0.0 }
0x184b   : > { %v8535_v26 = vmul.f32 %v8362_v8, %v18123_v57 }
0x184c   : > { %v8686_v48 = vsel %vm18120_vm14, %v8622_v53, 0.0  ;;  %v8627_v30 = vadd.f32 %v8626_v17, %v8625_v29  ;;  %9575 = vmatmul.mubr.msk.f32.gmra.mrb[130].mxu1 %vm18121_vm5, %v8622_v53  ;;  %v8647_v53 = vsel %vm18144_vm10, %v8544_v63, 0.0  ;;  %vm18148_vm14 = vmmov %vm18059_vm0 }
0x184d   : > { %8694 = vst [vmem:[%s16929_s27 + $0x18] sm:$0xff] %v8686_v48  ;;  %v8212_v18 = vpop.permute.xlu0 %8211  ;;  %v8630_v23 = vsel %vm18125_vm2, %v8535_v26, 0.0  ;;  %v18146_v48 = vld [vmem:[#allocation119_spill] sm:$0xff]  ;;  %vm18151_vm5 = vmmov %vm18059_vm0 }
0x184e   : > { %v8629_v10 = vadd.f32 %v8628_v19, %v8627_v30  ;;  %v8402_v13 = vpop.permute.xlu1 %8401  ;;  %v18147_v19 = vld [vmem:[#allocation114_spill] sm:$0xff]  ;;  %vm18153_vm2 = vmmov %vm18059_vm0 }
0x184f   : > { %v8543_v39 = vmul.f32 %v8402_v13, %v18124_v31  ;;  %v8505_v57 = vmul.f32 %v8212_v18, %v18147_v19  ;;  %vm18174_vm10 = vmmov %vm18059_vm0 }
0x1850   : > { %v8631_v40 = vadd.f32 %v8630_v23, %v8629_v10 }
0x1851   : > { %v8292_v51 = vpop.permute.xlu0 %8291  ;;  %v8632_v41 = vsel %vm18126_vm3, %v8543_v39, 0.0  ;;  %v18149_v39 = vld [vmem:[#allocation28_spill] sm:$0xff]  ;;  %vm18155_vm3 = vmmov %vm18059_vm0 }
0x1852   : > { %v8442_v46 = vpop.permute.xlu1 %8441  ;;  %v8633_v15 = vadd.f32 %v8632_v41, %v8631_v40  ;;  %v8521_v23 = vmul.f32 %v8292_v51, %v18149_v39  ;;  %v18150_v40 = vld [vmem:[#allocation103_spill] sm:$0xff] }
0x1853   : > { %v8551_v45 = vmul.f32 %v8442_v46, %v18127_v59  ;;  %v8653_v59 = vsel %vm18153_vm2, %v8505_v57, 0.0  ;;  %v18158_v51 = vld [vmem:[#allocation11_spill] sm:$0xff]  ;;  %vm18180_vm2 = vmmov %vm18059_vm0 }
0x1855   : > { %v8634_v58 = vsel %vm18128_vm1, %v8551_v45, 0.0  ;;  %v8332_v1 = vpop.permute.xlu0 %8331  ;;  %v18154_v45 = vld [vmem:[#allocation111_spill] sm:$0xff]  ;;  %vm18157_vm1 = vmmov %vm18059_vm0 }
0x1856   : > { %v8482_v44 = vpop.permute.xlu1 %8481  ;;  %v8635_v49 = vadd.f32 %v8634_v58, %v8633_v15  ;;  %v8529_v58 = vmul.f32 %v8332_v1, %v18154_v45  ;;  %v18156_v15 = vld [vmem:[#allocation41_spill] sm:$0xff] }
0x1857   : > { %v8559_v50 = vmul.f32 %v8482_v44, %v18129_v12 }
0x1859   : > { %v8636_v21 = vsel %vm18130_vm8, %v8559_v50, 0.0  ;;  %v8372_v54 = vpop.permute.xlu0 %8371  ;;  %vm18159_vm8 = vmmov %vm18059_vm0 }
0x185a   : > { %v8637_v20 = vadd.f32 %v8636_v21, %v8635_v49  ;;  %v8247_v43 = vpop.permute.xlu1 %8246  ;;  %v8537_v44 = vmul.f32 %v8372_v54, %v18156_v15  ;;  %v8656_v49 = vsel %vm18157_vm1, %v8521_v23, 0.0  ;;  %v8858_v23 = vld [vmem:[%s17183_s11 + $0x70] sm:$0xff]  ;;  %vm18183_vm1 = vmmov %vm18059_vm0 }
0x185b   : > { %v8512_v0 = vmul.f32 %v8247_v43, %v18131_v24  ;;  %v8658_v24 = vsel %vm18159_vm8, %v8529_v58, 0.0  ;;  %vm18184_vm8 = vmmov %vm18059_vm0  ;;  %v18185_v15 = vld [vmem:[#allocation15_spill] sm:$0xff] }
0x185c   : > { %v8687_v47 = vsel %vm18132_vm6, %v8637_v20, 0.0  ;;  %9577 = vmatprep.mubr.msk.f32.mxu1 %vm18133_vm9, %v8637_v20  ;;  %vm18162_vm6 = vmmov %vm18059_vm0 }
0x185d   : > { %8695 = vst [vmem:[%s16929_s27 + $0x20] sm:$0xff] %v8687_v47  ;;  %v8412_v25 = vpop.permute.xlu0 %8411  ;;  %v8639_v27 = vsel %vm18135_vm11, %v8512_v0, 0.0  ;;  %v18160_v0 = vld [vmem:[#allocation112_spill] sm:$0xff]  ;;  %v8660_v1 = vsel %vm18162_vm6, %v8537_v44, 0.0  ;;  %vm18164_vm9 = vmmov %vm18059_vm0 }
0x185e   : > { %v8287_v52 = vpop.permute.xlu1 %8286  ;;  %v8640_v11 = vadd.f32 %v8639_v27, %v8638_v14  ;;  %v8545_v47 = vmul.f32 %v8412_v25, %v18160_v0  ;;  %v18165_v14 = vld [vmem:[#allocation30_spill] sm:$0xff]  ;;  %vm18167_vm11 = vmmov %vm18059_vm0  ;;  %v18187_v0 = vld [vmem:[#allocation19_spill] sm:$0xff] }
0x185f   : > { %v8520_v28 = vmul.f32 %v8287_v52, %v18136_v36  ;;  %v18163_v36 = vld [vmem:[#allocation6_spill] sm:$0xff] }
0x1860   : > { %v8662_v22 = vsel %vm18167_vm11, %v8545_v47, 0.0 }
0x1861   : > { %v8641_v2 = vsel %vm18138_vm13, %v8520_v28, 0.0  ;;  %v8452_v33 = vpop.permute.xlu0 %8451  ;;  %vm18169_vm13 = vmmov %vm18059_vm0 }
0x1862   : > { %v8327_v7 = vpop.permute.xlu1 %8326  ;;  %v8642_v5 = vadd.f32 %v8641_v2, %v8640_v11  ;;  %v8553_v54 = vmul.f32 %v8452_v33, %v18163_v36  ;;  %v18166_v11 = vld [vmem:[#allocation55_spill] sm:$0xff] }
0x1863   : > { %v8528_v55 = vmul.f32 %v8327_v7, %v18140_v4 }
0x1865   : > { %v8643_v60 = vsel %vm18142_vm15, %v8528_v55, 0.0  ;;  %v8257_v61 = vpop.permute.xlu0 %8256  ;;  %vm18170_vm15 = vmmov %vm18059_vm0 }
0x1866   : > { %v8644_v37 = vadd.f32 %v8643_v60, %v8642_v5  ;;  %v8447_v34 = vpop.permute.xlu1 %8446  ;;  %v8514_v32 = vmul.f32 %v8257_v61, %v18161_v38  ;;  %v8664_v63 = vsel %vm18170_vm15, %v8553_v54, 0.0  ;;  %v18171_v60 = vld [vmem:[#allocation67_spill] sm:$0xff] }
0x1867   : > { %v8552_v56 = vmul.f32 %v8447_v34, %v18143_v35 }
0x1868   : > { %v8646_v9 = vadd.f32 %v8645_v62, %v8644_v37  ;;  %v8669_v4 = vsel %vm18168_vm12, %v8514_v32, 0.0  ;;  %v18172_v37 = vld [vmem:[#allocation115_spill] sm:$0xff]  ;;  %v18188_v32 = vld [vmem:[#allocation17_spill] sm:$0xff] }
0x1869   : > { %v8377_v6 = vpop.permute.xlu0 %8376  ;;  %v8649_v17 = vsel %vm18145_vm4, %v8552_v56, 0.0  ;;  %v18173_v56 = vld [vmem:[#allocation5_spill] sm:$0xff]  ;;  %vm18175_vm4 = vmmov %vm18059_vm0 }
0x186a   : > { %v8648_v29 = vadd.f32 %v8647_v53, %v8646_v9  ;;  %v8487_v8 = vpop.permute.xlu1 %8486  ;;  %v8538_v33 = vmul.f32 %v8377_v6, %v18171_v60  ;;  %v18192_v60 = vld [vmem:[#allocation26_spill] sm:$0xff] }
0x186b   : > { %v8560_v16 = vmul.f32 %v8487_v8, %v18146_v48 }
0x186c   : > { %v8650_v30 = vadd.f32 %v8649_v17, %v8648_v29  ;;  %v8675_v48 = vsel %vm18175_vm4, %v8538_v33, 0.0 }
0x186d   : > { %v8651_v26 = vsel %vm18148_vm14, %v8560_v16, 0.0  ;;  %v8417_v31 = vpop.permute.xlu0 %8416  ;;  %v18176_v16 = vld [vmem:[#allocation117_spill] sm:$0xff]  ;;  %vm18177_vm14 = vmmov %vm18059_vm0 }
0x186e   : > { %v8652_v10 = vadd.f32 %v8651_v26, %v8650_v30  ;;  %v8252_v13 = vpop.permute.xlu1 %8251  ;;  %v8546_v9 = vmul.f32 %v8417_v31, %v18173_v56  ;;  %v18181_v31 = vld [vmem:[#allocation61_spill] sm:$0xff] }
0x186f   : > { %v8513_v46 = vmul.f32 %v8252_v13, %v18150_v40  ;;  %v8859_v40 = vld [vmem:[%s17183_s11 + $0x78] sm:$0xff] }
0x1870   : > { %v8688_v41 = vsel %vm18151_vm5, %v8652_v10, 0.0  ;;  %9578 = vmatmul.mubr.msk.f32.gmra.mrb[132].mxu1 %vm18152_vm7, %v8652_v10  ;;  %vm18178_vm5 = vmmov %vm18059_vm0 }
0x1871   : > { %8696 = vst [vmem:[%s16929_s27 + $0x28] sm:$0xff] %v8688_v41  ;;  %v8654_v18 = vsel %vm18155_vm3, %v8513_v46, 0.0  ;;  %v8492_v43 = vpop.permute.xlu0 %8491  ;;  %vm18179_vm7 = vmmov %vm18059_vm0  ;;  %v9839_v41 = vpack.c.bf16 %v8859_v40, %v8858_v23 }
0x1872   : > { %v8655_v12 = vadd.f32 %v8654_v18, %v8653_v59  ;;  %v8217_v50 = vpop.permute.xlu1 %8216  ;;  %v8561_v7 = vmul.f32 %v8492_v43, %v18166_v11  ;;  %v8677_v57 = vsel %vm18179_vm7, %v8546_v9, 0.0  ;;  %vm18182_vm3 = vmmov %vm18059_vm0  ;;  %v10818_v18 = vld [vmem:[%s17182_s10] ss:$0 sm:$0xff] }
0x1873   : > { %v8506_v21 = vmul.f32 %v8217_v50, %v18158_v51  ;;  %9840 = vmatprep.subr.bf16.mxu0 %v9839_v41  ;;  %v2085_v44 = vadd.f32 %v10818_v18, %v18185_v15  ;;  %v18186_v50 = vld [vmem:[#allocation13_spill] sm:$0xff]  ;;  %v2095_v47 = vadd.f32 %v10818_v18, %v18187_v0 }
0x1874   : > { %v8657_v20 = vadd.f32 %v8656_v49, %v8655_v12  ;;  %v8666_v61 = vsel %vm18059_vm0, %v8561_v7, 0.0  ;;  %9842 = vmatpush3.bf16.msra.mxu0 %v9839_v41  ;;  %v2080_v49 = vadd.f32 %v10818_v18, %v18186_v50 }
0x1875   : > { %v8668_v28 = vsel %vm18164_vm9, %v8506_v21, 0.0 }
0x1876   : > { %v8659_v52 = vadd.f32 %v8658_v24, %v8657_v20  ;;  %v8297_v27 = vpop.permute.xlu1 %8296  ;;  %v8670_v55 = vadd.f32 %v8669_v4, %v8668_v28 }
0x1877   : > { %v8522_v2 = vmul.f32 %v8297_v27, %v18165_v14 }
0x1878   : > { %v8661_v3 = vadd.f32 %v8660_v1, %v8659_v52  ;;  %v2090_v1 = vadd.f32 %v10818_v18, %v18188_v32 }
0x1879   : > { %v8671_v25 = vsel %vm18169_vm13, %v8522_v2, 0.0  ;;  %v18189_v2 = vld [vmem:[#allocation24_spill] sm:$0xff] }
0x187a   : > { %v8337_v5 = vpop.permute.xlu1 %8336  ;;  %v8663_v42 = vadd.f32 %v8662_v22, %v8661_v3  ;;  %v8672_v62 = vadd.f32 %v8671_v25, %v8670_v55  ;;  %v18190_v3 = vld [vmem:[#allocation22_spill] sm:$0xff] }
0x187b   : > { %v8530_v34 = vmul.f32 %v8337_v5, %v18172_v37  ;;  %v18191_v5 = vld [vmem:[#allocation29_spill] sm:$0xff] }
0x187c   : > { %v8665_v35 = vadd.f32 %v8664_v63, %v8663_v42 }
0x187d   : > { %v8673_v53 = vsel %vm18174_vm10, %v8530_v34, 0.0 }
0x187e   : > { %v8674_v29 = vadd.f32 %v8673_v53, %v8672_v62  ;;  %v8667_v8 = vadd.f32 %v8666_v61, %v8665_v35  ;;  %v8457_v17 = vpop.permute.xlu1 %8456  ;;  %v9445_v61 = vld [vmem:[%s17184_s12] ss:$0 sm:$0xff] }
0x187f   : > { %v8554_v30 = vmul.f32 %v8457_v17, %v18176_v16 }
0x1880   : > { %v8676_v19 = vadd.f32 %v8675_v48, %v8674_v29  ;;  %v8689_v6 = vsel %vm18177_vm14, %v8667_v8, 0.0  ;;  %9580 = vmatprep.mubr.msk.f32.mxu1 %vm18178_vm5, %v8667_v8 }
0x1881   : > { %8697 = vst [vmem:[%s16929_s27 + $0x30] sm:$0xff] %v8689_v6  ;;  %v8679_v13 = vsel %vm18180_vm2, %v8554_v30, 0.0  ;;  %v18193_v30 = vlaneseq }
0x1882   : > { %v8678_v26 = vadd.f32 %v8677_v57, %v8676_v19  ;;  %v8497_v10 = vpop.permute.xlu1 %8496 }
0x1883   : > { %v8562_v39 = vmul.f32 %v8497_v10, %v18181_v31  ;;  %v17128_v19 = vand.u32 127, %v18193_v30 }
0x1884   : > { %v8680_v46 = vadd.f32 %v8679_v13, %v8678_v26 }
0x1885   : > { %v8681_v59 = vsel %vm18182_vm3, %v8562_v39, 0.0  ;;  %vm8974_vm6 = vcmp.eq.s32.totalorder %v17128_v19, 2 }
0x1886   : > { %v8682_v45 = vadd.f32 %v8681_v59, %v8680_v46 }
0x1888   : > { %v8690_v58 = vsel %vm18183_vm1, %v8682_v45, 0.0  ;;  %9581 = vmatmul.mubr.msk.f32.gmra.mrb[134].mxu1 %vm18184_vm8, %v8682_v45 }
0x1889   : > { %8698 = vst [vmem:[%s16929_s27 + $0x38] sm:$0xff] %v8690_v58 }
0x18ff   : > { %v9573_v12 = vpop.f32.mrb[128].mxu1 }
0x1900   : > { %v8803_v51 = vadd.f32 %v9573_v12, %v2085_v44  ;;  %v8797_v21 = vpop.f32.mrb[129].mxu1 }
0x1901   : > { %v8798_v20 = vadd.f32 %v8797_v21, %v2080_v49 }
0x1902   : > { %v8837_v24 = vmax.f32 %v8803_v51, 0.0 }
0x1903   : > { %v8836_v43 = vmax.f32 %v8798_v20, 0.0 }
0x1905   : > { %9615 = vmatprep.mubr.f32.mxu0 %v8836_v43 }
0x1906   : > { %9616 = vmatmul.mubr.f32.vlgmr.msra.gmra.mrb[144].mxu0 %v8837_v24 }
0x191f   : > { %v9576_v38 = vpop.f32.mrb[130].mxu1 }
0x1920   : > { %v8813_v52 = vadd.f32 %v9576_v38, %v2095_v47  ;;  %v8807_v27 = vpop.f32.mrb[131].mxu1 }
0x1921   : > { %v8808_v36 = vadd.f32 %v8807_v27, %v2090_v1 }
0x1922   : > { %v8839_v28 = vmax.f32 %v8813_v52, 0.0 }
0x1923   : > { %v8838_v54 = vmax.f32 %v8808_v36, 0.0 }
0x1925   : > { %9618 = vmatprep.mubr.f32.mxu0 %v8838_v54 }
0x1926   : > { %9619 = vmatmul.mubr.f32.gmra.mrb[146].mxu0 %v8839_v28 }
0x1943   : > { %v9579_v14 = vpop.f32.mrb[132].mxu1 }
0x1944   : > { %v8823_v11 = vadd.f32 %v9579_v14, %v18189_v2  ;;  %v8817_v7 = vpop.f32.mrb[133].mxu1 }
0x1945   : > { %v8818_v22 = vadd.f32 %v8817_v7, %v18190_v3 }
0x1946   : > { %v8841_v25 = vmax.f32 %v8823_v11, 0.0 }
0x1947   : > { %v8840_v4 = vmax.f32 %v8818_v22, 0.0 }
0x1949   : > { %9621 = vmatprep.mubr.f32.mxu0 %v8840_v4 }
0x194a   : > { %9622 = vmatmul.mubr.f32.gmra.mrb[148].mxu0 %v8841_v25 }
0x195b   : > { %v9582_v55 = vpop.f32.mrb[134].mxu1 }
0x195c   : > { %v8833_v42 = vadd.f32 %v9582_v55, %v18191_v5  ;;  %v8827_v63 = vpop.f32.mrb[135].mxu1 }
0x195d   : > { %v8828_v33 = vadd.f32 %v8827_v63, %v18192_v60 }
0x195e   : > { %v8843_v34 = vmax.f32 %v8833_v42, 0.0 }
0x195f   : > { %v8842_v37 = vmax.f32 %v8828_v33, 0.0 }
0x1961   : > { %9624 = vmatprep.mubr.f32.mxu0 %v8842_v37 }
0x1962   : > { %9625 = vmatmul.mubr.f32.gmra.mrb[150].mxu0 %v8843_v34 }
0x19d9   : > { %v9617_v62 = vpop.f32.mrb[144].mxu0 }
0x19da   : > { %v8939_v35 = vadd.f32 %v9617_v62, %v9445_v61  ;;  %v8933_v56 = vpop.f32.mrb[145].mxu0 }
0x19db   : > { %v8934_v9 = vadd.f32 %v9445_v61, %v8933_v56 }
0x19dc   : > { %v9447_v53 = vmul.f32 -1.442695, %v8939_v35 }
0x19dd   : > { %v9446_v29 = vmul.f32 -1.442695, %v8934_v9 }
0x19de   : > { %10785 = vpow2.f32 %v9447_v53 }
0x19df   : > { %10787 = vpow2.f32 %v9446_v29 }
0x19e8   : > { %v10786_v8 = vpop.eup %10785 }
0x19e9   : > { %v10788_v17 = vpop.eup %10787  ;;  %v9000_v48 = vadd.f32 1.0, %v10786_v8 }
0x19ea   : > { %v8999_v16 = vadd.f32 1.0, %v10788_v17 }
0x19eb   : > { %10789 = vrcp.f32 %v9000_v48 }
0x19ec   : > { %10791 = vrcp.f32 %v8999_v16 }
0x19f5   : > { %v10790_v6 = vpop.eup %10789 }
0x19f6   : > { %v10792_v57 = vpop.eup %10791  ;;  %v9024_v26 = vsel %vm8974_vm6, %v10790_v6, %v8939_v35 }
0x19f7   : > { %9032 = vst [vmem:[%s17136_s25 + $0x8] sm:$0xff] %v9024_v26  ;;  %v9023_v10 = vsel %vm8974_vm6, %v10792_v57, %v8934_v9 }
0x19f8   : > { %9031 = vst [vmem:[%s17136_s25] sm:$0xff] %v9023_v10 }
0x19f9   : > { %v9620_v13 = vpop.f32.mrb[146].mxu0 }
0x19fa   : > { %v8949_v31 = vadd.f32 %v9620_v13, %v9445_v61  ;;  %v8943_v39 = vpop.f32.mrb[147].mxu0 }
0x19fb   : > { %v8944_v23 = vadd.f32 %v9445_v61, %v8943_v39 }
0x19fc   : > { %v9449_v40 = vmul.f32 -1.442695, %v8949_v31 }
0x19fd   : > { %v9448_v46 = vmul.f32 -1.442695, %v8944_v23 }
0x19fe   : > { %10793 = vpow2.f32 %v9449_v40 }
0x19ff   : > { %10795 = vpow2.f32 %v9448_v46 }
0x1a08   : > { %v10794_v41 = vpop.eup %10793 }
0x1a09   : > { %v10796_v59 = vpop.eup %10795  ;;  %v9002_v45 = vadd.f32 1.0, %v10794_v41 }
0x1a0a   : > { %v9001_v58 = vadd.f32 1.0, %v10796_v59 }
0x1a0b   : > { %10797 = vrcp.f32 %v9002_v45 }
0x1a0c   : > { %10799 = vrcp.f32 %v9001_v58 }
0x1a15   : > { %v10798_v18 = vpop.eup %10797 }
0x1a16   : > { %v10800_v15 = vpop.eup %10799  ;;  %v9026_v44 = vsel %vm8974_vm6, %v10798_v18, %v8949_v31 }
0x1a17   : > { %9034 = vst [vmem:[%s17136_s25 + $0x18] sm:$0xff] %v9026_v44  ;;  %v9025_v12 = vsel %vm8974_vm6, %v10800_v15, %v8944_v23 }
0x1a18   : > { %9033 = vst [vmem:[%s17136_s25 + $0x10] sm:$0xff] %v9025_v12 }
0x1a1d   : > { %v9623_v50 = vpop.f32.mrb[148].mxu0 }
0x1a1e   : > { %v8959_v49 = vadd.f32 %v9623_v50, %v9445_v61  ;;  %v8953_v51 = vpop.f32.mrb[149].mxu0 }
0x1a1f   : > { %v8954_v21 = vadd.f32 %v9445_v61, %v8953_v51 }
0x1a20   : > { %v9451_v20 = vmul.f32 -1.442695, %v8959_v49 }
0x1a21   : > { %v9450_v43 = vmul.f32 -1.442695, %v8954_v21 }
0x1a22   : > { %10801 = vpow2.f32 %v9451_v20 }
0x1a23   : > { %10803 = vpow2.f32 %v9450_v43 }
0x1a2c   : > { %v10802_v24 = vpop.eup %10801 }
0x1a2d   : > { %v10804_v0 = vpop.eup %10803  ;;  %v9004_v47 = vadd.f32 1.0, %v10802_v24 }
0x1a2e   : > { %v9003_v38 = vadd.f32 1.0, %v10804_v0 }
0x1a2f   : > { %10805 = vrcp.f32 %v9004_v47 }
0x1a30   : > { %10807 = vrcp.f32 %v9003_v38 }
0x1a35   : > { %v9626_v32 = vpop.f32.mrb[150].mxu0 }
0x1a36   : > { %v8969_v1 = vadd.f32 %v9626_v32, %v9445_v61  ;;  %v8963_v52 = vpop.f32.mrb[151].mxu0 }
0x1a37   : > { %v8964_v27 = vadd.f32 %v9445_v61, %v8963_v52 }
0x1a38   : > { %v9453_v36 = vmul.f32 -1.442695, %v8969_v1 }
0x1a39   : > { %v10806_v54 = vpop.eup %10805  ;;  %v9452_v28 = vmul.f32 -1.442695, %v8964_v27 }
0x1a3a   : > { %v10808_v14 = vpop.eup %10807  ;;  %v9028_v2 = vsel %vm8974_vm6, %v10806_v54, %v8959_v49  ;;  %10809 = vpow2.f32 %v9453_v36 }
0x1a3b   : > { %9036 = vst [vmem:[%s17136_s25 + $0x28] sm:$0xff] %v9028_v2  ;;  %v9027_v11 = vsel %vm8974_vm6, %v10808_v14, %v8954_v21  ;;  %10811 = vpow2.f32 %v9452_v28 }
0x1a3c   : > { %9035 = vst [vmem:[%s17136_s25 + $0x20] sm:$0xff] %v9027_v11 }
0x1a44   : > { %v10810_v7 = vpop.eup %10809 }
0x1a45   : > { %v10812_v3 = vpop.eup %10811  ;;  %v9006_v22 = vadd.f32 1.0, %v10810_v7 }
0x1a46   : > { %v9005_v4 = vadd.f32 1.0, %v10812_v3 }
0x1a47   : > { %10813 = vrcp.f32 %v9006_v22 }
0x1a48   : > { %10815 = vrcp.f32 %v9005_v4 }
0x1a51   : > { %v10814_v25 = vpop.eup %10813 }
0x1a52   : > { %v10816_v55 = vpop.eup %10815  ;;  %v9030_v5 = vsel %vm8974_vm6, %v10814_v25, %v8969_v1 }
0x1a53   : > { %9038 = vst [vmem:[%s17136_s25 + $0x38] sm:$0xff] %v9030_v5  ;;  %v9029_v42 = vsel %vm8974_vm6, %v10816_v55, %v8964_v27 }
0x1a54   : > { %9037 = vst [vmem:[%s17136_s25 + $0x30] sm:$0xff] %v9029_v42 }
0x1a55 PF: > { %p22_p9 = scmp.ge.s32.totalorder %s10939_s17, 4   ;;  %s18194_s29 = smov %s10837_s30 }
0x1a56   : > { %s18195_s30 = smov %s10948_s20  ;;  %s18196_s15 = smov %s10939_s17 }
0x1a57   :  { %24 = sbr.rel (!%p22_p9) target bundleno = 4 (0x4), region = 213 }

</bundles_post_ra>
